<compile_context>
chip_gen: v5e
topology: v5e:2x2
jax: 0.10.0
libtpu: 0.0.40
codegen_flags: <defaults>
</compile_context>

<pallas_src>
import jax
import jax.numpy as jnp
from jax import lax
from jax.experimental import pallas as pl
from jax.experimental.pallas import tpu as pltpu

DILATIONS = (1, 3, 6, 9)
PAD_MAX = max(DILATIONS)          # 9: largest dilation/padding among branches
HPAD = PAD_MAX                    # H-side pad (outer dim, alignment irrelevant)
WPAD = 16                         # W-side pad: smallest multiple of 8 >= PAD_MAX
BN_EPS = 1e-5

# taps of a 3x3 kernel excluding the center (merged separately)
OFF_CENTER_TAPS = tuple((kh, kw) for kh in range(3) for kw in range(3)
                        if (kh, kw) != (1, 1))
# static window offsets into the (HPAD, WPAD)-padded scratch, one per folded
# off-center weight, in the same order the weights are stacked.
OFF_CENTER_OFFSETS = tuple((HPAD + (kh - 1) * d, WPAD + (kw - 1) * d)
                           for d in DILATIONS for (kh, kw) in OFF_CENTER_TAPS)


# ----------------------------- kernels --------------------------------------

def _aspp_kernel(x_ref, wc_ref, wo_ref, bias_ref,
                 y_ref, sum_ref, ssq_ref, xp_ref):
    H, W = y_ref.shape[1], y_ref.shape[2]
    Cin = x_ref.shape[3]

    # Build the zero-padded input in a VMEM scratch (no padded HBM tensor,
    # no extra HBM round trip).  Re-zeroed every step so the kernel stays
    # correct when the batch axis is split across cores.
    xp_ref[...] = jnp.zeros_like(xp_ref)
    xp_ref[HPAD:HPAD + H, WPAD:WPAD + W, :] = x_ref[0]   # aligned interior store
    xp = xp_ref[...]

    def patch(h0, w0):
        # static spatial window, flattened for the MXU
        return xp[h0:h0 + H, w0:w0 + W, :].reshape(H * W, Cin)

    # merged center taps (1x1 conv + (1,1) tap of every dilated conv),
    # weights pre-folded with the fusion 1x1 conv -> a single matmul.
    y = jnp.dot(patch(HPAD, WPAD), wc_ref[...],
                preferred_element_type=jnp.float32)

    # 32 off-center dilated taps, each weight pre-folded with the fusion conv.
    for i, (h0, w0) in enumerate(OFF_CENTER_OFFSETS):
        y = y + jnp.dot(patch(h0, w0), wo_ref[i],
                        preferred_element_type=jnp.float32)

    y = y + bias_ref[...]                                # single merged bias

    y_ref[0] = y.reshape(H, W, y.shape[-1])

    # per-batch partial sums for BatchNorm statistics (reduced in wrapper);
    # no cross-step accumulation, so the batch grid axis runs "parallel".
    sum_ref[0] = jnp.sum(y, axis=0, keepdims=True)
    ssq_ref[0] = jnp.sum(y * y, axis=0, keepdims=True)


def _bn_relu_kernel(y_ref, scale_ref, shift_ref, o_ref):
    # y viewed as (rows, W*Cout): lane-dense loads/stores.
    o_ref[...] = jnp.maximum(y_ref[...] * scale_ref[...] + shift_ref[...], 0.0)


# ----------------------------- wrapper ---------------------------------------

def atrous_block_forward(x_nchw, p):
    N, Cin, H, W = x_nchw.shape
    Cout = p['wc'].shape[1]
    x = jnp.transpose(x_nchw, (0, 2, 3, 1)).astype(jnp.float32)   # NHWC

    Hp = H + 2 * HPAD
    Wp = W + 2 * WPAD

    y, psum, pssq = pl.pallas_call(
        _aspp_kernel,
        out_shape=(jax.ShapeDtypeStruct((N, H, W, Cout), jnp.float32),
                   jax.ShapeDtypeStruct((N, 1, Cout), jnp.float32),
                   jax.ShapeDtypeStruct((N, 1, Cout), jnp.float32)),
        grid_spec=pltpu.PrefetchScalarGridSpec(
            num_scalar_prefetch=0,
            grid=(N,),
            in_specs=[
                pl.BlockSpec((1, H, W, Cin), lambda b: (b, 0, 0, 0)),
                pl.BlockSpec((Cin, Cout), lambda b: (0, 0)),
                pl.BlockSpec((32, Cin, Cout), lambda b: (0, 0, 0)),
                pl.BlockSpec((1, Cout), lambda b: (0, 0)),
            ],
            out_specs=(
                pl.BlockSpec((1, H, W, Cout), lambda b: (b, 0, 0, 0)),
                pl.BlockSpec((1, 1, Cout), lambda b: (b, 0, 0)),
                pl.BlockSpec((1, 1, Cout), lambda b: (b, 0, 0)),
            ),
            scratch_shapes=[pltpu.VMEM((Hp, Wp, Cin), jnp.float32)]),
        compiler_params=pltpu.CompilerParams(
            dimension_semantics=("parallel",)),          # no accumulator -> parallel
    )(x, p['wc'], p['wo'], p['bias'])

    # BatchNorm2d (training-mode batch statistics, biased variance).
    count = N * H * W
    mean = jnp.sum(psum[:, 0, :], axis=0) / count
    var = jnp.sum(pssq[:, 0, :], axis=0) / count - mean * mean
    var = jnp.maximum(var, 0.0)          # guard E[y^2]-E[y]^2 fp cancellation
    scale = p['gamma'] / jnp.sqrt(var + BN_EPS)
    shift = p['beta'] - mean * scale

    # BN + ReLU epilogue on a lane-dense (N*H, W*Cout) view.
    y2 = y.reshape(N * H, W * Cout)
    scale_r = jnp.tile(scale, W).reshape(1, W * Cout)
    shift_r = jnp.tile(shift, W).reshape(1, W * Cout)
    out2 = pl.pallas_call(
        _bn_relu_kernel,
        out_shape=jax.ShapeDtypeStruct((N * H, W * Cout), jnp.float32),
        grid_spec=pltpu.PrefetchScalarGridSpec(
            num_scalar_prefetch=0,
            grid=(N,),
            in_specs=[
                pl.BlockSpec((H, W * Cout), lambda b: (b, 0)),
                pl.BlockSpec((1, W * Cout), lambda b: (0, 0)),
                pl.BlockSpec((1, W * Cout), lambda b: (0, 0)),
            ],
            out_specs=pl.BlockSpec((H, W * Cout), lambda b: (b, 0))),
        compiler_params=pltpu.CompilerParams(
            dimension_semantics=("parallel",)),
    )(y2, scale_r, shift_r)

    out = out2.reshape(N, H, W, Cout)
    return jnp.transpose(out, (0, 3, 1, 2))              # back to NCHW


# ------------------------- params & pure-JAX reference ----------------------

def init_params(key, cin, cout):
    ks = jax.random.split(key, 13)

    def nrm(k, shape, s=0.1):
        return (s * jax.random.normal(k, shape)).astype(jnp.float32)

    torch_p = {
        'w_1r1': nrm(ks[0], (cout, cin, 1, 1)), 'b_1r1': nrm(ks[1], (cout,)),
        'w_3r1': nrm(ks[2], (cout, cin, 3, 3)), 'b_3r1': nrm(ks[3], (cout,)),
        'w_3r3': nrm(ks[4], (cout, cin, 3, 3)), 'b_3r3': nrm(ks[5], (cout,)),
        'w_3r6': nrm(ks[6], (cout, cin, 3, 3)), 'b_3r6': nrm(ks[7], (cout,)),
        'w_3r9': nrm(ks[8], (cout, cin, 3, 3)), 'b_3r9': nrm(ks[9], (cout,)),
        'w_f':   nrm(ks[10], (cout, 5 * cout, 1, 1)),
        'gamma': (1.0 + nrm(ks[11], (cout,))).astype(jnp.float32),
        'beta':  nrm(ks[12], (cout,)),
    }

    # --- offline folding of "concat + 1x1 fusion conv" into branch weights ---
    # y = cat(branches) @ Wf == sum_i branch_i @ Wf_i
    wf = torch_p['w_f'][:, :, 0, 0].T.reshape(5, cout, cout)     # Wf_i: (Cout,Cout)
    w1 = torch_p['w_1r1'][:, :, 0, 0].T                          # (Cin,Cout)
    w3 = [jnp.transpose(torch_p[f'w_3r{d}'], (2, 3, 1, 0)) for d in DILATIONS]

    # merged center taps: 1x1 conv + the (1,1) tap of every dilated conv
    wc = w1 @ wf[0]
    for di in range(4):
        wc = wc + w3[di][1, 1] @ wf[di + 1]
    # off-center taps, folded with the fusion conv (same order as OFFSETS)
    wo = jnp.stack([w3[di][kh, kw] @ wf[di + 1]
                    for di in range(4) for (kh, kw) in OFF_CENTER_TAPS])
    # merged bias (fusion conv has bias=False)
    bias = torch_p['b_1r1'] @ wf[0]
    for di, d in enumerate(DILATIONS):
        bias = bias + torch_p[f'b_3r{d}'] @ wf[di + 1]

    kern_p = {
        'wc': wc.astype(jnp.float32),                    # (Cin, Cout)
        'wo': wo.astype(jnp.float32),                    # (32, Cin, Cout)
        'bias': bias.reshape(1, cout).astype(jnp.float32),
        'gamma': torch_p['gamma'],
        'beta': torch_p['beta'],
    }
    return torch_p, kern_p


def reference_forward(x_nchw, tp):
    def conv(x, w, b, dil, pad):
        out = lax.conv_general_dilated(
            x, w, window_strides=(1, 1),
            padding=[(pad, pad), (pad, pad)],
            rhs_dilation=(dil, dil),
            dimension_numbers=('NCHW', 'OIHW', 'NCHW'))
        if b is not None:
            out = out + b[None, :, None, None]
        return out

    bulk = [conv(x_nchw, tp['w_1r1'], tp['b_1r1'], 1, 0)]
    for d in DILATIONS:
        bulk.append(conv(x_nchw, tp[f'w_3r{d}'], tp[f'b_3r{d}'], d, d))
    cat = jnp.concatenate(bulk, axis=1)
    y = conv(cat, tp['w_f'], None, 1, 0)
    mean = y.mean(axis=(0, 2, 3))
    var = y.var(axis=(0, 2, 3))                          # biased, like BN training fwd
    yn = (y - mean[None, :, None, None]) / jnp.sqrt(var + BN_EPS)[None, :, None, None]
    yn = yn * tp['gamma'][None, :, None, None] + tp['beta'][None, :, None, None]
    return jnp.maximum(yn, 0.0)


# ------------------------------- main ----------------------------------------

if __name__ == "__main__":
    import numpy as np

    key = jax.random.PRNGKey(0)
    kx, kp = jax.random.split(key)
    N, Cin, Cout, H, W = 2, 4, 4, 16, 16

    x = jax.random.normal(kx, (N, Cin, H, W), jnp.float32)
    torch_p, kern_p = init_params(kp, Cin, Cout)

    out = atrous_block_forward(x, kern_p)
    out = jax.block_until_ready(out)

    ref = reference_forward(x, torch_p)
    assert out.shape == (N, Cout, H, W)
    np.testing.assert_allclose(np.asarray(out), np.asarray(ref),
                               rtol=1e-3, atol=1e-3)
    print("KERNEL_OK")
</pallas_src>

<mosaic_0001>
module attributes {stable_mosaic.version = 11 : i64} {
  func.func @_aspp_kernel(%arg0: i32, %arg1: memref<1x16x16x4xf32, #tpu.memory_space<vmem>>, %arg2: memref<4x4xf32, #tpu.memory_space<vmem>>, %arg3: memref<32x4x4xf32, #tpu.memory_space<vmem>>, %arg4: memref<1x4xf32, #tpu.memory_space<vmem>>, %arg5: memref<1x16x16x4xf32, #tpu.memory_space<vmem>>, %arg6: memref<1x1x4xf32, #tpu.memory_space<vmem>>, %arg7: memref<1x1x4xf32, #tpu.memory_space<vmem>>, %arg8: memref<34x48x4xf32, #tpu.memory_space<vmem>>) attributes {dimension_semantics = [#tpu.dimension_semantics<parallel>], iteration_bounds = array<i64: 2>, scalar_prefetch = 0 : i64, scratch_operands = 1 : i64, tpu.core_type = #tpu.core_type<tc>, window_params = [{transform_indices = @transform_0, window_bounds = array<i64: 1, 16, 16, 4>}, {pipeline_mode = #tpu.pipeline_mode<synchronous>, transform_indices = @transform_1, window_bounds = array<i64: 4, 4>}, {pipeline_mode = #tpu.pipeline_mode<synchronous>, transform_indices = @transform_2, window_bounds = array<i64: 32, 4, 4>}, {pipeline_mode = #tpu.pipeline_mode<synchronous>, transform_indices = @transform_3, window_bounds = array<i64: 1, 4>}, {transform_indices = @transform_4, window_bounds = array<i64: 1, 16, 16, 4>}, {transform_indices = @transform_5, window_bounds = array<i64: 1, 1, 4>}, {transform_indices = @transform_6, window_bounds = array<i64: 1, 1, 4>}]} {
    %cst = arith.constant 0.000000e+00 : f32
    %0 = vector.broadcast %cst : f32 to vector<34x48x4xf32>
    %c0 = arith.constant 0 : index
    %c0_0 = arith.constant 0 : index
    %c0_1 = arith.constant 0 : index
    %1 = vector.load %arg8[%c0, %c0_0, %c0_1] : memref<34x48x4xf32, #tpu.memory_space<vmem>>, vector<34x48x4xf32>
    tpu.vector_store %arg8[%c0, %c0_0, %c0_1], %0 {strides = array<i32>} : memref<34x48x4xf32, #tpu.memory_space<vmem>>, vector<34x48x4xf32>,
    %c0_2 = arith.constant 0 : index
    %c0_3 = arith.constant 0 : index
    %c0_4 = arith.constant 0 : index
    %c0_5 = arith.constant 0 : index
    %2 = vector.load %arg1[%c0_2, %c0_3, %c0_4, %c0_5] : memref<1x16x16x4xf32, #tpu.memory_space<vmem>>, vector<1x16x16x4xf32>
    %3 = vector.shape_cast %2 : vector<1x16x16x4xf32> to vector<16x16x4xf32>
    %c9 = arith.constant 9 : index
    %c16 = arith.constant 16 : index
    %c0_6 = arith.constant 0 : index
    %4 = vector.load %arg8[%c9, %c16, %c0_6] : memref<34x48x4xf32, #tpu.memory_space<vmem>>, vector<16x16x4xf32>
    tpu.vector_store %arg8[%c9, %c16, %c0_6], %3 {strides = array<i32>} : memref<34x48x4xf32, #tpu.memory_space<vmem>>, vector<16x16x4xf32>,
    %c0_7 = arith.constant 0 : index
    %c0_8 = arith.constant 0 : index
    %c0_9 = arith.constant 0 : index
    %5 = vector.load %arg8[%c0_7, %c0_8, %c0_9] : memref<34x48x4xf32, #tpu.memory_space<vmem>>, vector<34x48x4xf32>
    %6 = vector.extract_strided_slice %5 {offsets = [9, 16, 0], sizes = [16, 16, 4], strides = [1, 1, 1]} : vector<34x48x4xf32> to vector<16x16x4xf32>
    %7 = vector.shape_cast %6 : vector<16x16x4xf32> to vector<256x4xf32>
    %c0_10 = arith.constant 0 : index
    %c0_11 = arith.constant 0 : index
    %8 = vector.load %arg2[%c0_10, %c0_11] : memref<4x4xf32, #tpu.memory_space<vmem>>, vector<4x4xf32>
    %cst_12 = arith.constant dense<0.000000e+00> : vector<256x4xf32>
    %9 = tpu.matmul %7, %8, %cst_12 {dimension_numbers = #tpu.dot_dimension_numbers<[1], [0], [0], [1], [0, 0, 1, 1], [], []>} : vector<256x4xf32>, vector<4x4xf32>, vector<256x4xf32> -> vector<256x4xf32>
    %10 = vector.extract_strided_slice %5 {offsets = [8, 15, 0], sizes = [16, 16, 4], strides = [1, 1, 1]} : vector<34x48x4xf32> to vector<16x16x4xf32>
    %11 = vector.shape_cast %10 : vector<16x16x4xf32> to vector<256x4xf32>
    %c0_13 = arith.constant 0 : index
    %c0_14 = arith.constant 0 : index
    %c0_15 = arith.constant 0 : index
    %12 = vector.load %arg3[%c0_13, %c0_14, %c0_15] : memref<32x4x4xf32, #tpu.memory_space<vmem>>, vector<1x4x4xf32>
    %13 = vector.shape_cast %12 : vector<1x4x4xf32> to vector<4x4xf32>
    %cst_16 = arith.constant dense<0.000000e+00> : vector<256x4xf32>
    %14 = tpu.matmul %11, %13, %cst_16 {dimension_numbers = #tpu.dot_dimension_numbers<[1], [0], [0], [1], [0, 0, 1, 1], [], []>} : vector<256x4xf32>, vector<4x4xf32>, vector<256x4xf32> -> vector<256x4xf32>
    %15 = arith.addf %9, %14 : vector<256x4xf32>
    %16 = vector.extract_strided_slice %5 {offsets = [8, 16, 0], sizes = [16, 16, 4], strides = [1, 1, 1]} : vector<34x48x4xf32> to vector<16x16x4xf32>
    %17 = vector.shape_cast %16 : vector<16x16x4xf32> to vector<256x4xf32>
    %c1 = arith.constant 1 : index
    %c0_17 = arith.constant 0 : index
    %c0_18 = arith.constant 0 : index
    %18 = vector.load %arg3[%c1, %c0_17, %c0_18] : memref<32x4x4xf32, #tpu.memory_space<vmem>>, vector<1x4x4xf32>
    %19 = vector.shape_cast %18 : vector<1x4x4xf32> to vector<4x4xf32>
    %cst_19 = arith.constant dense<0.000000e+00> : vector<256x4xf32>
    %20 = tpu.matmul %17, %19, %cst_19 {dimension_numbers = #tpu.dot_dimension_numbers<[1], [0], [0], [1], [0, 0, 1, 1], [], []>} : vector<256x4xf32>, vector<4x4xf32>, vector<256x4xf32> -> vector<256x4xf32>
    %21 = arith.addf %15, %20 : vector<256x4xf32>
    %22 = vector.extract_strided_slice %5 {offsets = [8, 17, 0], sizes = [16, 16, 4], strides = [1, 1, 1]} : vector<34x48x4xf32> to vector<16x16x4xf32>
    %23 = vector.shape_cast %22 : vector<16x16x4xf32> to vector<256x4xf32>
    %c2 = arith.constant 2 : index
    %c0_20 = arith.constant 0 : index
    %c0_21 = arith.constant 0 : index
    %24 = vector.load %arg3[%c2, %c0_20, %c0_21] : memref<32x4x4xf32, #tpu.memory_space<vmem>>, vector<1x4x4xf32>
    %25 = vector.shape_cast %24 : vector<1x4x4xf32> to vector<4x4xf32>
    %cst_22 = arith.constant dense<0.000000e+00> : vector<256x4xf32>
    %26 = tpu.matmul %23, %25, %cst_22 {dimension_numbers = #tpu.dot_dimension_numbers<[1], [0], [0], [1], [0, 0, 1, 1], [], []>} : vector<256x4xf32>, vector<4x4xf32>, vector<256x4xf32> -> vector<256x4xf32>
    %27 = arith.addf %21, %26 : vector<256x4xf32>
    %28 = vector.extract_strided_slice %5 {offsets = [9, 15, 0], sizes = [16, 16, 4], strides = [1, 1, 1]} : vector<34x48x4xf32> to vector<16x16x4xf32>
    %29 = vector.shape_cast %28 : vector<16x16x4xf32> to vector<256x4xf32>
    %c3 = arith.constant 3 : index
    %c0_23 = arith.constant 0 : index
    %c0_24 = arith.constant 0 : index
    %30 = vector.load %arg3[%c3, %c0_23, %c0_24] : memref<32x4x4xf32, #tpu.memory_space<vmem>>, vector<1x4x4xf32>
    %31 = vector.shape_cast %30 : vector<1x4x4xf32> to vector<4x4xf32>
    %cst_25 = arith.constant dense<0.000000e+00> : vector<256x4xf32>
    %32 = tpu.matmul %29, %31, %cst_25 {dimension_numbers = #tpu.dot_dimension_numbers<[1], [0], [0], [1], [0, 0, 1, 1], [], []>} : vector<256x4xf32>, vector<4x4xf32>, vector<256x4xf32> -> vector<256x4xf32>
    %33 = arith.addf %27, %32 : vector<256x4xf32>
    %34 = vector.extract_strided_slice %5 {offsets = [9, 17, 0], sizes = [16, 16, 4], strides = [1, 1, 1]} : vector<34x48x4xf32> to vector<16x16x4xf32>
    %35 = vector.shape_cast %34 : vector<16x16x4xf32> to vector<256x4xf32>
    %c4 = arith.constant 4 : index
    %c0_26 = arith.constant 0 : index
    %c0_27 = arith.constant 0 : index
    %36 = vector.load %arg3[%c4, %c0_26, %c0_27] : memref<32x4x4xf32, #tpu.memory_space<vmem>>, vector<1x4x4xf32>
    %37 = vector.shape_cast %36 : vector<1x4x4xf32> to vector<4x4xf32>
    %cst_28 = arith.constant dense<0.000000e+00> : vector<256x4xf32>
    %38 = tpu.matmul %35, %37, %cst_28 {dimension_numbers = #tpu.dot_dimension_numbers<[1], [0], [0], [1], [0, 0, 1, 1], [], []>} : vector<256x4xf32>, vector<4x4xf32>, vector<256x4xf32> -> vector<256x4xf32>
    %39 = arith.addf %33, %38 : vector<256x4xf32>
    %40 = vector.extract_strided_slice %5 {offsets = [10, 15, 0], sizes = [16, 16, 4], strides = [1, 1, 1]} : vector<34x48x4xf32> to vector<16x16x4xf32>
    %41 = vector.shape_cast %40 : vector<16x16x4xf32> to vector<256x4xf32>
    %c5 = arith.constant 5 : index
    %c0_29 = arith.constant 0 : index
    %c0_30 = arith.constant 0 : index
    %42 = vector.load %arg3[%c5, %c0_29, %c0_30] : memref<32x4x4xf32, #tpu.memory_space<vmem>>, vector<1x4x4xf32>
    %43 = vector.shape_cast %42 : vector<1x4x4xf32> to vector<4x4xf32>
    %cst_31 = arith.constant dense<0.000000e+00> : vector<256x4xf32>
    %44 = tpu.matmul %41, %43, %cst_31 {dimension_numbers = #tpu.dot_dimension_numbers<[1], [0], [0], [1], [0, 0, 1, 1], [], []>} : vector<256x4xf32>, vector<4x4xf32>, vector<256x4xf32> -> vector<256x4xf32>
    %45 = arith.addf %39, %44 : vector<256x4xf32>
    %46 = vector.extract_strided_slice %5 {offsets = [10, 16, 0], sizes = [16, 16, 4], strides = [1, 1, 1]} : vector<34x48x4xf32> to vector<16x16x4xf32>
    %47 = vector.shape_cast %46 : vector<16x16x4xf32> to vector<256x4xf32>
    %c6 = arith.constant 6 : index
    %c0_32 = arith.constant 0 : index
    %c0_33 = arith.constant 0 : index
    %48 = vector.load %arg3[%c6, %c0_32, %c0_33] : memref<32x4x4xf32, #tpu.memory_space<vmem>>, vector<1x4x4xf32>
    %49 = vector.shape_cast %48 : vector<1x4x4xf32> to vector<4x4xf32>
    %cst_34 = arith.constant dense<0.000000e+00> : vector<256x4xf32>
    %50 = tpu.matmul %47, %49, %cst_34 {dimension_numbers = #tpu.dot_dimension_numbers<[1], [0], [0], [1], [0, 0, 1, 1], [], []>} : vector<256x4xf32>, vector<4x4xf32>, vector<256x4xf32> -> vector<256x4xf32>
    %51 = arith.addf %45, %50 : vector<256x4xf32>
    %52 = vector.extract_strided_slice %5 {offsets = [10, 17, 0], sizes = [16, 16, 4], strides = [1, 1, 1]} : vector<34x48x4xf32> to vector<16x16x4xf32>
    %53 = vector.shape_cast %52 : vector<16x16x4xf32> to vector<256x4xf32>
    %c7 = arith.constant 7 : index
    %c0_35 = arith.constant 0 : index
    %c0_36 = arith.constant 0 : index
    %54 = vector.load %arg3[%c7, %c0_35, %c0_36] : memref<32x4x4xf32, #tpu.memory_space<vmem>>, vector<1x4x4xf32>
    %55 = vector.shape_cast %54 : vector<1x4x4xf32> to vector<4x4xf32>
    %cst_37 = arith.constant dense<0.000000e+00> : vector<256x4xf32>
    %56 = tpu.matmul %53, %55, %cst_37 {dimension_numbers = #tpu.dot_dimension_numbers<[1], [0], [0], [1], [0, 0, 1, 1], [], []>} : vector<256x4xf32>, vector<4x4xf32>, vector<256x4xf32> -> vector<256x4xf32>
    %57 = arith.addf %51, %56 : vector<256x4xf32>
    %58 = vector.extract_strided_slice %5 {offsets = [6, 13, 0], sizes = [16, 16, 4], strides = [1, 1, 1]} : vector<34x48x4xf32> to vector<16x16x4xf32>
    %59 = vector.shape_cast %58 : vector<16x16x4xf32> to vector<256x4xf32>
    %c8 = arith.constant 8 : index
    %c0_38 = arith.constant 0 : index
    %c0_39 = arith.constant 0 : index
    %60 = vector.load %arg3[%c8, %c0_38, %c0_39] : memref<32x4x4xf32, #tpu.memory_space<vmem>>, vector<1x4x4xf32>
    %61 = vector.shape_cast %60 : vector<1x4x4xf32> to vector<4x4xf32>
    %cst_40 = arith.constant dense<0.000000e+00> : vector<256x4xf32>
    %62 = tpu.matmul %59, %61, %cst_40 {dimension_numbers = #tpu.dot_dimension_numbers<[1], [0], [0], [1], [0, 0, 1, 1], [], []>} : vector<256x4xf32>, vector<4x4xf32>, vector<256x4xf32> -> vector<256x4xf32>
    %63 = arith.addf %57, %62 : vector<256x4xf32>
    %64 = vector.extract_strided_slice %5 {offsets = [6, 16, 0], sizes = [16, 16, 4], strides = [1, 1, 1]} : vector<34x48x4xf32> to vector<16x16x4xf32>
    %65 = vector.shape_cast %64 : vector<16x16x4xf32> to vector<256x4xf32>
    %c9_41 = arith.constant 9 : index
    %c0_42 = arith.constant 0 : index
    %c0_43 = arith.constant 0 : index
    %66 = vector.load %arg3[%c9_41, %c0_42, %c0_43] : memref<32x4x4xf32, #tpu.memory_space<vmem>>, vector<1x4x4xf32>
    %67 = vector.shape_cast %66 : vector<1x4x4xf32> to vector<4x4xf32>
    %cst_44 = arith.constant dense<0.000000e+00> : vector<256x4xf32>
    %68 = tpu.matmul %65, %67, %cst_44 {dimension_numbers = #tpu.dot_dimension_numbers<[1], [0], [0], [1], [0, 0, 1, 1], [], []>} : vector<256x4xf32>, vector<4x4xf32>, vector<256x4xf32> -> vector<256x4xf32>
    %69 = arith.addf %63, %68 : vector<256x4xf32>
    %70 = vector.extract_strided_slice %5 {offsets = [6, 19, 0], sizes = [16, 16, 4], strides = [1, 1, 1]} : vector<34x48x4xf32> to vector<16x16x4xf32>
    %71 = vector.shape_cast %70 : vector<16x16x4xf32> to vector<256x4xf32>
    %c10 = arith.constant 10 : index
    %c0_45 = arith.constant 0 : index
    %c0_46 = arith.constant 0 : index
    %72 = vector.load %arg3[%c10, %c0_45, %c0_46] : memref<32x4x4xf32, #tpu.memory_space<vmem>>, vector<1x4x4xf32>
    %73 = vector.shape_cast %72 : vector<1x4x4xf32> to vector<4x4xf32>
    %cst_47 = arith.constant dense<0.000000e+00> : vector<256x4xf32>
    %74 = tpu.matmul %71, %73, %cst_47 {dimension_numbers = #tpu.dot_dimension_numbers<[1], [0], [0], [1], [0, 0, 1, 1], [], []>} : vector<256x4xf32>, vector<4x4xf32>, vector<256x4xf32> -> vector<256x4xf32>
    %75 = arith.addf %69, %74 : vector<256x4xf32>
    %76 = vector.extract_strided_slice %5 {offsets = [9, 13, 0], sizes = [16, 16, 4], strides = [1, 1, 1]} : vector<34x48x4xf32> to vector<16x16x4xf32>
    %77 = vector.shape_cast %76 : vector<16x16x4xf32> to vector<256x4xf32>
    %c11 = arith.constant 11 : index
    %c0_48 = arith.constant 0 : index
    %c0_49 = arith.constant 0 : index
    %78 = vector.load %arg3[%c11, %c0_48, %c0_49] : memref<32x4x4xf32, #tpu.memory_space<vmem>>, vector<1x4x4xf32>
    %79 = vector.shape_cast %78 : vector<1x4x4xf32> to vector<4x4xf32>
    %cst_50 = arith.constant dense<0.000000e+00> : vector<256x4xf32>
    %80 = tpu.matmul %77, %79, %cst_50 {dimension_numbers = #tpu.dot_dimension_numbers<[1], [0], [0], [1], [0, 0, 1, 1], [], []>} : vector<256x4xf32>, vector<4x4xf32>, vector<256x4xf32> -> vector<256x4xf32>
    %81 = arith.addf %75, %80 : vector<256x4xf32>
    %82 = vector.extract_strided_slice %5 {offsets = [9, 19, 0], sizes = [16, 16, 4], strides = [1, 1, 1]} : vector<34x48x4xf32> to vector<16x16x4xf32>
    %83 = vector.shape_cast %82 : vector<16x16x4xf32> to vector<256x4xf32>
    %c12 = arith.constant 12 : index
    %c0_51 = arith.constant 0 : index
    %c0_52 = arith.constant 0 : index
    %84 = vector.load %arg3[%c12, %c0_51, %c0_52] : memref<32x4x4xf32, #tpu.memory_space<vmem>>, vector<1x4x4xf32>
    %85 = vector.shape_cast %84 : vector<1x4x4xf32> to vector<4x4xf32>
    %cst_53 = arith.constant dense<0.000000e+00> : vector<256x4xf32>
    %86 = tpu.matmul %83, %85, %cst_53 {dimension_numbers = #tpu.dot_dimension_numbers<[1], [0], [0], [1], [0, 0, 1, 1], [], []>} : vector<256x4xf32>, vector<4x4xf32>, vector<256x4xf32> -> vector<256x4xf32>
    %87 = arith.addf %81, %86 : vector<256x4xf32>
    %88 = vector.extract_strided_slice %5 {offsets = [12, 13, 0], sizes = [16, 16, 4], strides = [1, 1, 1]} : vector<34x48x4xf32> to vector<16x16x4xf32>
    %89 = vector.shape_cast %88 : vector<16x16x4xf32> to vector<256x4xf32>
    %c13 = arith.constant 13 : index
    %c0_54 = arith.constant 0 : index
    %c0_55 = arith.constant 0 : index
    %90 = vector.load %arg3[%c13, %c0_54, %c0_55] : memref<32x4x4xf32, #tpu.memory_space<vmem>>, vector<1x4x4xf32>
    %91 = vector.shape_cast %90 : vector<1x4x4xf32> to vector<4x4xf32>
    %cst_56 = arith.constant dense<0.000000e+00> : vector<256x4xf32>
    %92 = tpu.matmul %89, %91, %cst_56 {dimension_numbers = #tpu.dot_dimension_numbers<[1], [0], [0], [1], [0, 0, 1, 1], [], []>} : vector<256x4xf32>, vector<4x4xf32>, vector<256x4xf32> -> vector<256x4xf32>
    %93 = arith.addf %87, %92 : vector<256x4xf32>
    %94 = vector.extract_strided_slice %5 {offsets = [12, 16, 0], sizes = [16, 16, 4], strides = [1, 1, 1]} : vector<34x48x4xf32> to vector<16x16x4xf32>
    %95 = vector.shape_cast %94 : vector<16x16x4xf32> to vector<256x4xf32>
    %c14 = arith.constant 14 : index
    %c0_57 = arith.constant 0 : index
    %c0_58 = arith.constant 0 : index
    %96 = vector.load %arg3[%c14, %c0_57, %c0_58] : memref<32x4x4xf32, #tpu.memory_space<vmem>>, vector<1x4x4xf32>
    %97 = vector.shape_cast %96 : vector<1x4x4xf32> to vector<4x4xf32>
    %cst_59 = arith.constant dense<0.000000e+00> : vector<256x4xf32>
    %98 = tpu.matmul %95, %97, %cst_59 {dimension_numbers = #tpu.dot_dimension_numbers<[1], [0], [0], [1], [0, 0, 1, 1], [], []>} : vector<256x4xf32>, vector<4x4xf32>, vector<256x4xf32> -> vector<256x4xf32>
    %99 = arith.addf %93, %98 : vector<256x4xf32>
    %100 = vector.extract_strided_slice %5 {offsets = [12, 19, 0], sizes = [16, 16, 4], strides = [1, 1, 1]} : vector<34x48x4xf32> to vector<16x16x4xf32>
    %101 = vector.shape_cast %100 : vector<16x16x4xf32> to vector<256x4xf32>
    %c15 = arith.constant 15 : index
    %c0_60 = arith.constant 0 : index
    %c0_61 = arith.constant 0 : index
    %102 = vector.load %arg3[%c15, %c0_60, %c0_61] : memref<32x4x4xf32, #tpu.memory_space<vmem>>, vector<1x4x4xf32>
    %103 = vector.shape_cast %102 : vector<1x4x4xf32> to vector<4x4xf32>
    %cst_62 = arith.constant dense<0.000000e+00> : vector<256x4xf32>
    %104 = tpu.matmul %101, %103, %cst_62 {dimension_numbers = #tpu.dot_dimension_numbers<[1], [0], [0], [1], [0, 0, 1, 1], [], []>} : vector<256x4xf32>, vector<4x4xf32>, vector<256x4xf32> -> vector<256x4xf32>
    %105 = arith.addf %99, %104 : vector<256x4xf32>
    %106 = vector.extract_strided_slice %5 {offsets = [3, 10, 0], sizes = [16, 16, 4], strides = [1, 1, 1]} : vector<34x48x4xf32> to vector<16x16x4xf32>
    %107 = vector.shape_cast %106 : vector<16x16x4xf32> to vector<256x4xf32>
    %c16_63 = arith.constant 16 : index
    %c0_64 = arith.constant 0 : index
    %c0_65 = arith.constant 0 : index
    %108 = vector.load %arg3[%c16_63, %c0_64, %c0_65] : memref<32x4x4xf32, #tpu.memory_space<vmem>>, vector<1x4x4xf32>
    %109 = vector.shape_cast %108 : vector<1x4x4xf32> to vector<4x4xf32>
    %cst_66 = arith.constant dense<0.000000e+00> : vector<256x4xf32>
    %110 = tpu.matmul %107, %109, %cst_66 {dimension_numbers = #tpu.dot_dimension_numbers<[1], [0], [0], [1], [0, 0, 1, 1], [], []>} : vector<256x4xf32>, vector<4x4xf32>, vector<256x4xf32> -> vector<256x4xf32>
    %111 = arith.addf %105, %110 : vector<256x4xf32>
    %112 = vector.extract_strided_slice %5 {offsets = [3, 16, 0], sizes = [16, 16, 4], strides = [1, 1, 1]} : vector<34x48x4xf32> to vector<16x16x4xf32>
    %113 = vector.shape_cast %112 : vector<16x16x4xf32> to vector<256x4xf32>
    %c17 = arith.constant 17 : index
    %c0_67 = arith.constant 0 : index
    %c0_68 = arith.constant 0 : index
    %114 = vector.load %arg3[%c17, %c0_67, %c0_68] : memref<32x4x4xf32, #tpu.memory_space<vmem>>, vector<1x4x4xf32>
    %115 = vector.shape_cast %114 : vector<1x4x4xf32> to vector<4x4xf32>
    %cst_69 = arith.constant dense<0.000000e+00> : vector<256x4xf32>
    %116 = tpu.matmul %113, %115, %cst_69 {dimension_numbers = #tpu.dot_dimension_numbers<[1], [0], [0], [1], [0, 0, 1, 1], [], []>} : vector<256x4xf32>, vector<4x4xf32>, vector<256x4xf32> -> vector<256x4xf32>
    %117 = arith.addf %111, %116 : vector<256x4xf32>
    %118 = vector.extract_strided_slice %5 {offsets = [3, 22, 0], sizes = [16, 16, 4], strides = [1, 1, 1]} : vector<34x48x4xf32> to vector<16x16x4xf32>
    %119 = vector.shape_cast %118 : vector<16x16x4xf32> to vector<256x4xf32>
    %c18 = arith.constant 18 : index
    %c0_70 = arith.constant 0 : index
    %c0_71 = arith.constant 0 : index
    %120 = vector.load %arg3[%c18, %c0_70, %c0_71] : memref<32x4x4xf32, #tpu.memory_space<vmem>>, vector<1x4x4xf32>
    %121 = vector.shape_cast %120 : vector<1x4x4xf32> to vector<4x4xf32>
    %cst_72 = arith.constant dense<0.000000e+00> : vector<256x4xf32>
    %122 = tpu.matmul %119, %121, %cst_72 {dimension_numbers = #tpu.dot_dimension_numbers<[1], [0], [0], [1], [0, 0, 1, 1], [], []>} : vector<256x4xf32>, vector<4x4xf32>, vector<256x4xf32> -> vector<256x4xf32>
    %123 = arith.addf %117, %122 : vector<256x4xf32>
    %124 = vector.extract_strided_slice %5 {offsets = [9, 10, 0], sizes = [16, 16, 4], strides = [1, 1, 1]} : vector<34x48x4xf32> to vector<16x16x4xf32>
    %125 = vector.shape_cast %124 : vector<16x16x4xf32> to vector<256x4xf32>
    %c19 = arith.constant 19 : index
    %c0_73 = arith.constant 0 : index
    %c0_74 = arith.constant 0 : index
    %126 = vector.load %arg3[%c19, %c0_73, %c0_74] : memref<32x4x4xf32, #tpu.memory_space<vmem>>, vector<1x4x4xf32>
    %127 = vector.shape_cast %126 : vector<1x4x4xf32> to vector<4x4xf32>
    %cst_75 = arith.constant dense<0.000000e+00> : vector<256x4xf32>
    %128 = tpu.matmul %125, %127, %cst_75 {dimension_numbers = #tpu.dot_dimension_numbers<[1], [0], [0], [1], [0, 0, 1, 1], [], []>} : vector<256x4xf32>, vector<4x4xf32>, vector<256x4xf32> -> vector<256x4xf32>
    %129 = arith.addf %123, %128 : vector<256x4xf32>
    %130 = vector.extract_strided_slice %5 {offsets = [9, 22, 0], sizes = [16, 16, 4], strides = [1, 1, 1]} : vector<34x48x4xf32> to vector<16x16x4xf32>
    %131 = vector.shape_cast %130 : vector<16x16x4xf32> to vector<256x4xf32>
    %c20 = arith.constant 20 : index
    %c0_76 = arith.constant 0 : index
    %c0_77 = arith.constant 0 : index
    %132 = vector.load %arg3[%c20, %c0_76, %c0_77] : memref<32x4x4xf32, #tpu.memory_space<vmem>>, vector<1x4x4xf32>
    %133 = vector.shape_cast %132 : vector<1x4x4xf32> to vector<4x4xf32>
    %cst_78 = arith.constant dense<0.000000e+00> : vector<256x4xf32>
    %134 = tpu.matmul %131, %133, %cst_78 {dimension_numbers = #tpu.dot_dimension_numbers<[1], [0], [0], [1], [0, 0, 1, 1], [], []>} : vector<256x4xf32>, vector<4x4xf32>, vector<256x4xf32> -> vector<256x4xf32>
    %135 = arith.addf %129, %134 : vector<256x4xf32>
    %136 = vector.extract_strided_slice %5 {offsets = [15, 10, 0], sizes = [16, 16, 4], strides = [1, 1, 1]} : vector<34x48x4xf32> to vector<16x16x4xf32>
    %137 = vector.shape_cast %136 : vector<16x16x4xf32> to vector<256x4xf32>
    %c21 = arith.constant 21 : index
    %c0_79 = arith.constant 0 : index
    %c0_80 = arith.constant 0 : index
    %138 = vector.load %arg3[%c21, %c0_79, %c0_80] : memref<32x4x4xf32, #tpu.memory_space<vmem>>, vector<1x4x4xf32>
    %139 = vector.shape_cast %138 : vector<1x4x4xf32> to vector<4x4xf32>
    %cst_81 = arith.constant dense<0.000000e+00> : vector<256x4xf32>
    %140 = tpu.matmul %137, %139, %cst_81 {dimension_numbers = #tpu.dot_dimension_numbers<[1], [0], [0], [1], [0, 0, 1, 1], [], []>} : vector<256x4xf32>, vector<4x4xf32>, vector<256x4xf32> -> vector<256x4xf32>
    %141 = arith.addf %135, %140 : vector<256x4xf32>
    %142 = vector.extract_strided_slice %5 {offsets = [15, 16, 0], sizes = [16, 16, 4], strides = [1, 1, 1]} : vector<34x48x4xf32> to vector<16x16x4xf32>
    %143 = vector.shape_cast %142 : vector<16x16x4xf32> to vector<256x4xf32>
    %c22 = arith.constant 22 : index
    %c0_82 = arith.constant 0 : index
    %c0_83 = arith.constant 0 : index
    %144 = vector.load %arg3[%c22, %c0_82, %c0_83] : memref<32x4x4xf32, #tpu.memory_space<vmem>>, vector<1x4x4xf32>
    %145 = vector.shape_cast %144 : vector<1x4x4xf32> to vector<4x4xf32>
    %cst_84 = arith.constant dense<0.000000e+00> : vector<256x4xf32>
    %146 = tpu.matmul %143, %145, %cst_84 {dimension_numbers = #tpu.dot_dimension_numbers<[1], [0], [0], [1], [0, 0, 1, 1], [], []>} : vector<256x4xf32>, vector<4x4xf32>, vector<256x4xf32> -> vector<256x4xf32>
    %147 = arith.addf %141, %146 : vector<256x4xf32>
    %148 = vector.extract_strided_slice %5 {offsets = [15, 22, 0], sizes = [16, 16, 4], strides = [1, 1, 1]} : vector<34x48x4xf32> to vector<16x16x4xf32>
    %149 = vector.shape_cast %148 : vector<16x16x4xf32> to vector<256x4xf32>
    %c23 = arith.constant 23 : index
    %c0_85 = arith.constant 0 : index
    %c0_86 = arith.constant 0 : index
    %150 = vector.load %arg3[%c23, %c0_85, %c0_86] : memref<32x4x4xf32, #tpu.memory_space<vmem>>, vector<1x4x4xf32>
    %151 = vector.shape_cast %150 : vector<1x4x4xf32> to vector<4x4xf32>
    %cst_87 = arith.constant dense<0.000000e+00> : vector<256x4xf32>
    %152 = tpu.matmul %149, %151, %cst_87 {dimension_numbers = #tpu.dot_dimension_numbers<[1], [0], [0], [1], [0, 0, 1, 1], [], []>} : vector<256x4xf32>, vector<4x4xf32>, vector<256x4xf32> -> vector<256x4xf32>
    %153 = arith.addf %147, %152 : vector<256x4xf32>
    %154 = vector.extract_strided_slice %5 {offsets = [0, 7, 0], sizes = [16, 16, 4], strides = [1, 1, 1]} : vector<34x48x4xf32> to vector<16x16x4xf32>
    %155 = vector.shape_cast %154 : vector<16x16x4xf32> to vector<256x4xf32>
    %c24 = arith.constant 24 : index
    %c0_88 = arith.constant 0 : index
    %c0_89 = arith.constant 0 : index
    %156 = vector.load %arg3[%c24, %c0_88, %c0_89] : memref<32x4x4xf32, #tpu.memory_space<vmem>>, vector<1x4x4xf32>
    %157 = vector.shape_cast %156 : vector<1x4x4xf32> to vector<4x4xf32>
    %cst_90 = arith.constant dense<0.000000e+00> : vector<256x4xf32>
    %158 = tpu.matmul %155, %157, %cst_90 {dimension_numbers = #tpu.dot_dimension_numbers<[1], [0], [0], [1], [0, 0, 1, 1], [], []>} : vector<256x4xf32>, vector<4x4xf32>, vector<256x4xf32> -> vector<256x4xf32>
    %159 = arith.addf %153, %158 : vector<256x4xf32>
    %160 = vector.extract_strided_slice %5 {offsets = [0, 16, 0], sizes = [16, 16, 4], strides = [1, 1, 1]} : vector<34x48x4xf32> to vector<16x16x4xf32>
    %161 = vector.shape_cast %160 : vector<16x16x4xf32> to vector<256x4xf32>
    %c25 = arith.constant 25 : index
    %c0_91 = arith.constant 0 : index
    %c0_92 = arith.constant 0 : index
    %162 = vector.load %arg3[%c25, %c0_91, %c0_92] : memref<32x4x4xf32, #tpu.memory_space<vmem>>, vector<1x4x4xf32>
    %163 = vector.shape_cast %162 : vector<1x4x4xf32> to vector<4x4xf32>
    %cst_93 = arith.constant dense<0.000000e+00> : vector<256x4xf32>
    %164 = tpu.matmul %161, %163, %cst_93 {dimension_numbers = #tpu.dot_dimension_numbers<[1], [0], [0], [1], [0, 0, 1, 1], [], []>} : vector<256x4xf32>, vector<4x4xf32>, vector<256x4xf32> -> vector<256x4xf32>
    %165 = arith.addf %159, %164 : vector<256x4xf32>
    %166 = vector.extract_strided_slice %5 {offsets = [0, 25, 0], sizes = [16, 16, 4], strides = [1, 1, 1]} : vector<34x48x4xf32> to vector<16x16x4xf32>
    %167 = vector.shape_cast %166 : vector<16x16x4xf32> to vector<256x4xf32>
    %c26 = arith.constant 26 : index
    %c0_94 = arith.constant 0 : index
    %c0_95 = arith.constant 0 : index
    %168 = vector.load %arg3[%c26, %c0_94, %c0_95] : memref<32x4x4xf32, #tpu.memory_space<vmem>>, vector<1x4x4xf32>
    %169 = vector.shape_cast %168 : vector<1x4x4xf32> to vector<4x4xf32>
    %cst_96 = arith.constant dense<0.000000e+00> : vector<256x4xf32>
    %170 = tpu.matmul %167, %169, %cst_96 {dimension_numbers = #tpu.dot_dimension_numbers<[1], [0], [0], [1], [0, 0, 1, 1], [], []>} : vector<256x4xf32>, vector<4x4xf32>, vector<256x4xf32> -> vector<256x4xf32>
    %171 = arith.addf %165, %170 : vector<256x4xf32>
    %172 = vector.extract_strided_slice %5 {offsets = [9, 7, 0], sizes = [16, 16, 4], strides = [1, 1, 1]} : vector<34x48x4xf32> to vector<16x16x4xf32>
    %173 = vector.shape_cast %172 : vector<16x16x4xf32> to vector<256x4xf32>
    %c27 = arith.constant 27 : index
    %c0_97 = arith.constant 0 : index
    %c0_98 = arith.constant 0 : index
    %174 = vector.load %arg3[%c27, %c0_97, %c0_98] : memref<32x4x4xf32, #tpu.memory_space<vmem>>, vector<1x4x4xf32>
    %175 = vector.shape_cast %174 : vector<1x4x4xf32> to vector<4x4xf32>
    %cst_99 = arith.constant dense<0.000000e+00> : vector<256x4xf32>
    %176 = tpu.matmul %173, %175, %cst_99 {dimension_numbers = #tpu.dot_dimension_numbers<[1], [0], [0], [1], [0, 0, 1, 1], [], []>} : vector<256x4xf32>, vector<4x4xf32>, vector<256x4xf32> -> vector<256x4xf32>
    %177 = arith.addf %171, %176 : vector<256x4xf32>
    %178 = vector.extract_strided_slice %5 {offsets = [9, 25, 0], sizes = [16, 16, 4], strides = [1, 1, 1]} : vector<34x48x4xf32> to vector<16x16x4xf32>
    %179 = vector.shape_cast %178 : vector<16x16x4xf32> to vector<256x4xf32>
    %c28 = arith.constant 28 : index
    %c0_100 = arith.constant 0 : index
    %c0_101 = arith.constant 0 : index
    %180 = vector.load %arg3[%c28, %c0_100, %c0_101] : memref<32x4x4xf32, #tpu.memory_space<vmem>>, vector<1x4x4xf32>
    %181 = vector.shape_cast %180 : vector<1x4x4xf32> to vector<4x4xf32>
    %cst_102 = arith.constant dense<0.000000e+00> : vector<256x4xf32>
    %182 = tpu.matmul %179, %181, %cst_102 {dimension_numbers = #tpu.dot_dimension_numbers<[1], [0], [0], [1], [0, 0, 1, 1], [], []>} : vector<256x4xf32>, vector<4x4xf32>, vector<256x4xf32> -> vector<256x4xf32>
    %183 = arith.addf %177, %182 : vector<256x4xf32>
    %184 = vector.extract_strided_slice %5 {offsets = [18, 7, 0], sizes = [16, 16, 4], strides = [1, 1, 1]} : vector<34x48x4xf32> to vector<16x16x4xf32>
    %185 = vector.shape_cast %184 : vector<16x16x4xf32> to vector<256x4xf32>
    %c29 = arith.constant 29 : index
    %c0_103 = arith.constant 0 : index
    %c0_104 = arith.constant 0 : index
    %186 = vector.load %arg3[%c29, %c0_103, %c0_104] : memref<32x4x4xf32, #tpu.memory_space<vmem>>, vector<1x4x4xf32>
    %187 = vector.shape_cast %186 : vector<1x4x4xf32> to vector<4x4xf32>
    %cst_105 = arith.constant dense<0.000000e+00> : vector<256x4xf32>
    %188 = tpu.matmul %185, %187, %cst_105 {dimension_numbers = #tpu.dot_dimension_numbers<[1], [0], [0], [1], [0, 0, 1, 1], [], []>} : vector<256x4xf32>, vector<4x4xf32>, vector<256x4xf32> -> vector<256x4xf32>
    %189 = arith.addf %183, %188 : vector<256x4xf32>
    %190 = vector.extract_strided_slice %5 {offsets = [18, 16, 0], sizes = [16, 16, 4], strides = [1, 1, 1]} : vector<34x48x4xf32> to vector<16x16x4xf32>
    %191 = vector.shape_cast %190 : vector<16x16x4xf32> to vector<256x4xf32>
    %c30 = arith.constant 30 : index
    %c0_106 = arith.constant 0 : index
    %c0_107 = arith.constant 0 : index
    %192 = vector.load %arg3[%c30, %c0_106, %c0_107] : memref<32x4x4xf32, #tpu.memory_space<vmem>>, vector<1x4x4xf32>
    %193 = vector.shape_cast %192 : vector<1x4x4xf32> to vector<4x4xf32>
    %cst_108 = arith.constant dense<0.000000e+00> : vector<256x4xf32>
    %194 = tpu.matmul %191, %193, %cst_108 {dimension_numbers = #tpu.dot_dimension_numbers<[1], [0], [0], [1], [0, 0, 1, 1], [], []>} : vector<256x4xf32>, vector<4x4xf32>, vector<256x4xf32> -> vector<256x4xf32>
    %195 = arith.addf %189, %194 : vector<256x4xf32>
    %196 = vector.extract_strided_slice %5 {offsets = [18, 25, 0], sizes = [16, 16, 4], strides = [1, 1, 1]} : vector<34x48x4xf32> to vector<16x16x4xf32>
    %197 = vector.shape_cast %196 : vector<16x16x4xf32> to vector<256x4xf32>
    %c31 = arith.constant 31 : index
    %c0_109 = arith.constant 0 : index
    %c0_110 = arith.constant 0 : index
    %198 = vector.load %arg3[%c31, %c0_109, %c0_110] : memref<32x4x4xf32, #tpu.memory_space<vmem>>, vector<1x4x4xf32>
    %199 = vector.shape_cast %198 : vector<1x4x4xf32> to vector<4x4xf32>
    %cst_111 = arith.constant dense<0.000000e+00> : vector<256x4xf32>
    %200 = tpu.matmul %197, %199, %cst_111 {dimension_numbers = #tpu.dot_dimension_numbers<[1], [0], [0], [1], [0, 0, 1, 1], [], []>} : vector<256x4xf32>, vector<4x4xf32>, vector<256x4xf32> -> vector<256x4xf32>
    %201 = arith.addf %195, %200 : vector<256x4xf32>
    %c0_112 = arith.constant 0 : index
    %c0_113 = arith.constant 0 : index
    %202 = vector.load %arg4[%c0_112, %c0_113] : memref<1x4xf32, #tpu.memory_space<vmem>>, vector<1x4xf32>
    %203 = vector.broadcast %202 : vector<1x4xf32> to vector<256x4xf32>
    %204 = arith.addf %201, %203 : vector<256x4xf32>
    %205 = vector.shape_cast %204 : vector<256x4xf32> to vector<16x16x4xf32>
    %c0_114 = arith.constant 0 : index
    %c0_115 = arith.constant 0 : index
    %c0_116 = arith.constant 0 : index
    %c0_117 = arith.constant 0 : index
    %206 = vector.load %arg5[%c0_114, %c0_115, %c0_116, %c0_117] : memref<1x16x16x4xf32, #tpu.memory_space<vmem>>, vector<1x16x16x4xf32>
    %207 = vector.shape_cast %206 : vector<1x16x16x4xf32> to vector<16x16x4xf32>
    %208 = vector.shape_cast %205 : vector<16x16x4xf32> to vector<1x16x16x4xf32>
    tpu.vector_store %arg5[%c0_114, %c0_115, %c0_116, %c0_117], %208 {strides = array<i32>} : memref<1x16x16x4xf32, #tpu.memory_space<vmem>>, vector<1x16x16x4xf32>,
    %cst_118 = arith.constant dense<0.000000e+00> : vector<4xf32>
    %209 = vector.multi_reduction <add>, %204, %cst_118 [0] : vector<256x4xf32> to vector<4xf32>
    %210 = vector.shape_cast %209 : vector<4xf32> to vector<1x4xf32>
    %c0_119 = arith.constant 0 : index
    %c0_120 = arith.constant 0 : index
    %c0_121 = arith.constant 0 : index
    %211 = vector.load %arg6[%c0_119, %c0_120, %c0_121] : memref<1x1x4xf32, #tpu.memory_space<vmem>>, vector<1x1x4xf32>
    %212 = vector.shape_cast %211 : vector<1x1x4xf32> to vector<1x4xf32>
    %213 = vector.shape_cast %210 : vector<1x4xf32> to vector<1x1x4xf32>
    tpu.vector_store %arg6[%c0_119, %c0_120, %c0_121], %213 {strides = array<i32>} : memref<1x1x4xf32, #tpu.memory_space<vmem>>, vector<1x1x4xf32>,
    %214 = arith.mulf %204, %204 : vector<256x4xf32>
    %cst_122 = arith.constant dense<0.000000e+00> : vector<4xf32>
    %215 = vector.multi_reduction <add>, %214, %cst_122 [0] : vector<256x4xf32> to vector<4xf32>
    %216 = vector.shape_cast %215 : vector<4xf32> to vector<1x4xf32>
    %c0_123 = arith.constant 0 : index
    %c0_124 = arith.constant 0 : index
    %c0_125 = arith.constant 0 : index
    %217 = vector.load %arg7[%c0_123, %c0_124, %c0_125] : memref<1x1x4xf32, #tpu.memory_space<vmem>>, vector<1x1x4xf32>
    %218 = vector.shape_cast %217 : vector<1x1x4xf32> to vector<1x4xf32>
    %219 = vector.shape_cast %216 : vector<1x4xf32> to vector<1x1x4xf32>
    tpu.vector_store %arg7[%c0_123, %c0_124, %c0_125], %219 {strides = array<i32>} : memref<1x1x4xf32, #tpu.memory_space<vmem>>, vector<1x1x4xf32>,
    return
  }
  func.func @transform_0(%arg0: i32) -> (i32, i32, i32, i32) {
    %c0_i32 = arith.constant 0 : i32
    %c0_i32_0 = arith.constant 0 : i32
    %c0_i32_1 = arith.constant 0 : i32
    %c0_i32_2 = arith.constant 0 : i32
    return %arg0, %c0_i32, %c0_i32_0, %c0_i32_1 : i32, i32, i32, i32
  }
  func.func @transform_1(%arg0: i32) -> (i32, i32) {
    %c0_i32 = arith.constant 0 : i32
    %c0_i32_0 = arith.constant 0 : i32
    %c0_i32_1 = arith.constant 0 : i32
    return %c0_i32, %c0_i32_0 : i32, i32
  }
  func.func @transform_2(%arg0: i32) -> (i32, i32, i32) {
    %c0_i32 = arith.constant 0 : i32
    %c0_i32_0 = arith.constant 0 : i32
    %c0_i32_1 = arith.constant 0 : i32
    %c0_i32_2 = arith.constant 0 : i32
    return %c0_i32, %c0_i32_0, %c0_i32_1 : i32, i32, i32
  }
  func.func @transform_3(%arg0: i32) -> (i32, i32) {
    %c0_i32 = arith.constant 0 : i32
    %c0_i32_0 = arith.constant 0 : i32
    %c0_i32_1 = arith.constant 0 : i32
    return %c0_i32, %c0_i32_0 : i32, i32
  }
  func.func @transform_4(%arg0: i32) -> (i32, i32, i32, i32) {
    %c0_i32 = arith.constant 0 : i32
    %c0_i32_0 = arith.constant 0 : i32
    %c0_i32_1 = arith.constant 0 : i32
    %c0_i32_2 = arith.constant 0 : i32
    return %arg0, %c0_i32, %c0_i32_0, %c0_i32_1 : i32, i32, i32, i32
  }
  func.func @transform_5(%arg0: i32) -> (i32, i32, i32) {
    %c0_i32 = arith.constant 0 : i32
    %c0_i32_0 = arith.constant 0 : i32
    %c0_i32_1 = arith.constant 0 : i32
    return %arg0, %c0_i32, %c0_i32_0 : i32, i32, i32
  }
  func.func @transform_6(%arg0: i32) -> (i32, i32, i32) {
    %c0_i32 = arith.constant 0 : i32
    %c0_i32_0 = arith.constant 0 : i32
    %c0_i32_1 = arith.constant 0 : i32
    return %arg0, %c0_i32, %c0_i32_0 : i32, i32, i32
  }
}

</mosaic_0001>

<bundles_post_ra>
// kernel: tpu_custom_call.1
= control target key start
LH: loop header
LB: loop body
LE: loop exit
PB: predicated region body
PF: predicated region fallthrough
CT: control target
= control target key end

     0   :  { %12 = vsyncpa [#allocation4], 0  ;;  %s14632_s0 = inlined_call_operand.vmem [shape: f32[2,16,16,4], index: 0, kind: input, shape index: {}]   ;;  %s14633_s1 = inlined_call_operand.vmem [shape: f32[4,4], index: 1, kind: input, shape index: {}]   ;;  %s14634_s2 = inlined_call_operand.vmem [shape: f32[32,4,4], index: 2, kind: input, shape index: {}]   ;;  %s14635_s3 = inlined_call_operand.vmem [shape: f32[1,4], index: 3, kind: input, shape index: {}]   ;;  %s14636_s4 = inlined_call_operand.vmem [shape: f32[2,16,16,4], index: 4, kind: output, shape index: {0}]   ;;  %s14637_s5 = inlined_call_operand.hbm [shape: f32[2,1,4], index: 5, kind: output, shape index: {1}]   ;;  %s14638_s6 = inlined_call_operand.hbm [shape: f32[2,1,4], index: 6, kind: output, shape index: {2}]  }
   0x1   :  { %14 = vsyncpa [#allocation4 + $0x1], 0 }
   0x2   :  { %15 = vsyncpa [#allocation6], 0 }
   0x3   :  { %17 = vsyncpa [#allocation6 + $0x1], 0  ;;  %s9589_s21 = smov 0   ;;  %s9591_s22 = smov 0  }
   0x4   :  { %s9593_s23 = smov 0   ;;  %s9595_s24 = smov 0  }
   0x5 LB: > { %s9610_s25 = sadd.s32 4294967295, %s9551_s24   ;;  %s8019_s26 = sadd.s32 4294967294, %s9551_s24   ;;  %s9551_s24 = sphi %s9595_s24, %s15428_s24   ;;  %s9547_s23 = sphi %s9593_s23, %s15427_s23   ;;  %s9543_s22 = sphi %s9591_s22, %s15426_s22   ;;  %s9539_s21 = sphi %s9589_s21, %s15425_s21  }
   0x6   : > { %s9614_s27 = sadd.s32 1, %s9551_s24   ;;  %s145_s28 = sadd.s32 1, %s9547_s23 }
   0x7   : > { %s142_s29 = ssub.s32 %s9551_s24, %s9614_s27  ;;  %p155_p0 = scmp.ne.s32.totalorder %s9547_s23, %s9543_s22 }
   0x8   : > { %p143_p1 = scmp.eq.s32.totalorder %s142_s29, 0  ;;  %p156_p2 = scmp.eq.s32.totalorder %s9610_s25, 1 }
   0x9   : > { %p161_p3 = scmp.ne.s32.totalorder %s9543_s22, %s9539_s21  ;;  %p162_p4 = scmp.eq.s32.totalorder %s8019_s26, 1 }
   0xa   : > { %s9625_s30 = scalar_select %p143_p1, %s9547_s23, %s145_s28  }
   0xb   : > { %p9627_p5 = por %p156_p2, %p155_p0  ;;  %p9631_p6 = por %p162_p4, %p161_p3 }
   0xc   : > { %p8022_p7 = scmp.ge.s32.totalorder %s9551_s24, 1  ;;  %p223_p8 = scmp.lt.s32.totalorder %s9551_s24, 3 }
   0xe   : > { %p224_p9 = pnand %p8022_p7, %p223_p8 }
  0x10   : > { %227 = sbr.rel (%p224_p9) target bundleno = 2526 (0x9de), region = 36 }
  0x15   : > { %v875_v0 = vld [vmem:[%s14634_s2] sm:$0xf]  ;;  %vm940_vm0 = vcmask 1043456   ;;  %p261_p10 = scmp.lt.s32.totalorder %s9610_s25, 1  ;;  %vm271_vm1 = vcmask 31744   ;;  %v9553_v1 = vmov 0.0   ;;  %s7894_s29 = scalar_lea.hbm %s14637_s5, %s9610_s25 }
  0x16   : > { %9151 = vmatpush.msk.msra.mxu1 %vm940_vm0, %v875_v0  ;;  %9152 = vmatpush.msk.msra.mxu2 %vm940_vm0, %v875_v0  ;;  %345 = vst.msk [vmem:[#allocation2 + $0x248] sm:$0xff] %vm271_vm1, %v9553_v1  ;;  %vm794_vm2 = vcmask 1040384   ;;  %v8093_v8 = vld [vmem:[%s14634_s2 + $0x4] sm:$0xf]  ;;  %v8127_v9 = vld [vmem:[%s14634_s2 + $0x8] sm:$0xf]  ;;  %s7907_s13 = scalar_lea.hbm %s14638_s6, %s9610_s25 }
  0x17   : > { %s9646_s11 = scalar_select %p261_p10, %s9610_s25, 1  ;;  %346 = vst.msk [vmem:[#allocation2 + $0x250] sm:$0xff] %vm271_vm1, %v9553_v1  ;;  %9153 = vmatpush.msk.msra.mxu3 %vm940_vm0, %v875_v0  ;;  %8027 = vmatpush.msk.msra.mxu0 %vm940_vm0, %v875_v0  ;;  %v745_v10 = vld [vmem:[%s14633_s1] sm:$0xf]  ;;  %v8161_v16 = vld [vmem:[%s14634_s2 + $0xc] sm:$0xf] }
  0x18   : > { %272 = vst.msk [vmem:[#allocation2] sm:$0xff] %vm271_vm1, %v9553_v1  ;;  %8094 = vmatpush.msk.msrb.mxu2 %vm940_vm0, %v8093_v8  ;;  %8060 = vmatpush.msk.msrb.mxu1 %vm940_vm0, %v745_v10  ;;  %vm1409_vm3 = vcmask 1046528   ;;  %vm2506_vm4 = vcmask 1042432   ;;  %vm2961_vm5 = vcmask 1044480   ;;  %vm4139_vm6 = vcmask 1045504   ;;  %s14561_s20 = sand.u32 1, %s9543_s22  }
  0x19   : > { %s9149_s12 = sshll.u32 %s9646_s11, 8  ;;  %273 = vst.msk [vmem:[#allocation2 + $0x8] sm:$0xff] %vm271_vm1, %v9553_v1  ;;  %8128 = vmatpush.msk.msrb.mxu3 %vm940_vm0, %v8127_v9  ;;  %8162 = vmatpush.msk.msrb.mxu0 %vm940_vm0, %v8161_v16  ;;  %vm4599_vm7 = vcmask 1041408   ;;  %s254_s14 = scalar_lea.vmem [#allocation3], %s14561_s20  ;;  %vm7769_vm8 = vcmask 24576  }
  0x1a   : > { %s9662_s15 = scalar_lea.vmem %s14632_s0, %s9149_s12  ;;  %274 = vst.msk [vmem:[#allocation2 + $0x10] sm:$0xff] %vm271_vm1, %v9553_v1  ;;  %s14572_s16 = sshll.u32 %s254_s14, 4  ;;  %s7897_s16 = int_to_ptr.vmem [resolvable:$true] %s14572_s16 }
  0x1b   : > { %v482_v2 = vld [vmem:[%s9662_s15 + $0x30] sm:$0xff]  ;;  %275 = vst.msk [vmem:[#allocation2 + $0x18] sm:$0xff] %vm271_vm1, %v9553_v1  ;;  %v483_v22 = vld [vmem:[%s9662_s15 + $0x38] sm:$0xff]  ;;  %v484_v25 = vld [vmem:[%s9662_s15 + $0x40] sm:$0xff]  ;;  %s14574_s17 = sshll.u32 %s7894_s29, 4  ;;  %s260_s18 = scalar_lea.vmem [#allocation5], %s14561_s20  ;;  %s7899_s17 = int_to_ptr.hbm [resolvable:$true] %s14574_s17 }
  0x1c   : > { %515 = vst.msk [vmem:[#allocation2 + $0x250] sm:$0xff] %vm271_vm1, %v482_v2  ;;  %v490_v20 = vld [vmem:[%s9662_s15 + $0x70] sm:$0xff]  ;;  %v491_v23 = vld [vmem:[%s9662_s15 + $0x78] sm:$0xff]  ;;  %v492_v27 = vld [vmem:[%s9662_s15 + $0x80] sm:$0xff]  ;;  %s14577_s19 = sshll.u32 %s260_s18, 4  ;;  %s7879_s25 = scalar_lea.sflag [#allocation4], %s14561_s20  ;;  %s7910_s19 = int_to_ptr.vmem [resolvable:$true] %s14577_s19 }
  0x1d   : > { %276 = vst.msk [vmem:[#allocation2 + $0x20] sm:$0xff] %vm271_vm1, %v9553_v1  ;;  %v9674_v3 = vld [vmem:[#allocation2 + $0x248] sm:$0xff]  ;;  %v498_v21 = vld [vmem:[%s9662_s15 + $0xb0] sm:$0xff]  ;;  %v499_v24 = vld [vmem:[%s9662_s15 + $0xb8] sm:$0xff]  ;;  %s9471_s11 = sshra.s32 %s7899_s17, 4  ;;  %s9477_s29 = scalar_lea.hbm %s14637_s5, 2  ;;  %s9472_s11 = int_to_ptr.hbm [resolvable:$true] %s9471_s11 }
  0x1e   : > { %277 = vst.msk [vmem:[#allocation2 + $0x28] sm:$0xff] %vm271_vm1, %v9553_v1  ;;  %v14646_v4 = vrot.slane %v9674_v3, 7  ;;  %v500_v29 = vld [vmem:[%s9662_s15 + $0xc0] sm:$0xff]  ;;  %v485_v30 = vld [vmem:[%s9662_s15 + $0x48] sm:$0xff]  ;;  %v486_v41 = vld [vmem:[%s9662_s15 + $0x50] sm:$0xff]  ;;  %p9478_p0 = scmp.lt.s32.totalorder %s9472_s11, %s14637_s5 }
  0x1f   : > { %14884 = vst [vmem:[#allocation9_spill] sm:$0xff] %v9674_v3  ;;  %v493_v32 = vld [vmem:[%s9662_s15 + $0x88] sm:$0xff]  ;;  %v476_v35 = vld [vmem:[%s9662_s15] sm:$0xff]  ;;  %v494_v45 = vld [vmem:[%s9662_s15 + $0x90] sm:$0xff] }
  0x20   : > { %278 = vst.msk [vmem:[#allocation2 + $0x30] sm:$0xff] %vm271_vm1, %v9553_v1  ;;  %v501_v38 = vld [vmem:[%s9662_s15 + $0xc8] sm:$0xff]  ;;  %v502_v53 = vld [vmem:[%s9662_s15 + $0xd0] sm:$0xff]  ;;  %v487_v56 = vld [vmem:[%s9662_s15 + $0x58] sm:$0xff] }
  0x21   : > { %279 = vst.msk [vmem:[#allocation2 + $0x38] sm:$0xff] %vm271_vm1, %v9553_v1  ;;  %v477_v49 = vld [vmem:[%s9662_s15 + $0x8] sm:$0xff]  ;;  %v495_v59 = vld [vmem:[%s9662_s15 + $0x98] sm:$0xff]  ;;  %v478_v60 = vld [vmem:[%s9662_s15 + $0x10] sm:$0xff] }
  0x22   : > { %280 = vst.msk [vmem:[#allocation2 + $0x40] sm:$0xff] %vm271_vm1, %v9553_v1  ;;  %v503_v0 = vld [vmem:[%s9662_s15 + $0xd8] sm:$0xff]  ;;  %v488_v8 = vld [vmem:[%s9662_s15 + $0x60] sm:$0xff] }
  0x23   : > { %281 = vst.msk [vmem:[#allocation2 + $0x48] sm:$0xff] %vm271_vm1, %v9553_v1  ;;  %v9685_v5 = vld [vmem:[#allocation2 + $0x250] sm:$0xff] }
  0x24   : > { %282 = vst.msk [vmem:[#allocation2 + $0x50] sm:$0xff] %vm271_vm1, %v9553_v1  ;;  %v816_v6 = vrot.slane %v9685_v5, 7 }
  0x25   : > { %283 = vst.msk [vmem:[#allocation2 + $0x58] sm:$0xff] %vm271_vm1, %v9553_v1 }
  0x26   : > { %284 = vst.msk [vmem:[#allocation2 + $0x60] sm:$0xff] %vm271_vm1, %v9553_v1  ;;  %v9699_v7 = vsel %vm794_vm2, %v14646_v4, %v816_v6 }
  0x27   : > { %14885 = vst [vmem:[#allocation10_spill] sm:$0xff] %v9699_v7  ;;  %8036 = vmatmul.msk.f32.vlgmr.msra.gmra.mxu1 %vm271_vm1, %v9699_v7 }
  0x28   : > { %285 = vst.msk [vmem:[#allocation2 + $0x68] sm:$0xff] %vm271_vm1, %v9553_v1 }
  0x29   : > { %286 = vst.msk [vmem:[#allocation2 + $0x70] sm:$0xff] %vm271_vm1, %v9553_v1 }
  0x2a   : > { %287 = vst.msk [vmem:[#allocation2 + $0x78] sm:$0xff] %vm271_vm1, %v9553_v1 }
  0x2b   : > { %288 = vst.msk [vmem:[#allocation2 + $0x80] sm:$0xff] %vm271_vm1, %v9553_v1 }
  0x2c   : > { %289 = vst.msk [vmem:[#allocation2 + $0x88] sm:$0xff] %vm271_vm1, %v9553_v1 }
  0x2d   : > { %290 = vst.msk [vmem:[#allocation2 + $0x90] sm:$0xff] %vm271_vm1, %v9553_v1 }
  0x2e   : > { %291 = vst.msk [vmem:[#allocation2 + $0x98] sm:$0xff] %vm271_vm1, %v9553_v1 }
  0x2f   : > { %292 = vst.msk [vmem:[#allocation2 + $0xa0] sm:$0xff] %vm271_vm1, %v9553_v1 }
  0x30   : > { %293 = vst.msk [vmem:[#allocation2 + $0xa8] sm:$0xff] %vm271_vm1, %v9553_v1 }
  0x31   : > { %294 = vst.msk [vmem:[#allocation2 + $0xb0] sm:$0xff] %vm271_vm1, %v9553_v1 }
  0x32   : > { %295 = vst.msk [vmem:[#allocation2 + $0xb8] sm:$0xff] %vm271_vm1, %v9553_v1 }
  0x33   : > { %296 = vst.msk [vmem:[#allocation2 + $0xc0] sm:$0xff] %vm271_vm1, %v9553_v1 }
  0x34   : > { %297 = vst.msk [vmem:[#allocation2 + $0xc8] sm:$0xff] %vm271_vm1, %v9553_v1 }
  0x35   : > { %298 = vst.msk [vmem:[#allocation2 + $0xd0] sm:$0xff] %vm271_vm1, %v9553_v1 }
  0x36   : > { %299 = vst.msk [vmem:[#allocation2 + $0xd8] sm:$0xff] %vm271_vm1, %v9553_v1 }
  0x37   : > { %300 = vst.msk [vmem:[#allocation2 + $0xe0] sm:$0xff] %vm271_vm1, %v9553_v1 }
  0x38   : > { %301 = vst.msk [vmem:[#allocation2 + $0xe8] sm:$0xff] %vm271_vm1, %v9553_v1 }
  0x39   : > { %302 = vst.msk [vmem:[#allocation2 + $0xf0] sm:$0xff] %vm271_vm1, %v9553_v1 }
  0x3a   : > { %303 = vst.msk [vmem:[#allocation2 + $0xf8] sm:$0xff] %vm271_vm1, %v9553_v1 }
  0x3b   : > { %304 = vst.msk [vmem:[#allocation2 + $0x100] sm:$0xff] %vm271_vm1, %v9553_v1 }
  0x3c   : > { %305 = vst.msk [vmem:[#allocation2 + $0x108] sm:$0xff] %vm271_vm1, %v9553_v1 }
  0x3d   : > { %306 = vst.msk [vmem:[#allocation2 + $0x110] sm:$0xff] %vm271_vm1, %v9553_v1 }
  0x3e   : > { %307 = vst.msk [vmem:[#allocation2 + $0x118] sm:$0xff] %vm271_vm1, %v9553_v1 }
  0x3f   : > { %308 = vst.msk [vmem:[#allocation2 + $0x120] sm:$0xff] %vm271_vm1, %v9553_v1 }
  0x40   : > { %309 = vst.msk [vmem:[#allocation2 + $0x128] sm:$0xff] %vm271_vm1, %v9553_v1 }
  0x41   : > { %310 = vst.msk [vmem:[#allocation2 + $0x130] sm:$0xff] %vm271_vm1, %v9553_v1 }
  0x42   : > { %311 = vst.msk [vmem:[#allocation2 + $0x138] sm:$0xff] %vm271_vm1, %v9553_v1 }
  0x43   : > { %312 = vst.msk [vmem:[#allocation2 + $0x140] sm:$0xff] %vm271_vm1, %v9553_v1 }
  0x44   : > { %313 = vst.msk [vmem:[#allocation2 + $0x148] sm:$0xff] %vm271_vm1, %v9553_v1 }
  0x45   : > { %314 = vst.msk [vmem:[#allocation2 + $0x150] sm:$0xff] %vm271_vm1, %v9553_v1 }
  0x46   : > { %315 = vst.msk [vmem:[#allocation2 + $0x158] sm:$0xff] %vm271_vm1, %v9553_v1 }
  0x47   : > { %316 = vst.msk [vmem:[#allocation2 + $0x160] sm:$0xff] %vm271_vm1, %v9553_v1 }
  0x48   : > { %317 = vst.msk [vmem:[#allocation2 + $0x168] sm:$0xff] %vm271_vm1, %v9553_v1 }
  0x49   : > { %318 = vst.msk [vmem:[#allocation2 + $0x170] sm:$0xff] %vm271_vm1, %v9553_v1 }
  0x4a   : > { %319 = vst.msk [vmem:[#allocation2 + $0x178] sm:$0xff] %vm271_vm1, %v9553_v1 }
  0x4b   : > { %320 = vst.msk [vmem:[#allocation2 + $0x180] sm:$0xff] %vm271_vm1, %v9553_v1 }
  0x4c   : > { %321 = vst.msk [vmem:[#allocation2 + $0x188] sm:$0xff] %vm271_vm1, %v9553_v1 }
  0x4d   : > { %322 = vst.msk [vmem:[#allocation2 + $0x190] sm:$0xff] %vm271_vm1, %v9553_v1 }
  0x4e   : > { %323 = vst.msk [vmem:[#allocation2 + $0x198] sm:$0xff] %vm271_vm1, %v9553_v1 }
  0x4f   : > { %324 = vst.msk [vmem:[#allocation2 + $0x1a0] sm:$0xff] %vm271_vm1, %v9553_v1 }
  0x50   : > { %325 = vst.msk [vmem:[#allocation2 + $0x1a8] sm:$0xff] %vm271_vm1, %v9553_v1 }
  0x51   : > { %326 = vst.msk [vmem:[#allocation2 + $0x1b0] sm:$0xff] %vm271_vm1, %v9553_v1 }
  0x52   : > { %327 = vst.msk [vmem:[#allocation2 + $0x1b8] sm:$0xff] %vm271_vm1, %v9553_v1 }
  0x53   : > { %328 = vst.msk [vmem:[#allocation2 + $0x1c0] sm:$0xff] %vm271_vm1, %v9553_v1  ;;  %v10065_v11 = vld [vmem:[#allocation2 + $0x188] sm:$0xff] }
  0x54   : > { %329 = vst.msk [vmem:[#allocation2 + $0x1c8] sm:$0xff] %vm271_vm1, %v9553_v1  ;;  %v10067_v12 = vld [vmem:[#allocation2 + $0x190] sm:$0xff]  ;;  %v14642_v13 = vrot.slane %v10065_v11, 7 }
  0x55   : > { %330 = vst.msk [vmem:[#allocation2 + $0x1d0] sm:$0xff] %vm271_vm1, %v9553_v1  ;;  %v796_v14 = vrot.slane %v10067_v12, 7  ;;  %v10098_v17 = vld [vmem:[#allocation2 + $0x198] sm:$0xff] }
  0x56   : > { %331 = vst.msk [vmem:[#allocation2 + $0x1d8] sm:$0xff] %vm271_vm1, %v9553_v1  ;;  %v798_v18 = vrot.slane %v10098_v17, 7 }
  0x57   : > { %332 = vst.msk [vmem:[#allocation2 + $0x1e0] sm:$0xff] %vm271_vm1, %v9553_v1  ;;  %v10080_v15 = vsel %vm794_vm2, %v14642_v13, %v796_v14 }
  0x58   : > { %333 = vst.msk [vmem:[#allocation2 + $0x1e8] sm:$0xff] %vm271_vm1, %v9553_v1  ;;  %8028 = vmatmul.msk.f32.vlgmr.msra.gmra.mxu0 %vm271_vm1, %v10080_v15  ;;  %v799_v19 = vsel %vm794_vm2, %v796_v14, %v798_v18  ;;  %v496_v18 = vld [vmem:[%s9662_s15 + $0xa0] sm:$0xff] }
  0x59   : > { %334 = vst.msk [vmem:[#allocation2 + $0x1f0] sm:$0xff] %vm271_vm1, %v9553_v1  ;;  %v10190_v55 = vld [vmem:[#allocation2 + $0x1b8] sm:$0xff] }
  0x5a   : > { %335 = vst.msk [vmem:[#allocation2 + $0x1f8] sm:$0xff] %vm271_vm1, %v9553_v1  ;;  %v14648_v63 = vrot.slane %v10190_v55, 7 }
  0x5b   : > { %336 = vst.msk [vmem:[#allocation2 + $0x200] sm:$0xff] %vm271_vm1, %v9553_v1 }
  0x5c   : > { %337 = vst.msk [vmem:[#allocation2 + $0x208] sm:$0xff] %vm271_vm1, %v9553_v1 }
  0x5d   : > { %338 = vst.msk [vmem:[#allocation2 + $0x210] sm:$0xff] %vm271_vm1, %v9553_v1 }
  0x5e   : > { %339 = vst.msk [vmem:[#allocation2 + $0x218] sm:$0xff] %vm271_vm1, %v9553_v1 }
  0x5f   : > { %340 = vst.msk [vmem:[#allocation2 + $0x220] sm:$0xff] %vm271_vm1, %v9553_v1 }
  0x60   : > { %341 = vst.msk [vmem:[#allocation2 + $0x228] sm:$0xff] %vm271_vm1, %v9553_v1  ;;  %8029 = vmatmul.msk.f32.gmra.mxu0 %vm271_vm1, %v799_v19 }
  0x61   : > { %342 = vst.msk [vmem:[#allocation2 + $0x230] sm:$0xff] %vm271_vm1, %v9553_v1 }
  0x62   : > { %343 = vst.msk [vmem:[#allocation2 + $0x238] sm:$0xff] %vm271_vm1, %v9553_v1 }
  0x63   : > { %344 = vst.msk [vmem:[#allocation2 + $0x240] sm:$0xff] %vm271_vm1, %v9553_v1 }
  0x64   : > { %347 = vst.msk [vmem:[#allocation2 + $0x258] sm:$0xff] %vm271_vm1, %v9553_v1 }
  0x65   : > { %348 = vst.msk [vmem:[#allocation2 + $0x260] sm:$0xff] %vm271_vm1, %v9553_v1 }
  0x66   : > { %349 = vst.msk [vmem:[#allocation2 + $0x268] sm:$0xff] %vm271_vm1, %v9553_v1 }
  0x67   : > { %350 = vst.msk [vmem:[#allocation2 + $0x270] sm:$0xff] %vm271_vm1, %v9553_v1 }
  0x68   : > { %351 = vst.msk [vmem:[#allocation2 + $0x278] sm:$0xff] %vm271_vm1, %v9553_v1 }
  0x69   : > { %352 = vst.msk [vmem:[#allocation2 + $0x280] sm:$0xff] %vm271_vm1, %v9553_v1 }
  0x6a   : > { %353 = vst.msk [vmem:[#allocation2 + $0x288] sm:$0xff] %vm271_vm1, %v9553_v1 }
  0x6b   : > { %354 = vst.msk [vmem:[#allocation2 + $0x290] sm:$0xff] %vm271_vm1, %v9553_v1 }
  0x6c   : > { %355 = vst.msk [vmem:[#allocation2 + $0x298] sm:$0xff] %vm271_vm1, %v9553_v1 }
  0x6d   : > { %356 = vst.msk [vmem:[#allocation2 + $0x2a0] sm:$0xff] %vm271_vm1, %v9553_v1 }
  0x6e   : > { %357 = vst.msk [vmem:[#allocation2 + $0x2a8] sm:$0xff] %vm271_vm1, %v9553_v1 }
  0x6f   : > { %358 = vst.msk [vmem:[#allocation2 + $0x2b0] sm:$0xff] %vm271_vm1, %v9553_v1  ;;  %v10171_v48 = vld [vmem:[#allocation2 + $0x278] sm:$0xff] }
  0x70   : > { %359 = vst.msk [vmem:[#allocation2 + $0x2b8] sm:$0xff] %vm271_vm1, %v9553_v1  ;;  %v14645_v57 = vrot.slane %v10171_v48, 7 }
  0x71   : > { %360 = vst.msk [vmem:[#allocation2 + $0x2c0] sm:$0xff] %vm271_vm1, %v9553_v1 }
  0x72   : > { %361 = vst.msk [vmem:[#allocation2 + $0x2c8] sm:$0xff] %vm271_vm1, %v9553_v1 }
  0x73   : > { %362 = vst.msk [vmem:[#allocation2 + $0x2d0] sm:$0xff] %vm271_vm1, %v9553_v1 }
  0x74   : > { %363 = vst.msk [vmem:[#allocation2 + $0x2d8] sm:$0xff] %vm271_vm1, %v9553_v1 }
  0x75   : > { %364 = vst.msk [vmem:[#allocation2 + $0x2e0] sm:$0xff] %vm271_vm1, %v9553_v1 }
  0x76   : > { %365 = vst.msk [vmem:[#allocation2 + $0x2e8] sm:$0xff] %vm271_vm1, %v9553_v1 }
  0x77   : > { %366 = vst.msk [vmem:[#allocation2 + $0x2f0] sm:$0xff] %vm271_vm1, %v9553_v1 }
  0x78   : > { %367 = vst.msk [vmem:[#allocation2 + $0x2f8] sm:$0xff] %vm271_vm1, %v9553_v1 }
  0x79   : > { %368 = vst.msk [vmem:[#allocation2 + $0x300] sm:$0xff] %vm271_vm1, %v9553_v1 }
  0x7a   : > { %369 = vst.msk [vmem:[#allocation2 + $0x308] sm:$0xff] %vm271_vm1, %v9553_v1 }
  0x7b   : > { %370 = vst.msk [vmem:[#allocation2 + $0x310] sm:$0xff] %vm271_vm1, %v9553_v1 }
  0x7c   : > { %371 = vst.msk [vmem:[#allocation2 + $0x318] sm:$0xff] %vm271_vm1, %v9553_v1 }
  0x7d   : > { %372 = vst.msk [vmem:[#allocation2 + $0x320] sm:$0xff] %vm271_vm1, %v9553_v1 }
  0x7e   : > { %373 = vst.msk [vmem:[#allocation2 + $0x328] sm:$0xff] %vm271_vm1, %v9553_v1 }
  0x7f   : > { %374 = vst.msk [vmem:[#allocation2 + $0x330] sm:$0xff] %vm271_vm1, %v9553_v1 }
  0x80   : > { %375 = vst.msk [vmem:[#allocation2 + $0x338] sm:$0xff] %vm271_vm1, %v9553_v1 }
  0x81   : > { %376 = vst.msk [vmem:[#allocation2 + $0x340] sm:$0xff] %vm271_vm1, %v9553_v1  ;;  %v10124_v26 = vld [vmem:[#allocation2 + $0x308] sm:$0xff] }
  0x82   : > { %377 = vst.msk [vmem:[#allocation2 + $0x348] sm:$0xff] %vm271_vm1, %v9553_v1  ;;  %v14643_v31 = vrot.slane %v10124_v26, 7 }
  0x83   : > { %378 = vst.msk [vmem:[#allocation2 + $0x350] sm:$0xff] %vm271_vm1, %v9553_v1 }
  0x84   : > { %379 = vst.msk [vmem:[#allocation2 + $0x358] sm:$0xff] %vm271_vm1, %v9553_v1 }
  0x85   : > { %380 = vst.msk [vmem:[#allocation2 + $0x360] sm:$0xff] %vm271_vm1, %v9553_v1 }
  0x86   : > { %381 = vst.msk [vmem:[#allocation2 + $0x368] sm:$0xff] %vm271_vm1, %v9553_v1 }
  0x87   : > { %382 = vst.msk [vmem:[#allocation2 + $0x370] sm:$0xff] %vm271_vm1, %v9553_v1  ;;  %v10203_v62 = vld [vmem:[#allocation2 + $0x338] sm:$0xff] }
  0x88   : > { %383 = vst.msk [vmem:[#allocation2 + $0x378] sm:$0xff] %vm271_vm1, %v9553_v1 }
  0x89   : > { %384 = vst.msk [vmem:[#allocation2 + $0x380] sm:$0xff] %vm271_vm1, %v9553_v1 }
  0x8a   : > { %385 = vst.msk [vmem:[#allocation2 + $0x388] sm:$0xff] %vm271_vm1, %v9553_v1 }
  0x8b   : > { %386 = vst.msk [vmem:[#allocation2 + $0x390] sm:$0xff] %vm271_vm1, %v9553_v1 }
  0x8c   : > { %387 = vst.msk [vmem:[#allocation2 + $0x398] sm:$0xff] %vm271_vm1, %v9553_v1 }
  0x8d   : > { %388 = vst.msk [vmem:[#allocation2 + $0x3a0] sm:$0xff] %vm271_vm1, %v9553_v1 }
  0x8e   : > { %389 = vst.msk [vmem:[#allocation2 + $0x3a8] sm:$0xff] %vm271_vm1, %v9553_v1 }
  0x8f   : > { %390 = vst.msk [vmem:[#allocation2 + $0x3b0] sm:$0xff] %vm271_vm1, %v9553_v1 }
  0x90   : > { %391 = vst.msk [vmem:[#allocation2 + $0x3b8] sm:$0xff] %vm271_vm1, %v9553_v1 }
  0x91   : > { %392 = vst.msk [vmem:[#allocation2 + $0x3c0] sm:$0xff] %vm271_vm1, %v9553_v1 }
  0x92   : > { %393 = vst.msk [vmem:[#allocation2 + $0x3c8] sm:$0xff] %vm271_vm1, %v9553_v1 }
  0x93   : > { %394 = vst.msk [vmem:[#allocation2 + $0x3d0] sm:$0xff] %vm271_vm1, %v9553_v1 }
  0x94   : > { %395 = vst.msk [vmem:[#allocation2 + $0x3d8] sm:$0xff] %vm271_vm1, %v9553_v1 }
  0x95   : > { %396 = vst.msk [vmem:[#allocation2 + $0x3e0] sm:$0xff] %vm271_vm1, %v9553_v1 }
  0x96   : > { %397 = vst.msk [vmem:[#allocation2 + $0x3e8] sm:$0xff] %vm271_vm1, %v9553_v1 }
  0x97   : > { %398 = vst.msk [vmem:[#allocation2 + $0x3f0] sm:$0xff] %vm271_vm1, %v9553_v1 }
  0x98   : > { %399 = vst.msk [vmem:[#allocation2 + $0x3f8] sm:$0xff] %vm271_vm1, %v9553_v1 }
  0x99   : > { %400 = vst.msk [vmem:[#allocation2 + $0x400] sm:$0xff] %vm271_vm1, %v9553_v1  ;;  %v10128_v28 = vld [vmem:[#allocation2 + $0x3c8] sm:$0xff] }
  0x9a   : > { %401 = vst.msk [vmem:[#allocation2 + $0x408] sm:$0xff] %vm271_vm1, %v9553_v1  ;;  %v14640_v34 = vrot.slane %v10128_v28, 7 }
  0x9b   : > { %402 = vst.msk [vmem:[#allocation2 + $0x410] sm:$0xff] %vm271_vm1, %v9553_v1 }
  0x9c   : > { %403 = vst.msk [vmem:[#allocation2 + $0x418] sm:$0xff] %vm271_vm1, %v9553_v1 }
  0x9d   : > { %404 = vst.msk [vmem:[#allocation2 + $0x420] sm:$0xff] %vm271_vm1, %v9553_v1 }
  0x9e   : > { %405 = vst.msk [vmem:[#allocation2 + $0x428] sm:$0xff] %vm271_vm1, %v9553_v1 }
  0x9f   : > { %406 = vst.msk [vmem:[#allocation2 + $0x430] sm:$0xff] %vm271_vm1, %v9553_v1  ;;  %v10222_v10 = vld [vmem:[#allocation2 + $0x3f8] sm:$0xff] }
  0xa0   : > { %407 = vst.msk [vmem:[#allocation2 + $0x438] sm:$0xff] %vm271_vm1, %v9553_v1 }
  0xa1   : > { %408 = vst.msk [vmem:[#allocation2 + $0x440] sm:$0xff] %vm271_vm1, %v9553_v1 }
  0xa2   : > { %409 = vst.msk [vmem:[#allocation2 + $0x448] sm:$0xff] %vm271_vm1, %v9553_v1 }
  0xa3   : > { %410 = vst.msk [vmem:[#allocation2 + $0x450] sm:$0xff] %vm271_vm1, %v9553_v1 }
  0xa4   : > { %411 = vst.msk [vmem:[#allocation2 + $0x458] sm:$0xff] %vm271_vm1, %v9553_v1 }
  0xa5   : > { %412 = vst.msk [vmem:[#allocation2 + $0x460] sm:$0xff] %vm271_vm1, %v9553_v1 }
  0xa6   : > { %413 = vst.msk [vmem:[#allocation2 + $0x468] sm:$0xff] %vm271_vm1, %v9553_v1 }
  0xa7   : > { %414 = vst.msk [vmem:[#allocation2 + $0x470] sm:$0xff] %vm271_vm1, %v9553_v1 }
  0xa8   : > { %415 = vst.msk [vmem:[#allocation2 + $0x478] sm:$0xff] %vm271_vm1, %v9553_v1 }
  0xa9   : > { %416 = vst.msk [vmem:[#allocation2 + $0x480] sm:$0xff] %vm271_vm1, %v9553_v1 }
  0xaa   : > { %417 = vst.msk [vmem:[#allocation2 + $0x488] sm:$0xff] %vm271_vm1, %v9553_v1 }
  0xab   : > { %418 = vst.msk [vmem:[#allocation2 + $0x490] sm:$0xff] %vm271_vm1, %v9553_v1 }
  0xac   : > { %419 = vst.msk [vmem:[#allocation2 + $0x498] sm:$0xff] %vm271_vm1, %v9553_v1 }
  0xad   : > { %420 = vst.msk [vmem:[#allocation2 + $0x4a0] sm:$0xff] %vm271_vm1, %v9553_v1 }
  0xae   : > { %421 = vst.msk [vmem:[#allocation2 + $0x4a8] sm:$0xff] %vm271_vm1, %v9553_v1 }
  0xaf   : > { %422 = vst.msk [vmem:[#allocation2 + $0x4b0] sm:$0xff] %vm271_vm1, %v9553_v1 }
  0xb0   : > { %423 = vst.msk [vmem:[#allocation2 + $0x4b8] sm:$0xff] %vm271_vm1, %v9553_v1 }
  0xb1   : > { %424 = vst.msk [vmem:[#allocation2 + $0x4c0] sm:$0xff] %vm271_vm1, %v9553_v1 }
  0xb2   : > { %425 = vst.msk [vmem:[#allocation2 + $0x4c8] sm:$0xff] %vm271_vm1, %v9553_v1 }
  0xb3   : > { %426 = vst.msk [vmem:[#allocation2 + $0x4d0] sm:$0xff] %vm271_vm1, %v9553_v1 }
  0xb4   : > { %427 = vst.msk [vmem:[#allocation2 + $0x4d8] sm:$0xff] %vm271_vm1, %v9553_v1 }
  0xb5   : > { %428 = vst.msk [vmem:[#allocation2 + $0x4e0] sm:$0xff] %vm271_vm1, %v9553_v1 }
  0xb6   : > { %429 = vst.msk [vmem:[#allocation2 + $0x4e8] sm:$0xff] %vm271_vm1, %v9553_v1 }
  0xb7   : > { %430 = vst.msk [vmem:[#allocation2 + $0x4f0] sm:$0xff] %vm271_vm1, %v9553_v1 }
  0xb8   : > { %431 = vst.msk [vmem:[#allocation2 + $0x4f8] sm:$0xff] %vm271_vm1, %v9553_v1 }
  0xb9   : > { %432 = vst.msk [vmem:[#allocation2 + $0x500] sm:$0xff] %vm271_vm1, %v9553_v1 }
  0xba   : > { %433 = vst.msk [vmem:[#allocation2 + $0x508] sm:$0xff] %vm271_vm1, %v9553_v1 }
  0xbb   : > { %434 = vst.msk [vmem:[#allocation2 + $0x510] sm:$0xff] %vm271_vm1, %v9553_v1 }
  0xbc   : > { %435 = vst.msk [vmem:[#allocation2 + $0x518] sm:$0xff] %vm271_vm1, %v9553_v1 }
  0xbd   : > { %436 = vst.msk [vmem:[#allocation2 + $0x520] sm:$0xff] %vm271_vm1, %v9553_v1 }
  0xbe   : > { %437 = vst.msk [vmem:[#allocation2 + $0x528] sm:$0xff] %vm271_vm1, %v9553_v1 }
  0xbf   : > { %438 = vst.msk [vmem:[#allocation2 + $0x530] sm:$0xff] %vm271_vm1, %v9553_v1 }
  0xc0   : > { %439 = vst.msk [vmem:[#allocation2 + $0x538] sm:$0xff] %vm271_vm1, %v9553_v1 }
  0xc1   : > { %440 = vst.msk [vmem:[#allocation2 + $0x540] sm:$0xff] %vm271_vm1, %v9553_v1 }
  0xc2   : > { %441 = vst.msk [vmem:[#allocation2 + $0x548] sm:$0xff] %vm271_vm1, %v9553_v1 }
  0xc3   : > { %442 = vst.msk [vmem:[#allocation2 + $0x550] sm:$0xff] %vm271_vm1, %v9553_v1 }
  0xc4   : > { %443 = vst.msk [vmem:[#allocation2 + $0x558] sm:$0xff] %vm271_vm1, %v9553_v1 }
  0xc5   : > { %444 = vst.msk [vmem:[#allocation2 + $0x560] sm:$0xff] %vm271_vm1, %v9553_v1 }
  0xc6   : > { %445 = vst.msk [vmem:[#allocation2 + $0x568] sm:$0xff] %vm271_vm1, %v9553_v1 }
  0xc7   : > { %446 = vst.msk [vmem:[#allocation2 + $0x570] sm:$0xff] %vm271_vm1, %v9553_v1 }
  0xc8   : > { %447 = vst.msk [vmem:[#allocation2 + $0x578] sm:$0xff] %vm271_vm1, %v9553_v1 }
  0xc9   : > { %448 = vst.msk [vmem:[#allocation2 + $0x580] sm:$0xff] %vm271_vm1, %v9553_v1 }
  0xca   : > { %449 = vst.msk [vmem:[#allocation2 + $0x588] sm:$0xff] %vm271_vm1, %v9553_v1 }
  0xcb   : > { %450 = vst.msk [vmem:[#allocation2 + $0x590] sm:$0xff] %vm271_vm1, %v9553_v1 }
  0xcc   : > { %451 = vst.msk [vmem:[#allocation2 + $0x598] sm:$0xff] %vm271_vm1, %v9553_v1 }
  0xcd   : > { %452 = vst.msk [vmem:[#allocation2 + $0x5a0] sm:$0xff] %vm271_vm1, %v9553_v1 }
  0xce   : > { %453 = vst.msk [vmem:[#allocation2 + $0x5a8] sm:$0xff] %vm271_vm1, %v9553_v1 }
  0xcf   : > { %454 = vst.msk [vmem:[#allocation2 + $0x5b0] sm:$0xff] %vm271_vm1, %v9553_v1 }
  0xd0   : > { %455 = vst.msk [vmem:[#allocation2 + $0x5b8] sm:$0xff] %vm271_vm1, %v9553_v1 }
  0xd1   : > { %456 = vst.msk [vmem:[#allocation2 + $0x5c0] sm:$0xff] %vm271_vm1, %v9553_v1 }
  0xd2   : > { %457 = vst.msk [vmem:[#allocation2 + $0x5c8] sm:$0xff] %vm271_vm1, %v9553_v1 }
  0xd3   : > { %458 = vst.msk [vmem:[#allocation2 + $0x5d0] sm:$0xff] %vm271_vm1, %v9553_v1 }
  0xd4   : > { %459 = vst.msk [vmem:[#allocation2 + $0x5d8] sm:$0xff] %vm271_vm1, %v9553_v1 }
  0xd5   : > { %460 = vst.msk [vmem:[#allocation2 + $0x5e0] sm:$0xff] %vm271_vm1, %v9553_v1 }
  0xd6   : > { %461 = vst.msk [vmem:[#allocation2 + $0x5e8] sm:$0xff] %vm271_vm1, %v9553_v1 }
  0xd7   : > { %14886 = vst [vmem:[#allocation11_spill] sm:$0xff] %v10065_v11 }
  0xd8   : > { %462 = vst.msk [vmem:[#allocation2 + $0x5f0] sm:$0xff] %vm271_vm1, %v9553_v1 }
  0xd9   : > { %463 = vst.msk [vmem:[#allocation2 + $0x5f8] sm:$0xff] %vm271_vm1, %v9553_v1 }
  0xda   : > { %464 = vst.msk [vmem:[#allocation2 + $0x600] sm:$0xff] %vm271_vm1, %v9553_v1 }
  0xdb   : > { %14887 = vst [vmem:[#allocation12_spill] sm:$0xff] %v10080_v15 }
  0xdc   : > { %465 = vst.msk [vmem:[#allocation2 + $0x608] sm:$0xff] %vm271_vm1, %v9553_v1 }
  0xdd   : > { %466 = vst.msk [vmem:[#allocation2 + $0x610] sm:$0xff] %vm271_vm1, %v9553_v1 }
  0xde   : > { %467 = vst.msk [vmem:[#allocation2 + $0x618] sm:$0xff] %vm271_vm1, %v9553_v1 }
  0xdf   : > { %468 = vst.msk [vmem:[#allocation2 + $0x620] sm:$0xff] %vm271_vm1, %v9553_v1 }
  0xe0   : > { %469 = vst.msk [vmem:[#allocation2 + $0x628] sm:$0xff] %vm271_vm1, %v9553_v1 }
  0xe1   : > { %470 = vst.msk [vmem:[#allocation2 + $0x630] sm:$0xff] %vm271_vm1, %v9553_v1 }
  0xe2   : > { %471 = vst.msk [vmem:[#allocation2 + $0x638] sm:$0xff] %vm271_vm1, %v9553_v1 }
  0xe3   : > { %472 = vst.msk [vmem:[#allocation2 + $0x640] sm:$0xff] %vm271_vm1, %v9553_v1 }
  0xe4   : > { %473 = vst.msk [vmem:[#allocation2 + $0x648] sm:$0xff] %vm271_vm1, %v9553_v1 }
  0xe5   : > { %474 = vst.msk [vmem:[#allocation2 + $0x650] sm:$0xff] %vm271_vm1, %v9553_v1 }
  0xe6   : > { %475 = vst.msk [vmem:[#allocation2 + $0x658] sm:$0xff] %vm271_vm1, %v9553_v1 }
  0xe7   : > { %523 = vst.msk [vmem:[#allocation2 + $0x310] sm:$0xff] %vm271_vm1, %v490_v20  ;;  %v479_v20 = vld [vmem:[%s9662_s15 + $0x18] sm:$0xff] }
  0xe8   : > { %531 = vst.msk [vmem:[#allocation2 + $0x3d0] sm:$0xff] %vm271_vm1, %v498_v21  ;;  %v14641_v21 = vrot.slane %v10203_v62, 7 }
  0xe9   : > { %516 = vst.msk [vmem:[#allocation2 + $0x258] sm:$0xff] %vm271_vm1, %v483_v22 }
  0xea   : > { %14888 = vst [vmem:[#allocation13_spill] sm:$0xff] %v10124_v26 }
  0xeb   : > { %524 = vst.msk [vmem:[#allocation2 + $0x318] sm:$0xff] %vm271_vm1, %v491_v23 }
  0xec   : > { %14889 = vst [vmem:[#allocation14_spill] sm:$0xff] %v10128_v28 }
  0xed   : > { %532 = vst.msk [vmem:[#allocation2 + $0x3d8] sm:$0xff] %vm271_vm1, %v499_v24  ;;  %v504_v24 = vld [vmem:[%s9662_s15 + $0xe0] sm:$0xff] }
  0xee   : > { %517 = vst.msk [vmem:[#allocation2 + $0x280] sm:$0xff] %vm271_vm1, %v484_v25  ;;  %v10137_v33 = vld [vmem:[#allocation2 + $0x310] sm:$0xff]  ;;  %v14639_v25 = vrot.slane %v10222_v10, 7 }
  0xef   : > { %525 = vst.msk [vmem:[#allocation2 + $0x340] sm:$0xff] %vm271_vm1, %v492_v27  ;;  %v836_v36 = vrot.slane %v10137_v33, 7  ;;  %v10143_v37 = vld [vmem:[#allocation2 + $0x3d0] sm:$0xff] }
  0xf0   : > { %533 = vst.msk [vmem:[#allocation2 + $0x400] sm:$0xff] %vm271_vm1, %v500_v29  ;;  %v856_v39 = vrot.slane %v10143_v37, 7  ;;  %v10148_v40 = vld [vmem:[#allocation2 + $0x258] sm:$0xff] }
  0xf1   : > { %518 = vst.msk [vmem:[#allocation2 + $0x288] sm:$0xff] %vm271_vm1, %v485_v30  ;;  %v10155_v42 = vsel %vm794_vm2, %v14643_v31, %v836_v36  ;;  %v818_v43 = vrot.slane %v10148_v40, 7 }
  0xf2   : > { %526 = vst.msk [vmem:[#allocation2 + $0x348] sm:$0xff] %vm271_vm1, %v493_v32  ;;  %v10158_v44 = vld [vmem:[#allocation2 + $0x318] sm:$0xff]  ;;  %8044 = vmatmul.msk.f32.vlgmr.msra.gmra.mxu2 %vm271_vm1, %v10155_v42  ;;  %v10167_v46 = vsel %vm794_vm2, %v14640_v34, %v856_v39 }
  0xf3   : > { %14890 = vst [vmem:[#allocation15_spill] sm:$0xff] %v10155_v42  ;;  %8052 = vmatmul.msk.f32.vlgmr.msra.gmra.mxu3 %vm271_vm1, %v10167_v46  ;;  %v10180_v50 = vsel %vm794_vm2, %v816_v6, %v818_v43  ;;  %v838_v51 = vrot.slane %v10158_v44, 7  ;;  %v480_v43 = vld [vmem:[%s9662_s15 + $0x20] sm:$0xff] }
  0xf4   : > { %509 = vst.msk [vmem:[#allocation2 + $0x1c0] sm:$0xff] %vm271_vm1, %v476_v35  ;;  %v10169_v47 = vld [vmem:[#allocation2 + $0x3d8] sm:$0xff]  ;;  %8037 = vmatmul.msk.f32.gmra.mxu1 %vm271_vm1, %v10180_v50  ;;  %v489_v35 = vld [vmem:[%s9662_s15 + $0x68] sm:$0xff] }
  0xf5   : > { %14891 = vst [vmem:[#allocation16_spill] sm:$0xff] %v10167_v46  ;;  %v10183_v52 = vld [vmem:[#allocation2 + $0x280] sm:$0xff]  ;;  %v858_v54 = vrot.slane %v10169_v47, 7  ;;  %v10201_v61 = vsel %vm794_vm2, %v836_v36, %v838_v51  ;;  %v497_v36 = vld [vmem:[%s9662_s15 + $0xa8] sm:$0xff] }
  0xf6   : > { %14892 = vst [vmem:[#allocation17_spill] sm:$0xff] %v10171_v48  ;;  %v821_v58 = vrot.slane %v10183_v52, 7  ;;  %v10211_v2 = vld [vmem:[#allocation2 + $0x340] sm:$0xff]  ;;  %v10281_v51 = vld [vmem:[#allocation2 + $0x2a8] sm:$0xff]  ;;  %v10413_v48 = vld [vmem:[#allocation2 + $0x398] sm:$0xff] }
  0xf7   : > { %534 = vst.msk [vmem:[#allocation2 + $0x408] sm:$0xff] %vm271_vm1, %v501_v38  ;;  %v10209_v1 = vsel %vm794_vm2, %v856_v39, %v858_v54  ;;  %v10224_v14 = vld [vmem:[#allocation2 + $0x400] sm:$0xff]  ;;  %v841_v22 = vrot.slane %v10211_v2, 7  ;;  %v505_v54 = vld [vmem:[%s9662_s15 + $0xe8] sm:$0xff] }
  0xf8   : > { %14893 = vst [vmem:[#allocation18_spill] sm:$0xff] %v10180_v50  ;;  %v10220_v9 = vsel %vm794_vm2, %v14645_v57, %v821_v58  ;;  %v10231_v19 = vld [vmem:[#allocation2 + $0x288] sm:$0xff]  ;;  %v861_v27 = vrot.slane %v10224_v14, 7 }
  0xf9   : > { %519 = vst.msk [vmem:[#allocation2 + $0x2b0] sm:$0xff] %vm271_vm1, %v486_v41  ;;  %v823_v30 = vrot.slane %v10231_v19, 7  ;;  %v10264_v38 = vsel %vm794_vm2, %v14641_v21, %v841_v22  ;;  %v10272_v41 = vld [vmem:[#allocation2 + $0x348] sm:$0xff] }
  0xfa   : > { %14894 = vst [vmem:[#allocation19_spill] sm:$0xff] %v10190_v55  ;;  %8045 = vmatmul.msk.f32.gmra.mxu2 %vm271_vm1, %v10201_v61  ;;  %v10270_v39 = vsel %vm794_vm2, %v14639_v25, %v861_v27 }
  0xfb   : > { %527 = vst.msk [vmem:[#allocation2 + $0x370] sm:$0xff] %vm271_vm1, %v494_v45  ;;  %v10213_v6 = vld [vmem:[#allocation2 + $0x1c0] sm:$0xff]  ;;  %8053 = vmatmul.msk.f32.gmra.mxu3 %vm271_vm1, %v10209_v1  ;;  %v10277_v45 = vsel %vm794_vm2, %v821_v58, %v823_v30 }
  0xfc   : > { %510 = vst.msk [vmem:[#allocation2 + $0x1c8] sm:$0xff] %vm271_vm1, %v477_v49  ;;  %v801_v16 = vrot.slane %v10213_v6, 7  ;;  %8038 = vmatmul.msk.f32.gmra.mxu1 %vm271_vm1, %v10220_v9 }
  0xfd   : > { %535 = vst.msk [vmem:[#allocation2 + $0x430] sm:$0xff] %vm271_vm1, %v502_v53 }
  0xfe   : > { %14895 = vst [vmem:[#allocation20_spill] sm:$0xff] %v10201_v61  ;;  %v10242_v23 = vsel %vm794_vm2, %v14648_v63, %v801_v16  ;;  %v10279_v49 = vld [vmem:[#allocation2 + $0x408] sm:$0xff] }
  0xff   : > { %14896 = vst [vmem:[#allocation21_spill] sm:$0xff] %v10203_v62  ;;  %8030 = vmatmul.msk.f32.gmra.mxu0 %vm271_vm1, %v10242_v23 }
 0x100   : > { %520 = vst.msk [vmem:[#allocation2 + $0x2b8] sm:$0xff] %vm271_vm1, %v487_v56  ;;  %v10290_v56 = vld [vmem:[#allocation2 + $0x2b0] sm:$0xff] }
 0x101   : > { %528 = vst.msk [vmem:[#allocation2 + $0x378] sm:$0xff] %vm271_vm1, %v495_v59  ;;  %v10292_v59 = vld [vmem:[#allocation2 + $0x1e8] sm:$0xff] }
 0x102   : > { %14897 = vst [vmem:[#allocation22_spill] sm:$0xff] %v10220_v9  ;;  %8046 = vmatmul.msk.f32.gmra.mxu2 %vm271_vm1, %v10264_v38 }
 0x103   : > { %14898 = vst [vmem:[#allocation23_spill] sm:$0xff] %v10222_v10  ;;  %v10252_v29 = vld [vmem:[#allocation2 + $0x1c8] sm:$0xff]  ;;  %8054 = vmatmul.msk.f32.gmra.mxu3 %vm271_vm1, %v10270_v39  ;;  %v10370_v10 = vld [vmem:[#allocation2 + $0x2d8] sm:$0xff] }
 0x104   : > { %511 = vst.msk [vmem:[#allocation2 + $0x1f0] sm:$0xff] %vm271_vm1, %v478_v60  ;;  %v803_v32 = vrot.slane %v10252_v29, 7  ;;  %v843_v60 = vrot.slane %v10272_v41, 7  ;;  %8039 = vmatmul.msk.f32.gmra.mxu1 %vm271_vm1, %v10277_v45  ;;  %v10327_v25 = vld [vmem:[#allocation2 + $0x430] sm:$0xff]  ;;  %v14663_v15 = vrot.slane %v10370_v10, 7 }
 0x105   : > { %536 = vst.msk [vmem:[#allocation2 + $0x438] sm:$0xff] %vm271_vm1, %v503_v0  ;;  %v863_v0 = vrot.slane %v10279_v49, 7 }
 0x106   : > { %14899 = vst [vmem:[#allocation24_spill] sm:$0xff] %v10242_v23  ;;  %v10284_v53 = vsel %vm794_vm2, %v801_v16, %v803_v32  ;;  %v826_v16 = vrot.slane %v10290_v56, 7  ;;  %v10315_v32 = vld [vmem:[#allocation2 + $0x368] sm:$0xff] }
 0x107   : > { %521 = vst.msk [vmem:[#allocation2 + $0x2e0] sm:$0xff] %vm271_vm1, %v488_v8  ;;  %8031 = vmatmul.msk.f32.gmra.mxu0 %vm271_vm1, %v10284_v53  ;;  %v14644_v8 = vrot.slane %v10281_v51, 7  ;;  %v10313_v30 = vsel %vm794_vm2, %v861_v27, %v863_v0  ;;  %v10337_v27 = vld [vmem:[#allocation2 + $0x2b8] sm:$0xff]  ;;  %v14652_v0 = vrot.slane %v10315_v32, 7 }
 0x108   : > { %529 = vst.msk [vmem:[#allocation2 + $0x3a0] sm:$0xff] %vm271_vm1, %v496_v18  ;;  %v14647_v18 = vrot.slane %v10292_v59, 7  ;;  %v828_v13 = vrot.slane %v10337_v27, 7  ;;  %v10363_v4 = vld [vmem:[#allocation2 + $0x378] sm:$0xff] }
 0x109   : > { %512 = vst.msk [vmem:[#allocation2 + $0x1f8] sm:$0xff] %vm271_vm1, %v479_v20 }
 0x10a   : > { %537 = vst.msk [vmem:[#allocation2 + $0x460] sm:$0xff] %vm271_vm1, %v504_v24  ;;  %v10310_v24 = vsel %vm794_vm2, %v841_v22, %v843_v60 }
 0x10b   : > { %14900 = vst [vmem:[#allocation25_spill] sm:$0xff] %v10264_v38  ;;  %v10294_v58 = vld [vmem:[#allocation2 + $0x1f0] sm:$0xff]  ;;  %8047 = vmatmul.msk.f32.gmra.mxu2 %vm271_vm1, %v10310_v24  ;;  %8055 = vmatmul.msk.f32.gmra.mxu3 %vm271_vm1, %v10313_v30 }
 0x10c   : > { %522 = vst.msk [vmem:[#allocation2 + $0x2e8] sm:$0xff] %vm271_vm1, %v489_v35  ;;  %v806_v20 = vrot.slane %v10294_v58, 7  ;;  %v10317_v35 = vld [vmem:[#allocation2 + $0x370] sm:$0xff]  ;;  %v10368_v63 = vld [vmem:[#allocation2 + $0x438] sm:$0xff] }
 0x10d   : > { %14901 = vst [vmem:[#allocation26_spill] sm:$0xff] %v10270_v39  ;;  %v846_v34 = vrot.slane %v10317_v35, 7 }
 0x10e   : > { %530 = vst.msk [vmem:[#allocation2 + $0x3a8] sm:$0xff] %vm271_vm1, %v497_v36  ;;  %v481_v36 = vld [vmem:[%s9662_s15 + $0x28] sm:$0xff]  ;;  %v10332_v22 = vsel %vm794_vm2, %v14647_v18, %v806_v20  ;;  %v10366_v18 = vsel %vm794_vm2, %v826_v16, %v828_v13  ;;  %v10372_v28 = vld [vmem:[#allocation2 + $0x2e0] sm:$0xff]  ;;  %v8229_v13 = vld [vmem:[%s14634_s2 + $0x14] sm:$0xf] }
 0x10f   : > { %14902 = vst [vmem:[#allocation27_spill] sm:$0xff] %v10277_v45  ;;  %8032 = vmatmul.msk.f32.gmra.mxu0 %vm271_vm1, %v10332_v22  ;;  %8230 = vmatpush.msk.msra.mxu2 %vm940_vm0, %v8229_v13  ;;  %v831_v13 = vrot.slane %v10372_v28, 7  ;;  %v10415_v3 = vld [vmem:[#allocation2 + $0x3a0] sm:$0xff] }
 0x110   : > { %14903 = vst [vmem:[#allocation28_spill] sm:$0xff] %v10279_v49  ;;  %v10339_v60 = vld [vmem:[#allocation2 + $0x1f8] sm:$0xff] }
 0x111   : > { %14904 = vst [vmem:[#allocation29_spill] sm:$0xff] %v10281_v51  ;;  %v808_v31 = vrot.slane %v10339_v60, 7  ;;  %v10420_v62 = vsel %vm794_vm2, %v14663_v15, %v831_v13  ;;  %v851_v15 = vrot.slane %v10415_v3, 7 }
 0x112   : > { %513 = vst.msk [vmem:[#allocation2 + $0x220] sm:$0xff] %vm271_vm1, %v480_v43  ;;  %v10323_v43 = vsel %vm794_vm2, %v14644_v8, %v826_v16  ;;  %v10356_v8 = vsel %vm794_vm2, %v14652_v0, %v846_v34  ;;  %v10379_v0 = vld [vmem:[#allocation2 + $0x218] sm:$0xff]  ;;  %v848_v16 = vrot.slane %v10363_v4, 7 }
 0x113   : > { %14905 = vst [vmem:[#allocation30_spill] sm:$0xff] %v10292_v59  ;;  %8040 = vmatmul.msk.f32.gmra.mxu1 %vm271_vm1, %v10323_v43  ;;  %8048 = vmatmul.msk.f32.gmra.mxu2 %vm271_vm1, %v10356_v8  ;;  %v10422_v59 = vld [vmem:[#allocation2 + $0x458] sm:$0xff] }
 0x114   : > { %538 = vst.msk [vmem:[#allocation2 + $0x468] sm:$0xff] %vm271_vm1, %v505_v54  ;;  %v10325_v54 = vld [vmem:[#allocation2 + $0x428] sm:$0xff]  ;;  %v10408_v26 = vsel %vm794_vm2, %v846_v34, %v848_v16 }
 0x115   : > { %14906 = vst [vmem:[#allocation31_spill] sm:$0xff] %v10313_v30  ;;  %v14653_v21 = vrot.slane %v10325_v54, 7 }
 0x116   : > { %14907 = vst [vmem:[#allocation32_spill] sm:$0xff] %v10315_v32  ;;  %v10375_v32 = vsel %vm794_vm2, %v806_v20, %v808_v31  ;;  %v8263_v31 = vld [vmem:[%s14634_s2 + $0x18] sm:$0xf]  ;;  %v8195_v20 = vld [vmem:[%s14634_s2 + $0x10] sm:$0xf] }
 0x117   : > { %14908 = vst [vmem:[#allocation33_spill] sm:$0xff] %v10323_v43  ;;  %8033 = vmatmul.msk.f32.gmra.mxu0 %vm271_vm1, %v10375_v32  ;;  %8264 = vmatpush.msk.msra.mxu3 %vm940_vm0, %v8263_v31  ;;  %v10424_v31 = vld [vmem:[#allocation2 + $0x460] sm:$0xff] }
 0x118   : > { %14909 = vst [vmem:[#allocation34_spill] sm:$0xff] %v10325_v54  ;;  %v868_v54 = vrot.slane %v10368_v63, 7  ;;  %8196 = vmatpush.msk.msra.mxu1 %vm940_vm0, %v8195_v20  ;;  %v14924_v20 = vrot.slane %v10379_v0, 7 }
 0x119   : > { %14910 = vst [vmem:[#allocation35_spill] sm:$0xff] %v10327_v25 }
 0x11a   : > { %14911 = vst [vmem:[#allocation36_spill] sm:$0xff] %v10332_v22 }
 0x11b   : > { %514 = vst.msk [vmem:[#allocation2 + $0x228] sm:$0xff] %vm271_vm1, %v481_v36  ;;  %v866_v36 = vrot.slane %v10327_v25, 7  ;;  %8041 = vmatmul.msk.f32.gmra.mxu1 %vm271_vm1, %v10366_v18  ;;  %8049 = vmatmul.msk.f32.gmra.mxu2 %vm271_vm1, %v10408_v26  ;;  %v10468_v30 = vld [vmem:[#allocation2 + $0x468] sm:$0xff] }
 0x11c   : > { %14912 = vst [vmem:[#allocation37_spill] sm:$0xff] %v10356_v8 }
 0x11d   : > { %v10361_v57 = vsel %vm794_vm2, %v14653_v21, %v866_v36  ;;  %14914 = vst [vmem:[#allocation39_spill] sm:$0xff] %v10366_v18  ;;  %v10381_v21 = vld [vmem:[#allocation2 + $0x220] sm:$0xff]  ;;  %v10411_v51 = vsel %vm794_vm2, %v866_v36, %v868_v54  ;;  %v10433_v54 = vld [vmem:[#allocation2 + $0x2e8] sm:$0xff] }
 0x11e   : > { %14913 = vst [vmem:[#allocation38_spill] sm:$0xff] %v10361_v57  ;;  %8056 = vmatmul.msk.f32.gmra.mxu3 %vm271_vm1, %v10361_v57  ;;  %v811_v11 = vrot.slane %v10381_v21, 7  ;;  %v833_v55 = vrot.slane %v10433_v54, 7 }
 0x11f   : > { %14915 = vst [vmem:[#allocation40_spill] sm:$0xff] %v10368_v63 }
 0x120   : > { %14916 = vst [vmem:[#allocation41_spill] sm:$0xff] %v10370_v10  ;;  %v10429_v34 = vsel %vm794_vm2, %v14924_v20, %v811_v11  ;;  %v8297_v10 = vld [vmem:[%s14634_s2 + $0x1c] sm:$0xf]  ;;  %v14681_v20 = vrot.slane %v10422_v59, 7  ;;  %v10466_v25 = vsel %vm794_vm2, %v831_v13, %v833_v55  ;;  %v1410_v13 = vrot.slane %v10067_v12, 1 }
 0x121   : > { %14917 = vst [vmem:[#allocation42_spill] sm:$0xff] %v10379_v0  ;;  %v871_v0 = vrot.slane %v10424_v31, 7  ;;  %8034 = vmatmul.msk.f32.gmra.mxu0 %vm271_vm1, %v10429_v34 }
 0x122   : > { %14918 = vst [vmem:[#allocation43_spill] sm:$0xff] %v10381_v21  ;;  %v10435_v36 = vld [vmem:[#allocation2 + $0x228] sm:$0xff]  ;;  %8298 = vmatpush.msk.msra.mxu0 %vm940_vm0, %v8297_v10 }
 0x123   : > { %14919 = vst [vmem:[#allocation44_spill] sm:$0xff] %v10411_v51  ;;  %8042 = vmatmul.msk.f32.gmra.mxu1 %vm271_vm1, %v10420_v62  ;;  %v813_v16 = vrot.slane %v10435_v36, 7  ;;  %v10461_v57 = vsel %vm794_vm2, %v14681_v20, %v871_v0 }
 0x124   : > { %14920 = vst [vmem:[#allocation45_spill] sm:$0xff] %v10413_v48 }
 0x125   : > { %14921 = vst [vmem:[#allocation46_spill] sm:$0xff] %v10420_v62  ;;  %v10471_v49 = vsel %vm794_vm2, %v811_v11, %v813_v16  ;;  %v1411_v16 = vrot.slane %v10098_v17, 1 }
 0x126   : > { %14922 = vst [vmem:[#allocation47_spill] sm:$0xff] %v10422_v59  ;;  %8057 = vmatmul.msk.f32.gmra.mxu3 %vm271_vm1, %v10411_v51  ;;  %v14927_v51 = vrot.slane %v10413_v48, 7 }
 0x127   : > { %14923 = vst [vmem:[#allocation48_spill] sm:$0xff] %v10424_v31  ;;  %v10463_v31 = vld [vmem:[#allocation2 + $0x3a8] sm:$0xff] }
 0x128   : > { %14925 = vst [vmem:[#allocation49_spill] sm:$0xff] %v10429_v34  ;;  %v10456_v63 = vsel %vm794_vm2, %v14927_v51, %v851_v15  ;;  %v853_v10 = vrot.slane %v10463_v31, 7  ;;  %v873_v51 = vrot.slane %v10468_v30, 7 }
 0x129   : > { %14926 = vst [vmem:[#allocation50_spill] sm:$0xff] %v10435_v36  ;;  %8050 = vmatmul.msk.f32.gmra.mxu2 %vm271_vm1, %v10456_v63  ;;  %8035 = vmatmul.msk.f32.gmra.mxu0 %vm271_vm1, %v10471_v49 }
 0x12a   : > { %14928 = vst [vmem:[#allocation51_spill] sm:$0xff] %v10456_v63  ;;  %v10484_v55 = vsel %vm794_vm2, %v851_v15, %v853_v10  ;;  %v10487_v11 = vsel %vm794_vm2, %v871_v0, %v873_v51  ;;  %v1412_v15 = vsel %vm1409_vm3, %v1410_v13, %v1411_v16  ;;  %v10500_v0 = vld [vmem:[#allocation2 + $0x1a0] sm:$0xff]  ;;  %v1416_v13 = vrot.slane %v10252_v29, 1 }
 0x12b   : > { %14929 = vst [vmem:[#allocation52_spill] sm:$0xff] %v10461_v57  ;;  %8043 = vmatmul.msk.f32.gmra.mxu1 %vm271_vm1, %v10466_v25  ;;  %v14683_v10 = vrot.slane %v10500_v0, 1 }
 0x12c   : > { %14930 = vst [vmem:[#allocation53_spill] sm:$0xff] %v10466_v25 }
 0x12d   : > { %14931 = vst [vmem:[#allocation54_spill] sm:$0xff] %v10471_v49  ;;  %v10513_v51 = vsel %vm1409_vm3, %v1411_v16, %v14683_v10  ;;  %v10528_v16 = vld [vmem:[#allocation2 + $0x1d0] sm:$0xff]  ;;  %v1426_v10 = vrot.slane %v10435_v36, 1 }
 0x12e   : > { %8058 = vmatmul.msk.f32.gmra.mxu3 %vm271_vm1, %v10461_v57  ;;  %14932 = vst [vmem:[#allocation55_spill] sm:$0xff] %v10487_v11 }
 0x12f   : > { %14933 = vst [vmem:[#allocation56_spill] sm:$0xff] %v10500_v0  ;;  %v1431_v0 = vrot.slane %v10148_v40, 1 }
 0x130   : > { %14934 = vst [vmem:[#allocation57_spill] sm:$0xff] %v10513_v51 }
 0x131   : > { %8051 = vmatmul.msk.f32.gmra.mxu2 %vm271_vm1, %v10484_v55  ;;  %8163 = vmatmul.msk.f32.vlgmr.msrb.gmra.mxu0 %vm271_vm1, %v10242_v23  ;;  %14935 = vst [vmem:[#allocation58_spill] sm:$0xff] %v10528_v16 }
 0x133   : > { %8061 = vmatmul.msk.f32.vlgmr.msrb.gmra.mxu1 %vm271_vm1, %v10213_v6 }
 0x136   : > { %8059 = vmatmul.msk.f32.gmra.mxu3 %vm271_vm1, %v10487_v11 }
 0x139   : > { %8095 = vmatmul.msk.f32.vlgmr.msrb.gmra.mxu2 %vm271_vm1, %v10067_v12  ;;  %8164 = vmatmul.msk.f32.gmra.mxu0 %vm271_vm1, %v10284_v53  ;;  %v1415_v12 = vrot.slane %v10213_v6, 1 }
 0x13b   : > { %8062 = vmatmul.msk.f32.gmra.mxu1 %vm271_vm1, %v10252_v29  ;;  %v10526_v53 = vsel %vm1409_vm3, %v1415_v12, %v1416_v13  ;;  %v1421_v12 = vrot.slane %v10339_v60, 1 }
 0x13e   : > { %8129 = vmatmul.msk.f32.vlgmr.msrb.gmra.mxu3 %vm271_vm1, %v1412_v15 }
 0x141   : > { %8096 = vmatmul.msk.f32.gmra.mxu2 %vm271_vm1, %v10098_v17  ;;  %8165 = vmatmul.msk.f32.gmra.mxu0 %vm271_vm1, %v10332_v22  ;;  %v14682_v17 = vrot.slane %v10528_v16, 1  ;;  %v1430_v16 = vrot.slane %v9685_v5, 1 }
 0x143   : > { %8063 = vmatmul.msk.f32.gmra.mxu1 %vm271_vm1, %v10294_v58  ;;  %v10542_v15 = vsel %vm1409_vm3, %v1416_v13, %v14682_v17  ;;  %v10557_v13 = vld [vmem:[#allocation2 + $0x200] sm:$0xff]  ;;  %v1425_v17 = vrot.slane %v10381_v21, 1 }
 0x144   : > { %14936 = vst [vmem:[#allocation59_spill] sm:$0xff] %v10542_v15 }
 0x145   : > { %14937 = vst [vmem:[#allocation60_spill] sm:$0xff] %v10557_v13  ;;  %v10584_v59 = vsel %vm1409_vm3, %v1425_v17, %v1426_v10  ;;  %v10599_v17 = vpop.f32.mrf.mxu1 }
 0x146   : > { %8130 = vmatmul.msk.f32.gmra.mxu3 %vm271_vm1, %v10513_v51  ;;  %v10623_v51 = vld [vmem:[#allocation2 + $0x260] sm:$0xff] }
 0x147   : > { %14942 = vst [vmem:[#allocation65_spill] sm:$0xff] %v10623_v51  ;;  %v14701_v23 = vrot.slane %v10623_v51, 1  ;;  %v1436_v51 = vrot.slane %v10231_v19, 1 }
 0x149   : > { %8097 = vmatmul.msk.f32.gmra.mxu2 %vm271_vm1, %v10213_v6  ;;  %8166 = vmatmul.msk.f32.gmra.mxu0 %vm271_vm1, %v10375_v32  ;;  %v1420_v6 = vrot.slane %v10294_v58, 1 }
 0x14b   : > { %8064 = vmatmul.msk.f32.gmra.mxu1 %vm271_vm1, %v10339_v60  ;;  %v10555_v20 = vsel %vm1409_vm3, %v1420_v6, %v1421_v12 }
 0x14e   : > { %8131 = vmatmul.msk.f32.gmra.mxu3 %vm271_vm1, %v10526_v53 }
 0x151   : > { %8098 = vmatmul.msk.f32.gmra.mxu2 %vm271_vm1, %v10252_v29  ;;  %8167 = vmatmul.msk.f32.gmra.mxu0 %vm271_vm1, %v10429_v34  ;;  %v14685_v29 = vrot.slane %v10557_v13, 1  ;;  %v10597_v13 = vpop.f32.mrf.mxu0 }
 0x153   : > { %8065 = vmatmul.msk.f32.gmra.mxu1 %vm271_vm1, %v10381_v21  ;;  %v10571_v6 = vsel %vm1409_vm3, %v1421_v12, %v14685_v29  ;;  %v10586_v12 = vld [vmem:[#allocation2 + $0x230] sm:$0xff] }
 0x154   : > { %14938 = vst [vmem:[#allocation61_spill] sm:$0xff] %v10571_v6  ;;  %v14691_v29 = vrot.slane %v10586_v12, 1 }
 0x155   : > { %14939 = vst [vmem:[#allocation62_spill] sm:$0xff] %v10586_v12 }
 0x156   : > { %8132 = vmatmul.msk.f32.gmra.mxu3 %vm271_vm1, %v10542_v15  ;;  %v10604_v48 = vsel %vm1409_vm3, %v1426_v10, %v14691_v29  ;;  %v10619_v10 = vsel %vm1409_vm3, %v1430_v16, %v1431_v0 }
 0x157   : > { %14940 = vst [vmem:[#allocation63_spill] sm:$0xff] %v10604_v48 }
 0x158   : > { %14941 = vst [vmem:[#allocation64_spill] sm:$0xff] %v10619_v10 }
 0x159   : > { %8099 = vmatmul.msk.f32.gmra.mxu2 %vm271_vm1, %v10294_v58  ;;  %8168 = vmatmul.msk.f32.gmra.mxu0 %vm271_vm1, %v10471_v49  ;;  %v10616_v12 = vpop.f32.mrf.mxu0 }
 0x15b   : > { %8066 = vmatmul.msk.f32.gmra.mxu1 %vm271_vm1, %v10435_v36 }
 0x15e   : > { %8133 = vmatmul.msk.f32.gmra.mxu3 %vm271_vm1, %v10555_v20 }
 0x161   : > { %8100 = vmatmul.msk.f32.gmra.mxu2 %vm271_vm1, %v10339_v60  ;;  %8169 = vmatmul.msk.f32.gmra.mxu0 %vm271_vm1, %v9699_v7 }
 0x163   : > { %8067 = vmatmul.msk.f32.gmra.mxu1 %vm271_vm1, %v9685_v5 }
 0x166   : > { %8134 = vmatmul.msk.f32.gmra.mxu3 %vm271_vm1, %v10571_v6 }
 0x169   : > { %8101 = vmatmul.msk.f32.gmra.mxu2 %vm271_vm1, %v10381_v21  ;;  %8170 = vmatmul.msk.f32.gmra.mxu0 %vm271_vm1, %v10180_v50  ;;  %v10641_v50 = vsel %vm1409_vm3, %v1431_v0, %v14701_v23 }
 0x16a   : > { %14944 = vst [vmem:[#allocation67_spill] sm:$0xff] %v10641_v50 }
 0x16b   : > { %8068 = vmatmul.msk.f32.gmra.mxu1 %vm271_vm1, %v10148_v40 }
 0x16e   : > { %8135 = vmatmul.msk.f32.gmra.mxu3 %vm271_vm1, %v10584_v59 }
 0x171   : > { %8102 = vmatmul.msk.f32.gmra.mxu2 %vm271_vm1, %v10435_v36  ;;  %8171 = vmatmul.msk.f32.gmra.mxu0 %vm271_vm1, %v10220_v9  ;;  %v10621_v29 = vpop.f32.mrf.mxu1 }
 0x173   : > { %8069 = vmatmul.msk.f32.gmra.mxu1 %vm271_vm1, %v10183_v52 }
 0x175   : > { %v10634_v16 = vpop.f32.mrf.mxu2 }
 0x176   : > { %8136 = vmatmul.msk.f32.gmra.mxu3 %vm271_vm1, %v10604_v48  ;;  %v10636_v9 = vpop.f32.mrf.mxu3 }
 0x177   : > { %14943 = vst [vmem:[#allocation66_spill] sm:$0xff] %v10636_v9  ;;  %v1435_v9 = vrot.slane %v10183_v52, 1 }
 0x179   : > { %8103 = vmatmul.msk.f32.gmra.mxu2 %vm271_vm1, %v9685_v5  ;;  %8172 = vmatmul.msk.f32.gmra.mxu0 %vm271_vm1, %v10277_v45  ;;  %v10643_v5 = vpop.f32.mrf.mxu1  ;;  %v10662_v45 = vsel %vm1409_vm3, %v1435_v9, %v1436_v51 }
 0x17a   : > { %14946 = vst [vmem:[#allocation69_spill] sm:$0xff] %v10662_v45 }
 0x17b   : > { %8070 = vmatmul.msk.f32.gmra.mxu1 %vm271_vm1, %v10231_v19 }
 0x17c   : > { %v10645_v7 = vpop.f32.mrf.mxu0 }
 0x17d   : > { %v10657_v0 = vpop.f32.mrf.mxu2 }
 0x17e   : > { %8137 = vmatmul.msk.f32.gmra.mxu3 %vm271_vm1, %v10619_v10  ;;  %v10659_v23 = vpop.f32.mrf.mxu3 }
 0x17f   : > { %14945 = vst [vmem:[#allocation68_spill] sm:$0xff] %v10659_v23 }
 0x181   : > { %8104 = vmatmul.msk.f32.gmra.mxu2 %vm271_vm1, %v10148_v40  ;;  %8173 = vmatmul.msk.f32.gmra.mxu0 %vm271_vm1, %v10323_v43  ;;  %v10664_v40 = vpop.f32.mrf.mxu1 }
 0x183   : > { %8071 = vmatmul.msk.f32.gmra.mxu1 %vm271_vm1, %v10290_v56 }
 0x184   : > { %v10668_v10 = vpop.f32.mrf.mxu0 }
 0x185   : > { %v10679_v9 = vpop.f32.mrf.mxu2 }
 0x186   : > { %8138 = vmatmul.msk.f32.gmra.mxu3 %vm271_vm1, %v10641_v50  ;;  %v10666_v50 = vld [vmem:[#allocation2 + $0x290] sm:$0xff]  ;;  %14948 = vst [vmem:[#allocation71_spill] sm:$0xff] %v10679_v9  ;;  %v10681_v43 = vpop.f32.mrf.mxu3 }
 0x187   : > { %14947 = vst [vmem:[#allocation70_spill] sm:$0xff] %v10666_v50  ;;  %v14713_v23 = vrot.slane %v10666_v50, 1  ;;  %v1441_v50 = vrot.slane %v10337_v27, 1 }
 0x188   : > { %14949 = vst [vmem:[#allocation72_spill] sm:$0xff] %v10681_v43  ;;  %v1440_v43 = vrot.slane %v10290_v56, 1 }
 0x189   : > { %8105 = vmatmul.msk.f32.gmra.mxu2 %vm271_vm1, %v10183_v52  ;;  %8174 = vmatmul.msk.f32.gmra.mxu0 %vm271_vm1, %v10366_v18  ;;  %v10686_v36 = vsel %vm1409_vm3, %v1436_v51, %v14713_v23 }
 0x18a   : > { %14950 = vst [vmem:[#allocation73_spill] sm:$0xff] %v10686_v36  ;;  %v10707_v18 = vsel %vm1409_vm3, %v1440_v43, %v1441_v50 }
 0x18b   : > { %8072 = vmatmul.msk.f32.gmra.mxu1 %vm271_vm1, %v10337_v27  ;;  %14953 = vst [vmem:[#allocation76_spill] sm:$0xff] %v10707_v18 }
 0x18e   : > { %8139 = vmatmul.msk.f32.gmra.mxu3 %vm271_vm1, %v10662_v45  ;;  %v10690_v45 = vpop.f32.mrf.mxu0  ;;  %v10702_v51 = vpop.f32.mrf.mxu2 }
 0x18f   : > { %14951 = vst [vmem:[#allocation74_spill] sm:$0xff] %v10702_v51  ;;  %v10704_v23 = vpop.f32.mrf.mxu3 }
 0x190   : > { %v10688_v52 = vpop.f32.mrf.mxu1  ;;  %14952 = vst [vmem:[#allocation75_spill] sm:$0xff] %v10704_v23 }
 0x191   : > { %8106 = vmatmul.msk.f32.gmra.mxu2 %vm271_vm1, %v10231_v19  ;;  %8175 = vmatmul.msk.f32.gmra.mxu0 %vm271_vm1, %v10420_v62 }
 0x193   : > { %8073 = vmatmul.msk.f32.gmra.mxu1 %vm271_vm1, %v10372_v28 }
 0x196   : > { %8140 = vmatmul.msk.f32.gmra.mxu3 %vm271_vm1, %v10686_v36  ;;  %v10711_v36 = vld [vmem:[#allocation2 + $0x2c0] sm:$0xff]  ;;  %v10713_v49 = vpop.f32.mrf.mxu0  ;;  %v10724_v43 = vpop.f32.mrf.mxu2 }
 0x197   : > { %14954 = vst [vmem:[#allocation77_spill] sm:$0xff] %v10711_v36  ;;  %v14723_v23 = vrot.slane %v10711_v36, 1  ;;  %v1446_v36 = vrot.slane %v10433_v54, 1 }
 0x198   : > { %v10709_v19 = vpop.f32.mrf.mxu1  ;;  %14955 = vst [vmem:[#allocation78_spill] sm:$0xff] %v10724_v43 }
 0x199   : > { %8107 = vmatmul.msk.f32.gmra.mxu2 %vm271_vm1, %v10290_v56  ;;  %8176 = vmatmul.msk.f32.gmra.mxu0 %vm271_vm1, %v10466_v25  ;;  %v10731_v51 = vsel %vm1409_vm3, %v1441_v50, %v14723_v23 }
 0x19a   : > { %14957 = vst [vmem:[#allocation80_spill] sm:$0xff] %v10731_v51 }
 0x19b   : > { %8074 = vmatmul.msk.f32.gmra.mxu1 %vm271_vm1, %v10433_v54 }
 0x19e   : > { %8141 = vmatmul.msk.f32.gmra.mxu3 %vm271_vm1, %v10707_v18  ;;  %v10735_v18 = vpop.f32.mrf.mxu0  ;;  %v10747_v50 = vpop.f32.mrf.mxu2 }
 0x19f   : > { %14958 = vst [vmem:[#allocation81_spill] sm:$0xff] %v10747_v50 }
 0x1a0   : > { %v10733_v56 = vpop.f32.mrf.mxu1 }
 0x1a1   : > { %v10726_v62 = vpop.f32.mrf.mxu3  ;;  %8108 = vmatmul.msk.f32.gmra.mxu2 %vm271_vm1, %v10337_v27  ;;  %8177 = vmatmul.msk.f32.gmra.mxu0 %vm271_vm1, %v10155_v42 }
 0x1a2   : > { %14956 = vst [vmem:[#allocation79_spill] sm:$0xff] %v10726_v62  ;;  %v1445_v62 = vrot.slane %v10372_v28, 1 }
 0x1a3   : > { %8075 = vmatmul.msk.f32.gmra.mxu1 %vm271_vm1, %v10137_v33 }
 0x1a4   : > { %v10752_v25 = vsel %vm1409_vm3, %v1445_v62, %v1446_v36 }
 0x1a5   : > { %14960 = vst [vmem:[#allocation83_spill] sm:$0xff] %v10752_v25 }
 0x1a6   : > { %8142 = vmatmul.msk.f32.gmra.mxu3 %vm271_vm1, %v10731_v51  ;;  %v10756_v51 = vld [vmem:[#allocation2 + $0x2f0] sm:$0xff]  ;;  %v10758_v43 = vpop.f32.mrf.mxu0 }
 0x1a7   : > { %14961 = vst [vmem:[#allocation84_spill] sm:$0xff] %v10756_v51 }
 0x1a8   : > { %v10754_v27 = vpop.f32.mrf.mxu1 }
 0x1a9   : > { %v10749_v23 = vpop.f32.mrf.mxu3  ;;  %8109 = vmatmul.msk.f32.gmra.mxu2 %vm271_vm1, %v10372_v28  ;;  %8178 = vmatmul.msk.f32.gmra.mxu0 %vm271_vm1, %v10201_v61  ;;  %v1450_v61 = vrot.slane %v10137_v33, 1 }
 0x1aa   : > { %14959 = vst [vmem:[#allocation82_spill] sm:$0xff] %v10749_v23  ;;  %v14732_v23 = vrot.slane %v10756_v51, 1 }
 0x1ab   : > { %8076 = vmatmul.msk.f32.gmra.mxu1 %vm271_vm1, %v10158_v44 }
 0x1ac   : > { %v10769_v62 = vpop.f32.mrf.mxu2  ;;  %v10776_v50 = vsel %vm1409_vm3, %v1446_v36, %v14732_v23 }
 0x1ad   : > { %14962 = vst [vmem:[#allocation85_spill] sm:$0xff] %v10769_v62 }
 0x1ae   : > { %8143 = vmatmul.msk.f32.gmra.mxu3 %vm271_vm1, %v10752_v25  ;;  %14964 = vst [vmem:[#allocation87_spill] sm:$0xff] %v10776_v50  ;;  %v1736_v48 = vpop.f32.mrf.mxu0  ;;  %v10795_v25 = vld [vmem:[#allocation2 + $0x320] sm:$0xff] }
 0x1af   : > { %14968 = vst [vmem:[#allocation91_spill] sm:$0xff] %v10795_v25 }
 0x1b0   : > { %v1143_v28 = vpop.f32.mrf.mxu1 }
 0x1b1   : > { %v10771_v42 = vpop.f32.mrf.mxu3  ;;  %8110 = vmatmul.msk.f32.gmra.mxu2 %vm271_vm1, %v10433_v54  ;;  %8179 = vmatmul.msk.f32.gmra.mxu0 %vm271_vm1, %v10264_v38  ;;  %v1144_v62 = vadd.f32 %v1143_v28, %v10597_v13 }
 0x1b2   : > { %14963 = vst [vmem:[#allocation86_spill] sm:$0xff] %v10771_v42  ;;  %v1451_v42 = vrot.slane %v10158_v44, 1 }
 0x1b3   : > { %8077 = vmatmul.msk.f32.gmra.mxu1 %vm271_vm1, %v10211_v2 }
 0x1b4   : > { %v10788_v36 = vpop.f32.mrf.mxu2  ;;  %v10793_v51 = vsel %vm1409_vm3, %v1450_v61, %v1451_v42 }
 0x1b5   : > { %14965 = vst [vmem:[#allocation88_spill] sm:$0xff] %v10788_v36 }
 0x1b6   : > { %8144 = vmatmul.msk.f32.gmra.mxu3 %vm271_vm1, %v10776_v50  ;;  %14967 = vst [vmem:[#allocation90_spill] sm:$0xff] %v10793_v51  ;;  %v1739_v50 = vpop.f32.mrf.mxu0 }
 0x1b8   : > { %v1146_v54 = vpop.f32.mrf.mxu1 }
 0x1b9   : > { %v10790_v23 = vpop.f32.mrf.mxu3  ;;  %8111 = vmatmul.msk.f32.gmra.mxu2 %vm271_vm1, %v10137_v33  ;;  %8180 = vmatmul.msk.f32.gmra.mxu0 %vm271_vm1, %v10310_v24  ;;  %v1147_v28 = vadd.f32 %v1146_v54, %v10616_v12 }
 0x1ba   : > { %14966 = vst [vmem:[#allocation89_spill] sm:$0xff] %v10790_v23  ;;  %v14743_v23 = vrot.slane %v10795_v25, 1 }
 0x1bb   : > { %8078 = vmatmul.msk.f32.gmra.mxu1 %vm271_vm1, %v10272_v41 }
 0x1bc   : > { %v1265_v61 = vpop.f32.mrf.mxu2  ;;  %v10810_v33 = vsel %vm1409_vm3, %v1451_v42, %v14743_v23  ;;  %v1456_v42 = vrot.slane %v10272_v41, 1  ;;  %v10828_v23 = vld [vmem:[#allocation2 + $0x350] sm:$0xff] }
 0x1bd   : > { %v1361_v38 = vadd.f32 %v1265_v61, %v1144_v62  ;;  %14969 = vst [vmem:[#allocation92_spill] sm:$0xff] %v10810_v33 }
 0x1be   : > { %8145 = vmatmul.msk.f32.gmra.mxu3 %vm271_vm1, %v10793_v51  ;;  %v1742_v21 = vpop.f32.mrf.mxu0  ;;  %14970 = vst [vmem:[#allocation93_spill] sm:$0xff] %v10828_v23 }
 0x1c0   : > { %v1149_v51 = vpop.f32.mrf.mxu1 }
 0x1c1   : > { %v1576_v36 = vpop.f32.mrf.mxu3  ;;  %8112 = vmatmul.msk.f32.gmra.mxu2 %vm271_vm1, %v10158_v44  ;;  %8181 = vmatmul.msk.f32.gmra.mxu0 %vm271_vm1, %v10356_v8  ;;  %v1150_v25 = vadd.f32 %v1149_v51, %v10645_v7 }
 0x1c2   : > { %v1672_v9 = vadd.f32 %v1576_v36, %v1361_v38  ;;  %v1455_v38 = vrot.slane %v10211_v2, 1 }
 0x1c3   : > { %8079 = vmatmul.msk.f32.gmra.mxu1 %vm271_vm1, %v10317_v35 }
 0x1c4   : > { %v10812_v13 = vadd.f32 %v1736_v48, %v1672_v9  ;;  %v1268_v48 = vpop.f32.mrf.mxu2  ;;  %v10826_v44 = vsel %vm1409_vm3, %v1455_v38, %v1456_v42 }
 0x1c5   : > { %v1362_v9 = vadd.f32 %v1268_v48, %v1147_v28  ;;  %v14745_v28 = vrot.slane %v10828_v23, 1 }
 0x1c6   : > { %8146 = vmatmul.msk.f32.gmra.mxu3 %vm271_vm1, %v10810_v33  ;;  %v1745_v12 = vpop.f32.mrf.mxu0 }
 0x1c8   : > { %v1152_v61 = vpop.f32.mrf.mxu1 }
 0x1c9   : > { %v1579_v62 = vpop.f32.mrf.mxu3  ;;  %8113 = vmatmul.msk.f32.gmra.mxu2 %vm271_vm1, %v10211_v2  ;;  %8182 = vmatmul.msk.f32.gmra.mxu0 %vm271_vm1, %v10408_v26  ;;  %v10845_v2 = vsel %vm1409_vm3, %v1456_v42, %v14745_v28  ;;  %v1153_v51 = vadd.f32 %v1152_v61, %v10668_v10  ;;  %v1461_v42 = vrot.slane %v10363_v4, 1  ;;  %v10863_v28 = vld [vmem:[#allocation2 + $0x380] sm:$0xff] }
 0x1ca   : > { %v1673_v36 = vadd.f32 %v1579_v62, %v1362_v9  ;;  %14971 = vst [vmem:[#allocation94_spill] sm:$0xff] %v10845_v2 }
 0x1cb   : > { %8080 = vmatmul.msk.f32.gmra.mxu1 %vm271_vm1, %v10363_v4  ;;  %14972 = vst [vmem:[#allocation95_spill] sm:$0xff] %v10863_v28 }
 0x1cc   : > { %v10830_v54 = vadd.f32 %v1739_v50, %v1673_v36  ;;  %v1271_v38 = vpop.f32.mrf.mxu2 }
 0x1cd   : > { %v1363_v48 = vadd.f32 %v1271_v38, %v1150_v25  ;;  %v1460_v25 = vrot.slane %v10317_v35, 1 }
 0x1ce   : > { %8147 = vmatmul.msk.f32.gmra.mxu3 %vm271_vm1, %v10826_v44  ;;  %v1748_v36 = vpop.f32.mrf.mxu0 }
 0x1d0   : > { %v1155_v62 = vpop.f32.mrf.mxu1 }
 0x1d1   : > { %v1582_v50 = vpop.f32.mrf.mxu3  ;;  %8114 = vmatmul.msk.f32.gmra.mxu2 %vm271_vm1, %v10272_v41  ;;  %8183 = vmatmul.msk.f32.gmra.mxu0 %vm271_vm1, %v10456_v63  ;;  %v10861_v41 = vsel %vm1409_vm3, %v1460_v25, %v1461_v42  ;;  %v1156_v23 = vadd.f32 %v1155_v62, %v10690_v45 }
 0x1d2   : > { %v1674_v9 = vadd.f32 %v1582_v50, %v1363_v48 }
 0x1d3   : > { %8081 = vmatmul.msk.f32.gmra.mxu1 %vm271_vm1, %v10415_v3 }
 0x1d4   : > { %v10847_v7 = vadd.f32 %v1742_v21, %v1674_v9  ;;  %v1274_v21 = vpop.f32.mrf.mxu2 }
 0x1d5   : > { %v1364_v38 = vadd.f32 %v1274_v21, %v1153_v51  ;;  %v14747_v51 = vrot.slane %v10863_v28, 1 }
 0x1d6   : > { %8148 = vmatmul.msk.f32.gmra.mxu3 %vm271_vm1, %v10845_v2  ;;  %v1751_v10 = vpop.f32.mrf.mxu0 }
 0x1d8   : > { %v1158_v9 = vpop.f32.mrf.mxu1 }
 0x1d9   : > { %v1585_v48 = vpop.f32.mrf.mxu3  ;;  %8115 = vmatmul.msk.f32.gmra.mxu2 %vm271_vm1, %v10317_v35  ;;  %8184 = vmatmul.msk.f32.gmra.mxu0 %vm271_vm1, %v10484_v55  ;;  %v10880_v35 = vsel %vm1409_vm3, %v1461_v42, %v14747_v51  ;;  %v1159_v62 = vadd.f32 %v1158_v9, %v10713_v49  ;;  %v1466_v42 = vrot.slane %v10463_v31, 1  ;;  %v10898_v51 = vld [vmem:[#allocation2 + $0x3b0] sm:$0xff] }
 0x1da   : > { %v1675_v50 = vadd.f32 %v1585_v48, %v1364_v38  ;;  %14973 = vst [vmem:[#allocation96_spill] sm:$0xff] %v10880_v35 }
 0x1db   : > { %8082 = vmatmul.msk.f32.gmra.mxu1 %vm271_vm1, %v10463_v31  ;;  %14974 = vst [vmem:[#allocation97_spill] sm:$0xff] %v10898_v51 }
 0x1dc   : > { %v10865_v61 = vadd.f32 %v1745_v12, %v1675_v50  ;;  %v1277_v25 = vpop.f32.mrf.mxu2 }
 0x1dd   : > { %v1365_v21 = vadd.f32 %v1277_v25, %v1156_v23  ;;  %v1465_v23 = vrot.slane %v10415_v3, 1 }
 0x1de   : > { %8149 = vmatmul.msk.f32.gmra.mxu3 %vm271_vm1, %v10861_v41  ;;  %v1754_v50 = vpop.f32.mrf.mxu0 }
 0x1e0   : > { %v1161_v48 = vpop.f32.mrf.mxu1 }
 0x1e1   : > { %v1588_v12 = vpop.f32.mrf.mxu3  ;;  %8116 = vmatmul.msk.f32.gmra.mxu2 %vm271_vm1, %v10363_v4  ;;  %8185 = vmatmul.msk.f32.gmra.mxu0 %vm271_vm1, %v10167_v46  ;;  %v10896_v4 = vsel %vm1409_vm3, %v1465_v23, %v1466_v42  ;;  %v1162_v28 = vadd.f32 %v1161_v48, %v10735_v18 }
 0x1e2   : > { %v1676_v38 = vadd.f32 %v1588_v12, %v1365_v21 }
 0x1e3   : > { %8083 = vmatmul.msk.f32.gmra.mxu1 %vm271_vm1, %v10143_v37 }
 0x1e4   : > { %v10882_v45 = vadd.f32 %v1748_v36, %v1676_v38  ;;  %v1280_v36 = vpop.f32.mrf.mxu2 }
 0x1e5   : > { %v1366_v25 = vadd.f32 %v1280_v36, %v1159_v62  ;;  %v14749_v62 = vrot.slane %v10898_v51, 1 }
 0x1e6   : > { %8150 = vmatmul.msk.f32.gmra.mxu3 %vm271_vm1, %v10880_v35  ;;  %v1757_v49 = vpop.f32.mrf.mxu0 }
 0x1e8   : > { %v1164_v38 = vpop.f32.mrf.mxu1 }
 0x1e9   : > { %v1591_v21 = vpop.f32.mrf.mxu3  ;;  %8117 = vmatmul.msk.f32.gmra.mxu2 %vm271_vm1, %v10415_v3  ;;  %8186 = vmatmul.msk.f32.gmra.mxu0 %vm271_vm1, %v10209_v1  ;;  %v10915_v3 = vsel %vm1409_vm3, %v1466_v42, %v14749_v62  ;;  %v1165_v48 = vadd.f32 %v1164_v38, %v10758_v43  ;;  %v1471_v42 = vrot.slane %v10169_v47, 1  ;;  %v10933_v62 = vld [vmem:[#allocation2 + $0x3e0] sm:$0xff] }
 0x1ea   : > { %v1677_v12 = vadd.f32 %v1591_v21, %v1366_v25  ;;  %14975 = vst [vmem:[#allocation98_spill] sm:$0xff] %v10915_v3 }
 0x1eb   : > { %8084 = vmatmul.msk.f32.gmra.mxu1 %vm271_vm1, %v10169_v47  ;;  %14977 = vst [vmem:[#allocation100_spill] sm:$0xff] %v10933_v62 }
 0x1ec   : > { %v10900_v9 = vadd.f32 %v1751_v10, %v1677_v12  ;;  %v1283_v23 = vpop.f32.mrf.mxu2 }
 0x1ed   : > { %v1367_v36 = vadd.f32 %v1283_v23, %v1162_v28  ;;  %v1470_v28 = vrot.slane %v10143_v37, 1 }
 0x1ee   : > { %8151 = vmatmul.msk.f32.gmra.mxu3 %vm271_vm1, %v10896_v4  ;;  %v1760_v12 = vpop.f32.mrf.mxu0 }
 0x1f0   : > { %v1167_v21 = vpop.f32.mrf.mxu1 }
 0x1f1   : > { %v1594_v10 = vpop.f32.mrf.mxu3  ;;  %8118 = vmatmul.msk.f32.gmra.mxu2 %vm271_vm1, %v10463_v31  ;;  %8187 = vmatmul.msk.f32.gmra.mxu0 %vm271_vm1, %v10270_v39  ;;  %v10931_v31 = vsel %vm1409_vm3, %v1470_v28, %v1471_v42  ;;  %v14751_v28 = vrot.slane %v10933_v62, 1 }
 0x1f2   : > { %v1678_v25 = vadd.f32 %v1594_v10, %v1367_v36 }
 0x1f3   : > { %8085 = vmatmul.msk.f32.gmra.mxu1 %vm271_vm1, %v10224_v14 }
 0x1f4   : > { %v10917_v18 = vadd.f32 %v1754_v50, %v1678_v25  ;;  %v1286_v50 = vpop.f32.mrf.mxu2 }
 0x1f5   : > { %v1368_v23 = vadd.f32 %v1286_v50, %v1165_v48  ;;  %v1168_v48 = vadd.f32 %v1167_v21, %v10599_v17  ;;  %v14979_v50 = vld [vmem:[#allocation28_spill] sm:$0xff]  ;;  %v506_v17 = vld [vmem:[%s9662_s15 + $0xf0] sm:$0xff] }
 0x1f6   : > { %14976 = vst [vmem:[#allocation99_spill] sm:$0xff] %v10917_v18  ;;  %8152 = vmatmul.msk.f32.gmra.mxu3 %vm271_vm1, %v10915_v3  ;;  %v1763_v43 = vpop.f32.mrf.mxu0 }
 0x1f7   : > { %539 = vst.msk [vmem:[#allocation2 + $0x490] sm:$0xff] %vm271_vm1, %v506_v17 }
 0x1f8   : > { %v1170_v25 = vpop.f32.mrf.mxu1 }
 0x1f9   : > { %v1597_v36 = vpop.f32.mrf.mxu3  ;;  %8119 = vmatmul.msk.f32.gmra.mxu2 %vm271_vm1, %v10143_v37  ;;  %v10950_v37 = vsel %vm1409_vm3, %v1471_v42, %v14751_v28  ;;  %v1475_v42 = vrot.slane %v10224_v14, 1 }
 0x1fa   : > { %v1679_v10 = vadd.f32 %v1597_v36, %v1368_v23  ;;  %v14980_v23 = vld [vmem:[#allocation31_spill] sm:$0xff]  ;;  %14981 = vst [vmem:[#allocation28_spill] sm:$0xff] %v10950_v37 }
 0x1fb   : > { %8086 = vmatmul.msk.f32.gmra.mxu1 %vm271_vm1, %v14979_v50  ;;  %8188 = vmatmul.msk.f32.gmra.mxu0 %vm271_vm1, %v14980_v23 }
 0x1fc   : > { %v10935_v38 = vadd.f32 %v1757_v49, %v1679_v10  ;;  %v1289_v36 = vpop.f32.mrf.mxu2 }
 0x1fd   : > { %v1369_v51 = vadd.f32 %v1289_v36, %v1168_v48  ;;  %v14983_v48 = vld [vmem:[#allocation35_spill] sm:$0xff]  ;;  %v1476_v36 = vrot.slane %v14979_v50, 1 }
 0x1fe   : > { %14978 = vst [vmem:[#allocation101_spill] sm:$0xff] %v10935_v38  ;;  %8153 = vmatmul.msk.f32.gmra.mxu3 %vm271_vm1, %v10931_v31  ;;  %v1766_v18 = vpop.f32.mrf.mxu0 }
 0x1ff   : > { %v10968_v17 = vsel %vm1409_vm3, %v1475_v42, %v1476_v36 }
 0x200   : > { %v1173_v38 = vpop.f32.mrf.mxu1 }
 0x201   : > { %v1600_v49 = vpop.f32.mrf.mxu3  ;;  %8120 = vmatmul.msk.f32.gmra.mxu2 %vm271_vm1, %v10169_v47 }
 0x202   : > { %v1680_v10 = vadd.f32 %v1600_v49, %v1369_v51  ;;  %v1171_v51 = vadd.f32 %v1170_v25, %v10621_v29  ;;  %v507_v25 = vld [vmem:[%s9662_s15 + $0xf8] sm:$0xff]  ;;  %s14239_s15 = scalar_lea.vmem %s14636_s4, %s9149_s12  ;;  %s9473_s12 = scalar_lea.hbm %s9472_s11, 1 }
 0x203   : > { %8087 = vmatmul.msk.f32.gmra.mxu1 %vm271_vm1, %v14983_v48  ;;  %540 = vst.msk [vmem:[#allocation2 + $0x498] sm:$0xff] %vm271_vm1, %v507_v25  ;;  %p9474_p11 = scmp.ne.s32.totalorder %s9472_s11, %s9473_s12  ;;  %p9479_p1 = scmp.lt.s32.totalorder %s9477_s29, %s9473_s12 }
 0x204   : > { %v10953_v21 = vadd.f32 %v1760_v12, %v1680_v10  ;;  %v14984_v12 = vld [vmem:[#allocation38_spill] sm:$0xff]  ;;  %v1292_v49 = vpop.f32.mrf.mxu2 }
 0x205   : > { %8189 = vmatmul.msk.f32.gmra.mxu0 %vm271_vm1, %v14984_v12  ;;  %v1370_v47 = vadd.f32 %v1292_v49, %v1171_v51  ;;  %v1174_v51 = vadd.f32 %v1173_v38, %v10643_v5  ;;  %v14987_v49 = vld [vmem:[#allocation40_spill] sm:$0xff]  ;;  %p9475_p12 = pnand %p9474_p11, %p9627_p5  ;;  %p9480_p2 = por %p9479_p1, %p9478_p0 }
 0x206   : > { %14982 = vst [vmem:[#allocation102_spill] sm:$0xff] %v10953_v21  ;;  %8154 = vmatmul.msk.f32.gmra.mxu3 %vm271_vm1, %v10950_v37  ;;  %v10970_v21 = vld [vmem:[#allocation2 + $0x410] sm:$0xff]  ;;  %v1769_v29 = vpop.f32.mrf.mxu0 }
 0x207   : > { %14985 = vst [vmem:[#allocation35_spill] sm:$0xff] %v10970_v21  ;;  %v14753_v42 = vrot.slane %v10970_v21, 1  ;;  %v11007_v21 = vld [vmem:[#allocation2 + $0x440] sm:$0xff]  ;;  %p9476_p13 = pneg %p9475_p12 }
 0x208   : > { %v1176_v62 = vpop.f32.mrf.mxu1 }
 0x209   : > { %v1603_v10 = vpop.f32.mrf.mxu3  ;;  %8121 = vmatmul.msk.f32.gmra.mxu2 %vm271_vm1, %v10224_v14  ;;  %v10989_v14 = vsel %vm1409_vm3, %v1476_v36, %v14753_v42  ;;  %v1177_v38 = vadd.f32 %v1176_v62, %v10664_v40  ;;  %v1481_v36 = vrot.slane %v14987_v49, 1  ;;  %p9481_p3 = pnand %p9480_p2, %p9476_p13 }
 0x20a   : > { %v1681_v28 = vadd.f32 %v1603_v10, %v1370_v47  ;;  %v14988_v47 = vld [vmem:[#allocation44_spill] sm:$0xff]  ;;  %14989 = vst [vmem:[#allocation40_spill] sm:$0xff] %v10989_v14 }
 0x20b   : > { %8088 = vmatmul.msk.f32.gmra.mxu1 %vm271_vm1, %v14987_v49 }
 0x20c   : > { %v10973_v23 = vadd.f32 %v1763_v43, %v1681_v28  ;;  %v1295_v43 = vpop.f32.mrf.mxu2 }
 0x20d   : > { %8190 = vmatmul.msk.f32.gmra.mxu0 %vm271_vm1, %v14988_v47  ;;  %v1371_v28 = vadd.f32 %v1295_v43, %v1174_v51  ;;  %v14991_v51 = vld [vmem:[#allocation48_spill] sm:$0xff]  ;;  %v1480_v43 = vrot.slane %v14983_v48, 1 }
 0x20e   : > { %14986 = vst [vmem:[#allocation103_spill] sm:$0xff] %v10973_v23  ;;  %8155 = vmatmul.msk.f32.gmra.mxu3 %vm271_vm1, %v10968_v17  ;;  %v1772_v12 = vpop.f32.mrf.mxu0 }
 0x20f   : > { %14992 = vst [vmem:[#allocation48_spill] sm:$0xff] %v11007_v21 }
 0x210   : > { %v1179_v25 = vpop.f32.mrf.mxu1 }
 0x211   : > { %v1606_v10 = vpop.f32.mrf.mxu3  ;;  %8122 = vmatmul.msk.f32.gmra.mxu2 %vm271_vm1, %v14979_v50  ;;  %v11005_v50 = vsel %vm1409_vm3, %v1480_v43, %v1481_v36  ;;  %v8399_v43 = vld [vmem:[%s14634_s2 + $0x28] sm:$0xf] }
 0x212   : > { %v1682_v23 = vadd.f32 %v1606_v10, %v1371_v28  ;;  %8400 = vmatpush.msk.msrb.mxu3 %vm940_vm0, %v8399_v43 }
 0x213   : > { %8089 = vmatmul.msk.f32.gmra.mxu1 %vm271_vm1, %v14991_v51 }
 0x214   : > { %v10991_v5 = vadd.f32 %v1766_v18, %v1682_v23  ;;  %v1298_v18 = vpop.f32.mrf.mxu2 }
 0x215   : > { %8191 = vmatmul.msk.f32.gmra.mxu0 %vm271_vm1, %v10461_v57  ;;  %v1372_v23 = vadd.f32 %v1298_v18, %v1177_v38  ;;  %v8365_v38 = vld [vmem:[%s14634_s2 + $0x24] sm:$0xf]  ;;  %v11028_v18 = vld [vmem:[#allocation2 + $0x490] sm:$0xff] }
 0x216   : > { %14990 = vst [vmem:[#allocation104_spill] sm:$0xff] %v10991_v5  ;;  %8156 = vmatmul.msk.f32.gmra.mxu3 %vm271_vm1, %v10989_v14  ;;  %v1775_v40 = vpop.f32.mrf.mxu0  ;;  %v11013_v5 = vld [vmem:[#allocation2 + $0x488] sm:$0xff]  ;;  %8366 = vmatpush.msk.msrb.mxu2 %vm940_vm0, %v8365_v38 }
 0x217   : > { %14994 = vst [vmem:[#allocation106_spill] sm:$0xff] %v11013_v5  ;;  %v14997_v47 = vrot.slane %v11013_v5, 7 }
 0x218   : > { %v1182_v42 = vpop.f32.mrf.mxu1  ;;  %14995 = vst [vmem:[#allocation107_spill] sm:$0xff] %v11028_v18 }
 0x219   : > { %v1609_v28 = vpop.f32.mrf.mxu3  ;;  %8123 = vmatmul.msk.f32.gmra.mxu2 %vm271_vm1, %v14983_v48  ;;  %v14758_v48 = vrot.slane %v11007_v21, 1  ;;  %v11072_v21 = vld [vmem:[#allocation2 + $0x470] sm:$0xff] }
 0x21a   : > { %v1683_v10 = vadd.f32 %v1609_v28, %v1372_v23  ;;  %15000 = vst [vmem:[#allocation111_spill] sm:$0xff] %v11072_v21 }
 0x21b   : > { %8090 = vmatmul.msk.f32.gmra.mxu1 %vm271_vm1, %v10468_v30 }
 0x21c   : > { %v11009_v62 = vadd.f32 %v1769_v29, %v1683_v10  ;;  %v1180_v29 = vadd.f32 %v1179_v25, %v10688_v52  ;;  %v1301_v23 = vpop.f32.mrf.mxu2  ;;  %v1706_v10 = vrot.slane %v11028_v18, 7  ;;  %v8331_v52 = vld [vmem:[%s14634_s2 + $0x20] sm:$0xf] }
 0x21d   : > { %8192 = vmatmul.msk.f32.gmra.mxu0 %vm271_vm1, %v10487_v11  ;;  %8332 = vmatpush.msk.msrb.mxu1 %vm940_vm0, %v8331_v52  ;;  %v11042_v11 = vsel %vm1409_vm3, %v1481_v36, %v14758_v48  ;;  %v8433_v36 = vld [vmem:[%s14634_s2 + $0x2c] sm:$0xf] }
 0x21e   : > { %14993 = vst [vmem:[#allocation105_spill] sm:$0xff] %v11009_v62  ;;  %8157 = vmatmul.msk.f32.gmra.mxu3 %vm271_vm1, %v11005_v50  ;;  %v1373_v38 = vadd.f32 %v1301_v23, %v1180_v29  ;;  %v1778_v28 = vpop.f32.mrf.mxu0  ;;  %v11047_v43 = vsel %vm794_vm2, %v14997_v47, %v1706_v10  ;;  %v1485_v47 = vrot.slane %v14991_v51, 1  ;;  %v11063_v23 = vld [vmem:[#allocation2 + $0x498] sm:$0xff]  ;;  %8434 = vmatpush.msk.msrb.mxu0 %vm940_vm0, %v8433_v36 }
 0x21f   : > { %14996 = vst [vmem:[#allocation108_spill] sm:$0xff] %v11042_v11 }
 0x220   : > { %v1185_v57 = vpop.f32.mrf.mxu1  ;;  %14998 = vst [vmem:[#allocation109_spill] sm:$0xff] %v11047_v43 }
 0x221   : > { %v1612_v62 = vpop.f32.mrf.mxu3  ;;  %8124 = vmatmul.msk.f32.gmra.mxu2 %vm271_vm1, %v14987_v49  ;;  %v1186_v36 = vadd.f32 %v1185_v57, %v10733_v56 }
 0x222   : > { %v1684_v25 = vadd.f32 %v1612_v62, %v1373_v38  ;;  %v1183_v62 = vadd.f32 %v1182_v42, %v10709_v19  ;;  %v1708_v38 = vrot.slane %v11063_v23, 7 }
 0x223   : > { %8091 = vmatmul.msk.f32.gmra.mxu1 %vm271_vm1, %v11028_v18 }
 0x224   : > { %v11049_v29 = vadd.f32 %v1772_v12, %v1684_v25  ;;  %v1486_v12 = vrot.slane %v10468_v30, 1  ;;  %v1304_v49 = vpop.f32.mrf.mxu2 }
 0x225   : > { %8193 = vmatmul.msk.f32.gmra.mxu0 %vm271_vm1, %v11047_v43  ;;  %v1374_v52 = vadd.f32 %v1304_v49, %v1183_v62  ;;  %v14763_v62 = vrot.slane %v11072_v21, 1 }
 0x226   : > { %14999 = vst [vmem:[#allocation110_spill] sm:$0xff] %v11049_v29  ;;  %8158 = vmatmul.msk.f32.gmra.mxu3 %vm271_vm1, %v11042_v11  ;;  %v11070_v42 = vsel %vm1409_vm3, %v1485_v47, %v1486_v12  ;;  %v1781_v5 = vpop.f32.mrf.mxu0  ;;  %v11075_v29 = vsel %vm794_vm2, %v1706_v10, %v1708_v38 }
 0x228   : > { %v1188_v48 = vpop.f32.mrf.mxu1 }
 0x229   : > { %v1615_v25 = vpop.f32.mrf.mxu3  ;;  %8125 = vmatmul.msk.f32.gmra.mxu2 %vm271_vm1, %v14991_v51  ;;  %v11092_v51 = vsel %vm1409_vm3, %v1486_v12, %v14763_v62  ;;  %v1189_v56 = vadd.f32 %v1188_v48, %v10754_v27  ;;  %v11166_v62 = vld [vmem:[#allocation2 + $0x258] sm:$0xff] }
 0x22a   : > { %v1685_v19 = vadd.f32 %v1615_v25, %v1374_v52  ;;  %15001 = vst [vmem:[#allocation112_spill] sm:$0xff] %v11092_v51 }
 0x22b   : > { %8092 = vmatmul.msk.f32.gmra.mxu1 %vm271_vm1, %v11063_v23 }
 0x22c   : > { %v11077_v18 = vadd.f32 %v1775_v40, %v1685_v19  ;;  %v1307_v10 = vpop.f32.mrf.mxu2 }
 0x22d   : > { %8194 = vmatmul.msk.f32.gmra.mxu0 %vm271_vm1, %v11075_v29  ;;  %v1375_v47 = vadd.f32 %v1307_v10, %v1186_v36 }
 0x22e   : > { %8159 = vmatmul.msk.f32.gmra.mxu3 %vm271_vm1, %v11070_v42  ;;  %v1784_v52 = vpop.f32.mrf.mxu0 }
 0x230   : > { %v1191_v38 = vpop.f32.mrf.mxu1 }
 0x231   : > { %v1618_v40 = vpop.f32.mrf.mxu3  ;;  %8126 = vmatmul.msk.f32.gmra.mxu2 %vm271_vm1, %v10468_v30  ;;  %v1192_v30 = vadd.f32 %v1191_v38, %v10634_v16 }
 0x232   : > { %v1686_v49 = vadd.f32 %v1618_v40, %v1375_v47 }
 0x233   : > { %8197 = vmatmul.msk.f32.vlgmr.msra.gmra.mxu1 %vm271_vm1, %v10526_v53 }
 0x234   : > { %v11094_v57 = vadd.f32 %v1778_v28, %v1686_v49  ;;  %v1310_v12 = vpop.f32.mrf.mxu2 }
 0x235   : > { %8299 = vmatmul.msk.f32.vlgmr.msra.gmra.mxu0 %vm271_vm1, %v10555_v20  ;;  %v1376_v25 = vadd.f32 %v1310_v12, %v1189_v56 }
 0x236   : > { %8160 = vmatmul.msk.f32.gmra.mxu3 %vm271_vm1, %v11092_v51  ;;  %v1787_v10 = vpop.f32.mrf.mxu0 }
 0x238   : > { %v1194_v28 = vpop.f32.mrf.mxu1 }
 0x239   : > { %v1621_v19 = vpop.f32.mrf.mxu3  ;;  %8231 = vmatmul.msk.f32.vlgmr.msra.gmra.mxu2 %vm271_vm1, %v10332_v22  ;;  %v11205_v22 = vld [vmem:[#allocation2 + $0x2b0] sm:$0xff] }
 0x23a   : > { %v1687_v36 = vadd.f32 %v1621_v19, %v1376_v25 }
 0x23b   : > { %8198 = vmatmul.msk.f32.gmra.mxu1 %vm271_vm1, %v10542_v15 }
 0x23c   : > { %v11105_v47 = vadd.f32 %v1781_v5, %v1687_v36  ;;  %v1313_v53 = vpop.f32.mrf.mxu2 }
 0x23d   : > { %8300 = vmatmul.msk.f32.gmra.mxu0 %vm271_vm1, %v10571_v6  ;;  %v1377_v27 = vadd.f32 %v1313_v53, %v1192_v30 }
 0x23e   : > { %8265 = vmatmul.msk.f32.vlgmr.msra.gmra.mxu3 %vm271_vm1, %v10294_v58  ;;  %v1790_v49 = vpop.f32.mrf.mxu0  ;;  %v1195_v58 = vadd.f32 %v1194_v28, %v10657_v0 }
 0x240   : > { %v1197_v5 = vpop.f32.mrf.mxu1 }
 0x241   : > { %v1624_v48 = vpop.f32.mrf.mxu3  ;;  %8232 = vmatmul.msk.f32.gmra.mxu2 %vm271_vm1, %v10375_v32  ;;  %v15002_v32 = vld [vmem:[#allocation43_spill] sm:$0xff] }
 0x242   : > { %v1688_v40 = vadd.f32 %v1624_v48, %v1377_v27 }
 0x243   : > { %8199 = vmatmul.msk.f32.gmra.mxu1 %vm271_vm1, %v10555_v20  ;;  %v15004_v20 = vld [vmem:[#allocation63_spill] sm:$0xff] }
 0x244   : > { %v11116_v56 = vadd.f32 %v1784_v52, %v1688_v40  ;;  %v1316_v16 = vpop.f32.mrf.mxu2 }
 0x245   : > { %8301 = vmatmul.msk.f32.gmra.mxu0 %vm271_vm1, %v10584_v59  ;;  %v1378_v38 = vadd.f32 %v1316_v16, %v1195_v58  ;;  %v15005_v58 = vld [vmem:[#allocation54_spill] sm:$0xff] }
 0x246   : > { %8266 = vmatmul.msk.f32.gmra.mxu3 %vm271_vm1, %v10339_v60  ;;  %v1793_v19 = vpop.f32.mrf.mxu0  ;;  %v15003_v60 = vld [vmem:[#allocation71_spill] sm:$0xff]  ;;  %v15006_v16 = vld [vmem:[#allocation50_spill] sm:$0xff] }
 0x247   : > { %v1198_v0 = vadd.f32 %v1197_v5, %v15003_v60  ;;  %v15007_v5 = vld [vmem:[#allocation74_spill] sm:$0xff]  ;;  %15023 = vst [vmem:[#allocation71_spill] sm:$0xff] %v11205_v22 }
 0x248   : > { %v1200_v52 = vpop.f32.mrf.mxu1 }
 0x249   : > { %v1627_v12 = vpop.f32.mrf.mxu3  ;;  %8233 = vmatmul.msk.f32.gmra.mxu2 %vm271_vm1, %v10429_v34  ;;  %v15022_v34 = vld [vmem:[#allocation33_spill] sm:$0xff] }
 0x24a   : > { %v1689_v25 = vadd.f32 %v1627_v12, %v1378_v38  ;;  %v1201_v38 = vadd.f32 %v1200_v52, %v15007_v5  ;;  %v15008_v12 = vld [vmem:[#allocation64_spill] sm:$0xff] }
 0x24b   : > { %8200 = vmatmul.msk.f32.gmra.mxu1 %vm271_vm1, %v10571_v6  ;;  %v11179_v6 = vld [vmem:[#allocation2 + $0x280] sm:$0xff] }
 0x24c   : > { %v11127_v36 = vadd.f32 %v1787_v10, %v1689_v25  ;;  %v1319_v28 = vpop.f32.mrf.mxu2 }
 0x24d   : > { %8302 = vmatmul.msk.f32.gmra.mxu0 %vm271_vm1, %v15004_v20  ;;  %v1379_v30 = vadd.f32 %v1319_v28, %v1198_v0 }
 0x24e   : > { %8267 = vmatmul.msk.f32.gmra.mxu3 %vm271_vm1, %v15002_v32  ;;  %v1796_v48 = vpop.f32.mrf.mxu0 }
 0x250   : > { %v1203_v10 = vpop.f32.mrf.mxu1 }
 0x251   : > { %v1630_v53 = vpop.f32.mrf.mxu3  ;;  %8234 = vmatmul.msk.f32.gmra.mxu2 %vm271_vm1, %v15005_v58  ;;  %v15011_v58 = vld [vmem:[#allocation67_spill] sm:$0xff] }
 0x252   : > { %v1690_v27 = vadd.f32 %v1630_v53, %v1379_v30  ;;  %v15009_v53 = vld [vmem:[#allocation10_spill] sm:$0xff] }
 0x253   : > { %8201 = vmatmul.msk.f32.gmra.mxu1 %vm271_vm1, %v10584_v59  ;;  %v15010_v59 = vld [vmem:[#allocation78_spill] sm:$0xff] }
 0x254   : > { %v11138_v40 = vadd.f32 %v1790_v49, %v1690_v27  ;;  %v1322_v25 = vpop.f32.mrf.mxu2  ;;  %v11153_v27 = vld [vmem:[#allocation2 + $0x250] sm:$0xff]  ;;  %v1204_v52 = vadd.f32 %v1203_v10, %v15010_v59  ;;  %v15013_v10 = vld [vmem:[#allocation81_spill] sm:$0xff] }
 0x255   : > { %8303 = vmatmul.msk.f32.gmra.mxu0 %vm271_vm1, %v15008_v12  ;;  %v1380_v32 = vadd.f32 %v1322_v25, %v1201_v38 }
 0x256   : > { %8268 = vmatmul.msk.f32.gmra.mxu3 %vm271_vm1, %v15006_v16  ;;  %v1799_v28 = vpop.f32.mrf.mxu0 }
 0x258   : > { %v1206_v49 = vpop.f32.mrf.mxu1 }
 0x259   : > { %v1633_v60 = vpop.f32.mrf.mxu3  ;;  %8235 = vmatmul.msk.f32.gmra.mxu2 %vm271_vm1, %v15009_v53  ;;  %v1207_v59 = vadd.f32 %v1206_v49, %v15013_v10  ;;  %v15017_v10 = vld [vmem:[#allocation73_spill] sm:$0xff] }
 0x25a   : > { %v1691_v0 = vadd.f32 %v1633_v60, %v1380_v32  ;;  %v11192_v53 = vld [vmem:[#allocation2 + $0x288] sm:$0xff] }
 0x25b   : > { %8202 = vmatmul.msk.f32.gmra.mxu1 %vm271_vm1, %v15004_v20  ;;  %v15015_v20 = vld [vmem:[#allocation22_spill] sm:$0xff]  ;;  %15019 = vst [vmem:[#allocation43_spill] sm:$0xff] %v11192_v53 }
 0x25c   : > { %v11149_v30 = vadd.f32 %v1793_v19, %v1691_v0  ;;  %v1325_v16 = vpop.f32.mrf.mxu2  ;;  %v15012_v0 = vld [vmem:[#allocation18_spill] sm:$0xff] }
 0x25d   : > { %8304 = vmatmul.msk.f32.gmra.mxu0 %vm271_vm1, %v15011_v58  ;;  %v1381_v5 = vadd.f32 %v1325_v16, %v1204_v52  ;;  %v15014_v52 = vld [vmem:[#allocation69_spill] sm:$0xff] }
 0x25e   : > { %8269 = vmatmul.msk.f32.gmra.mxu3 %vm271_vm1, %v11153_v27  ;;  %v1802_v32 = vpop.f32.mrf.mxu0 }
 0x260   : > { %v1209_v25 = vpop.f32.mrf.mxu1 }
 0x261   : > { %v1636_v19 = vpop.f32.mrf.mxu3  ;;  %8236 = vmatmul.msk.f32.gmra.mxu2 %vm271_vm1, %v15012_v0 }
 0x262   : > { %v1692_v38 = vadd.f32 %v1636_v19, %v1381_v5 }
 0x263   : > { %8203 = vmatmul.msk.f32.gmra.mxu1 %vm271_vm1, %v15008_v12  ;;  %v15016_v12 = vld [vmem:[#allocation85_spill] sm:$0xff] }
 0x264   : > { %v11162_v60 = vadd.f32 %v1796_v48, %v1692_v38  ;;  %v1328_v16 = vpop.f32.mrf.mxu2  ;;  %v1210_v49 = vadd.f32 %v1209_v25, %v15016_v12  ;;  %v15020_v25 = vld [vmem:[#allocation88_spill] sm:$0xff] }
 0x265   : > { %8305 = vmatmul.msk.f32.gmra.mxu0 %vm271_vm1, %v15014_v52  ;;  %v1382_v5 = vadd.f32 %v1328_v16, %v1207_v59 }
 0x266   : > { %8270 = vmatmul.msk.f32.gmra.mxu3 %vm271_vm1, %v11166_v62  ;;  %v1805_v21 = vpop.f32.mrf.mxu0 }
 0x268   : > { %v1212_v38 = vpop.f32.mrf.mxu1 }
 0x269   : > { %v1639_v48 = vpop.f32.mrf.mxu3  ;;  %8237 = vmatmul.msk.f32.gmra.mxu2 %vm271_vm1, %v15015_v20  ;;  %v15018_v20 = vld [vmem:[#allocation27_spill] sm:$0xff]  ;;  %v1213_v12 = vadd.f32 %v1212_v38, %v15020_v25  ;;  %v15025_v25 = vld [vmem:[#allocation80_spill] sm:$0xff] }
 0x26a   : > { %v1693_v19 = vadd.f32 %v1639_v48, %v1382_v5 }
 0x26b   : > { %8204 = vmatmul.msk.f32.gmra.mxu1 %vm271_vm1, %v15011_v58 }
 0x26c   : > { %v11175_v0 = vadd.f32 %v1799_v28, %v1693_v19  ;;  %v1331_v59 = vpop.f32.mrf.mxu2 }
 0x26d   : > { %8306 = vmatmul.msk.f32.gmra.mxu0 %vm271_vm1, %v15017_v10  ;;  %v1383_v16 = vadd.f32 %v1331_v59, %v1210_v49  ;;  %v15021_v49 = vld [vmem:[#allocation76_spill] sm:$0xff] }
 0x26e   : > { %8271 = vmatmul.msk.f32.gmra.mxu3 %vm271_vm1, %v11179_v6  ;;  %v1808_v19 = vpop.f32.mrf.mxu0 }
 0x270   : > { %v1215_v48 = vpop.f32.mrf.mxu1 }
 0x271   : > { %v1642_v28 = vpop.f32.mrf.mxu3  ;;  %8238 = vmatmul.msk.f32.gmra.mxu2 %vm271_vm1, %v15018_v20 }
 0x272   : > { %v1694_v5 = vadd.f32 %v1642_v28, %v1383_v16 }
 0x273   : > { %8205 = vmatmul.msk.f32.gmra.mxu1 %vm271_vm1, %v15014_v52  ;;  %v15024_v52 = vld [vmem:[#allocation66_spill] sm:$0xff] }
 0x274   : > { %v11188_v15 = vadd.f32 %v1802_v32, %v1694_v5  ;;  %v1334_v59 = vpop.f32.mrf.mxu2  ;;  %v1216_v38 = vadd.f32 %v1215_v48, %v15024_v52  ;;  %v15029_v48 = vld [vmem:[#allocation68_spill] sm:$0xff] }
 0x275   : > { %8307 = vmatmul.msk.f32.gmra.mxu0 %vm271_vm1, %v15021_v49  ;;  %v1384_v16 = vadd.f32 %v1334_v59, %v1213_v12 }
 0x276   : > { %8272 = vmatmul.msk.f32.gmra.mxu3 %vm271_vm1, %v11192_v53  ;;  %v15027_v53 = vld [vmem:[#allocation39_spill] sm:$0xff] }
 0x278   : > { %v1218_v5 = vpop.f32.mrf.mxu1  ;;  %v1811_v58 = vpop.f32.mrf.mxu0 }
 0x279   : > { %v1645_v32 = vpop.f32.mrf.mxu3  ;;  %8239 = vmatmul.msk.f32.gmra.mxu2 %vm271_vm1, %v15022_v34  ;;  %v1219_v52 = vadd.f32 %v1218_v5, %v15029_v48  ;;  %v15035_v48 = vld [vmem:[#allocation87_spill] sm:$0xff] }
 0x27a   : > { %v1695_v28 = vadd.f32 %v1645_v32, %v1384_v16 }
 0x27b   : > { %8206 = vmatmul.msk.f32.gmra.mxu1 %vm271_vm1, %v15017_v10 }
 0x27c   : > { %v11201_v20 = vadd.f32 %v1805_v21, %v1695_v28  ;;  %v1337_v12 = vpop.f32.mrf.mxu2 }
 0x27d   : > { %8308 = vmatmul.msk.f32.gmra.mxu0 %vm271_vm1, %v15025_v25  ;;  %v1385_v59 = vadd.f32 %v1337_v12, %v1216_v38  ;;  %v15030_v38 = vld [vmem:[#allocation83_spill] sm:$0xff] }
 0x27e   : > { %8273 = vmatmul.msk.f32.gmra.mxu3 %vm271_vm1, %v11205_v22  ;;  %v11218_v22 = vld [vmem:[#allocation2 + $0x2b8] sm:$0xff] }
 0x27f   : > { %15028 = vst [vmem:[#allocation50_spill] sm:$0xff] %v11218_v22 }
 0x280   : > { %v1221_v32 = vpop.f32.mrf.mxu1 }
 0x281   : > { %v1648_v21 = vpop.f32.mrf.mxu3  ;;  %8240 = vmatmul.msk.f32.gmra.mxu2 %vm271_vm1, %v15027_v53 }
 0x282   : > { %v1696_v16 = vadd.f32 %v1648_v21, %v1385_v59  ;;  %v1814_v28 = vpop.f32.mrf.mxu0 }
 0x283   : > { %8207 = vmatmul.msk.f32.gmra.mxu1 %vm271_vm1, %v15021_v49  ;;  %v15034_v49 = vld [vmem:[#allocation72_spill] sm:$0xff] }
 0x284   : > { %v11214_v34 = vadd.f32 %v1808_v19, %v1696_v16  ;;  %v1340_v12 = vpop.f32.mrf.mxu2  ;;  %v1222_v5 = vadd.f32 %v1221_v32, %v15034_v49  ;;  %v15039_v32 = vld [vmem:[#allocation75_spill] sm:$0xff] }
 0x285   : > { %8309 = vmatmul.msk.f32.gmra.mxu0 %vm271_vm1, %v15030_v38  ;;  %v1386_v59 = vadd.f32 %v1340_v12, %v1219_v52 }
 0x286   : > { %15026 = vst [vmem:[#allocation54_spill] sm:$0xff] %v11214_v34  ;;  %8274 = vmatmul.msk.f32.gmra.mxu3 %vm271_vm1, %v11218_v22  ;;  %v15032_v34 = vld [vmem:[#allocation46_spill] sm:$0xff]  ;;  %v11231_v22 = vld [vmem:[#allocation2 + $0x2e0] sm:$0xff] }
 0x287   : > { %15033 = vst [vmem:[#allocation64_spill] sm:$0xff] %v11231_v22 }
 0x288   : > { %v1224_v16 = vpop.f32.mrf.mxu1 }
 0x289   : > { %v1651_v19 = vpop.f32.mrf.mxu3  ;;  %8241 = vmatmul.msk.f32.gmra.mxu2 %vm271_vm1, %v15032_v34  ;;  %v1225_v49 = vadd.f32 %v1224_v16, %v15039_v32  ;;  %v15042_v16 = vld [vmem:[#allocation79_spill] sm:$0xff] }
 0x28a   : > { %v1697_v21 = vadd.f32 %v1651_v19, %v1386_v59  ;;  %v1817_v10 = vpop.f32.mrf.mxu0 }
 0x28b   : > { %8208 = vmatmul.msk.f32.gmra.mxu1 %vm271_vm1, %v15025_v25 }
 0x28c   : > { %v11227_v53 = vadd.f32 %v1811_v58, %v1697_v21  ;;  %v1343_v52 = vpop.f32.mrf.mxu2 }
 0x28d   : > { %8310 = vmatmul.msk.f32.gmra.mxu0 %vm271_vm1, %v15035_v48  ;;  %v1387_v12 = vadd.f32 %v1343_v52, %v1222_v5  ;;  %v15040_v5 = vld [vmem:[#allocation90_spill] sm:$0xff] }
 0x28e   : > { %15031 = vst [vmem:[#allocation74_spill] sm:$0xff] %v11227_v53  ;;  %8275 = vmatmul.msk.f32.gmra.mxu3 %vm271_vm1, %v11231_v22  ;;  %v15037_v53 = vld [vmem:[#allocation53_spill] sm:$0xff] }
 0x28f   : > { %v11244_v22 = vld [vmem:[#allocation2 + $0x2e8] sm:$0xff] }
 0x290   : > { %v1227_v19 = vpop.f32.mrf.mxu1  ;;  %15038 = vst [vmem:[#allocation18_spill] sm:$0xff] %v11244_v22 }
 0x291   : > { %v1654_v58 = vpop.f32.mrf.mxu3  ;;  %8242 = vmatmul.msk.f32.gmra.mxu2 %vm271_vm1, %v15037_v53  ;;  %v1228_v32 = vadd.f32 %v1227_v19, %v15042_v16  ;;  %v15044_v19 = vld [vmem:[#allocation82_spill] sm:$0xff] }
 0x292   : > { %v1698_v59 = vadd.f32 %v1654_v58, %v1387_v12  ;;  %v1820_v21 = vpop.f32.mrf.mxu0 }
 0x293   : > { %8209 = vmatmul.msk.f32.gmra.mxu1 %vm271_vm1, %v15030_v38 }
 0x294   : > { %v11240_v34 = vadd.f32 %v1814_v28, %v1698_v59  ;;  %v1346_v52 = vpop.f32.mrf.mxu2 }
 0x295   : > { %8311 = vmatmul.msk.f32.gmra.mxu0 %vm271_vm1, %v15040_v5  ;;  %v1388_v12 = vadd.f32 %v1346_v52, %v1225_v49 }
 0x296   : > { %15036 = vst [vmem:[#allocation78_spill] sm:$0xff] %v11240_v34  ;;  %8276 = vmatmul.msk.f32.gmra.mxu3 %vm271_vm1, %v11244_v22  ;;  %v15041_v34 = vld [vmem:[#allocation15_spill] sm:$0xff] }
 0x297   : > { %v9208_v22 = vld [vmem:[#allocation2 + $0x310] sm:$0xff] }
 0x298   : > { %v1230_v59 = vpop.f32.mrf.mxu1 }
 0x299   : > { %v1657_v28 = vpop.f32.mrf.mxu3  ;;  %8243 = vmatmul.msk.f32.gmra.mxu2 %vm271_vm1, %v15041_v34  ;;  %v15043_v34 = vld [vmem:[#allocation20_spill] sm:$0xff]  ;;  %v1231_v16 = vadd.f32 %v1230_v59, %v15044_v19  ;;  %v15046_v59 = vld [vmem:[#allocation86_spill] sm:$0xff] }
 0x29a   : > { %v1699_v58 = vadd.f32 %v1657_v28, %v1388_v12  ;;  %v1823_v25 = vpop.f32.mrf.mxu0 }
 0x29b   : > { %8210 = vmatmul.msk.f32.gmra.mxu1 %vm271_vm1, %v15035_v48 }
 0x29c   : > { %v11253_v53 = vadd.f32 %v1817_v10, %v1699_v58  ;;  %v1349_v38 = vpop.f32.mrf.mxu2 }
 0x29d   : > { %8312 = vmatmul.msk.f32.gmra.mxu0 %vm271_vm1, %v10810_v33  ;;  %v1389_v49 = vadd.f32 %v1349_v38, %v1228_v32 }
 0x29e   : > { %8277 = vmatmul.msk.f32.gmra.mxu3 %vm271_vm1, %v9208_v22  ;;  %v9209_v22 = vld [vmem:[#allocation2 + $0x318] sm:$0xff] }
 0x2a0   : > { %v1233_v10 = vpop.f32.mrf.mxu1 }
 0x2a1   : > { %v1660_v52 = vpop.f32.mrf.mxu3  ;;  %8244 = vmatmul.msk.f32.gmra.mxu2 %vm271_vm1, %v15043_v34  ;;  %v15045_v34 = vld [vmem:[#allocation25_spill] sm:$0xff]  ;;  %v1234_v19 = vadd.f32 %v1233_v10, %v15046_v59 }
 0x2a2   : > { %v1700_v12 = vadd.f32 %v1660_v52, %v1389_v49  ;;  %v1826_v28 = vpop.f32.mrf.mxu0  ;;  %v15047_v10 = vld [vmem:[#allocation89_spill] sm:$0xff] }
 0x2a3   : > { %8211 = vmatmul.msk.f32.gmra.mxu1 %vm271_vm1, %v15040_v5 }
 0x2a4   : > { %v11263_v58 = vadd.f32 %v1820_v21, %v1700_v12  ;;  %v1352_v32 = vpop.f32.mrf.mxu2 }
 0x2a5   : > { %8313 = vmatmul.msk.f32.gmra.mxu0 %vm271_vm1, %v10826_v44  ;;  %v1390_v38 = vadd.f32 %v1352_v32, %v1231_v16 }
 0x2a6   : > { %8278 = vmatmul.msk.f32.gmra.mxu3 %vm271_vm1, %v9209_v22  ;;  %v9210_v22 = vld [vmem:[#allocation2 + $0x340] sm:$0xff] }
 0x2a8   : > { %v1236_v21 = vpop.f32.mrf.mxu1 }
 0x2a9   : > { %v1663_v49 = vpop.f32.mrf.mxu3  ;;  %8245 = vmatmul.msk.f32.gmra.mxu2 %vm271_vm1, %v15045_v34  ;;  %v1237_v59 = vadd.f32 %v1236_v21, %v15047_v10 }
 0x2aa   : > { %v1701_v52 = vadd.f32 %v1663_v49, %v1390_v38  ;;  %v1829_v12 = vpop.f32.mrf.mxu0 }
 0x2ab   : > { %8212 = vmatmul.msk.f32.gmra.mxu1 %vm271_vm1, %v10810_v33 }
 0x2ac   : > { %v11273_v48 = vadd.f32 %v1823_v25, %v1701_v52  ;;  %v1355_v5 = vpop.f32.mrf.mxu2 }
 0x2ad   : > { %8314 = vmatmul.msk.f32.gmra.mxu0 %vm271_vm1, %v10845_v2  ;;  %v1391_v16 = vadd.f32 %v1355_v5, %v1234_v19 }
 0x2ae   : > { %8279 = vmatmul.msk.f32.gmra.mxu3 %vm271_vm1, %v9210_v22  ;;  %v9211_v22 = vld [vmem:[#allocation2 + $0x348] sm:$0xff] }
 0x2b0   : > { %v1896_v25 = vpop.f32.mrf.mxu1 }
 0x2b1   : > { %v1666_v32 = vpop.f32.mrf.mxu3  ;;  %8246 = vmatmul.msk.f32.gmra.mxu2 %vm271_vm1, %v10310_v24  ;;  %v9212_v24 = vld [vmem:[#allocation2 + $0x370] sm:$0xff]  ;;  %v1992_v21 = vadd.f32 %v1896_v25, %v10812_v13 }
 0x2b2   : > { %v1702_v38 = vadd.f32 %v1666_v32, %v1391_v16  ;;  %v2372_v49 = vpop.f32.mrf.mxu0 }
 0x2b3   : > { %8213 = vmatmul.msk.f32.gmra.mxu1 %vm271_vm1, %v10826_v44 }
 0x2b4   : > { %v11283_v52 = vadd.f32 %v1826_v28, %v1702_v38  ;;  %v1358_v19 = vpop.f32.mrf.mxu2 }
 0x2b5   : > { %8315 = vmatmul.msk.f32.gmra.mxu0 %vm271_vm1, %v10861_v41  ;;  %v1392_v5 = vadd.f32 %v1358_v19, %v1237_v59 }
 0x2b6   : > { %8280 = vmatmul.msk.f32.gmra.mxu3 %vm271_vm1, %v9211_v22 }
 0x2b8   : > { %v1899_v28 = vpop.f32.mrf.mxu1 }
 0x2b9   : > { %v1669_v16 = vpop.f32.mrf.mxu3  ;;  %8247 = vmatmul.msk.f32.gmra.mxu2 %vm271_vm1, %v10356_v8  ;;  %v1993_v13 = vadd.f32 %v1899_v28, %v10830_v54 }
 0x2ba   : > { %v1703_v32 = vadd.f32 %v1669_v16, %v1392_v5  ;;  %v2375_v38 = vpop.f32.mrf.mxu0  ;;  %v9213_v16 = vld [vmem:[#allocation2 + $0x378] sm:$0xff] }
 0x2bb   : > { %8214 = vmatmul.msk.f32.gmra.mxu1 %vm271_vm1, %v10845_v2  ;;  %v9223_v2 = vld [vmem:[#allocation2 + $0x468] sm:$0xff] }
 0x2bc   : > { %v11293_v33 = vadd.f32 %v1829_v12, %v1703_v32  ;;  %v2058_v44 = vpop.f32.mrf.mxu2 }
 0x2bd   : > { %8316 = vmatmul.msk.f32.gmra.mxu0 %vm271_vm1, %v10880_v35  ;;  %v2154_v22 = vadd.f32 %v2058_v44, %v1992_v21 }
 0x2be   : > { %8281 = vmatmul.msk.f32.gmra.mxu3 %vm271_vm1, %v9212_v24 }
 0x2c0   : > { %v1902_v12 = vpop.f32.mrf.mxu1 }
 0x2c1   : > { %v2212_v10 = vpop.f32.mrf.mxu3  ;;  %8248 = vmatmul.msk.f32.gmra.mxu2 %vm271_vm1, %v10408_v26  ;;  %v9214_v26 = vld [vmem:[#allocation2 + $0x3a0] sm:$0xff]  ;;  %v1994_v54 = vadd.f32 %v1902_v12, %v10847_v7 }
 0x2c2   : > { %v2308_v59 = vadd.f32 %v2212_v10, %v2154_v22  ;;  %v2378_v19 = vpop.f32.mrf.mxu0 }
 0x2c3   : > { %8215 = vmatmul.msk.f32.gmra.mxu1 %vm271_vm1, %v10861_v41 }
 0x2c4   : > { %v11303_v5 = vadd.f32 %v2372_v49, %v2308_v59  ;;  %v2061_v25 = vpop.f32.mrf.mxu2 }
 0x2c5   : > { %8317 = vmatmul.msk.f32.gmra.mxu0 %vm271_vm1, %v10896_v4  ;;  %v2155_v32 = vadd.f32 %v2061_v25, %v1993_v13  ;;  %v9215_v25 = vld [vmem:[#allocation2 + $0x3a8] sm:$0xff] }
 0x2c6   : > { %8282 = vmatmul.msk.f32.gmra.mxu3 %vm271_vm1, %v9213_v16 }
 0x2c8   : > { %v1905_v49 = vpop.f32.mrf.mxu1 }
 0x2c9   : > { %v2215_v24 = vpop.f32.mrf.mxu3  ;;  %8249 = vmatmul.msk.f32.gmra.mxu2 %vm271_vm1, %v10456_v63  ;;  %v1995_v7 = vadd.f32 %v1905_v49, %v10865_v61 }
 0x2ca   : > { %v2309_v21 = vadd.f32 %v2215_v24, %v2155_v32  ;;  %v2381_v44 = vpop.f32.mrf.mxu0 }
 0x2cb   : > { %8216 = vmatmul.msk.f32.gmra.mxu1 %vm271_vm1, %v10880_v35 }
 0x2cc   : > { %v11313_v22 = vadd.f32 %v2375_v38, %v2309_v21  ;;  %v2064_v41 = vpop.f32.mrf.mxu2 }
 0x2cd   : > { %8318 = vmatmul.msk.f32.gmra.mxu0 %vm271_vm1, %v10915_v3  ;;  %v2156_v28 = vadd.f32 %v2064_v41, %v1994_v54 }
 0x2ce   : > { %8283 = vmatmul.msk.f32.gmra.mxu3 %vm271_vm1, %v9214_v26 }
 0x2d0   : > { %v1908_v38 = vpop.f32.mrf.mxu1 }
 0x2d1   : > { %v2218_v10 = vpop.f32.mrf.mxu3  ;;  %8250 = vmatmul.msk.f32.gmra.mxu2 %vm271_vm1, %v10484_v55  ;;  %v9216_v55 = vld [vmem:[#allocation2 + $0x3d0] sm:$0xff]  ;;  %v1996_v61 = vadd.f32 %v1908_v38, %v10882_v45 }
 0x2d2   : > { %v2310_v59 = vadd.f32 %v2218_v10, %v2156_v28  ;;  %v2384_v16 = vpop.f32.mrf.mxu0 }
 0x2d3   : > { %8217 = vmatmul.msk.f32.gmra.mxu1 %vm271_vm1, %v10896_v4 }
 0x2d4   : > { %v11323_v13 = vadd.f32 %v2378_v19, %v2310_v59  ;;  %v2067_v12 = vpop.f32.mrf.mxu2 }
 0x2d5   : > { %8319 = vmatmul.msk.f32.gmra.mxu0 %vm271_vm1, %v10931_v31  ;;  %v2157_v32 = vadd.f32 %v2067_v12, %v1995_v7 }
 0x2d6   : > { %8284 = vmatmul.msk.f32.gmra.mxu3 %vm271_vm1, %v9215_v25  ;;  %v9217_v25 = vld [vmem:[#allocation2 + $0x3d8] sm:$0xff] }
 0x2d8   : > { %v1911_v19 = vpop.f32.mrf.mxu1 }
 0x2d9   : > { %v2221_v24 = vpop.f32.mrf.mxu3  ;;  %8251 = vmatmul.msk.f32.gmra.mxu2 %vm271_vm1, %v10167_v46  ;;  %v1997_v45 = vadd.f32 %v1911_v19, %v10900_v9  ;;  %v15048_v9 = vld [vmem:[#allocation99_spill] sm:$0xff] }
 0x2da   : > { %v2311_v21 = vadd.f32 %v2221_v24, %v2157_v32  ;;  %v2387_v26 = vpop.f32.mrf.mxu0 }
 0x2db   : > { %8218 = vmatmul.msk.f32.gmra.mxu1 %vm271_vm1, %v10915_v3 }
 0x2dc   : > { %v11333_v54 = vadd.f32 %v2381_v44, %v2311_v21  ;;  %v2070_v4 = vpop.f32.mrf.mxu2 }
 0x2dd   : > { %8320 = vmatmul.msk.f32.gmra.mxu0 %vm271_vm1, %v10950_v37  ;;  %v2158_v49 = vadd.f32 %v2070_v4, %v1996_v61 }
 0x2de   : > { %8285 = vmatmul.msk.f32.gmra.mxu3 %vm271_vm1, %v9216_v55 }
 0x2e0   : > { %v1914_v44 = vpop.f32.mrf.mxu1 }
 0x2e1   : > { %v2224_v41 = vpop.f32.mrf.mxu3  ;;  %8252 = vmatmul.msk.f32.gmra.mxu2 %vm271_vm1, %v10209_v1  ;;  %v9218_v1 = vld [vmem:[#allocation2 + $0x400] sm:$0xff]  ;;  %v1998_v19 = vadd.f32 %v1914_v44, %v15048_v9 }
 0x2e2   : > { %v2312_v28 = vadd.f32 %v2224_v41, %v2158_v49  ;;  %v2390_v10 = vpop.f32.mrf.mxu0  ;;  %v15050_v44 = vld [vmem:[#allocation101_spill] sm:$0xff] }
 0x2e3   : > { %8219 = vmatmul.msk.f32.gmra.mxu1 %vm271_vm1, %v10931_v31 }
 0x2e4   : > { %v11343_v59 = vadd.f32 %v2384_v16, %v2312_v28  ;;  %v2073_v38 = vpop.f32.mrf.mxu2  ;;  %v15049_v28 = vld [vmem:[#allocation31_spill] sm:$0xff] }
 0x2e5   : > { %8321 = vmatmul.msk.f32.gmra.mxu0 %vm271_vm1, %v10968_v17  ;;  %v2159_v7 = vadd.f32 %v2073_v38, %v1997_v45 }
 0x2e6   : > { %8286 = vmatmul.msk.f32.gmra.mxu3 %vm271_vm1, %v9217_v25  ;;  %v9219_v25 = vld [vmem:[#allocation2 + $0x408] sm:$0xff] }
 0x2e8   : > { %v1917_v16 = vpop.f32.mrf.mxu1 }
 0x2e9   : > { %v2227_v12 = vpop.f32.mrf.mxu3  ;;  %8253 = vmatmul.msk.f32.gmra.mxu2 %vm271_vm1, %v10270_v39  ;;  %v1999_v45 = vadd.f32 %v1917_v16, %v15050_v44  ;;  %v15052_v16 = vld [vmem:[#allocation102_spill] sm:$0xff] }
 0x2ea   : > { %v2313_v32 = vadd.f32 %v2227_v12, %v2159_v7  ;;  %v2393_v24 = vpop.f32.mrf.mxu0 }
 0x2eb   : > { %8220 = vmatmul.msk.f32.gmra.mxu1 %vm271_vm1, %v10950_v37 }
 0x2ec   : > { %v11353_v21 = vadd.f32 %v2387_v26, %v2313_v32  ;;  %v2076_v31 = vpop.f32.mrf.mxu2 }
 0x2ed   : > { %8322 = vmatmul.msk.f32.gmra.mxu0 %vm271_vm1, %v10989_v14  ;;  %v2160_v55 = vadd.f32 %v2076_v31, %v1998_v19  ;;  %v15051_v19 = vld [vmem:[#allocation38_spill] sm:$0xff] }
 0x2ee   : > { %8287 = vmatmul.msk.f32.gmra.mxu3 %vm271_vm1, %v9218_v1  ;;  %v9220_v31 = vld [vmem:[#allocation2 + $0x430] sm:$0xff] }
 0x2f0   : > { %v1920_v26 = vpop.f32.mrf.mxu1 }
 0x2f1   : > { %v2230_v61 = vpop.f32.mrf.mxu3  ;;  %8254 = vmatmul.msk.f32.gmra.mxu2 %vm271_vm1, %v15049_v28 }
 0x2f2   : > { %v2314_v4 = vadd.f32 %v2230_v61, %v2160_v55  ;;  %v2396_v49 = vpop.f32.mrf.mxu0  ;;  %v2000_v55 = vadd.f32 %v1920_v26, %v15052_v16  ;;  %v15054_v26 = vld [vmem:[#allocation103_spill] sm:$0xff] }
 0x2f3   : > { %8221 = vmatmul.msk.f32.gmra.mxu1 %vm271_vm1, %v10968_v17 }
 0x2f4   : > { %v11363_v41 = vadd.f32 %v2390_v10, %v2314_v4  ;;  %v2079_v38 = vpop.f32.mrf.mxu2 }
 0x2f5   : > { %8323 = vmatmul.msk.f32.gmra.mxu0 %vm271_vm1, %v11005_v50  ;;  %v2161_v7 = vadd.f32 %v2079_v38, %v1999_v45  ;;  %v15053_v45 = vld [vmem:[#allocation44_spill] sm:$0xff] }
 0x2f6   : > { %8288 = vmatmul.msk.f32.gmra.mxu3 %vm271_vm1, %v9219_v25  ;;  %v9221_v38 = vld [vmem:[#allocation2 + $0x438] sm:$0xff] }
 0x2f8   : > { %v1923_v10 = vpop.f32.mrf.mxu1 }
 0x2f9   : > { %v2233_v12 = vpop.f32.mrf.mxu3  ;;  %8255 = vmatmul.msk.f32.gmra.mxu2 %vm271_vm1, %v15051_v19  ;;  %v585_v19 = vld [vmem:[#allocation2 + $0x160] sm:$0xff] }
 0x2fa   : > { %v2315_v32 = vadd.f32 %v2233_v12, %v2161_v7  ;;  %v2399_v1 = vpop.f32.mrf.mxu0  ;;  %v2001_v7 = vadd.f32 %v1923_v10, %v15054_v26  ;;  %v15056_v10 = vld [vmem:[#allocation104_spill] sm:$0xff] }
 0x2fb   : > { %8222 = vmatmul.msk.f32.gmra.mxu1 %vm271_vm1, %v10989_v14 }
 0x2fc   : > { %v11373_v9 = vadd.f32 %v2393_v24, %v2315_v32  ;;  %v2082_v17 = vpop.f32.mrf.mxu2 }
 0x2fd   : > { %8324 = vmatmul.msk.f32.gmra.mxu0 %vm271_vm1, %v11042_v11  ;;  %v2162_v61 = vadd.f32 %v2082_v17, %v2000_v55 }
 0x2fe   : > { %8289 = vmatmul.msk.f32.gmra.mxu3 %vm271_vm1, %v9220_v31 }
 0x300   : > { %v1926_v24 = vpop.f32.mrf.mxu1 }
 0x301   : > { %v2236_v4 = vpop.f32.mrf.mxu3  ;;  %8256 = vmatmul.msk.f32.gmra.mxu2 %vm271_vm1, %v15053_v45  ;;  %v15057_v45 = vld [vmem:[#allocation107_spill] sm:$0xff] }
 0x302   : > { %v2316_v28 = vadd.f32 %v2236_v4, %v2162_v61  ;;  %v2402_v25 = vpop.f32.mrf.mxu0  ;;  %v15055_v61 = vld [vmem:[#allocation52_spill] sm:$0xff] }
 0x303   : > { %8223 = vmatmul.msk.f32.gmra.mxu1 %vm271_vm1, %v11005_v50  ;;  %v9222_v4 = vld [vmem:[#allocation2 + $0x460] sm:$0xff] }
 0x304   : > { %v11383_v44 = vadd.f32 %v2396_v49, %v2316_v28  ;;  %v2085_v12 = vpop.f32.mrf.mxu2  ;;  %v2002_v28 = vadd.f32 %v1926_v24, %v15056_v10  ;;  %v15058_v24 = vld [vmem:[#allocation55_spill] sm:$0xff]  ;;  %v11410_v10 = vld [vmem:[#allocation2 + $0x4a0] sm:$0xff] }
 0x305   : > { %8325 = vmatmul.msk.f32.gmra.mxu0 %vm271_vm1, %v11070_v42  ;;  %v2163_v32 = vadd.f32 %v2085_v12, %v2001_v7  ;;  %15059 = vst [vmem:[#allocation81_spill] sm:$0xff] %v11410_v10 }
 0x306   : > { %8290 = vmatmul.msk.f32.gmra.mxu3 %vm271_vm1, %v9221_v38  ;;  %v1865_v38 = vrot.slane %v15057_v45, 1 }
 0x308   : > { %v1929_v49 = vpop.f32.mrf.mxu1 }
 0x309   : > { %v2239_v31 = vpop.f32.mrf.mxu3  ;;  %8257 = vmatmul.msk.f32.gmra.mxu2 %vm271_vm1, %v15055_v61  ;;  %v584_v61 = vld [vmem:[#allocation2 + $0x158] sm:$0xff] }
 0x30a   : > { %v2317_v16 = vadd.f32 %v2239_v31, %v2163_v32  ;;  %v2405_v55 = vpop.f32.mrf.mxu0 }
 0x30b   : > { %8224 = vmatmul.msk.f32.gmra.mxu1 %vm271_vm1, %v11042_v11  ;;  %v15060_v11 = vld [vmem:[#allocation105_spill] sm:$0xff] }
 0x30c   : > { %v11393_v17 = vadd.f32 %v2399_v1, %v2317_v16  ;;  %v2088_v50 = vpop.f32.mrf.mxu2  ;;  %v1866_v1 = vrot.slane %v11063_v23, 1  ;;  %v2003_v14 = vadd.f32 %v1929_v49, %v15060_v11  ;;  %v8501_v11 = vld [vmem:[%s14634_s2 + $0x34] sm:$0xf] }
 0x30d   : > { %8326 = vmatmul.msk.f32.gmra.mxu0 %vm271_vm1, %v11092_v51  ;;  %v2164_v26 = vadd.f32 %v2088_v50, %v2002_v28  ;;  %v14789_v50 = vrot.slane %v11410_v10, 1  ;;  %8502 = vmatpush.msk.msra.mxu2 %vm940_vm0, %v8501_v11  ;;  %v8467_v11 = vld [vmem:[%s14634_s2 + $0x30] sm:$0xf] }
 0x30e   : > { %8291 = vmatmul.msk.f32.gmra.mxu3 %vm271_vm1, %v9222_v4  ;;  %v1867_v16 = vsel %vm1409_vm3, %v1865_v38, %v1866_v1  ;;  %8468 = vmatpush.msk.msra.mxu1 %vm940_vm0, %v8467_v11 }
 0x310   : > { %v1932_v32 = vpop.f32.mrf.mxu1 }
 0x311   : > { %v2242_v7 = vpop.f32.mrf.mxu3  ;;  %8258 = vmatmul.msk.f32.gmra.mxu2 %vm271_vm1, %v15058_v24  ;;  %v11421_v24 = vsel %vm1409_vm3, %v1866_v1, %v14789_v50  ;;  %v694_v1 = vld [vmem:[#allocation2 + $0x4c8] sm:$0xff] }
 0x312   : > { %v2318_v12 = vadd.f32 %v2242_v7, %v2164_v26  ;;  %v2408_v31 = vpop.f32.mrf.mxu0  ;;  %15061 = vst [vmem:[#allocation69_spill] sm:$0xff] %v11421_v24 }
 0x313   : > { %8225 = vmatmul.msk.f32.gmra.mxu1 %vm271_vm1, %v11070_v42  ;;  %v15062_v42 = vld [vmem:[#allocation110_spill] sm:$0xff] }
 0x314   : > { %v11406_v4 = vadd.f32 %v2402_v25, %v2318_v12  ;;  %v2091_v28 = vpop.f32.mrf.mxu2  ;;  %v2004_v49 = vadd.f32 %v1932_v32, %v15062_v42  ;;  %v11446_v42 = vld [vmem:[#allocation2 + $0x4b8] sm:$0xff] }
 0x315   : > { %8327 = vmatmul.msk.f32.gmra.mxu0 %vm271_vm1, %v1867_v16  ;;  %v2165_v25 = vadd.f32 %v2091_v28, %v2003_v14  ;;  %v8535_v14 = vld [vmem:[%s14634_s2 + $0x38] sm:$0xf]  ;;  %15063 = vst [vmem:[#allocation85_spill] sm:$0xff] %v11446_v42 }
 0x316   : > { %8292 = vmatmul.msk.f32.gmra.mxu3 %vm271_vm1, %v9223_v2 }
 0x317   : > { %8536 = vmatpush.msk.msra.mxu3 %vm940_vm0, %v8535_v14  ;;  %v11453_v14 = vld [vmem:[#allocation2 + $0x4d0] sm:$0xff] }
 0x318   : > { %v1935_v7 = vpop.f32.mrf.mxu1  ;;  %15064 = vst [vmem:[#allocation27_spill] sm:$0xff] %v11453_v14 }
 0x319   : > { %v2245_v38 = vpop.f32.mrf.mxu3  ;;  %8259 = vmatmul.msk.f32.gmra.mxu2 %vm271_vm1, %v11047_v43 }
 0x31a   : > { %v2319_v26 = vadd.f32 %v2245_v38, %v2165_v25  ;;  %v2411_v12 = vpop.f32.mrf.mxu0  ;;  %v2342_v38 = vrot.slane %v694_v1, 1 }
 0x31b   : > { %8226 = vmatmul.msk.f32.gmra.mxu1 %vm271_vm1, %v11092_v51 }
 0x31c   : > { %v11423_v2 = vadd.f32 %v2405_v55, %v2319_v26  ;;  %v693_v55 = vld [vmem:[#allocation2 + $0x4c0] sm:$0xff]  ;;  %v2094_v28 = vpop.f32.mrf.mxu2 }
 0x31d   : > { %8328 = vmatmul.msk.f32.gmra.mxu0 %vm271_vm1, %v11421_v24  ;;  %v2341_v25 = vrot.slane %v693_v55, 1 }
 0x31e   : > { %8293 = vmatmul.msk.f32.gmra.mxu3 %vm271_vm1, %v15057_v45  ;;  %v2166_v45 = vadd.f32 %v2094_v28, %v2004_v49  ;;  %v14800_v49 = vrot.slane %v11446_v42, 7  ;;  %v2028_v28 = vrot.slane %v693_v55, 7  ;;  %v580_v42 = vld [vmem:[#allocation2 + $0x138] sm:$0xff] }
 0x31f   : > { %v2343_v51 = vsel %vm1409_vm3, %v2341_v25, %v2342_v38 }
 0x320   : > { %v1938_v50 = vpop.f32.mrf.mxu1  ;;  %v11469_v11 = vsel %vm794_vm2, %v14800_v49, %v2028_v28 }
 0x321   : > { %v2248_v26 = vpop.f32.mrf.mxu3  ;;  %8260 = vmatmul.msk.f32.gmra.mxu2 %vm271_vm1, %v11075_v29  ;;  %v14799_v29 = vrot.slane %v11453_v14, 1  ;;  %15065 = vst [vmem:[#allocation88_spill] sm:$0xff] %v11469_v11 }
 0x322   : > { %v2320_v32 = vadd.f32 %v2248_v26, %v2166_v45  ;;  %v2414_v10 = vpop.f32.mrf.mxu0  ;;  %v8569_v45 = vld [vmem:[%s14634_s2 + $0x3c] sm:$0xf]  ;;  %v2005_v26 = vadd.f32 %v1935_v7, %v11077_v18  ;;  %v579_v7 = vld [vmem:[#allocation2 + $0x130] sm:$0xff] }
 0x323   : > { %8227 = vmatmul.msk.f32.gmra.mxu1 %vm271_vm1, %v1867_v16  ;;  %8570 = vmatpush.msk.msra.mxu0 %vm940_vm0, %v8569_v45  ;;  %v11474_v18 = vsel %vm1409_vm3, %v2342_v38, %v14799_v29  ;;  %v578_v16 = vld [vmem:[#allocation2 + $0x128] sm:$0xff]  ;;  %v2030_v45 = vrot.slane %v694_v1, 7  ;;  %v9224_v38 = vld [vmem:[#allocation2 + $0x1b8] sm:$0xff] }
 0x324   : > { %v11449_v37 = vadd.f32 %v2408_v31, %v2320_v32  ;;  %v2097_v31 = vpop.f32.mrf.mxu2  ;;  %15066 = vst [vmem:[#allocation76_spill] sm:$0xff] %v11474_v18 }
 0x325   : > { %8329 = vmatmul.msk.f32.gmra.mxu0 %vm271_vm1, %v2343_v51  ;;  %v2167_v25 = vadd.f32 %v2097_v31, %v2005_v26  ;;  %v2006_v26 = vadd.f32 %v1938_v50, %v11094_v57  ;;  %v2522_v31 = vrot.slane %v9224_v38, 5  ;;  %v2031_v57 = vsel %vm794_vm2, %v2028_v28, %v2030_v45 }
 0x326   : > { %8294 = vmatmul.msk.f32.gmra.mxu3 %vm271_vm1, %v11063_v23  ;;  %v2962_v28 = vrot.slane %v579_v7, 3 }
 0x328   : > { %v1941_v3 = vpop.f32.mrf.mxu1 }
 0x329   : > { %v2251_v23 = vpop.f32.mrf.mxu3  ;;  %8261 = vmatmul.msk.f32.gmra.mxu2 %vm271_vm1, %v11469_v11 }
 0x32a   : > { %v2321_v32 = vadd.f32 %v2251_v23, %v2167_v25  ;;  %v2417_v35 = vpop.f32.mrf.mxu0  ;;  %v2507_v25 = vrot.slane %v578_v16, 5  ;;  %v2508_v23 = vrot.slane %v579_v7, 5 }
 0x32b   : > { %8228 = vmatmul.msk.f32.gmra.mxu1 %vm271_vm1, %v11421_v24 }
 0x32c   : > { %v11476_v51 = vadd.f32 %v2411_v12, %v2321_v32  ;;  %v2100_v12 = vpop.f32.mrf.mxu2  ;;  %v11486_v32 = vld [vmem:[#allocation2 + $0x1c0] sm:$0xff]  ;;  %v2509_v14 = vsel %vm2506_vm4, %v2507_v25, %v2508_v23 }
 0x32d   : > { %8330 = vmatmul.msk.f32.gmra.mxu0 %vm271_vm1, %v11474_v18  ;;  %v2523_v29 = vrot.slane %v11486_v32, 5  ;;  %v2168_v49 = vadd.f32 %v2100_v12, %v2006_v26  ;;  %v2007_v26 = vadd.f32 %v1941_v3, %v11105_v47  ;;  %v2510_v12 = vrot.slane %v580_v42, 5 }
 0x32e   : > { %8295 = vmatmul.msk.f32.gmra.mxu3 %vm271_vm1, %v693_v55 }
 0x32f   : > { %v11492_v38 = vsel %vm2506_vm4, %v2522_v31, %v2523_v29  ;;  %v11502_v31 = vld [vmem:[#allocation2 + $0x1c8] sm:$0xff]  ;;  %v2511_v47 = vsel %vm2506_vm4, %v2508_v23, %v2510_v12 }
 0x330   : > { %v1944_v11 = vpop.f32.mrf.mxu1  ;;  %v9227_v12 = vld [vmem:[#allocation2 + $0x1e8] sm:$0xff] }
 0x331   : > { %v2254_v55 = vpop.f32.mrf.mxu3  ;;  %8262 = vmatmul.msk.f32.gmra.mxu2 %vm271_vm1, %v2031_v57 }
 0x332   : > { %v2322_v50 = vadd.f32 %v2254_v55, %v2168_v49  ;;  %v2420_v18 = vpop.f32.mrf.mxu0  ;;  %v2963_v49 = vrot.slane %v580_v42, 3 }
 0x333   : > { %8333 = vmatmul.msk.f32.vlgmr.msrb.gmra.mxu1 %vm271_vm1, %v2509_v14  ;;  %v581_v14 = vld [vmem:[#allocation2 + $0x140] sm:$0xff] }
 0x334   : > { %v11494_v16 = vadd.f32 %v2414_v10, %v2322_v50  ;;  %v2103_v45 = vpop.f32.mrf.mxu2  ;;  %v2525_v10 = vrot.slane %v11502_v31, 5 }
 0x335   : > { %8435 = vmatmul.msk.f32.vlgmr.msrb.gmra.mxu0 %vm271_vm1, %v11492_v38  ;;  %v2169_v25 = vadd.f32 %v2103_v45, %v2007_v26  ;;  %v2008_v26 = vadd.f32 %v1944_v11, %v11116_v56  ;;  %v2512_v45 = vrot.slane %v584_v61, 5 }
 0x336   : > { %8296 = vmatmul.msk.f32.gmra.mxu3 %vm271_vm1, %v694_v1  ;;  %v2964_v1 = vsel %vm2961_vm5, %v2962_v28, %v2963_v49  ;;  %v11508_v24 = vsel %vm2506_vm4, %v2523_v29, %v2525_v10  ;;  %v2965_v28 = vrot.slane %v581_v14, 3  ;;  %v2513_v29 = vrot.slane %v585_v19, 5  ;;  %v11518_v10 = vld [vmem:[#allocation2 + $0x1f0] sm:$0xff] }
 0x338   : > { %v1947_v3 = vpop.f32.mrf.mxu1  ;;  %v2966_v56 = vsel %vm2961_vm5, %v2963_v49, %v2965_v28 }
 0x339   : > { %v2257_v55 = vpop.f32.mrf.mxu3  ;;  %8367 = vmatmul.msk.f32.vlgmr.msrb.gmra.mxu2 %vm271_vm1, %v579_v7  ;;  %v2528_v7 = vrot.slane %v11518_v10, 5 }
 0x33a   : > { %v2323_v57 = vadd.f32 %v2257_v55, %v2169_v25  ;;  %v2423_v50 = vpop.f32.mrf.mxu0 }
 0x33b   : > { %8334 = vmatmul.msk.f32.gmra.mxu1 %vm271_vm1, %v2511_v47  ;;  %v586_v47 = vld [vmem:[#allocation2 + $0x168] sm:$0xff] }
 0x33c   : > { %v11510_v43 = vadd.f32 %v2417_v35, %v2323_v57  ;;  %v2106_v23 = vpop.f32.mrf.mxu2  ;;  %v2527_v35 = vrot.slane %v9227_v12, 5  ;;  %v2968_v49 = vrot.slane %v586_v47, 3  ;;  %v11534_v12 = vld [vmem:[#allocation2 + $0x1f8] sm:$0xff] }
 0x33d   : > { %8436 = vmatmul.msk.f32.gmra.mxu0 %vm271_vm1, %v11508_v24  ;;  %v2170_v25 = vadd.f32 %v2106_v23, %v2008_v26  ;;  %v2009_v26 = vadd.f32 %v1947_v3, %v11127_v36  ;;  %v2967_v23 = vrot.slane %v585_v19, 3  ;;  %v587_v3 = vld [vmem:[#allocation2 + $0x170] sm:$0xff] }
 0x33e   : > { %8401 = vmatmul.msk.f32.vlgmr.msrb.gmra.mxu3 %vm271_vm1, %v2964_v1  ;;  %v2514_v1 = vsel %vm2506_vm4, %v2512_v45, %v2513_v29  ;;  %v11524_v39 = vsel %vm2506_vm4, %v2527_v35, %v2528_v7  ;;  %v2515_v45 = vrot.slane %v586_v47, 5 }
 0x340   : > { %v1950_v11 = vpop.f32.mrf.mxu1  ;;  %v2516_v36 = vsel %vm2506_vm4, %v2513_v29, %v2515_v45 }
 0x341   : > { %v2260_v55 = vpop.f32.mrf.mxu3  ;;  %8368 = vmatmul.msk.f32.gmra.mxu2 %vm271_vm1, %v580_v42 }
 0x342   : > { %v2324_v57 = vadd.f32 %v2260_v55, %v2170_v25  ;;  %v2426_v14 = vpop.f32.mrf.mxu0  ;;  %v2969_v55 = vsel %vm2961_vm5, %v2967_v23, %v2968_v49  ;;  %v9230_v23 = vld [vmem:[#allocation2 + $0x188] sm:$0xff] }
 0x343   : > { %8335 = vmatmul.msk.f32.gmra.mxu1 %vm271_vm1, %v2514_v1  ;;  %v2517_v45 = vrot.slane %v9230_v23, 5 }
 0x344   : > { %v11526_v61 = vadd.f32 %v2420_v18, %v2324_v57  ;;  %v2109_v28 = vpop.f32.mrf.mxu2  ;;  %v2530_v18 = vrot.slane %v11534_v12, 5 }
 0x345   : > { %8437 = vmatmul.msk.f32.gmra.mxu0 %vm271_vm1, %v11524_v39  ;;  %v2171_v35 = vadd.f32 %v2109_v28, %v2009_v26  ;;  %v2010_v26 = vadd.f32 %v1950_v11, %v11138_v40  ;;  %v2970_v28 = vrot.slane %v587_v3, 3 }
 0x346   : > { %8402 = vmatmul.msk.f32.gmra.mxu3 %vm271_vm1, %v2966_v56  ;;  %v11540_v1 = vsel %vm2506_vm4, %v2528_v7, %v2530_v18  ;;  %v9232_v18 = vld [vmem:[#allocation2 + $0x218] sm:$0xff] }
 0x347   : > { %v2971_v11 = vsel %vm2961_vm5, %v2968_v49, %v2970_v28 }
 0x348   : > { %v1953_v57 = vpop.f32.mrf.mxu1 }
 0x349   : > { %v2263_v25 = vpop.f32.mrf.mxu3  ;;  %8369 = vmatmul.msk.f32.gmra.mxu2 %vm271_vm1, %v585_v19 }
 0x34a   : > { %v2325_v42 = vadd.f32 %v2263_v25, %v2171_v35  ;;  %v2429_v56 = vpop.f32.mrf.mxu0  ;;  %v9231_v35 = vld [vmem:[#allocation2 + $0x190] sm:$0xff]  ;;  %v11550_v25 = vld [vmem:[#allocation2 + $0x220] sm:$0xff] }
 0x34b   : > { %8336 = vmatmul.msk.f32.gmra.mxu1 %vm271_vm1, %v2516_v36  ;;  %v2518_v7 = vrot.slane %v9231_v35, 5  ;;  %v2533_v19 = vrot.slane %v11550_v25, 5 }
 0x34c   : > { %v11542_v46 = vadd.f32 %v2423_v50, %v2325_v42  ;;  %v2112_v29 = vpop.f32.mrf.mxu2  ;;  %v2532_v50 = vrot.slane %v9232_v18, 5  ;;  %v2011_v18 = vadd.f32 %v1953_v57, %v11149_v30 }
 0x34d   : > { %8438 = vmatmul.msk.f32.gmra.mxu0 %vm271_vm1, %v11540_v1  ;;  %v2172_v42 = vadd.f32 %v2112_v29, %v2010_v26  ;;  %v2519_v3 = vsel %vm2506_vm4, %v2517_v45, %v2518_v7  ;;  %v2972_v26 = vrot.slane %v9231_v35, 3  ;;  %v9234_v29 = vld [vmem:[#allocation2 + $0x198] sm:$0xff] }
 0x34e   : > { %8403 = vmatmul.msk.f32.gmra.mxu3 %vm271_vm1, %v2969_v55  ;;  %v11556_v8 = vsel %vm2506_vm4, %v2532_v50, %v2533_v19  ;;  %v2973_v49 = vrot.slane %v9234_v29, 3  ;;  %v2520_v45 = vrot.slane %v9234_v29, 5  ;;  %v11566_v50 = vld [vmem:[#allocation2 + $0x228] sm:$0xff] }
 0x350   : > { %v1956_v36 = vpop.f32.mrf.mxu1  ;;  %v2521_v57 = vsel %vm2506_vm4, %v2518_v7, %v2520_v45 }
 0x351   : > { %v2266_v55 = vpop.f32.mrf.mxu3  ;;  %8370 = vmatmul.msk.f32.gmra.mxu2 %vm271_vm1, %v586_v47 }
 0x352   : > { %v2326_v40 = vadd.f32 %v2266_v55, %v2172_v42  ;;  %v2432_v63 = vpop.f32.mrf.mxu0 }
 0x353   : > { %8337 = vmatmul.msk.f32.gmra.mxu1 %vm271_vm1, %v2519_v3 }
 0x354   : > { %v11558_v23 = vadd.f32 %v2426_v14, %v2326_v40  ;;  %v2115_v28 = vpop.f32.mrf.mxu2  ;;  %v2535_v14 = vrot.slane %v11566_v50, 5  ;;  %v2974_v40 = vsel %vm2961_vm5, %v2972_v26, %v2973_v49  ;;  %v9237_v26 = vld [vmem:[#allocation2 + $0x248] sm:$0xff] }
 0x355   : > { %8439 = vmatmul.msk.f32.gmra.mxu0 %vm271_vm1, %v11556_v8  ;;  %v2173_v42 = vadd.f32 %v2115_v28, %v2011_v18  ;;  %v9236_v18 = vld [vmem:[#allocation2 + $0x1a0] sm:$0xff]  ;;  %v2537_v45 = vrot.slane %v9237_v26, 5  ;;  %v9238_v26 = vld [vmem:[#allocation2 + $0x1d0] sm:$0xff] }
 0x356   : > { %15067 = vst [vmem:[#allocation66_spill] sm:$0xff] %v11558_v23  ;;  %8404 = vmatmul.msk.f32.gmra.mxu3 %vm271_vm1, %v2971_v11  ;;  %v11572_v3 = vsel %vm2506_vm4, %v2533_v19, %v2535_v14  ;;  %v2012_v23 = vadd.f32 %v1956_v36, %v11162_v60  ;;  %v2975_v28 = vrot.slane %v9236_v18, 3  ;;  %v2538_v19 = vrot.slane %v11153_v27, 5 }
 0x357   : > { %v2977_v27 = vrot.slane %v11486_v32, 3 }
 0x358   : > { %v1959_v30 = vpop.f32.mrf.mxu1  ;;  %v11585_v60 = vsel %vm2506_vm4, %v2537_v45, %v2538_v19  ;;  %v2980_v45 = vrot.slane %v9238_v26, 3 }
 0x359   : > { %v2269_v47 = vpop.f32.mrf.mxu3  ;;  %8371 = vmatmul.msk.f32.gmra.mxu2 %vm271_vm1, %v9231_v35  ;;  %v2976_v35 = vsel %vm2961_vm5, %v2973_v49, %v2975_v28 }
 0x35a   : > { %v2327_v55 = vadd.f32 %v2269_v47, %v2173_v42  ;;  %v2435_v11 = vpop.f32.mrf.mxu0 }
 0x35b   : > { %8338 = vmatmul.msk.f32.gmra.mxu1 %vm271_vm1, %v2521_v57 }
 0x35c   : > { %v11574_v34 = vadd.f32 %v2429_v56, %v2327_v55  ;;  %v2118_v7 = vpop.f32.mrf.mxu2 }
 0x35d   : > { %8440 = vmatmul.msk.f32.gmra.mxu0 %vm271_vm1, %v11572_v3  ;;  %v2174_v56 = vadd.f32 %v2118_v7, %v2012_v23  ;;  %v2978_v23 = vrot.slane %v11502_v31, 3 }
 0x35e   : > { %8405 = vmatmul.msk.f32.gmra.mxu3 %vm271_vm1, %v2974_v40  ;;  %v2013_v40 = vadd.f32 %v1959_v30, %v11175_v0 }
 0x35f   : > { %v11600_v28 = vsel %vm2961_vm5, %v2977_v27, %v2978_v23 }
 0x360   : > { %v1962_v47 = vpop.f32.mrf.mxu1 }
 0x361   : > { %v2272_v14 = vpop.f32.mrf.mxu3  ;;  %8372 = vmatmul.msk.f32.gmra.mxu2 %vm271_vm1, %v9234_v29 }
 0x362   : > { %v2328_v42 = vadd.f32 %v2272_v14, %v2174_v56  ;;  %v2438_v55 = vpop.f32.mrf.mxu0  ;;  %v9239_v56 = vld [vmem:[#allocation2 + $0x278] sm:$0xff]  ;;  %v2543_v14 = vrot.slane %v11179_v6, 5 }
 0x363   : > { %8339 = vmatmul.msk.f32.gmra.mxu1 %vm271_vm1, %v11492_v38 }
 0x364   : > { %v11587_v36 = vadd.f32 %v2432_v63, %v2328_v42  ;;  %v2121_v49 = vpop.f32.mrf.mxu2  ;;  %v2540_v63 = vrot.slane %v11166_v62, 5  ;;  %v2014_v62 = vadd.f32 %v1962_v47, %v11188_v15 }
 0x365   : > { %8441 = vmatmul.msk.f32.gmra.mxu0 %vm271_vm1, %v11585_v60  ;;  %v2175_v57 = vadd.f32 %v2121_v49, %v2013_v40  ;;  %v11618_v40 = vsel %vm2961_vm5, %v2978_v23, %v2980_v45  ;;  %v2982_v23 = vrot.slane %v11518_v10, 3  ;;  %v2983_v49 = vrot.slane %v11534_v12, 3  ;;  %v15073_v45 = vld [vmem:[#allocation54_spill] sm:$0xff] }
 0x366   : > { %15068 = vst [vmem:[#allocation39_spill] sm:$0xff] %v11587_v36  ;;  %8406 = vmatmul.msk.f32.gmra.mxu3 %vm271_vm1, %v2976_v35  ;;  %v11603_v38 = vsel %vm2506_vm4, %v2538_v19, %v2540_v63  ;;  %v15071_v63 = vld [vmem:[#allocation43_spill] sm:$0xff] }
 0x368   : > { %v1965_v0 = vpop.f32.mrf.mxu1 }
 0x369   : > { %v2275_v18 = vpop.f32.mrf.mxu3  ;;  %8373 = vmatmul.msk.f32.gmra.mxu2 %vm271_vm1, %v11486_v32  ;;  %v2015_v6 = vadd.f32 %v1965_v0, %v11201_v20 }
 0x36a   : > { %v2329_v29 = vadd.f32 %v2275_v18, %v2175_v57  ;;  %v2441_v30 = vpop.f32.mrf.mxu0  ;;  %v2545_v57 = vrot.slane %v15071_v63, 5 }
 0x36b   : > { %8340 = vmatmul.msk.f32.gmra.mxu1 %vm271_vm1, %v11508_v24 }
 0x36c   : > { %v11605_v7 = vadd.f32 %v2435_v11, %v2329_v29  ;;  %v2124_v19 = vpop.f32.mrf.mxu2  ;;  %v2542_v11 = vrot.slane %v9239_v56, 5  ;;  %v9240_v56 = vld [vmem:[#allocation2 + $0x200] sm:$0xff] }
 0x36d   : > { %8442 = vmatmul.msk.f32.gmra.mxu0 %vm271_vm1, %v11603_v38  ;;  %v2176_v42 = vadd.f32 %v2124_v19, %v2014_v62  ;;  %v11638_v62 = vsel %vm2961_vm5, %v2982_v23, %v2983_v49 }
 0x36e   : > { %15069 = vst [vmem:[#allocation68_spill] sm:$0xff] %v11605_v7  ;;  %8407 = vmatmul.msk.f32.gmra.mxu3 %vm271_vm1, %v11600_v28  ;;  %v11621_v24 = vsel %vm2506_vm4, %v2542_v11, %v2543_v14  ;;  %v2985_v11 = vrot.slane %v9240_v56, 3 }
 0x370   : > { %v1968_v15 = vpop.f32.mrf.mxu1 }
 0x371   : > { %v2278_v32 = vpop.f32.mrf.mxu3  ;;  %8374 = vmatmul.msk.f32.gmra.mxu2 %vm271_vm1, %v11502_v31  ;;  %v2016_v19 = vadd.f32 %v1968_v15, %v15073_v45  ;;  %v15078_v45 = vld [vmem:[#allocation50_spill] sm:$0xff] }
 0x372   : > { %v2330_v35 = vadd.f32 %v2278_v32, %v2176_v42  ;;  %v2444_v47 = vpop.f32.mrf.mxu0  ;;  %v9241_v42 = vld [vmem:[#allocation2 + $0x2a8] sm:$0xff]  ;;  %v15074_v32 = vld [vmem:[#allocation71_spill] sm:$0xff] }
 0x373   : > { %8341 = vmatmul.msk.f32.gmra.mxu1 %vm271_vm1, %v11524_v39  ;;  %v11641_v39 = vsel %vm2506_vm4, %v2543_v14, %v2545_v57 }
 0x374   : > { %v11623_v27 = vadd.f32 %v2438_v55, %v2330_v35  ;;  %v2127_v55 = vpop.f32.mrf.mxu2  ;;  %v2548_v35 = vrot.slane %v15074_v32, 5  ;;  %v15082_v32 = vld [vmem:[#allocation78_spill] sm:$0xff] }
 0x375   : > { %8443 = vmatmul.msk.f32.gmra.mxu0 %vm271_vm1, %v11621_v24  ;;  %v2177_v18 = vadd.f32 %v2127_v55, %v2015_v6  ;;  %v11656_v55 = vsel %vm2961_vm5, %v2983_v49, %v2985_v11  ;;  %v2987_v49 = vrot.slane %v11550_v25, 3 }
 0x376   : > { %15070 = vst [vmem:[#allocation83_spill] sm:$0xff] %v11623_v27  ;;  %8408 = vmatmul.msk.f32.gmra.mxu3 %vm271_vm1, %v11618_v40 }
 0x378   : > { %v1971_v20 = vpop.f32.mrf.mxu1 }
 0x379   : > { %v2281_v31 = vpop.f32.mrf.mxu3  ;;  %8375 = vmatmul.msk.f32.gmra.mxu2 %vm271_vm1, %v11518_v10 }
 0x37a   : > { %v2331_v29 = vadd.f32 %v2281_v31, %v2177_v18  ;;  %v2447_v0 = vpop.f32.mrf.mxu0  ;;  %v15077_v18 = vld [vmem:[#allocation74_spill] sm:$0xff] }
 0x37b   : > { %8342 = vmatmul.msk.f32.gmra.mxu1 %vm271_vm1, %v11540_v1  ;;  %v2017_v31 = vadd.f32 %v1971_v20, %v15077_v18  ;;  %v9243_v18 = vld [vmem:[#allocation2 + $0x2d8] sm:$0xff] }
 0x37c   : > { %v11643_v26 = vadd.f32 %v2441_v30, %v2331_v29  ;;  %v2130_v14 = vpop.f32.mrf.mxu2  ;;  %v2547_v30 = vrot.slane %v9241_v42, 5  ;;  %v2988_v29 = vrot.slane %v11566_v50, 3 }
 0x37d   : > { %8444 = vmatmul.msk.f32.gmra.mxu0 %vm271_vm1, %v11641_v39  ;;  %v2178_v6 = vadd.f32 %v2130_v14, %v2016_v19  ;;  %v2550_v19 = vrot.slane %v15078_v45, 5 }
 0x37e   : > { %15072 = vst [vmem:[#allocation72_spill] sm:$0xff] %v11643_v26  ;;  %8409 = vmatmul.msk.f32.gmra.mxu3 %vm271_vm1, %v11638_v62  ;;  %v11659_v1 = vsel %vm2506_vm4, %v2547_v30, %v2548_v35  ;;  %v11676_v14 = vsel %vm2961_vm5, %v2987_v49, %v2988_v29 }
 0x37f   : > { %15075 = vst [vmem:[#allocation53_spill] sm:$0xff] %v11659_v1 }
 0x380   : > { %v1974_v15 = vpop.f32.mrf.mxu1  ;;  %15079 = vst [vmem:[#allocation90_spill] sm:$0xff] %v11676_v14 }
 0x381   : > { %v2284_v10 = vpop.f32.mrf.mxu3  ;;  %8376 = vmatmul.msk.f32.gmra.mxu2 %vm271_vm1, %v11534_v12 }
 0x382   : > { %v2332_v23 = vadd.f32 %v2284_v10, %v2178_v6  ;;  %v2450_v63 = vpop.f32.mrf.mxu0  ;;  %v2018_v6 = vadd.f32 %v1974_v15, %v15082_v32  ;;  %v9242_v10 = vld [vmem:[#allocation2 + $0x230] sm:$0xff] }
 0x383   : > { %8343 = vmatmul.msk.f32.gmra.mxu1 %vm271_vm1, %v11556_v8  ;;  %v11679_v8 = vsel %vm2506_vm4, %v2548_v35, %v2550_v19 }
 0x384   : > { %v11661_v57 = vadd.f32 %v2444_v47, %v2332_v23  ;;  %v2133_v47 = vpop.f32.mrf.mxu2  ;;  %15080 = vst [vmem:[#allocation79_spill] sm:$0xff] %v11679_v8  ;;  %v2990_v23 = vrot.slane %v9242_v10, 3  ;;  %v15087_v10 = vld [vmem:[#allocation18_spill] sm:$0xff] }
 0x385   : > { %8445 = vmatmul.msk.f32.gmra.mxu0 %vm271_vm1, %v11659_v1  ;;  %v2179_v56 = vadd.f32 %v2133_v47, %v2017_v31  ;;  %v15083_v31 = vld [vmem:[#allocation64_spill] sm:$0xff] }
 0x386   : > { %15076 = vst [vmem:[#allocation75_spill] sm:$0xff] %v11661_v57  ;;  %8410 = vmatmul.msk.f32.gmra.mxu3 %vm271_vm1, %v11656_v55  ;;  %v2553_v49 = vrot.slane %v15083_v31, 5  ;;  %v11694_v19 = vsel %vm2961_vm5, %v2988_v29, %v2990_v23  ;;  %v11708_v29 = vld [vmem:[#allocation2 + $0x250] sm:$0xff]  ;;  %v2555_v23 = vrot.slane %v15087_v10, 5 }
 0x387   : > { %15084 = vst [vmem:[#allocation82_spill] sm:$0xff] %v11694_v19  ;;  %v2992_v32 = vrot.slane %v11708_v29, 3  ;;  %v11734_v10 = vld [vmem:[#allocation2 + $0x310] sm:$0xff] }
 0x388   : > { %v1977_v20 = vpop.f32.mrf.mxu1  ;;  %15090 = vst [vmem:[#allocation101_spill] sm:$0xff] %v11734_v10 }
 0x389   : > { %v2287_v12 = vpop.f32.mrf.mxu3  ;;  %8377 = vmatmul.msk.f32.gmra.mxu2 %vm271_vm1, %v11550_v25 }
 0x38a   : > { %v2333_v11 = vadd.f32 %v2287_v12, %v2179_v56  ;;  %v2453_v42 = vpop.f32.mrf.mxu0 }
 0x38b   : > { %8344 = vmatmul.msk.f32.gmra.mxu1 %vm271_vm1, %v11572_v3 }
 0x38c   : > { %v11681_v30 = vadd.f32 %v2447_v0, %v2333_v11  ;;  %v2136_v35 = vpop.f32.mrf.mxu2  ;;  %v2552_v0 = vrot.slane %v9243_v18, 5  ;;  %v2019_v11 = vadd.f32 %v1977_v20, %v11253_v53 }
 0x38d   : > { %8446 = vmatmul.msk.f32.gmra.mxu0 %vm271_vm1, %v11679_v8  ;;  %v2180_v47 = vadd.f32 %v2136_v35, %v2018_v6  ;;  %v11711_v6 = vld [vmem:[#allocation2 + $0x258] sm:$0xff] }
 0x38e   : > { %15081 = vst [vmem:[#allocation20_spill] sm:$0xff] %v11681_v30  ;;  %8411 = vmatmul.msk.f32.gmra.mxu3 %vm271_vm1, %v11676_v14  ;;  %v11697_v3 = vsel %vm2506_vm4, %v2552_v0, %v2553_v49 }
 0x38f   : > { %15085 = vst [vmem:[#allocation86_spill] sm:$0xff] %v11697_v3 }
 0x390   : > { %v1980_v15 = vpop.f32.mrf.mxu1 }
 0x391   : > { %v2290_v25 = vpop.f32.mrf.mxu3  ;;  %8378 = vmatmul.msk.f32.gmra.mxu2 %vm271_vm1, %v11566_v50 }
 0x392   : > { %v2334_v45 = vadd.f32 %v2290_v25, %v2180_v47  ;;  %v2456_v56 = vpop.f32.mrf.mxu0  ;;  %v11721_v47 = vsel %vm2506_vm4, %v2553_v49, %v2555_v23  ;;  %v2558_v23 = vrot.slane %v11734_v10, 5 }
 0x393   : > { %8345 = vmatmul.msk.f32.gmra.mxu1 %vm271_vm1, %v11585_v60  ;;  %15088 = vst [vmem:[#allocation99_spill] sm:$0xff] %v11721_v47 }
 0x394   : > { %v11699_v12 = vadd.f32 %v2450_v63, %v2334_v45  ;;  %v2993_v63 = vrot.slane %v11711_v6, 3  ;;  %v2139_v50 = vpop.f32.mrf.mxu2  ;;  %v2020_v45 = vadd.f32 %v1980_v15, %v11263_v58 }
 0x395   : > { %8447 = vmatmul.msk.f32.gmra.mxu0 %vm271_vm1, %v11697_v3  ;;  %v2181_v35 = vadd.f32 %v2139_v50, %v2019_v11  ;;  %v9246_v11 = vld [vmem:[#allocation2 + $0x260] sm:$0xff]  ;;  %v9247_v50 = vld [vmem:[#allocation2 + $0x308] sm:$0xff] }
 0x396   : > { %15086 = vst [vmem:[#allocation89_spill] sm:$0xff] %v11699_v12  ;;  %8412 = vmatmul.msk.f32.gmra.mxu3 %vm271_vm1, %v11694_v19  ;;  %v11718_v20 = vsel %vm2961_vm5, %v2992_v32, %v2993_v63  ;;  %v2995_v32 = vrot.slane %v9246_v11, 3 }
 0x398   : > { %v1983_v0 = vpop.f32.mrf.mxu1  ;;  %v11738_v58 = vsel %vm2961_vm5, %v2993_v63, %v2995_v32  ;;  %v11752_v63 = vld [vmem:[#allocation2 + $0x280] sm:$0xff] }
 0x399   : > { %v2293_v18 = vpop.f32.mrf.mxu3  ;;  %8379 = vmatmul.msk.f32.gmra.mxu2 %vm271_vm1, %v11708_v29  ;;  %v2997_v32 = vrot.slane %v11752_v63, 3 }
 0x39a   : > { %v2335_v53 = vadd.f32 %v2293_v18, %v2181_v35  ;;  %v2459_v31 = vpop.f32.mrf.mxu0 }
 0x39b   : > { %8346 = vmatmul.msk.f32.gmra.mxu1 %vm271_vm1, %v11603_v38 }
 0x39c   : > { %v11723_v25 = vadd.f32 %v2453_v42, %v2335_v53  ;;  %v2142_v49 = vpop.f32.mrf.mxu2  ;;  %v2557_v42 = vrot.slane %v9247_v50, 5 }
 0x39d   : > { %8448 = vmatmul.msk.f32.gmra.mxu0 %vm271_vm1, %v11721_v47  ;;  %v2182_v35 = vadd.f32 %v2142_v49, %v2020_v45  ;;  %v2021_v45 = vadd.f32 %v1983_v0, %v11273_v48  ;;  %v11755_v49 = vld [vmem:[#allocation2 + $0x288] sm:$0xff] }
 0x39e   : > { %15089 = vst [vmem:[#allocation31_spill] sm:$0xff] %v11723_v25  ;;  %8413 = vmatmul.msk.f32.gmra.mxu3 %vm271_vm1, %v11718_v20  ;;  %v11741_v11 = vsel %vm2506_vm4, %v2557_v42, %v2558_v23  ;;  %v11760_v42 = vld [vmem:[#allocation2 + $0x318] sm:$0xff] }
 0x39f   : > { %15091 = vst [vmem:[#allocation102_spill] sm:$0xff] %v11741_v11 }
 0x3a0   : > { %v1986_v15 = vpop.f32.mrf.mxu1 }
 0x3a1   : > { %v2296_v18 = vpop.f32.mrf.mxu3  ;;  %8380 = vmatmul.msk.f32.gmra.mxu2 %vm271_vm1, %v11711_v6 }
 0x3a2   : > { %v2336_v53 = vadd.f32 %v2296_v18, %v2182_v35  ;;  %v2462_v25 = vpop.f32.mrf.mxu0  ;;  %v2560_v35 = vrot.slane %v11760_v42, 5 }
 0x3a3   : > { %8347 = vmatmul.msk.f32.gmra.mxu1 %vm271_vm1, %v11621_v24 }
 0x3a4   : > { %v11743_v12 = vadd.f32 %v2456_v56, %v2336_v53  ;;  %v2998_v56 = vrot.slane %v11755_v49, 3  ;;  %v2145_v50 = vpop.f32.mrf.mxu2  ;;  %v11767_v57 = vsel %vm2506_vm4, %v2558_v23, %v2560_v35  ;;  %v9253_v35 = vld [vmem:[#allocation2 + $0x338] sm:$0xff] }
 0x3a5   : > { %8449 = vmatmul.msk.f32.gmra.mxu0 %vm271_vm1, %v11741_v11  ;;  %v2183_v48 = vadd.f32 %v2145_v50, %v2021_v45  ;;  %15093 = vst [vmem:[#allocation103_spill] sm:$0xff] %v11767_v57  ;;  %v2022_v45 = vadd.f32 %v1986_v15, %v11283_v52 }
 0x3a6   : > { %15092 = vst [vmem:[#allocation44_spill] sm:$0xff] %v11743_v12  ;;  %8414 = vmatmul.msk.f32.gmra.mxu3 %vm271_vm1, %v11738_v58  ;;  %v11764_v53 = vsel %vm2961_vm5, %v2997_v32, %v2998_v56  ;;  %v9252_v32 = vld [vmem:[#allocation2 + $0x290] sm:$0xff] }
 0x3a7   : > { %v3000_v50 = vrot.slane %v9252_v32, 3 }
 0x3a8   : > { %v1989_v12 = vpop.f32.mrf.mxu1 }
 0x3a9   : > { %v2299_v0 = vpop.f32.mrf.mxu3  ;;  %8381 = vmatmul.msk.f32.gmra.mxu2 %vm271_vm1, %v11752_v63  ;;  %v11784_v52 = vsel %vm2961_vm5, %v2998_v56, %v3000_v50  ;;  %v11801_v50 = vld [vmem:[#allocation2 + $0x2b8] sm:$0xff] }
 0x3aa   : > { %v2337_v18 = vadd.f32 %v2299_v0, %v2183_v48  ;;  %v2465_v30 = vpop.f32.mrf.mxu0  ;;  %v11780_v48 = vld [vmem:[#allocation2 + $0x340] sm:$0xff]  ;;  %15099 = vst [vmem:[#allocation43_spill] sm:$0xff] %v11801_v50 }
 0x3ab   : > { %8348 = vmatmul.msk.f32.gmra.mxu1 %vm271_vm1, %v11641_v39  ;;  %15095 = vst [vmem:[#allocation107_spill] sm:$0xff] %v11780_v48  ;;  %v2563_v0 = vrot.slane %v11780_v48, 5 }
 0x3ac   : > { %v11769_v26 = vadd.f32 %v2459_v31, %v2337_v18  ;;  %v2148_v23 = vpop.f32.mrf.mxu2  ;;  %v2562_v31 = vrot.slane %v9253_v35, 5 }
 0x3ad   : > { %8450 = vmatmul.msk.f32.gmra.mxu0 %vm271_vm1, %v11767_v57  ;;  %v2184_v18 = vadd.f32 %v2148_v23, %v2022_v45  ;;  %v2023_v45 = vadd.f32 %v1989_v12, %v11293_v33  ;;  %v11806_v23 = vld [vmem:[#allocation2 + $0x348] sm:$0xff] }
 0x3ae   : > { %15094 = vst [vmem:[#allocation104_spill] sm:$0xff] %v11769_v26  ;;  %8415 = vmatmul.msk.f32.gmra.mxu3 %vm271_vm1, %v11764_v53  ;;  %v11787_v32 = vsel %vm2506_vm4, %v2562_v31, %v2563_v0  ;;  %v2565_v35 = vrot.slane %v11806_v23, 5 }
 0x3af   : > { %15096 = vst [vmem:[#allocation55_spill] sm:$0xff] %v11787_v32 }
 0x3b0   : > { %v2673_v15 = vpop.f32.mrf.mxu1 }
 0x3b1   : > { %v2302_v26 = vpop.f32.mrf.mxu3  ;;  %8382 = vmatmul.msk.f32.gmra.mxu2 %vm271_vm1, %v11755_v49 }
 0x3b2   : > { %v2338_v27 = vadd.f32 %v2302_v26, %v2184_v18  ;;  %v3305_v7 = vpop.f32.mrf.mxu0  ;;  %v11798_v26 = vld [vmem:[#allocation2 + $0x2b0] sm:$0xff] }
 0x3b3   : > { %8349 = vmatmul.msk.f32.gmra.mxu1 %vm271_vm1, %v11659_v1  ;;  %15098 = vst [vmem:[#allocation110_spill] sm:$0xff] %v11798_v26  ;;  %v3002_v56 = vrot.slane %v11798_v26, 3  ;;  %v11813_v1 = vsel %vm2506_vm4, %v2563_v0, %v2565_v35  ;;  %v9259_v35 = vld [vmem:[#allocation2 + $0x368] sm:$0xff] }
 0x3b4   : > { %v11789_v19 = vadd.f32 %v2462_v25, %v2338_v27  ;;  %v3003_v27 = vrot.slane %v11801_v50, 3  ;;  %v2151_v25 = vpop.f32.mrf.mxu2  ;;  %15101 = vst [vmem:[#allocation71_spill] sm:$0xff] %v11813_v1 }
 0x3b5   : > { %8451 = vmatmul.msk.f32.gmra.mxu0 %vm271_vm1, %v11787_v32  ;;  %v2185_v33 = vadd.f32 %v2151_v25, %v2023_v45  ;;  %v2769_v45 = vadd.f32 %v2673_v15, %v11303_v5 }
 0x3b6   : > { %15097 = vst [vmem:[#allocation105_spill] sm:$0xff] %v11789_v19  ;;  %8416 = vmatmul.msk.f32.gmra.mxu3 %vm271_vm1, %v11784_v52  ;;  %v11810_v18 = vsel %vm2961_vm5, %v3002_v56, %v3003_v27  ;;  %v9258_v56 = vld [vmem:[#allocation2 + $0x2c0] sm:$0xff] }
 0x3b7   : > { %15100 = vst [vmem:[#allocation54_spill] sm:$0xff] %v11810_v18  ;;  %v3005_v25 = vrot.slane %v9258_v56, 3 }
 0x3b8   : > { %v2676_v19 = vpop.f32.mrf.mxu1 }
 0x3b9   : > { %v2305_v12 = vpop.f32.mrf.mxu3  ;;  %8383 = vmatmul.msk.f32.gmra.mxu2 %vm271_vm1, %v11798_v26  ;;  %v11830_v5 = vsel %vm2961_vm5, %v3003_v27, %v3005_v25  ;;  %v11847_v25 = vld [vmem:[#allocation2 + $0x2e8] sm:$0xff] }
 0x3ba   : > { %v2339_v31 = vadd.f32 %v2305_v12, %v2185_v33  ;;  %v3308_v36 = vpop.f32.mrf.mxu0  ;;  %v11826_v33 = vld [vmem:[#allocation2 + $0x370] sm:$0xff]  ;;  %15104 = vst [vmem:[#allocation78_spill] sm:$0xff] %v11830_v5 }
 0x3bb   : > { %8350 = vmatmul.msk.f32.gmra.mxu1 %vm271_vm1, %v11679_v8  ;;  %15103 = vst [vmem:[#allocation50_spill] sm:$0xff] %v11826_v33  ;;  %v2568_v12 = vrot.slane %v11826_v33, 5 }
 0x3bc   : > { %v11815_v14 = vadd.f32 %v2465_v30, %v2339_v31  ;;  %v2831_v0 = vpop.f32.mrf.mxu2  ;;  %v2567_v30 = vrot.slane %v9259_v35, 5 }
 0x3bd   : > { %8452 = vmatmul.msk.f32.gmra.mxu0 %vm271_vm1, %v11813_v1  ;;  %v2927_v31 = vadd.f32 %v2831_v0, %v2769_v45  ;;  %v2770_v45 = vadd.f32 %v2676_v19, %v11313_v22  ;;  %v11852_v0 = vld [vmem:[#allocation2 + $0x378] sm:$0xff] }
 0x3be   : > { %15102 = vst [vmem:[#allocation74_spill] sm:$0xff] %v11815_v14  ;;  %8417 = vmatmul.msk.f32.gmra.mxu3 %vm271_vm1, %v11810_v18  ;;  %v11833_v56 = vsel %vm2506_vm4, %v2567_v30, %v2568_v12  ;;  %v2570_v35 = vrot.slane %v11852_v0, 5 }
 0x3bf   : > { %15105 = vst [vmem:[#allocation64_spill] sm:$0xff] %v11833_v56 }
 0x3c0   : > { %v2679_v15 = vpop.f32.mrf.mxu1 }
 0x3c1   : > { %v3128_v14 = vpop.f32.mrf.mxu3  ;;  %8384 = vmatmul.msk.f32.gmra.mxu2 %vm271_vm1, %v11801_v50  ;;  %v11859_v50 = vsel %vm2506_vm4, %v2568_v12, %v2570_v35  ;;  %v9265_v35 = vld [vmem:[#allocation2 + $0x398] sm:$0xff] }
 0x3c2   : > { %v3224_v26 = vadd.f32 %v3128_v14, %v2927_v31  ;;  %v3311_v8 = vpop.f32.mrf.mxu0  ;;  %v11844_v14 = vld [vmem:[#allocation2 + $0x2e0] sm:$0xff]  ;;  %15109 = vst [vmem:[#allocation115_spill] sm:$0xff] %v11859_v50 }
 0x3c3   : > { %8351 = vmatmul.msk.f32.gmra.mxu1 %vm271_vm1, %v11697_v3  ;;  %15107 = vst [vmem:[#allocation113_spill] sm:$0xff] %v11844_v14  ;;  %v3007_v27 = vrot.slane %v11844_v14, 3 }
 0x3c4   : > { %v11835_v18 = vadd.f32 %v3305_v7, %v3224_v26  ;;  %v3008_v7 = vrot.slane %v11847_v25, 3  ;;  %v2834_v26 = vpop.f32.mrf.mxu2 }
 0x3c5   : > { %8453 = vmatmul.msk.f32.gmra.mxu0 %vm271_vm1, %v11833_v56  ;;  %v2928_v22 = vadd.f32 %v2834_v26, %v2770_v45  ;;  %v2771_v45 = vadd.f32 %v2679_v15, %v11323_v13 }
 0x3c6   : > { %15106 = vst [vmem:[#allocation18_spill] sm:$0xff] %v11835_v18  ;;  %8418 = vmatmul.msk.f32.gmra.mxu3 %vm271_vm1, %v11830_v5  ;;  %v11856_v31 = vsel %vm2961_vm5, %v3007_v27, %v3008_v7  ;;  %v9264_v27 = vld [vmem:[#allocation2 + $0x2f0] sm:$0xff] }
 0x3c7   : > { %15108 = vst [vmem:[#allocation114_spill] sm:$0xff] %v11856_v31  ;;  %v3010_v26 = vrot.slane %v9264_v27, 3 }
 0x3c8   : > { %v2682_v18 = vpop.f32.mrf.mxu1 }
 0x3c9   : > { %v3131_v19 = vpop.f32.mrf.mxu3  ;;  %8385 = vmatmul.msk.f32.gmra.mxu2 %vm271_vm1, %v11844_v14  ;;  %v11876_v13 = vsel %vm2961_vm5, %v3008_v7, %v3010_v26  ;;  %v3013_v7 = vrot.slane %v11760_v42, 3 }
 0x3ca   : > { %v3225_v30 = vadd.f32 %v3131_v19, %v2928_v22  ;;  %v3314_v3 = vpop.f32.mrf.mxu0  ;;  %v11872_v22 = vld [vmem:[#allocation2 + $0x3a0] sm:$0xff] }
 0x3cb   : > { %8352 = vmatmul.msk.f32.gmra.mxu1 %vm271_vm1, %v11721_v47  ;;  %v2573_v19 = vrot.slane %v11872_v22, 5 }
 0x3cc   : > { %v11861_v5 = vadd.f32 %v3308_v36, %v3225_v30  ;;  %v2837_v12 = vpop.f32.mrf.mxu2  ;;  %v2572_v36 = vrot.slane %v9265_v35, 5 }
 0x3cd   : > { %8454 = vmatmul.msk.f32.gmra.mxu0 %vm271_vm1, %v11859_v50  ;;  %v2929_v30 = vadd.f32 %v2837_v12, %v2771_v45  ;;  %v2772_v45 = vadd.f32 %v2682_v18, %v11333_v54 }
 0x3ce   : > { %15110 = vst [vmem:[#allocation116_spill] sm:$0xff] %v11861_v5  ;;  %8419 = vmatmul.msk.f32.gmra.mxu3 %vm271_vm1, %v11856_v31  ;;  %v11879_v27 = vsel %vm2506_vm4, %v2572_v36, %v2573_v19 }
 0x3d0   : > { %v2685_v15 = vpop.f32.mrf.mxu1 }
 0x3d1   : > { %v3134_v5 = vpop.f32.mrf.mxu3  ;;  %8386 = vmatmul.msk.f32.gmra.mxu2 %vm271_vm1, %v11847_v25 }
 0x3d2   : > { %v3226_v14 = vadd.f32 %v3134_v5, %v2929_v30  ;;  %v3317_v47 = vpop.f32.mrf.mxu0  ;;  %v3012_v5 = vrot.slane %v11734_v10, 3 }
 0x3d3   : > { %8353 = vmatmul.msk.f32.gmra.mxu1 %vm271_vm1, %v11741_v11 }
 0x3d4   : > { %v11881_v31 = vadd.f32 %v3311_v8, %v3226_v14  ;;  %v2840_v8 = vpop.f32.mrf.mxu2  ;;  %v11894_v14 = vld [vmem:[#allocation2 + $0x3a8] sm:$0xff]  ;;  %v11898_v54 = vsel %vm2961_vm5, %v3012_v5, %v3013_v7  ;;  %v9268_v5 = vld [vmem:[#allocation2 + $0x320] sm:$0xff] }
 0x3d5   : > { %8455 = vmatmul.msk.f32.gmra.mxu0 %vm271_vm1, %v11879_v27  ;;  %v2575_v26 = vrot.slane %v11894_v14, 5  ;;  %v2930_v12 = vadd.f32 %v2840_v8, %v2772_v45  ;;  %15112 = vst [vmem:[#allocation118_spill] sm:$0xff] %v11898_v54  ;;  %v2773_v45 = vadd.f32 %v2685_v15, %v11343_v59  ;;  %v3015_v8 = vrot.slane %v9268_v5, 3 }
 0x3d6   : > { %15111 = vst [vmem:[#allocation117_spill] sm:$0xff] %v11881_v31  ;;  %8420 = vmatmul.msk.f32.gmra.mxu3 %vm271_vm1, %v11876_v13 }
 0x3d7   : > { %v11901_v31 = vsel %vm2506_vm4, %v2573_v19, %v2575_v26  ;;  %v9269_v26 = vld [vmem:[#allocation2 + $0x3c8] sm:$0xff]  ;;  %v11918_v59 = vsel %vm2961_vm5, %v3013_v7, %v3015_v8  ;;  %v3018_v7 = vrot.slane %v11806_v23, 3 }
 0x3d8   : > { %v2688_v18 = vpop.f32.mrf.mxu1  ;;  %15113 = vst [vmem:[#allocation119_spill] sm:$0xff] %v11901_v31 }
 0x3d9   : > { %v3137_v35 = vpop.f32.mrf.mxu3  ;;  %8387 = vmatmul.msk.f32.gmra.mxu2 %vm271_vm1, %v11734_v10 }
 0x3da   : > { %v3227_v36 = vadd.f32 %v3137_v35, %v2930_v12  ;;  %v3320_v30 = vpop.f32.mrf.mxu0  ;;  %v11914_v12 = vld [vmem:[#allocation2 + $0x3d0] sm:$0xff] }
 0x3db   : > { %8354 = vmatmul.msk.f32.gmra.mxu1 %vm271_vm1, %v11767_v57  ;;  %v2578_v35 = vrot.slane %v11914_v12, 5 }
 0x3dc   : > { %v11903_v11 = vadd.f32 %v3314_v3, %v3227_v36  ;;  %v2843_v19 = vpop.f32.mrf.mxu2  ;;  %v2577_v3 = vrot.slane %v9269_v26, 5 }
 0x3dd   : > { %8456 = vmatmul.msk.f32.gmra.mxu0 %vm271_vm1, %v11901_v31  ;;  %v2931_v36 = vadd.f32 %v2843_v19, %v2773_v45  ;;  %v2774_v45 = vadd.f32 %v2688_v18, %v11353_v21 }
 0x3de   : > { %15114 = vst [vmem:[#allocation120_spill] sm:$0xff] %v11903_v11  ;;  %8421 = vmatmul.msk.f32.gmra.mxu3 %vm271_vm1, %v11898_v54  ;;  %v11921_v5 = vsel %vm2506_vm4, %v2577_v3, %v2578_v35 }
 0x3e0   : > { %v2691_v15 = vpop.f32.mrf.mxu1 }
 0x3e1   : > { %v3140_v11 = vpop.f32.mrf.mxu3  ;;  %8388 = vmatmul.msk.f32.gmra.mxu2 %vm271_vm1, %v11760_v42 }
 0x3e2   : > { %v3228_v10 = vadd.f32 %v3140_v11, %v2931_v36  ;;  %v3323_v57 = vpop.f32.mrf.mxu0  ;;  %v3017_v11 = vrot.slane %v11780_v48, 3 }
 0x3e3   : > { %8355 = vmatmul.msk.f32.gmra.mxu1 %vm271_vm1, %v11787_v32 }
 0x3e4   : > { %v11923_v54 = vadd.f32 %v3317_v47, %v3228_v10  ;;  %v2846_v47 = vpop.f32.mrf.mxu2  ;;  %v11936_v10 = vld [vmem:[#allocation2 + $0x3d8] sm:$0xff]  ;;  %v11940_v21 = vsel %vm2961_vm5, %v3017_v11, %v3018_v7  ;;  %v9272_v11 = vld [vmem:[#allocation2 + $0x350] sm:$0xff] }
 0x3e5   : > { %8457 = vmatmul.msk.f32.gmra.mxu0 %vm271_vm1, %v11921_v5  ;;  %v2580_v8 = vrot.slane %v11936_v10, 5  ;;  %v2932_v19 = vadd.f32 %v2846_v47, %v2774_v45  ;;  %15116 = vst [vmem:[#allocation122_spill] sm:$0xff] %v11940_v21  ;;  %v2775_v45 = vadd.f32 %v2691_v15, %v11363_v41  ;;  %v3020_v47 = vrot.slane %v9272_v11, 3 }
 0x3e6   : > { %15115 = vst [vmem:[#allocation121_spill] sm:$0xff] %v11923_v54  ;;  %8422 = vmatmul.msk.f32.gmra.mxu3 %vm271_vm1, %v11918_v59 }
 0x3e7   : > { %v11943_v54 = vsel %vm2506_vm4, %v2578_v35, %v2580_v8  ;;  %v9273_v8 = vld [vmem:[#allocation2 + $0x3f8] sm:$0xff]  ;;  %v11960_v41 = vsel %vm2961_vm5, %v3018_v7, %v3020_v47  ;;  %v3023_v7 = vrot.slane %v11852_v0, 3 }
 0x3e8   : > { %v2694_v18 = vpop.f32.mrf.mxu1 }
 0x3e9   : > { %v3143_v26 = vpop.f32.mrf.mxu3  ;;  %8389 = vmatmul.msk.f32.gmra.mxu2 %vm271_vm1, %v11780_v48 }
 0x3ea   : > { %v3229_v3 = vadd.f32 %v3143_v26, %v2932_v19  ;;  %v3326_v36 = vpop.f32.mrf.mxu0  ;;  %v11956_v19 = vld [vmem:[#allocation2 + $0x400] sm:$0xff] }
 0x3eb   : > { %8356 = vmatmul.msk.f32.gmra.mxu1 %vm271_vm1, %v11813_v1  ;;  %v2583_v26 = vrot.slane %v11956_v19, 5 }
 0x3ec   : > { %v11945_v32 = vadd.f32 %v3320_v30, %v3229_v3  ;;  %v2849_v35 = vpop.f32.mrf.mxu2  ;;  %v2582_v30 = vrot.slane %v9273_v8, 5 }
 0x3ed   : > { %8458 = vmatmul.msk.f32.gmra.mxu0 %vm271_vm1, %v11943_v54  ;;  %v2933_v3 = vadd.f32 %v2849_v35, %v2775_v45  ;;  %v2776_v45 = vadd.f32 %v2694_v18, %v11373_v9 }
 0x3ee   : > { %15117 = vst [vmem:[#allocation123_spill] sm:$0xff] %v11945_v32  ;;  %8423 = vmatmul.msk.f32.gmra.mxu3 %vm271_vm1, %v11940_v21  ;;  %v11963_v11 = vsel %vm2506_vm4, %v2582_v30, %v2583_v26 }
 0x3f0   : > { %v2697_v15 = vpop.f32.mrf.mxu1 }
 0x3f1   : > { %v3146_v32 = vpop.f32.mrf.mxu3  ;;  %8390 = vmatmul.msk.f32.gmra.mxu2 %vm271_vm1, %v11806_v23 }
 0x3f2   : > { %v3230_v48 = vadd.f32 %v3146_v32, %v2933_v3  ;;  %v3329_v1 = vpop.f32.mrf.mxu0  ;;  %v3022_v32 = vrot.slane %v11826_v33, 3 }
 0x3f3   : > { %8357 = vmatmul.msk.f32.gmra.mxu1 %vm271_vm1, %v11833_v56 }
 0x3f4   : > { %v11965_v21 = vadd.f32 %v3323_v57, %v3230_v48  ;;  %v2852_v57 = vpop.f32.mrf.mxu2  ;;  %v11978_v48 = vld [vmem:[#allocation2 + $0x408] sm:$0xff]  ;;  %v11982_v9 = vsel %vm2961_vm5, %v3022_v32, %v3023_v7  ;;  %v9276_v32 = vld [vmem:[#allocation2 + $0x380] sm:$0xff] }
 0x3f5   : > { %8459 = vmatmul.msk.f32.gmra.mxu0 %vm271_vm1, %v11963_v11  ;;  %v2585_v47 = vrot.slane %v11978_v48, 5  ;;  %v2934_v35 = vadd.f32 %v2852_v57, %v2776_v45  ;;  %15119 = vst [vmem:[#allocation125_spill] sm:$0xff] %v11982_v9  ;;  %v2777_v45 = vadd.f32 %v2697_v15, %v11383_v44  ;;  %v3025_v57 = vrot.slane %v9276_v32, 3 }
 0x3f6   : > { %15118 = vst [vmem:[#allocation124_spill] sm:$0xff] %v11965_v21  ;;  %8424 = vmatmul.msk.f32.gmra.mxu3 %vm271_vm1, %v11960_v41 }
 0x3f7   : > { %v11985_v21 = vsel %vm2506_vm4, %v2583_v26, %v2585_v47  ;;  %v9277_v47 = vld [vmem:[#allocation2 + $0x428] sm:$0xff]  ;;  %v12002_v44 = vsel %vm2961_vm5, %v3023_v7, %v3025_v57  ;;  %v3028_v7 = vrot.slane %v11894_v14, 3 }
 0x3f8   : > { %v2700_v18 = vpop.f32.mrf.mxu1 }
 0x3f9   : > { %v3149_v8 = vpop.f32.mrf.mxu3  ;;  %8391 = vmatmul.msk.f32.gmra.mxu2 %vm271_vm1, %v11826_v33 }
 0x3fa   : > { %v3231_v30 = vadd.f32 %v3149_v8, %v2934_v35  ;;  %v3332_v3 = vpop.f32.mrf.mxu0  ;;  %v11998_v35 = vld [vmem:[#allocation2 + $0x430] sm:$0xff] }
 0x3fb   : > { %8358 = vmatmul.msk.f32.gmra.mxu1 %vm271_vm1, %v11859_v50  ;;  %15121 = vst [vmem:[#allocation127_spill] sm:$0xff] %v11998_v35  ;;  %v3257_v8 = vrot.slane %v11998_v35, 5 }
 0x3fc   : > { %v11987_v56 = vadd.f32 %v3326_v36, %v3231_v30  ;;  %v2855_v26 = vpop.f32.mrf.mxu2  ;;  %v3256_v36 = vrot.slane %v9277_v47, 5 }
 0x3fd   : > { %8460 = vmatmul.msk.f32.gmra.mxu0 %vm271_vm1, %v11985_v21  ;;  %v2935_v30 = vadd.f32 %v2855_v26, %v2777_v45  ;;  %v2778_v45 = vadd.f32 %v2700_v18, %v11393_v17 }
 0x3fe   : > { %15120 = vst [vmem:[#allocation126_spill] sm:$0xff] %v11987_v56  ;;  %8425 = vmatmul.msk.f32.gmra.mxu3 %vm271_vm1, %v11982_v9  ;;  %v12005_v32 = vsel %vm2506_vm4, %v3256_v36, %v3257_v8 }
 0x3ff   : > { %15122 = vst [vmem:[#allocation128_spill] sm:$0xff] %v12005_v32 }
 0x400   : > { %v2703_v15 = vpop.f32.mrf.mxu1 }
 0x401   : > { %v3152_v56 = vpop.f32.mrf.mxu3  ;;  %8392 = vmatmul.msk.f32.gmra.mxu2 %vm271_vm1, %v11852_v0 }
 0x402   : > { %v3232_v33 = vadd.f32 %v3152_v56, %v2935_v30  ;;  %v3335_v50 = vpop.f32.mrf.mxu0  ;;  %v3027_v56 = vrot.slane %v11872_v22, 3 }
 0x403   : > { %8359 = vmatmul.msk.f32.gmra.mxu1 %vm271_vm1, %v11879_v27 }
 0x404   : > { %v12007_v9 = vadd.f32 %v3329_v1, %v3232_v33  ;;  %v2858_v1 = vpop.f32.mrf.mxu2  ;;  %v12020_v33 = vld [vmem:[#allocation2 + $0x438] sm:$0xff]  ;;  %v12024_v17 = vsel %vm2961_vm5, %v3027_v56, %v3028_v7  ;;  %v9280_v56 = vld [vmem:[#allocation2 + $0x3b0] sm:$0xff] }
 0x405   : > { %8461 = vmatmul.msk.f32.gmra.mxu0 %vm271_vm1, %v12005_v32  ;;  %15124 = vst [vmem:[#allocation130_spill] sm:$0xff] %v12020_v33  ;;  %v3259_v57 = vrot.slane %v12020_v33, 5  ;;  %v2936_v26 = vadd.f32 %v2858_v1, %v2778_v45  ;;  %v2779_v45 = vadd.f32 %v2703_v15, %v11406_v4  ;;  %v3030_v1 = vrot.slane %v9280_v56, 3 }
 0x406   : > { %15123 = vst [vmem:[#allocation129_spill] sm:$0xff] %v12007_v9  ;;  %8426 = vmatmul.msk.f32.gmra.mxu3 %vm271_vm1, %v12002_v44 }
 0x407   : > { %v12027_v9 = vsel %vm2506_vm4, %v3257_v8, %v3259_v57  ;;  %v9281_v57 = vld [vmem:[#allocation2 + $0x458] sm:$0xff]  ;;  %v12044_v4 = vsel %vm2961_vm5, %v3028_v7, %v3030_v1  ;;  %v3033_v7 = vrot.slane %v11936_v10, 3 }
 0x408   : > { %v2706_v18 = vpop.f32.mrf.mxu1  ;;  %15125 = vst [vmem:[#allocation131_spill] sm:$0xff] %v12027_v9 }
 0x409   : > { %v3155_v47 = vpop.f32.mrf.mxu3  ;;  %8393 = vmatmul.msk.f32.gmra.mxu2 %vm271_vm1, %v11872_v22 }
 0x40a   : > { %v3233_v36 = vadd.f32 %v3155_v47, %v2936_v26  ;;  %v3338_v30 = vpop.f32.mrf.mxu0  ;;  %v12040_v26 = vld [vmem:[#allocation2 + $0x460] sm:$0xff] }
 0x40b   : > { %8360 = vmatmul.msk.f32.gmra.mxu1 %vm271_vm1, %v11901_v31  ;;  %15127 = vst [vmem:[#allocation133_spill] sm:$0xff] %v12040_v26  ;;  %v3262_v47 = vrot.slane %v12040_v26, 5 }
 0x40c   : > { %v12029_v35 = vadd.f32 %v3332_v3, %v3233_v36  ;;  %v2861_v8 = vpop.f32.mrf.mxu2  ;;  %v3261_v3 = vrot.slane %v9281_v57, 5 }
 0x40d   : > { %8462 = vmatmul.msk.f32.gmra.mxu0 %vm271_vm1, %v12027_v9  ;;  %v2937_v36 = vadd.f32 %v2861_v8, %v2779_v45  ;;  %v2780_v45 = vadd.f32 %v2706_v18, %v11423_v2 }
 0x40e   : > { %15126 = vst [vmem:[#allocation132_spill] sm:$0xff] %v12029_v35  ;;  %8427 = vmatmul.msk.f32.gmra.mxu3 %vm271_vm1, %v12024_v17  ;;  %v12047_v56 = vsel %vm2506_vm4, %v3261_v3, %v3262_v47 }
 0x40f   : > { %15128 = vst [vmem:[#allocation134_spill] sm:$0xff] %v12047_v56 }
 0x410   : > { %v2709_v15 = vpop.f32.mrf.mxu1 }
 0x411   : > { %v3158_v35 = vpop.f32.mrf.mxu3  ;;  %8394 = vmatmul.msk.f32.gmra.mxu2 %vm271_vm1, %v11894_v14 }
 0x412   : > { %v3234_v32 = vadd.f32 %v3158_v35, %v2937_v36  ;;  %v3341_v33 = vpop.f32.mrf.mxu0  ;;  %v3032_v35 = vrot.slane %v11914_v12, 3 }
 0x413   : > { %8361 = vmatmul.msk.f32.gmra.mxu1 %vm271_vm1, %v11921_v5 }
 0x414   : > { %v12049_v31 = vadd.f32 %v3335_v50, %v3234_v32  ;;  %v2864_v50 = vpop.f32.mrf.mxu2  ;;  %v12062_v32 = vld [vmem:[#allocation2 + $0x468] sm:$0xff]  ;;  %v12066_v2 = vsel %vm2961_vm5, %v3032_v35, %v3033_v7 }
 0x415   : > { %8463 = vmatmul.msk.f32.gmra.mxu0 %vm271_vm1, %v12047_v56  ;;  %15130 = vst [vmem:[#allocation136_spill] sm:$0xff] %v12062_v32  ;;  %v3264_v1 = vrot.slane %v12062_v32, 5  ;;  %v2938_v8 = vadd.f32 %v2864_v50, %v2780_v45  ;;  %v8637_v56 = vld [vmem:[%s14634_s2 + $0x44] sm:$0xf]  ;;  %v8671_v45 = vld [vmem:[%s14634_s2 + $0x48] sm:$0xf] }
 0x416   : > { %15129 = vst [vmem:[#allocation135_spill] sm:$0xff] %v12049_v31  ;;  %8428 = vmatmul.msk.f32.gmra.mxu3 %vm271_vm1, %v12044_v4  ;;  %8638 = vmatpush.msk.msrb.mxu2 %vm940_vm0, %v8637_v56 }
 0x417   : > { %v12069_v31 = vsel %vm2506_vm4, %v3262_v47, %v3264_v1  ;;  %v2781_v47 = vadd.f32 %v2709_v15, %v11449_v37  ;;  %v9285_v1 = vld [vmem:[#allocation2 + $0x488] sm:$0xff]  ;;  %8672 = vmatpush.msk.msrb.mxu3 %vm940_vm0, %v8671_v45  ;;  %v8603_v37 = vld [vmem:[%s14634_s2 + $0x40] sm:$0xf]  ;;  %v3037_v45 = vrot.slane %v11956_v19, 3 }
 0x418   : > { %v2712_v18 = vpop.f32.mrf.mxu1  ;;  %15131 = vst [vmem:[#allocation137_spill] sm:$0xff] %v12069_v31  ;;  %8604 = vmatpush.msk.msrb.mxu1 %vm940_vm0, %v8603_v37 }
 0x419   : > { %v3161_v57 = vpop.f32.mrf.mxu3  ;;  %8395 = vmatmul.msk.f32.gmra.mxu2 %vm271_vm1, %v11914_v12 }
 0x41a   : > { %v3235_v3 = vadd.f32 %v3161_v57, %v2938_v8  ;;  %v3344_v36 = vpop.f32.mrf.mxu0  ;;  %v3266_v8 = vrot.slane %v9285_v1, 5  ;;  %v12089_v57 = vld [vmem:[#allocation2 + $0x490] sm:$0xff] }
 0x41b   : > { %8362 = vmatmul.msk.f32.gmra.mxu1 %vm271_vm1, %v11943_v54  ;;  %15133 = vst [vmem:[#allocation139_spill] sm:$0xff] %v12089_v57  ;;  %v3267_v56 = vrot.slane %v12089_v57, 5 }
 0x41c   : > { %v12071_v9 = vadd.f32 %v3338_v30, %v3235_v3  ;;  %v9284_v30 = vld [vmem:[#allocation2 + $0x3e0] sm:$0xff]  ;;  %v2867_v50 = vpop.f32.mrf.mxu2 }
 0x41d   : > { %v3035_v35 = vrot.slane %v9284_v30, 3  ;;  %8464 = vmatmul.msk.f32.gmra.mxu0 %vm271_vm1, %v12069_v31  ;;  %v2939_v3 = vadd.f32 %v2867_v50, %v2781_v47  ;;  %v12101_v32 = vsel %vm2506_vm4, %v3266_v8, %v3267_v56 }
 0x41e   : > { %15132 = vst [vmem:[#allocation138_spill] sm:$0xff] %v12071_v9  ;;  %8429 = vmatmul.msk.f32.gmra.mxu3 %vm271_vm1, %v12066_v2 }
 0x41f   : > { %v12098_v30 = vsel %vm2961_vm5, %v3033_v7, %v3035_v35  ;;  %v2782_v7 = vadd.f32 %v2712_v18, %v11476_v51  ;;  %v12119_v35 = vld [vmem:[#allocation2 + $0x498] sm:$0xff] }
 0x420   : > { %v2715_v31 = vpop.f32.mrf.mxu1  ;;  %v3269_v50 = vrot.slane %v12119_v35, 5 }
 0x421   : > { %v3164_v9 = vpop.f32.mrf.mxu3  ;;  %8396 = vmatmul.msk.f32.gmra.mxu2 %vm271_vm1, %v11936_v10 }
 0x422   : > { %v3236_v15 = vadd.f32 %v3164_v9, %v2939_v3  ;;  %v3347_v1 = vpop.f32.mrf.mxu0  ;;  %v8705_v9 = vld [vmem:[%s14634_s2 + $0x4c] sm:$0xf] }
 0x423   : > { %8363 = vmatmul.msk.f32.gmra.mxu1 %vm271_vm1, %v11963_v11  ;;  %8706 = vmatpush.msk.msrb.mxu0 %vm940_vm0, %v8705_v9  ;;  %v2783_v9 = vadd.f32 %v2715_v31, %v11494_v16 }
 0x424   : > { %v12103_v57 = vadd.f32 %v3341_v33, %v3236_v15  ;;  %v3038_v33 = vrot.slane %v11978_v48, 3  ;;  %v2870_v47 = vpop.f32.mrf.mxu2 }
 0x425   : > { %8465 = vmatmul.msk.f32.gmra.mxu0 %vm271_vm1, %v12101_v32  ;;  %v2940_v8 = vadd.f32 %v2870_v47, %v2782_v7  ;;  %v9288_v7 = vld [vmem:[#allocation2 + $0x410] sm:$0xff] }
 0x426   : > { %15134 = vst [vmem:[#allocation140_spill] sm:$0xff] %v12103_v57  ;;  %8430 = vmatmul.msk.f32.gmra.mxu3 %vm271_vm1, %v12098_v30  ;;  %v12124_v18 = vsel %vm2961_vm5, %v3037_v45, %v3038_v33  ;;  %v12127_v57 = vsel %vm2506_vm4, %v3267_v56, %v3269_v50  ;;  %v3040_v45 = vrot.slane %v9288_v7, 3 }
 0x428   : > { %v2718_v37 = vpop.f32.mrf.mxu1 }
 0x429   : > { %v3167_v3 = vpop.f32.mrf.mxu3  ;;  %8397 = vmatmul.msk.f32.gmra.mxu2 %vm271_vm1, %v11956_v19  ;;  %v2784_v16 = vadd.f32 %v2718_v37, %v11510_v43 }
 0x42a   : > { %v3237_v51 = vadd.f32 %v3167_v3, %v2940_v8  ;;  %v3350_v15 = vpop.f32.mrf.mxu0  ;;  %v12141_v8 = vsel %vm2961_vm5, %v3038_v33, %v3040_v45 }
 0x42b   : > { %8364 = vmatmul.msk.f32.gmra.mxu1 %vm271_vm1, %v11985_v21 }
 0x42c   : > { %v12129_v26 = vadd.f32 %v3344_v36, %v3237_v51  ;;  %v2873_v56 = vpop.f32.mrf.mxu2 }
 0x42d   : > { %8466 = vmatmul.msk.f32.gmra.mxu0 %vm271_vm1, %v12127_v57  ;;  %v2941_v47 = vadd.f32 %v2873_v56, %v2783_v9 }
 0x42e   : > { %15135 = vst [vmem:[#allocation141_spill] sm:$0xff] %v12129_v26  ;;  %8431 = vmatmul.msk.f32.gmra.mxu3 %vm271_vm1, %v12124_v18 }
 0x430   : > { %v2721_v3 = vpop.f32.mrf.mxu1 }
 0x431   : > { %v3170_v36 = vpop.f32.mrf.mxu3  ;;  %8398 = vmatmul.msk.f32.gmra.mxu2 %vm271_vm1, %v11978_v48  ;;  %v2785_v43 = vadd.f32 %v2721_v3, %v11526_v61 }
 0x432   : > { %v3238_v50 = vadd.f32 %v3170_v36, %v2941_v47  ;;  %v3353_v51 = vpop.f32.mrf.mxu0 }
 0x433   : > { %8469 = vmatmul.msk.f32.vlgmr.msra.gmra.mxu1 %vm271_vm1, %v11600_v28 }
 0x434   : > { %v12143_v26 = vadd.f32 %v3347_v1, %v3238_v50  ;;  %v2876_v31 = vpop.f32.mrf.mxu2 }
 0x435   : > { %8571 = vmatmul.msk.f32.vlgmr.msra.gmra.mxu0 %vm271_vm1, %v11718_v20  ;;  %v2942_v33 = vadd.f32 %v2876_v31, %v2784_v16 }
 0x436   : > { %8432 = vmatmul.msk.f32.gmra.mxu3 %vm271_vm1, %v12141_v8 }
 0x438   : > { %v2724_v1 = vpop.f32.mrf.mxu1 }
 0x439   : > { %v3173_v9 = vpop.f32.mrf.mxu3  ;;  %8503 = vmatmul.msk.f32.vlgmr.msra.gmra.mxu2 %vm271_vm1, %v11585_v60  ;;  %v2786_v61 = vadd.f32 %v2724_v1, %v11542_v46  ;;  %v15136_v46 = vld [vmem:[#allocation66_spill] sm:$0xff] }
 0x43a   : > { %v3239_v7 = vadd.f32 %v3173_v9, %v2942_v33  ;;  %v3356_v45 = vpop.f32.mrf.mxu0 }
 0x43b   : > { %8470 = vmatmul.msk.f32.gmra.mxu1 %vm271_vm1, %v11618_v40 }
 0x43c   : > { %v12154_v56 = vadd.f32 %v3350_v15, %v3239_v7  ;;  %v2879_v28 = vpop.f32.mrf.mxu2 }
 0x43d   : > { %8572 = vmatmul.msk.f32.gmra.mxu0 %vm271_vm1, %v11738_v58  ;;  %v2943_v37 = vadd.f32 %v2879_v28, %v2785_v43 }
 0x43e   : > { %8537 = vmatmul.msk.f32.vlgmr.msra.gmra.mxu3 %vm271_vm1, %v11708_v29 }
 0x440   : > { %v2727_v15 = vpop.f32.mrf.mxu1 }
 0x441   : > { %v3176_v47 = vpop.f32.mrf.mxu3  ;;  %8504 = vmatmul.msk.f32.gmra.mxu2 %vm271_vm1, %v11603_v38  ;;  %v2787_v38 = vadd.f32 %v2727_v15, %v15136_v46 }
 0x442   : > { %v3240_v36 = vadd.f32 %v3176_v47, %v2943_v37  ;;  %v3359_v50 = vpop.f32.mrf.mxu0 }
 0x443   : > { %8471 = vmatmul.msk.f32.gmra.mxu1 %vm271_vm1, %v11638_v62 }
 0x444   : > { %v12165_v16 = vadd.f32 %v3353_v51, %v3240_v36  ;;  %v2882_v60 = vpop.f32.mrf.mxu2 }
 0x445   : > { %8573 = vmatmul.msk.f32.gmra.mxu0 %vm271_vm1, %v11764_v53  ;;  %v2944_v40 = vadd.f32 %v2882_v60, %v2786_v61 }
 0x446   : > { %8538 = vmatmul.msk.f32.gmra.mxu3 %vm271_vm1, %v11711_v6 }
 0x448   : > { %v2730_v51 = vpop.f32.mrf.mxu1 }
 0x449   : > { %v3179_v29 = vpop.f32.mrf.mxu3  ;;  %8505 = vmatmul.msk.f32.gmra.mxu2 %vm271_vm1, %v11621_v24  ;;  %v2788_v24 = vadd.f32 %v2730_v51, %v11574_v34  ;;  %v15141_v34 = vld [vmem:[#allocation39_spill] sm:$0xff] }
 0x44a   : > { %v3241_v3 = vadd.f32 %v3179_v29, %v2944_v40  ;;  %v3362_v31 = vpop.f32.mrf.mxu0  ;;  %v15142_v40 = vld [vmem:[#allocation82_spill] sm:$0xff] }
 0x44b   : > { %8472 = vmatmul.msk.f32.gmra.mxu1 %vm271_vm1, %v11656_v55  ;;  %v15137_v55 = vld [vmem:[#allocation90_spill] sm:$0xff] }
 0x44c   : > { %v12176_v33 = vadd.f32 %v3356_v45, %v3241_v3  ;;  %v2885_v62 = vpop.f32.mrf.mxu2  ;;  %v15143_v29 = vld [vmem:[#allocation78_spill] sm:$0xff] }
 0x44d   : > { %8574 = vmatmul.msk.f32.gmra.mxu0 %vm271_vm1, %v11784_v52  ;;  %v2945_v6 = vadd.f32 %v2885_v62, %v2787_v38 }
 0x44e   : > { %8539 = vmatmul.msk.f32.gmra.mxu3 %vm271_vm1, %v11752_v63  ;;  %v15138_v63 = vld [vmem:[#allocation54_spill] sm:$0xff] }
 0x450   : > { %v2733_v1 = vpop.f32.mrf.mxu1 }
 0x451   : > { %v3182_v9 = vpop.f32.mrf.mxu3  ;;  %8506 = vmatmul.msk.f32.gmra.mxu2 %vm271_vm1, %v11641_v39  ;;  %v15139_v39 = vld [vmem:[#allocation53_spill] sm:$0xff]  ;;  %v2789_v60 = vadd.f32 %v2733_v1, %v15141_v34  ;;  %v15146_v1 = vld [vmem:[#allocation68_spill] sm:$0xff]  ;;  %v15148_v34 = vld [vmem:[#allocation86_spill] sm:$0xff] }
 0x452   : > { %v3242_v7 = vadd.f32 %v3182_v9, %v2945_v6  ;;  %v3365_v45 = vpop.f32.mrf.mxu0  ;;  %v15144_v9 = vld [vmem:[#allocation79_spill] sm:$0xff] }
 0x453   : > { %8473 = vmatmul.msk.f32.gmra.mxu1 %vm271_vm1, %v15137_v55  ;;  %v15147_v55 = vld [vmem:[#allocation114_spill] sm:$0xff] }
 0x454   : > { %v12187_v43 = vadd.f32 %v3359_v50, %v3242_v7  ;;  %v2888_v28 = vpop.f32.mrf.mxu2  ;;  %v15145_v7 = vld [vmem:[#allocation43_spill] sm:$0xff] }
 0x455   : > { %8575 = vmatmul.msk.f32.gmra.mxu0 %vm271_vm1, %v15138_v63  ;;  %v2946_v37 = vadd.f32 %v2888_v28, %v2788_v24 }
 0x456   : > { %8540 = vmatmul.msk.f32.gmra.mxu3 %vm271_vm1, %v11755_v49  ;;  %v15140_v49 = vld [vmem:[#allocation110_spill] sm:$0xff] }
 0x458   : > { %v2736_v15 = vpop.f32.mrf.mxu1 }
 0x459   : > { %v3185_v47 = vpop.f32.mrf.mxu3  ;;  %8507 = vmatmul.msk.f32.gmra.mxu2 %vm271_vm1, %v15139_v39  ;;  %v2790_v24 = vadd.f32 %v2736_v15, %v15146_v1  ;;  %v15150_v15 = vld [vmem:[#allocation83_spill] sm:$0xff] }
 0x45a   : > { %v3243_v36 = vadd.f32 %v3185_v47, %v2946_v37  ;;  %v3368_v50 = vpop.f32.mrf.mxu0 }
 0x45b   : > { %8474 = vmatmul.msk.f32.gmra.mxu1 %vm271_vm1, %v15142_v40 }
 0x45c   : > { %v12198_v61 = vadd.f32 %v3362_v31, %v3243_v36  ;;  %v2891_v3 = vpop.f32.mrf.mxu2 }
 0x45d   : > { %8576 = vmatmul.msk.f32.gmra.mxu0 %vm271_vm1, %v15143_v29  ;;  %v2947_v51 = vadd.f32 %v2891_v3, %v2789_v60  ;;  %v15149_v60 = vld [vmem:[#allocation113_spill] sm:$0xff] }
 0x45e   : > { %8541 = vmatmul.msk.f32.gmra.mxu3 %vm271_vm1, %v15140_v49 }
 0x460   : > { %v2739_v31 = vpop.f32.mrf.mxu1 }
 0x461   : > { %v3188_v46 = vpop.f32.mrf.mxu3  ;;  %8508 = vmatmul.msk.f32.gmra.mxu2 %vm271_vm1, %v15144_v9  ;;  %v2791_v40 = vadd.f32 %v2739_v31, %v15150_v15  ;;  %v15152_v31 = vld [vmem:[#allocation72_spill] sm:$0xff] }
 0x462   : > { %v3244_v38 = vadd.f32 %v3188_v46, %v2947_v51  ;;  %v3371_v62 = vpop.f32.mrf.mxu0 }
 0x463   : > { %8475 = vmatmul.msk.f32.gmra.mxu1 %vm271_vm1, %v11718_v20 }
 0x464   : > { %v12209_v6 = vadd.f32 %v3365_v45, %v3244_v38  ;;  %v2894_v28 = vpop.f32.mrf.mxu2 }
 0x465   : > { %8577 = vmatmul.msk.f32.gmra.mxu0 %vm271_vm1, %v15147_v55  ;;  %v2948_v37 = vadd.f32 %v2894_v28, %v2790_v24 }
 0x466   : > { %8542 = vmatmul.msk.f32.gmra.mxu3 %vm271_vm1, %v15145_v7  ;;  %v15151_v7 = vld [vmem:[#allocation99_spill] sm:$0xff] }
 0x468   : > { %v2742_v45 = vpop.f32.mrf.mxu1 }
 0x469   : > { %v3191_v47 = vpop.f32.mrf.mxu3  ;;  %8509 = vmatmul.msk.f32.gmra.mxu2 %vm271_vm1, %v15148_v34  ;;  %v2792_v1 = vadd.f32 %v2742_v45, %v15152_v31  ;;  %v15156_v45 = vld [vmem:[#allocation75_spill] sm:$0xff] }
 0x46a   : > { %v3245_v36 = vadd.f32 %v3191_v47, %v2948_v37  ;;  %v3374_v39 = vpop.f32.mrf.mxu0 }
 0x46b   : > { %8476 = vmatmul.msk.f32.gmra.mxu1 %vm271_vm1, %v11738_v58  ;;  %v15153_v58 = vld [vmem:[#allocation118_spill] sm:$0xff] }
 0x46c   : > { %v12220_v49 = vadd.f32 %v3368_v50, %v3245_v36  ;;  %v2897_v20 = vpop.f32.mrf.mxu2 }
 0x46d   : > { %8578 = vmatmul.msk.f32.gmra.mxu0 %vm271_vm1, %v11876_v13  ;;  %v2949_v3 = vadd.f32 %v2897_v20, %v2791_v40 }
 0x46e   : > { %8543 = vmatmul.msk.f32.gmra.mxu3 %vm271_vm1, %v15149_v60  ;;  %v15154_v60 = vld [vmem:[#allocation102_spill] sm:$0xff] }
 0x470   : > { %v2745_v50 = vpop.f32.mrf.mxu1 }
 0x471   : > { %v3194_v51 = vpop.f32.mrf.mxu3  ;;  %8510 = vmatmul.msk.f32.gmra.mxu2 %vm271_vm1, %v15151_v7  ;;  %v2793_v15 = vadd.f32 %v2745_v50, %v15156_v45  ;;  %v15157_v7 = vld [vmem:[#allocation103_spill] sm:$0xff]  ;;  %v15158_v50 = vld [vmem:[#allocation20_spill] sm:$0xff] }
 0x472   : > { %v3246_v46 = vadd.f32 %v3194_v51, %v2949_v3  ;;  %v3377_v38 = vpop.f32.mrf.mxu0 }
 0x473   : > { %8477 = vmatmul.msk.f32.gmra.mxu1 %vm271_vm1, %v11764_v53 }
 0x474   : > { %v12231_v9 = vadd.f32 %v3371_v62, %v3246_v46  ;;  %v2900_v24 = vpop.f32.mrf.mxu2 }
 0x475   : > { %8579 = vmatmul.msk.f32.gmra.mxu0 %vm271_vm1, %v15153_v58  ;;  %v2950_v28 = vadd.f32 %v2900_v24, %v2792_v1 }
 0x476   : > { %8544 = vmatmul.msk.f32.gmra.mxu3 %vm271_vm1, %v11847_v25  ;;  %v15155_v25 = vld [vmem:[#allocation101_spill] sm:$0xff] }
 0x478   : > { %v2748_v62 = vpop.f32.mrf.mxu1 }
 0x479   : > { %v3197_v37 = vpop.f32.mrf.mxu3  ;;  %8511 = vmatmul.msk.f32.gmra.mxu2 %vm271_vm1, %v15154_v60  ;;  %v2794_v31 = vadd.f32 %v2748_v62, %v15158_v50  ;;  %v15162_v62 = vld [vmem:[#allocation89_spill] sm:$0xff] }
 0x47a   : > { %v3247_v47 = vadd.f32 %v3197_v37, %v2950_v28  ;;  %v3380_v36 = vpop.f32.mrf.mxu0 }
 0x47b   : > { %8478 = vmatmul.msk.f32.gmra.mxu1 %vm271_vm1, %v11784_v52  ;;  %v15159_v52 = vld [vmem:[#allocation122_spill] sm:$0xff] }
 0x47c   : > { %v12242_v34 = vadd.f32 %v3374_v39, %v3247_v47  ;;  %v2903_v53 = vpop.f32.mrf.mxu2 }
 0x47d   : > { %8580 = vmatmul.msk.f32.gmra.mxu0 %vm271_vm1, %v11918_v59  ;;  %v2951_v40 = vadd.f32 %v2903_v53, %v2793_v15 }
 0x47e   : > { %8545 = vmatmul.msk.f32.gmra.mxu3 %vm271_vm1, %v15155_v25  ;;  %v15160_v25 = vld [vmem:[#allocation55_spill] sm:$0xff] }
 0x480   : > { %v2751_v39 = vpop.f32.mrf.mxu1 }
 0x481   : > { %v3200_v20 = vpop.f32.mrf.mxu3  ;;  %8512 = vmatmul.msk.f32.gmra.mxu2 %vm271_vm1, %v15157_v7  ;;  %v2795_v45 = vadd.f32 %v2751_v39, %v15162_v62  ;;  %v15163_v7 = vld [vmem:[#allocation71_spill] sm:$0xff] }
 0x482   : > { %v3248_v3 = vadd.f32 %v3200_v20, %v2951_v40  ;;  %v3383_v51 = vpop.f32.mrf.mxu0  ;;  %v15164_v39 = vld [vmem:[#allocation31_spill] sm:$0xff] }
 0x483   : > { %8479 = vmatmul.msk.f32.gmra.mxu1 %vm271_vm1, %v15138_v63 }
 0x484   : > { %v12253_v46 = vadd.f32 %v3377_v38, %v3248_v3  ;;  %v2906_v1 = vpop.f32.mrf.mxu2 }
 0x485   : > { %8581 = vmatmul.msk.f32.gmra.mxu0 %vm271_vm1, %v15159_v52  ;;  %v2952_v24 = vadd.f32 %v2906_v1, %v2794_v31 }
 0x486   : > { %8546 = vmatmul.msk.f32.gmra.mxu3 %vm271_vm1, %v11760_v42  ;;  %v15161_v42 = vld [vmem:[#allocation107_spill] sm:$0xff] }
 0x488   : > { %v2754_v38 = vpop.f32.mrf.mxu1 }
 0x489   : > { %v3203_v28 = vpop.f32.mrf.mxu3  ;;  %8513 = vmatmul.msk.f32.gmra.mxu2 %vm271_vm1, %v15160_v25  ;;  %v2796_v50 = vadd.f32 %v2754_v38, %v15164_v39  ;;  %v15168_v38 = vld [vmem:[#allocation44_spill] sm:$0xff] }
 0x48a   : > { %v3249_v37 = vadd.f32 %v3203_v28, %v2952_v24  ;;  %v3386_v47 = vpop.f32.mrf.mxu0 }
 0x48b   : > { %8480 = vmatmul.msk.f32.gmra.mxu1 %vm271_vm1, %v15143_v29  ;;  %v15165_v29 = vld [vmem:[#allocation125_spill] sm:$0xff] }
 0x48c   : > { %v12264_v60 = vadd.f32 %v3380_v36, %v3249_v37  ;;  %v2909_v63 = vpop.f32.mrf.mxu2 }
 0x48d   : > { %8582 = vmatmul.msk.f32.gmra.mxu0 %vm271_vm1, %v11960_v41  ;;  %v2953_v15 = vadd.f32 %v2909_v63, %v2795_v45 }
 0x48e   : > { %8547 = vmatmul.msk.f32.gmra.mxu3 %vm271_vm1, %v15161_v42  ;;  %v15166_v42 = vld [vmem:[#allocation64_spill] sm:$0xff] }
 0x490   : > { %v2757_v36 = vpop.f32.mrf.mxu1 }
 0x491   : > { %v3206_v53 = vpop.f32.mrf.mxu3  ;;  %8514 = vmatmul.msk.f32.gmra.mxu2 %vm271_vm1, %v15163_v7  ;;  %v2797_v62 = vadd.f32 %v2757_v36, %v15168_v38  ;;  %v15169_v7 = vld [vmem:[#allocation115_spill] sm:$0xff]  ;;  %v15170_v36 = vld [vmem:[#allocation104_spill] sm:$0xff] }
 0x492   : > { %v3250_v40 = vadd.f32 %v3206_v53, %v2953_v15  ;;  %v3389_v20 = vpop.f32.mrf.mxu0 }
 0x493   : > { %8481 = vmatmul.msk.f32.gmra.mxu1 %vm271_vm1, %v15147_v55 }
 0x494   : > { %v12275_v3 = vadd.f32 %v3383_v51, %v3250_v40  ;;  %v2912_v31 = vpop.f32.mrf.mxu2 }
 0x495   : > { %8583 = vmatmul.msk.f32.gmra.mxu0 %vm271_vm1, %v15165_v29  ;;  %v2954_v1 = vadd.f32 %v2912_v31, %v2796_v50 }
 0x496   : > { %8548 = vmatmul.msk.f32.gmra.mxu3 %vm271_vm1, %v11806_v23  ;;  %v15167_v23 = vld [vmem:[#allocation50_spill] sm:$0xff] }
 0x498   : > { %v2760_v51 = vpop.f32.mrf.mxu1 }
 0x499   : > { %v3209_v24 = vpop.f32.mrf.mxu3  ;;  %8515 = vmatmul.msk.f32.gmra.mxu2 %vm271_vm1, %v15166_v42  ;;  %v2798_v39 = vadd.f32 %v2760_v51, %v15170_v36 }
 0x49a   : > { %v3251_v28 = vadd.f32 %v3209_v24, %v2954_v1  ;;  %v3392_v37 = vpop.f32.mrf.mxu0 }
 0x49b   : > { %8482 = vmatmul.msk.f32.gmra.mxu1 %vm271_vm1, %v11876_v13 }
 0x49c   : > { %v12286_v25 = vadd.f32 %v3386_v47, %v3251_v28  ;;  %v2915_v55 = vpop.f32.mrf.mxu2 }
 0x49d   : > { %8584 = vmatmul.msk.f32.gmra.mxu0 %vm271_vm1, %v12002_v44  ;;  %v2955_v45 = vadd.f32 %v2915_v55, %v2797_v62 }
 0x49e   : > { %8549 = vmatmul.msk.f32.gmra.mxu3 %vm271_vm1, %v15167_v23 }
 0x4a0   : > { %v2763_v47 = vpop.f32.mrf.mxu1 }
 0x4a1   : > { %v3212_v63 = vpop.f32.mrf.mxu3  ;;  %8516 = vmatmul.msk.f32.gmra.mxu2 %vm271_vm1, %v15169_v7 }
 0x4a2   : > { %v3252_v15 = vadd.f32 %v3212_v63, %v2955_v45  ;;  %v3395_v53 = vpop.f32.mrf.mxu0 }
 0x4a3   : > { %8483 = vmatmul.msk.f32.gmra.mxu1 %vm271_vm1, %v15153_v58 }
 0x4a4   : > { %v12297_v40 = vadd.f32 %v3389_v20, %v3252_v15  ;;  %v2918_v13 = vpop.f32.mrf.mxu2 }
 0x4a5   : > { %8585 = vmatmul.msk.f32.gmra.mxu0 %vm271_vm1, %v12024_v17  ;;  %v2956_v50 = vadd.f32 %v2918_v13, %v2798_v39 }
 0x4a6   : > { %8550 = vmatmul.msk.f32.gmra.mxu3 %vm271_vm1, %v11852_v0  ;;  %v15171_v0 = vld [vmem:[#allocation105_spill] sm:$0xff] }
 0x4a7   : > { %v2799_v51 = vadd.f32 %v2763_v47, %v15171_v0 }
 0x4a8   : > { %v2766_v20 = vpop.f32.mrf.mxu1 }
 0x4a9   : > { %v3215_v31 = vpop.f32.mrf.mxu3  ;;  %8517 = vmatmul.msk.f32.gmra.mxu2 %vm271_vm1, %v11879_v27  ;;  %v15172_v27 = vld [vmem:[#allocation119_spill] sm:$0xff] }
 0x4aa   : > { %v3253_v1 = vadd.f32 %v3215_v31, %v2956_v50  ;;  %v3398_v24 = vpop.f32.mrf.mxu0 }
 0x4ab   : > { %8484 = vmatmul.msk.f32.gmra.mxu1 %vm271_vm1, %v11918_v59 }
 0x4ac   : > { %v12308_v28 = vadd.f32 %v3392_v37, %v3253_v1  ;;  %v2921_v58 = vpop.f32.mrf.mxu2 }
 0x4ad   : > { %8586 = vmatmul.msk.f32.gmra.mxu0 %vm271_vm1, %v12044_v4  ;;  %v2957_v42 = vadd.f32 %v2921_v58, %v2799_v51 }
 0x4ae   : > { %8551 = vmatmul.msk.f32.gmra.mxu3 %vm271_vm1, %v11872_v22  ;;  %v15173_v22 = vld [vmem:[#allocation74_spill] sm:$0xff] }
 0x4af   : > { %v2800_v45 = vadd.f32 %v2766_v20, %v15173_v22 }
 0x4b0   : > { %v3482_v37 = vpop.f32.mrf.mxu1 }
 0x4b1   : > { %v3218_v23 = vpop.f32.mrf.mxu3  ;;  %8518 = vmatmul.msk.f32.gmra.mxu2 %vm271_vm1, %v15172_v27  ;;  %v15178_v27 = vld [vmem:[#allocation130_spill] sm:$0xff] }
 0x4b2   : > { %v3254_v38 = vadd.f32 %v3218_v23, %v2957_v42  ;;  %v4002_v62 = vpop.f32.mrf.mxu0  ;;  %v3434_v22 = vrot.slane %v15178_v27, 3 }
 0x4b3   : > { %8485 = vmatmul.msk.f32.gmra.mxu1 %vm271_vm1, %v15159_v52 }
 0x4b4   : > { %v12319_v55 = vadd.f32 %v3395_v53, %v3254_v38  ;;  %v2924_v59 = vpop.f32.mrf.mxu2 }
 0x4b5   : > { %8587 = vmatmul.msk.f32.gmra.mxu0 %vm271_vm1, %v12066_v2  ;;  %v2958_v63 = vadd.f32 %v2924_v59, %v2800_v45 }
 0x4b6   : > { %8552 = vmatmul.msk.f32.gmra.mxu3 %vm271_vm1, %v11894_v14  ;;  %v15174_v14 = vld [vmem:[#allocation18_spill] sm:$0xff] }
 0x4b7   : > { %v3578_v39 = vadd.f32 %v3482_v37, %v15174_v14  ;;  %v15177_v37 = vld [vmem:[#allocation127_spill] sm:$0xff]  ;;  %v9289_v14 = vld [vmem:[#allocation2 + $0x440] sm:$0xff] }
 0x4b8   : > { %v3485_v53 = vpop.f32.mrf.mxu1 }
 0x4b9   : > { %v3221_v15 = vpop.f32.mrf.mxu3  ;;  %8519 = vmatmul.msk.f32.gmra.mxu2 %vm271_vm1, %v11921_v5 }
 0x4ba   : > { %v3255_v47 = vadd.f32 %v3221_v15, %v2958_v63  ;;  %v4005_v7 = vpop.f32.mrf.mxu0 }
 0x4bb   : > { %8486 = vmatmul.msk.f32.gmra.mxu1 %vm271_vm1, %v11960_v41 }
 0x4bc   : > { %v12330_v36 = vadd.f32 %v3398_v24, %v3255_v47  ;;  %v3665_v52 = vpop.f32.mrf.mxu2 }
 0x4bd   : > { %8588 = vmatmul.msk.f32.gmra.mxu0 %vm271_vm1, %v12098_v30  ;;  %v3761_v13 = vadd.f32 %v3665_v52, %v3578_v39  ;;  %v3436_v39 = vrot.slane %v9289_v14, 3 }
 0x4be   : > { %8553 = vmatmul.msk.f32.gmra.mxu3 %vm271_vm1, %v11914_v12  ;;  %v15175_v12 = vld [vmem:[#allocation116_spill] sm:$0xff] }
 0x4bf   : > { %v3579_v5 = vadd.f32 %v3485_v53, %v15175_v12 }
 0x4c0   : > { %v3488_v1 = vpop.f32.mrf.mxu1 }
 0x4c1   : > { %v3823_v50 = vpop.f32.mrf.mxu3  ;;  %8520 = vmatmul.msk.f32.gmra.mxu2 %vm271_vm1, %v11943_v54  ;;  %v15176_v54 = vld [vmem:[#allocation117_spill] sm:$0xff] }
 0x4c2   : > { %v3919_v31 = vadd.f32 %v3823_v50, %v3761_v13  ;;  %v4008_v20 = vpop.f32.mrf.mxu0 }
 0x4c3   : > { %8487 = vmatmul.msk.f32.gmra.mxu1 %vm271_vm1, %v15165_v29 }
 0x4c4   : > { %v12341_v24 = vadd.f32 %v4002_v62, %v3919_v31  ;;  %v3668_v41 = vpop.f32.mrf.mxu2  ;;  %v3433_v62 = vrot.slane %v15177_v37, 3 }
 0x4c5   : > { %8589 = vmatmul.msk.f32.gmra.mxu0 %vm271_vm1, %v12124_v18  ;;  %v3762_v0 = vadd.f32 %v3668_v41, %v3579_v5  ;;  %v15182_v41 = vld [vmem:[#allocation133_spill] sm:$0xff] }
 0x4c6   : > { %8554 = vmatmul.msk.f32.gmra.mxu3 %vm271_vm1, %v11936_v10  ;;  %v3580_v10 = vadd.f32 %v3488_v1, %v15176_v54 }
 0x4c8   : > { %v3491_v42 = vpop.f32.mrf.mxu1 }
 0x4c9   : > { %v3826_v51 = vpop.f32.mrf.mxu3  ;;  %8521 = vmatmul.msk.f32.gmra.mxu2 %vm271_vm1, %v11963_v11 }
 0x4ca   : > { %v3920_v58 = vadd.f32 %v3826_v51, %v3762_v0  ;;  %v4011_v23 = vpop.f32.mrf.mxu0  ;;  %v3438_v0 = vrot.slane %v15182_v41, 3  ;;  %v15183_v51 = vld [vmem:[#allocation136_spill] sm:$0xff] }
 0x4cb   : > { %8488 = vmatmul.msk.f32.gmra.mxu1 %vm271_vm1, %v12002_v44  ;;  %v15179_v44 = vld [vmem:[#allocation120_spill] sm:$0xff] }
 0x4cc   : > { %v12352_v38 = vadd.f32 %v4005_v7, %v3920_v58  ;;  %v3671_v29 = vpop.f32.mrf.mxu2  ;;  %v3581_v53 = vadd.f32 %v3491_v42, %v15179_v44  ;;  %v3439_v58 = vrot.slane %v15183_v51, 3 }
 0x4cd   : > { %8590 = vmatmul.msk.f32.gmra.mxu0 %vm271_vm1, %v12141_v8  ;;  %v3763_v45 = vadd.f32 %v3671_v29, %v3580_v10 }
 0x4ce   : > { %8555 = vmatmul.msk.f32.gmra.mxu3 %vm271_vm1, %v11956_v19  ;;  %v12366_v19 = vsel %vm2961_vm5, %v3433_v62, %v3434_v22 }
 0x4d0   : > { %v3494_v11 = vpop.f32.mrf.mxu1 }
 0x4d1   : > { %v3829_v59 = vpop.f32.mrf.mxu3  ;;  %8522 = vmatmul.msk.f32.gmra.mxu2 %vm271_vm1, %v11985_v21  ;;  %v12380_v21 = vsel %vm2961_vm5, %v3434_v22, %v3436_v39  ;;  %v15184_v22 = vld [vmem:[#allocation131_spill] sm:$0xff] }
 0x4d2   : > { %v3921_v63 = vadd.f32 %v3829_v59, %v3763_v45  ;;  %v4014_v15 = vpop.f32.mrf.mxu0 }
 0x4d3   : > { %8489 = vmatmul.msk.f32.gmra.mxu1 %vm271_vm1, %v12024_v17  ;;  %v15181_v17 = vld [vmem:[#allocation121_spill] sm:$0xff] }
 0x4d4   : > { %v12368_v47 = vadd.f32 %v4008_v20, %v3921_v63  ;;  %v3674_v7 = vpop.f32.mrf.mxu2  ;;  %v15180_v20 = vld [vmem:[#allocation128_spill] sm:$0xff]  ;;  %v3582_v12 = vadd.f32 %v3494_v11, %v15181_v17  ;;  %v9290_v63 = vld [vmem:[#allocation2 + $0x470] sm:$0xff] }
 0x4d5   : > { %8591 = vmatmul.msk.f32.gmra.mxu0 %vm271_vm1, %v12366_v19  ;;  %v3764_v52 = vadd.f32 %v3674_v7, %v3581_v53  ;;  %v3441_v11 = vrot.slane %v9290_v63, 3 }
 0x4d6   : > { %8556 = vmatmul.msk.f32.gmra.mxu3 %vm271_vm1, %v11978_v48 }
 0x4d7   : > { %v12410_v39 = vsel %vm2961_vm5, %v3439_v58, %v3441_v11 }
 0x4d8   : > { %v3497_v31 = vpop.f32.mrf.mxu1 }
 0x4d9   : > { %v3832_v13 = vpop.f32.mrf.mxu3  ;;  %8523 = vmatmul.msk.f32.gmra.mxu2 %vm271_vm1, %v15180_v20 }
 0x4da   : > { %v3922_v50 = vadd.f32 %v3832_v13, %v3764_v52  ;;  %v4017_v1 = vpop.f32.mrf.mxu0  ;;  %v15186_v52 = vld [vmem:[#allocation134_spill] sm:$0xff] }
 0x4db   : > { %8490 = vmatmul.msk.f32.gmra.mxu1 %vm271_vm1, %v12044_v4  ;;  %v15185_v4 = vld [vmem:[#allocation123_spill] sm:$0xff] }
 0x4dc   : > { %v12382_v48 = vadd.f32 %v4011_v23, %v3922_v50  ;;  %v3677_v5 = vpop.f32.mrf.mxu2  ;;  %v3583_v45 = vadd.f32 %v3497_v31, %v15185_v4  ;;  %v15188_v31 = vld [vmem:[#allocation139_spill] sm:$0xff] }
 0x4dd   : > { %8592 = vmatmul.msk.f32.gmra.mxu0 %vm271_vm1, %v12380_v21  ;;  %v3765_v42 = vadd.f32 %v3677_v5, %v3582_v12  ;;  %v3443_v20 = vrot.slane %v15188_v31, 3 }
 0x4de   : > { %8557 = vmatmul.msk.f32.gmra.mxu3 %vm271_vm1, %v15177_v37  ;;  %v12396_v37 = vsel %vm2961_vm5, %v3438_v0, %v3439_v58 }
 0x4e0   : > { %v3500_v10 = vpop.f32.mrf.mxu1 }
 0x4e1   : > { %v3835_v23 = vpop.f32.mrf.mxu3  ;;  %8524 = vmatmul.msk.f32.gmra.mxu2 %vm271_vm1, %v15184_v22  ;;  %v9291_v22 = vld [vmem:[#allocation2 + $0x4a0] sm:$0xff] }
 0x4e2   : > { %v3923_v54 = vadd.f32 %v3835_v23, %v3765_v42  ;;  %v4020_v29 = vpop.f32.mrf.mxu0  ;;  %v15189_v23 = vld [vmem:[#allocation137_spill] sm:$0xff]  ;;  %v3446_v4 = vrot.slane %v9291_v22, 3 }
 0x4e3   : > { %8491 = vmatmul.msk.f32.gmra.mxu1 %vm271_vm1, %v12066_v2  ;;  %v15187_v2 = vld [vmem:[#allocation124_spill] sm:$0xff] }
 0x4e4   : > { %v12398_v62 = vadd.f32 %v4014_v15, %v3923_v54  ;;  %v3680_v59 = vpop.f32.mrf.mxu2  ;;  %v3584_v13 = vadd.f32 %v3500_v10, %v15187_v2  ;;  %v9293_v2 = vld [vmem:[#allocation2 + $0x4c8] sm:$0xff] }
 0x4e5   : > { %8593 = vmatmul.msk.f32.gmra.mxu0 %vm271_vm1, %v12396_v37  ;;  %v3766_v44 = vadd.f32 %v3680_v59, %v3583_v45 }
 0x4e6   : > { %8558 = vmatmul.msk.f32.gmra.mxu3 %vm271_vm1, %v15178_v27 }
 0x4e8   : > { %v3503_v7 = vpop.f32.mrf.mxu1 }
 0x4e9   : > { %v3838_v15 = vpop.f32.mrf.mxu3  ;;  %8525 = vmatmul.msk.f32.gmra.mxu2 %vm271_vm1, %v15186_v52 }
 0x4ea   : > { %v3924_v53 = vadd.f32 %v3838_v15, %v3766_v44  ;;  %v4023_v14 = vpop.f32.mrf.mxu0 }
 0x4eb   : > { %8492 = vmatmul.msk.f32.gmra.mxu1 %vm271_vm1, %v12098_v30  ;;  %v15190_v30 = vld [vmem:[#allocation126_spill] sm:$0xff] }
 0x4ec   : > { %v12412_v27 = vadd.f32 %v4017_v1, %v3924_v53  ;;  %v3683_v50 = vpop.f32.mrf.mxu2  ;;  %v3444_v1 = vrot.slane %v12119_v35, 3  ;;  %v3585_v54 = vadd.f32 %v3503_v7, %v15190_v30  ;;  %v9292_v7 = vld [vmem:[#allocation2 + $0x4c0] sm:$0xff] }
 0x4ed   : > { %8594 = vmatmul.msk.f32.gmra.mxu0 %vm271_vm1, %v12410_v39  ;;  %v3767_v17 = vadd.f32 %v3683_v50, %v3584_v13  ;;  %v3953_v52 = vrot.slane %v9292_v7, 3 }
 0x4ee   : > { %8559 = vmatmul.msk.f32.gmra.mxu3 %vm271_vm1, %v15182_v41  ;;  %v12426_v41 = vsel %vm2961_vm5, %v3443_v20, %v3444_v1  ;;  %v12440_v44 = vsel %vm2961_vm5, %v3444_v1, %v3446_v4 }
 0x4f0   : > { %v3506_v0 = vpop.f32.mrf.mxu1 }
 0x4f1   : > { %v3841_v12 = vpop.f32.mrf.mxu3  ;;  %8526 = vmatmul.msk.f32.gmra.mxu2 %vm271_vm1, %v15189_v23 }
 0x4f2   : > { %v3925_v5 = vadd.f32 %v3841_v12, %v3767_v17  ;;  %v4026_v58 = vpop.f32.mrf.mxu0 }
 0x4f3   : > { %8493 = vmatmul.msk.f32.gmra.mxu1 %vm271_vm1, %v12124_v18  ;;  %v15191_v18 = vld [vmem:[#allocation129_spill] sm:$0xff] }
 0x4f4   : > { %v12428_v42 = vadd.f32 %v4020_v29, %v3925_v5  ;;  %v3686_v10 = vpop.f32.mrf.mxu2  ;;  %v3586_v15 = vadd.f32 %v3506_v0, %v15191_v18  ;;  %v3617_v5 = vrot.slane %v9292_v7, 5  ;;  %v15192_v0 = vld [vmem:[#allocation132_spill] sm:$0xff] }
 0x4f5   : > { %8595 = vmatmul.msk.f32.gmra.mxu0 %vm271_vm1, %v12426_v41  ;;  %v3768_v45 = vadd.f32 %v3686_v10, %v3585_v54  ;;  %v9295_v54 = vld [vmem:[#allocation2 + $0x4d0] sm:$0xff] }
 0x4f6   : > { %8560 = vmatmul.msk.f32.gmra.mxu3 %vm271_vm1, %v15183_v51 }
 0x4f8   : > { %v3509_v63 = vpop.f32.mrf.mxu1 }
 0x4f9   : > { %v3844_v29 = vpop.f32.mrf.mxu3  ;;  %8527 = vmatmul.msk.f32.gmra.mxu2 %vm271_vm1, %v12101_v32  ;;  %v3587_v23 = vadd.f32 %v3509_v63, %v15192_v0  ;;  %v15193_v63 = vld [vmem:[#allocation135_spill] sm:$0xff] }
 0x4fa   : > { %v3926_v59 = vadd.f32 %v3844_v29, %v3768_v45  ;;  %v4029_v11 = vpop.f32.mrf.mxu0 }
 0x4fb   : > { %8494 = vmatmul.msk.f32.gmra.mxu1 %vm271_vm1, %v12141_v8  ;;  %v9294_v8 = vld [vmem:[#allocation2 + $0x4b8] sm:$0xff] }
 0x4fc   : > { %v12442_v51 = vadd.f32 %v4023_v14, %v3926_v59  ;;  %v3689_v53 = vpop.f32.mrf.mxu2  ;;  %v3954_v14 = vrot.slane %v9293_v2, 3  ;;  %v3616_v12 = vrot.slane %v9294_v8, 5  ;;  %v698_v8 = vld [vmem:[#allocation2 + $0x4e8] sm:$0xff] }
 0x4fd   : > { %8596 = vmatmul.msk.f32.gmra.mxu0 %vm271_vm1, %v12440_v44  ;;  %v3769_v13 = vadd.f32 %v3689_v53, %v3586_v15  ;;  %v699_v15 = vld [vmem:[#allocation2 + $0x4f0] sm:$0xff]  ;;  %v700_v53 = vld [vmem:[#allocation2 + $0x4f8] sm:$0xff] }
 0x4fe   : > { %8561 = vmatmul.msk.f32.gmra.mxu3 %vm271_vm1, %v15188_v31  ;;  %v3955_v31 = vsel %vm2961_vm5, %v3953_v52, %v3954_v14 }
 0x500   : > { %v3512_v32 = vpop.f32.mrf.mxu1 }
 0x501   : > { %v3847_v50 = vpop.f32.mrf.mxu3  ;;  %8528 = vmatmul.msk.f32.gmra.mxu2 %vm271_vm1, %v12127_v57  ;;  %v3618_v57 = vsel %vm2506_vm4, %v3616_v12, %v3617_v5  ;;  %v3588_v18 = vadd.f32 %v3512_v32, %v15193_v63 }
 0x502   : > { %v3927_v20 = vadd.f32 %v3847_v50, %v3769_v13  ;;  %v4032_v1 = vpop.f32.mrf.mxu0  ;;  %v3958_v13 = vrot.slane %v699_v15, 3  ;;  %v3959_v50 = vrot.slane %v700_v53, 3 }
 0x503   : > { %8495 = vmatmul.msk.f32.gmra.mxu1 %vm271_vm1, %v12366_v19  ;;  %v3619_v19 = vrot.slane %v9293_v2, 5 }
 0x504   : > { %v12454_v17 = vadd.f32 %v4026_v58, %v3927_v20  ;;  %v3692_v30 = vpop.f32.mrf.mxu2  ;;  %v3956_v58 = vrot.slane %v9295_v54, 3  ;;  %v3960_v32 = vsel %vm2961_vm5, %v3958_v13, %v3959_v50  ;;  %v15194_v54 = vld [vmem:[#allocation138_spill] sm:$0xff] }
 0x505   : > { %8597 = vmatmul.msk.f32.gmra.mxu0 %vm271_vm1, %v3955_v31  ;;  %v3770_v10 = vadd.f32 %v3692_v30, %v3587_v23  ;;  %v3620_v20 = vsel %vm2506_vm4, %v3617_v5, %v3619_v19  ;;  %v3621_v23 = vrot.slane %v698_v8, 5  ;;  %v3622_v30 = vrot.slane %v699_v15, 5  ;;  %v8739_v8 = vld [vmem:[%s14634_s2 + $0x50] sm:$0xf] }
 0x506   : > { %8562 = vmatmul.msk.f32.gmra.mxu3 %vm271_vm1, %v12119_v35  ;;  %v3957_v29 = vsel %vm2961_vm5, %v3954_v14, %v3956_v58  ;;  %8740 = vmatpush.msk.msra.mxu1 %vm940_vm0, %v8739_v8 }
 0x508   : > { %v3515_v45 = vpop.f32.mrf.mxu1 }
 0x509   : > { %v3850_v22 = vpop.f32.mrf.mxu3  ;;  %8529 = vmatmul.msk.f32.gmra.mxu2 %vm271_vm1, %v3618_v57  ;;  %v3589_v58 = vadd.f32 %v3515_v45, %v15194_v54  ;;  %v3624_v45 = vrot.slane %v700_v53, 5 }
 0x50a   : > { %v3928_v4 = vadd.f32 %v3850_v22, %v3770_v10  ;;  %v4035_v35 = vpop.f32.mrf.mxu0 }
 0x50b   : > { %8496 = vmatmul.msk.f32.gmra.mxu1 %vm271_vm1, %v12380_v21  ;;  %v701_v21 = vld [vmem:[#allocation2 + $0x500] sm:$0xff] }
 0x50c   : > { %v12466_v59 = vadd.f32 %v4029_v11, %v3928_v4  ;;  %v3695_v52 = vpop.f32.mrf.mxu2  ;;  %v3961_v10 = vrot.slane %v701_v21, 3 }
 0x50d   : > { %8598 = vmatmul.msk.f32.gmra.mxu0 %vm271_vm1, %v3957_v29  ;;  %v3771_v14 = vadd.f32 %v3695_v52, %v3588_v18  ;;  %v8807_v18 = vld [vmem:[%s14634_s2 + $0x58] sm:$0xf]  ;;  %v15195_v52 = vld [vmem:[#allocation140_spill] sm:$0xff] }
 0x50e   : > { %8563 = vmatmul.msk.f32.gmra.mxu3 %vm271_vm1, %v9292_v7 }
 0x50f   : > { %8808 = vmatpush.msk.msra.mxu3 %vm940_vm0, %v8807_v18 }
 0x510   : > { %v3518_v7 = vpop.f32.mrf.mxu1 }
 0x511   : > { %v3853_v11 = vpop.f32.mrf.mxu3  ;;  %8530 = vmatmul.msk.f32.gmra.mxu2 %vm271_vm1, %v3620_v20  ;;  %v3590_v13 = vadd.f32 %v3518_v7, %v15195_v52  ;;  %v3625_v7 = vsel %vm2506_vm4, %v3622_v30, %v3624_v45 }
 0x512   : > { %v3929_v31 = vadd.f32 %v3853_v11, %v3771_v14  ;;  %v4038_v12 = vpop.f32.mrf.mxu0 }
 0x513   : > { %8497 = vmatmul.msk.f32.gmra.mxu1 %vm271_vm1, %v12396_v37  ;;  %v8773_v37 = vld [vmem:[%s14634_s2 + $0x54] sm:$0xf] }
 0x514   : > { %v12476_v0 = vadd.f32 %v4032_v1, %v3929_v31  ;;  %v3698_v5 = vpop.f32.mrf.mxu2  ;;  %v3623_v1 = vsel %vm2506_vm4, %v3621_v23, %v3622_v30  ;;  %8774 = vmatpush.msk.msra.mxu2 %vm940_vm0, %v8773_v37  ;;  %v8841_v30 = vld [vmem:[%s14634_s2 + $0x5c] sm:$0xf] }
 0x515   : > { %8599 = vmatmul.msk.f32.gmra.mxu0 %vm271_vm1, %v3960_v32  ;;  %v3772_v22 = vadd.f32 %v3698_v5, %v3589_v58  ;;  %v704_v32 = vld [vmem:[#allocation2 + $0x518] sm:$0xff]  ;;  %v707_v5 = vld [vmem:[#allocation2 + $0x530] sm:$0xff] }
 0x516   : > { %8564 = vmatmul.msk.f32.gmra.mxu3 %vm271_vm1, %v9293_v2  ;;  %v3962_v2 = vsel %vm2961_vm5, %v3959_v50, %v3961_v10  ;;  %v12501_v50 = vld [vmem:[#allocation2 + $0x528] sm:$0xff]  ;;  %v3626_v10 = vrot.slane %v704_v32, 5  ;;  %8842 = vmatpush.msk.msra.mxu0 %vm940_vm0, %v8841_v30 }
 0x518   : > { %v3521_v29 = vpop.f32.mrf.mxu1 }
 0x519   : > { %v3856_v57 = vpop.f32.mrf.mxu3  ;;  %8531 = vmatmul.msk.f32.gmra.mxu2 %vm271_vm1, %v3623_v1 }
 0x51a   : > { %v3930_v4 = vadd.f32 %v3856_v57, %v3772_v22  ;;  %v4041_v19 = vpop.f32.mrf.mxu0  ;;  %v15197_v57 = vld [vmem:[#allocation141_spill] sm:$0xff] }
 0x51b   : > { %8498 = vmatmul.msk.f32.gmra.mxu1 %vm271_vm1, %v12410_v39  ;;  %v3591_v1 = vadd.f32 %v3521_v29, %v15197_v57  ;;  %v561_v29 = vld [vmem:[#allocation2 + $0xa0] sm:$0xff] }
 0x51c   : > { %v12486_v63 = vadd.f32 %v4035_v35, %v3930_v4  ;;  %v705_v35 = vld [vmem:[#allocation2 + $0x520] sm:$0xff]  ;;  %v3701_v14 = vpop.f32.mrf.mxu2  ;;  %v3966_v4 = vrot.slane %v707_v5, 3 }
 0x51d   : > { %8600 = vmatmul.msk.f32.gmra.mxu0 %vm271_vm1, %v3962_v2  ;;  %v3963_v11 = vrot.slane %v705_v35, 3  ;;  %v3773_v20 = vadd.f32 %v3701_v14, %v3590_v13  ;;  %v3627_v22 = vrot.slane %v705_v35, 5 }
 0x51e   : > { %8565 = vmatmul.msk.f32.gmra.mxu3 %vm271_vm1, %v699_v15  ;;  %v3964_v15 = vrot.slane %v12501_v50, 3 }
 0x520   : > { %v3524_v21 = vpop.f32.mrf.mxu1  ;;  %v3965_v54 = vsel %vm2961_vm5, %v3963_v11, %v3964_v15  ;;  %v3967_v13 = vsel %vm2961_vm5, %v3964_v15, %v3966_v4  ;;  %v3629_v11 = vrot.slane %v12501_v50, 5 }
 0x521   : > { %v3859_v31 = vpop.f32.mrf.mxu3  ;;  %8532 = vmatmul.msk.f32.gmra.mxu2 %vm271_vm1, %v3625_v7  ;;  %v4141_v7 = vrot.slane %v561_v29, 2 }
 0x522   : > { %v3931_v39 = vadd.f32 %v3859_v31, %v3773_v20  ;;  %v4044_v23 = vpop.f32.mrf.mxu0  ;;  %v3592_v20 = vadd.f32 %v3524_v21, %v12143_v26  ;;  %v9296_v31 = vld [vmem:[#allocation2 + $0x1b8] sm:$0xff]  ;;  %v3630_v5 = vsel %vm2506_vm4, %v3627_v22, %v3629_v11  ;;  %v563_v11 = vld [vmem:[#allocation2 + $0xb0] sm:$0xff] }
 0x523   : > { %8499 = vmatmul.msk.f32.gmra.mxu1 %vm271_vm1, %v12426_v41  ;;  %v560_v41 = vld [vmem:[#allocation2 + $0x98] sm:$0xff]  ;;  %v4170_v8 = vrot.slane %v9296_v31, 2 }
 0x524   : > { %v12511_v58 = vadd.f32 %v4038_v12, %v3931_v39  ;;  %v3704_v12 = vpop.f32.mrf.mxu2  ;;  %v12534_v39 = vld [vmem:[#allocation2 + $0x1c0] sm:$0xff] }
 0x525   : > { %8601 = vmatmul.msk.f32.gmra.mxu0 %vm271_vm1, %v3965_v54  ;;  %v3774_v2 = vadd.f32 %v3704_v12, %v3591_v1  ;;  %v4171_v32 = vrot.slane %v12534_v39, 2 }
 0x526   : > { %15196 = vst [vmem:[#allocation66_spill] sm:$0xff] %v12511_v58  ;;  %8566 = vmatmul.msk.f32.gmra.mxu3 %vm271_vm1, %v700_v53  ;;  %v3628_v53 = vsel %vm2506_vm4, %v3626_v10, %v3627_v22  ;;  %v562_v10 = vld [vmem:[#allocation2 + $0xa8] sm:$0xff]  ;;  %v4600_v22 = vrot.slane %v561_v29, 6 }
 0x527   : > { %v12540_v57 = vsel %vm4139_vm6, %v4170_v8, %v4171_v32  ;;  %v4601_v4 = vrot.slane %v562_v10, 6 }
 0x528   : > { %v3527_v18 = vpop.f32.mrf.mxu1 }
 0x529   : > { %v3862_v37 = vpop.f32.mrf.mxu3  ;;  %8533 = vmatmul.msk.f32.gmra.mxu2 %vm271_vm1, %v3628_v53  ;;  %v3593_v12 = vadd.f32 %v3527_v18, %v12154_v56  ;;  %v12551_v53 = vld [vmem:[#allocation2 + $0x1c8] sm:$0xff] }
 0x52a   : > { %v3932_v45 = vadd.f32 %v3862_v37, %v3774_v2  ;;  %v4047_v52 = vpop.f32.mrf.mxu0  ;;  %v4143_v37 = vrot.slane %v562_v10, 2 }
 0x52b   : > { %8500 = vmatmul.msk.f32.gmra.mxu1 %vm271_vm1, %v12440_v44 }
 0x52c   : > { %v12525_v14 = vadd.f32 %v4041_v19, %v3932_v45  ;;  %v3707_v15 = vpop.f32.mrf.mxu2  ;;  %v4140_v19 = vrot.slane %v560_v41, 2  ;;  %v4144_v18 = vsel %vm4139_vm6, %v4141_v7, %v4143_v37 }
 0x52d   : > { %8602 = vmatmul.msk.f32.gmra.mxu0 %vm271_vm1, %v3967_v13  ;;  %v3775_v54 = vadd.f32 %v3707_v15, %v3592_v20  ;;  %v566_v15 = vld [vmem:[#allocation2 + $0xc8] sm:$0xff] }
 0x52e   : > { %15198 = vst [vmem:[#allocation90_spill] sm:$0xff] %v12525_v14  ;;  %8567 = vmatmul.msk.f32.gmra.mxu3 %vm271_vm1, %v705_v35  ;;  %v4142_v44 = vsel %vm4139_vm6, %v4140_v19, %v4141_v7  ;;  %v567_v19 = vld [vmem:[#allocation2 + $0xd0] sm:$0xff] }
 0x530   : > { %v3530_v21 = vpop.f32.mrf.mxu1 }
 0x531   : > { %v3865_v35 = vpop.f32.mrf.mxu3  ;;  %8534 = vmatmul.msk.f32.gmra.mxu2 %vm271_vm1, %v3630_v5  ;;  %v4145_v5 = vrot.slane %v566_v15, 2 }
 0x532   : > { %v3933_v26 = vadd.f32 %v3865_v35, %v3775_v54  ;;  %v4050_v30 = vpop.f32.mrf.mxu0  ;;  %v3594_v54 = vadd.f32 %v3530_v21, %v12165_v16  ;;  %v4603_v35 = vrot.slane %v563_v11, 6 }
 0x533   : > { %8605 = vmatmul.msk.f32.vlgmr.msrb.gmra.mxu1 %vm271_vm1, %v4142_v44  ;;  %v12567_v44 = vld [vmem:[#allocation2 + $0x1f0] sm:$0xff] }
 0x534   : > { %v12542_v1 = vadd.f32 %v4044_v23, %v3933_v26  ;;  %v3710_v2 = vpop.f32.mrf.mxu2  ;;  %v4173_v23 = vrot.slane %v12551_v53, 2  ;;  %v9299_v26 = vld [vmem:[#allocation2 + $0x1e8] sm:$0xff]  ;;  %v4604_v16 = vsel %vm4599_vm7, %v4601_v4, %v4603_v35 }
 0x535   : > { %8707 = vmatmul.msk.f32.vlgmr.msrb.gmra.mxu0 %vm271_vm1, %v12540_v57  ;;  %v3776_v45 = vadd.f32 %v3710_v2, %v3593_v12 }
 0x536   : > { %15199 = vst [vmem:[#allocation54_spill] sm:$0xff] %v12542_v1  ;;  %8568 = vmatmul.msk.f32.gmra.mxu3 %vm271_vm1, %v12501_v50  ;;  %v4602_v50 = vsel %vm4599_vm7, %v4600_v22, %v4601_v4  ;;  %v12557_v31 = vsel %vm4139_vm6, %v4171_v32, %v4173_v23  ;;  %v4146_v32 = vrot.slane %v567_v19, 2  ;;  %v568_v23 = vld [vmem:[#allocation2 + $0xd8] sm:$0xff] }
 0x537   : > { %v4606_v4 = vrot.slane %v568_v23, 6  ;;  %v4148_v15 = vrot.slane %v568_v23, 2 }
 0x538   : > { %v3533_v56 = vpop.f32.mrf.mxu1  ;;  %v4147_v37 = vsel %vm4139_vm6, %v4145_v5, %v4146_v32 }
 0x539   : > { %v3868_v13 = vpop.f32.mrf.mxu3  ;;  %8639 = vmatmul.msk.f32.vlgmr.msrb.gmra.mxu2 %vm271_vm1, %v561_v29  ;;  %v4176_v29 = vrot.slane %v12567_v44, 2 }
 0x53a   : > { %v3934_v41 = vadd.f32 %v3868_v13, %v3776_v45  ;;  %v4053_v20 = vpop.f32.mrf.mxu0 }
 0x53b   : > { %8606 = vmatmul.msk.f32.gmra.mxu1 %vm271_vm1, %v4144_v18  ;;  %v4605_v18 = vrot.slane %v567_v19, 6 }
 0x53c   : > { %v12559_v8 = vadd.f32 %v4047_v52, %v3934_v41  ;;  %v3713_v7 = vpop.f32.mrf.mxu2  ;;  %v4175_v52 = vrot.slane %v9299_v26, 2 }
 0x53d   : > { %8708 = vmatmul.msk.f32.gmra.mxu0 %vm271_vm1, %v12557_v31  ;;  %v3777_v12 = vadd.f32 %v3713_v7, %v3594_v54  ;;  %v12583_v54 = vld [vmem:[#allocation2 + $0x1f8] sm:$0xff]  ;;  %v4607_v5 = vsel %vm4599_vm7, %v4605_v18, %v4606_v4 }
 0x53e   : > { %15200 = vst [vmem:[#allocation53_spill] sm:$0xff] %v12559_v8  ;;  %8673 = vmatmul.msk.f32.vlgmr.msrb.gmra.mxu3 %vm271_vm1, %v4602_v50  ;;  %v12573_v13 = vsel %vm4139_vm6, %v4175_v52, %v4176_v29  ;;  %v3595_v50 = vadd.f32 %v3533_v56, %v12176_v33  ;;  %v4149_v33 = vsel %vm4139_vm6, %v4146_v32, %v4148_v15  ;;  %v569_v56 = vld [vmem:[#allocation2 + $0xe0] sm:$0xff] }
 0x53f   : > { %v12599_v15 = vld [vmem:[#allocation2 + $0x220] sm:$0xff] }
 0x540   : > { %v3536_v21 = vpop.f32.mrf.mxu1 }
 0x541   : > { %v3871_v22 = vpop.f32.mrf.mxu3  ;;  %8640 = vmatmul.msk.f32.gmra.mxu2 %vm271_vm1, %v562_v10 }
 0x542   : > { %v3935_v2 = vadd.f32 %v3871_v22, %v3777_v12  ;;  %v4056_v45 = vpop.f32.mrf.mxu0 }
 0x543   : > { %8607 = vmatmul.msk.f32.gmra.mxu1 %vm271_vm1, %v4147_v37  ;;  %v3596_v37 = vadd.f32 %v3536_v21, %v12187_v43 }
 0x544   : > { %v12575_v41 = vadd.f32 %v4050_v30, %v3935_v2  ;;  %v3716_v11 = vpop.f32.mrf.mxu2  ;;  %v4178_v30 = vrot.slane %v12583_v54, 2  ;;  %v572_v2 = vld [vmem:[#allocation2 + $0xf8] sm:$0xff] }
 0x545   : > { %8709 = vmatmul.msk.f32.gmra.mxu0 %vm271_vm1, %v12573_v13  ;;  %v3778_v35 = vadd.f32 %v3716_v11, %v3595_v50  ;;  %v4608_v50 = vrot.slane %v569_v56, 6  ;;  %v4150_v18 = vrot.slane %v572_v2, 2  ;;  %v9302_v11 = vld [vmem:[#allocation2 + $0x218] sm:$0xff] }
 0x546   : > { %15201 = vst [vmem:[#allocation110_spill] sm:$0xff] %v12575_v41  ;;  %8674 = vmatmul.msk.f32.gmra.mxu3 %vm271_vm1, %v4604_v16  ;;  %v12589_v12 = vsel %vm4139_vm6, %v4176_v29, %v4178_v30  ;;  %v573_v16 = vld [vmem:[#allocation2 + $0x100] sm:$0xff] }
 0x547   : > { %v4151_v29 = vrot.slane %v573_v16, 2  ;;  %v4609_v43 = vsel %vm4599_vm7, %v4606_v4, %v4608_v50 }
 0x548   : > { %v3539_v26 = vpop.f32.mrf.mxu1 }
 0x549   : > { %v3874_v7 = vpop.f32.mrf.mxu3  ;;  %8641 = vmatmul.msk.f32.gmra.mxu2 %vm271_vm1, %v567_v19  ;;  %v4181_v19 = vrot.slane %v12599_v15, 2 }
 0x54a   : > { %v3936_v10 = vadd.f32 %v3874_v7, %v3778_v35  ;;  %v4059_v52 = vpop.f32.mrf.mxu0 }
 0x54b   : > { %8608 = vmatmul.msk.f32.gmra.mxu1 %vm271_vm1, %v4149_v33 }
 0x54c   : > { %v12591_v22 = vadd.f32 %v4053_v20, %v3936_v10  ;;  %v3719_v32 = vpop.f32.mrf.mxu2  ;;  %v4180_v20 = vrot.slane %v9302_v11, 2  ;;  %v4152_v10 = vsel %vm4139_vm6, %v4150_v18, %v4151_v29  ;;  %v12615_v11 = vld [vmem:[#allocation2 + $0x228] sm:$0xff] }
 0x54d   : > { %8710 = vmatmul.msk.f32.gmra.mxu0 %vm271_vm1, %v12589_v12  ;;  %v3779_v30 = vadd.f32 %v3719_v32, %v3596_v37  ;;  %v3597_v37 = vadd.f32 %v3539_v26, %v12198_v61  ;;  %v4610_v32 = vrot.slane %v573_v16, 6  ;;  %v575_v26 = vld [vmem:[#allocation2 + $0x110] sm:$0xff] }
 0x54e   : > { %15202 = vst [vmem:[#allocation39_spill] sm:$0xff] %v12591_v22  ;;  %8675 = vmatmul.msk.f32.gmra.mxu3 %vm271_vm1, %v4607_v5  ;;  %v574_v5 = vld [vmem:[#allocation2 + $0x108] sm:$0xff]  ;;  %v12605_v56 = vsel %vm4139_vm6, %v4180_v20, %v4181_v19 }
 0x54f   : > { %v4611_v4 = vrot.slane %v574_v5, 6  ;;  %v4153_v18 = vrot.slane %v574_v5, 2 }
 0x550   : > { %v3542_v21 = vpop.f32.mrf.mxu1 }
 0x551   : > { %v3877_v35 = vpop.f32.mrf.mxu3  ;;  %8642 = vmatmul.msk.f32.gmra.mxu2 %vm271_vm1, %v568_v23  ;;  %v4154_v61 = vsel %vm4139_vm6, %v4151_v29, %v4153_v18 }
 0x552   : > { %v3937_v7 = vadd.f32 %v3877_v35, %v3779_v30  ;;  %v4062_v33 = vpop.f32.mrf.mxu0  ;;  %v4612_v35 = vsel %vm4599_vm7, %v4610_v32, %v4611_v4  ;;  %v9305_v32 = vld [vmem:[#allocation2 + $0x128] sm:$0xff] }
 0x553   : > { %8609 = vmatmul.msk.f32.gmra.mxu1 %vm271_vm1, %v4152_v10  ;;  %v4155_v18 = vrot.slane %v9305_v32, 2 }
 0x554   : > { %v12607_v2 = vadd.f32 %v4056_v45, %v3937_v7  ;;  %v3722_v50 = vpop.f32.mrf.mxu2  ;;  %v4183_v45 = vrot.slane %v12615_v11, 2 }
 0x555   : > { %8711 = vmatmul.msk.f32.gmra.mxu0 %vm271_vm1, %v12605_v56  ;;  %v3780_v20 = vadd.f32 %v3722_v50, %v3597_v37  ;;  %v3598_v37 = vadd.f32 %v3542_v21, %v12209_v6  ;;  %v4613_v50 = vrot.slane %v575_v26, 6 }
 0x556   : > { %15203 = vst [vmem:[#allocation82_spill] sm:$0xff] %v12607_v2  ;;  %8676 = vmatmul.msk.f32.gmra.mxu3 %vm271_vm1, %v4609_v43  ;;  %v12621_v10 = vsel %vm4139_vm6, %v4181_v19, %v4183_v45  ;;  %v9307_v45 = vld [vmem:[#allocation2 + $0x248] sm:$0xff] }
 0x557   : > { %v4614_v21 = vsel %vm4599_vm7, %v4611_v4, %v4613_v50 }
 0x558   : > { %v3545_v7 = vpop.f32.mrf.mxu1 }
 0x559   : > { %v3880_v30 = vpop.f32.mrf.mxu3  ;;  %8643 = vmatmul.msk.f32.gmra.mxu2 %vm271_vm1, %v573_v16 }
 0x55a   : > { %v3938_v23 = vadd.f32 %v3880_v30, %v3780_v20  ;;  %v4065_v43 = vpop.f32.mrf.mxu0  ;;  %v9306_v20 = vld [vmem:[#allocation2 + $0x130] sm:$0xff] }
 0x55b   : > { %8610 = vmatmul.msk.f32.gmra.mxu1 %vm271_vm1, %v4154_v61  ;;  %v4156_v19 = vrot.slane %v9306_v20, 2  ;;  %v12631_v30 = vld [vmem:[#allocation2 + $0x250] sm:$0xff] }
 0x55c   : > { %v12623_v2 = vadd.f32 %v4059_v52, %v3938_v23  ;;  %v3725_v29 = vpop.f32.mrf.mxu2  ;;  %v4185_v52 = vrot.slane %v9307_v45, 2  ;;  %v4186_v16 = vrot.slane %v12631_v30, 2  ;;  %v3599_v45 = vadd.f32 %v3545_v7, %v12220_v49 }
 0x55d   : > { %8712 = vmatmul.msk.f32.gmra.mxu0 %vm271_vm1, %v12621_v10  ;;  %v3781_v23 = vadd.f32 %v3725_v29, %v3598_v37  ;;  %v4157_v26 = vsel %vm4139_vm6, %v4155_v18, %v4156_v19  ;;  %v4615_v37 = vrot.slane %v9306_v20, 6  ;;  %v9309_v29 = vld [vmem:[#allocation2 + $0x138] sm:$0xff] }
 0x55e   : > { %15204 = vst [vmem:[#allocation78_spill] sm:$0xff] %v12623_v2  ;;  %8677 = vmatmul.msk.f32.gmra.mxu3 %vm271_vm1, %v4612_v35  ;;  %v12637_v22 = vsel %vm4139_vm6, %v4185_v52, %v4186_v16  ;;  %v4616_v4 = vrot.slane %v9309_v29, 6  ;;  %v4158_v18 = vrot.slane %v9309_v29, 2  ;;  %v12647_v52 = vld [vmem:[#allocation2 + $0x258] sm:$0xff] }
 0x560   : > { %v3548_v61 = vpop.f32.mrf.mxu1  ;;  %v4159_v7 = vsel %vm4139_vm6, %v4156_v19, %v4158_v18 }
 0x561   : > { %v3883_v35 = vpop.f32.mrf.mxu3  ;;  %8644 = vmatmul.msk.f32.gmra.mxu2 %vm271_vm1, %v574_v5  ;;  %v3600_v41 = vadd.f32 %v3548_v61, %v12231_v9 }
 0x562   : > { %v3939_v6 = vadd.f32 %v3883_v35, %v3781_v23  ;;  %v4068_v2 = vpop.f32.mrf.mxu0 }
 0x563   : > { %8611 = vmatmul.msk.f32.gmra.mxu1 %vm271_vm1, %v4157_v26 }
 0x564   : > { %v12639_v32 = vadd.f32 %v4062_v33, %v3939_v6  ;;  %v3728_v50 = vpop.f32.mrf.mxu2  ;;  %v4188_v33 = vrot.slane %v12647_v52, 2  ;;  %v4617_v6 = vsel %vm4599_vm7, %v4615_v37, %v4616_v4  ;;  %v9312_v37 = vld [vmem:[#allocation2 + $0x158] sm:$0xff] }
 0x565   : > { %8713 = vmatmul.msk.f32.gmra.mxu0 %vm271_vm1, %v12637_v22  ;;  %v3782_v23 = vadd.f32 %v3728_v50, %v3599_v45  ;;  %v9311_v45 = vld [vmem:[#allocation2 + $0x140] sm:$0xff]  ;;  %v4160_v18 = vrot.slane %v9312_v37, 2 }
 0x566   : > { %15205 = vst [vmem:[#allocation79_spill] sm:$0xff] %v12639_v32  ;;  %8678 = vmatmul.msk.f32.gmra.mxu3 %vm271_vm1, %v4614_v21  ;;  %v12653_v26 = vsel %vm4139_vm6, %v4186_v16, %v4188_v33  ;;  %v4618_v50 = vrot.slane %v9311_v45, 6  ;;  %v9313_v16 = vld [vmem:[#allocation2 + $0x160] sm:$0xff] }
 0x567   : > { %v4161_v33 = vrot.slane %v9313_v16, 2 }
 0x568   : > { %v3551_v49 = vpop.f32.mrf.mxu1 }
 0x569   : > { %v3886_v5 = vpop.f32.mrf.mxu3  ;;  %8645 = vmatmul.msk.f32.gmra.mxu2 %vm271_vm1, %v9306_v20  ;;  %v4162_v45 = vsel %vm4139_vm6, %v4160_v18, %v4161_v33 }
 0x56a   : > { %v3940_v35 = vadd.f32 %v3886_v5, %v3782_v23  ;;  %v4071_v21 = vpop.f32.mrf.mxu0  ;;  %v12663_v5 = vld [vmem:[#allocation2 + $0x280] sm:$0xff] }
 0x56b   : > { %8612 = vmatmul.msk.f32.gmra.mxu1 %vm271_vm1, %v4159_v7  ;;  %v4191_v20 = vrot.slane %v12663_v5, 2 }
 0x56c   : > { %v12655_v32 = vadd.f32 %v4065_v43, %v3940_v35  ;;  %v3731_v19 = vpop.f32.mrf.mxu2  ;;  %v9314_v43 = vld [vmem:[#allocation2 + $0x278] sm:$0xff] }
 0x56d   : > { %8714 = vmatmul.msk.f32.gmra.mxu0 %vm271_vm1, %v12653_v26  ;;  %v4190_v23 = vrot.slane %v9314_v43, 2  ;;  %v3783_v35 = vadd.f32 %v3731_v19, %v3600_v41  ;;  %v3601_v43 = vadd.f32 %v3551_v49, %v12242_v34  ;;  %v4620_v41 = vrot.slane %v9313_v16, 6  ;;  %v9316_v19 = vld [vmem:[#allocation2 + $0x168] sm:$0xff] }
 0x56e   : > { %15206 = vst [vmem:[#allocation43_spill] sm:$0xff] %v12655_v32  ;;  %8679 = vmatmul.msk.f32.gmra.mxu3 %vm271_vm1, %v4617_v6  ;;  %v4619_v6 = vsel %vm4599_vm7, %v4616_v4, %v4618_v50  ;;  %v4621_v4 = vrot.slane %v9316_v19, 6  ;;  %v4163_v18 = vrot.slane %v9316_v19, 2 }
 0x56f   : > { %v12669_v8 = vsel %vm4139_vm6, %v4190_v23, %v4191_v20  ;;  %v12679_v23 = vld [vmem:[#allocation2 + $0x288] sm:$0xff] }
 0x570   : > { %v3554_v7 = vpop.f32.mrf.mxu1  ;;  %v4164_v49 = vsel %vm4139_vm6, %v4161_v33, %v4163_v18 }
 0x571   : > { %v3889_v9 = vpop.f32.mrf.mxu3  ;;  %8646 = vmatmul.msk.f32.gmra.mxu2 %vm271_vm1, %v9309_v29  ;;  %v3602_v1 = vadd.f32 %v3554_v7, %v12253_v46 }
 0x572   : > { %v3941_v61 = vadd.f32 %v3889_v9, %v3783_v35  ;;  %v4074_v32 = vpop.f32.mrf.mxu0 }
 0x573   : > { %8613 = vmatmul.msk.f32.gmra.mxu1 %vm271_vm1, %v4162_v45 }
 0x574   : > { %v12671_v37 = vadd.f32 %v4068_v2, %v3941_v61  ;;  %v3734_v50 = vpop.f32.mrf.mxu2  ;;  %v4193_v2 = vrot.slane %v12679_v23, 2  ;;  %v4622_v61 = vsel %vm4599_vm7, %v4620_v41, %v4621_v4  ;;  %v9319_v41 = vld [vmem:[#allocation2 + $0x188] sm:$0xff] }
 0x575   : > { %8715 = vmatmul.msk.f32.gmra.mxu0 %vm271_vm1, %v12669_v8  ;;  %v3784_v35 = vadd.f32 %v3734_v50, %v3601_v43  ;;  %v9318_v43 = vld [vmem:[#allocation2 + $0x170] sm:$0xff]  ;;  %v4165_v18 = vrot.slane %v9319_v41, 2 }
 0x576   : > { %15207 = vst [vmem:[#allocation68_spill] sm:$0xff] %v12671_v37  ;;  %8680 = vmatmul.msk.f32.gmra.mxu3 %vm271_vm1, %v4619_v6  ;;  %v12685_v45 = vsel %vm4139_vm6, %v4191_v20, %v4193_v2  ;;  %v4623_v50 = vrot.slane %v9318_v43, 6  ;;  %v9320_v20 = vld [vmem:[#allocation2 + $0x190] sm:$0xff] }
 0x577   : > { %v4166_v2 = vrot.slane %v9320_v20, 2 }
 0x578   : > { %v3557_v34 = vpop.f32.mrf.mxu1 }
 0x579   : > { %v3892_v29 = vpop.f32.mrf.mxu3  ;;  %8647 = vmatmul.msk.f32.gmra.mxu2 %vm271_vm1, %v9313_v16  ;;  %v4167_v43 = vsel %vm4139_vm6, %v4165_v18, %v4166_v2 }
 0x57a   : > { %v3942_v9 = vadd.f32 %v3892_v29, %v3784_v35  ;;  %v4077_v6 = vpop.f32.mrf.mxu0  ;;  %v12695_v29 = vld [vmem:[#allocation2 + $0x2b0] sm:$0xff] }
 0x57b   : > { %8614 = vmatmul.msk.f32.gmra.mxu1 %vm271_vm1, %v4164_v49  ;;  %v4196_v16 = vrot.slane %v12695_v29, 2 }
 0x57c   : > { %v12687_v37 = vadd.f32 %v4071_v21, %v3942_v9  ;;  %v3737_v33 = vpop.f32.mrf.mxu2  ;;  %v9321_v21 = vld [vmem:[#allocation2 + $0x2a8] sm:$0xff] }
 0x57d   : > { %8716 = vmatmul.msk.f32.gmra.mxu0 %vm271_vm1, %v12685_v45  ;;  %v4195_v35 = vrot.slane %v9321_v21, 2  ;;  %v3785_v9 = vadd.f32 %v3737_v33, %v3602_v1  ;;  %v3603_v21 = vadd.f32 %v3557_v34, %v12264_v60  ;;  %v4625_v1 = vrot.slane %v9320_v20, 6  ;;  %v9323_v33 = vld [vmem:[#allocation2 + $0x198] sm:$0xff] }
 0x57e   : > { %15208 = vst [vmem:[#allocation114_spill] sm:$0xff] %v12687_v37  ;;  %8681 = vmatmul.msk.f32.gmra.mxu3 %vm271_vm1, %v4622_v61  ;;  %v4624_v61 = vsel %vm4599_vm7, %v4621_v4, %v4623_v50  ;;  %v4626_v4 = vrot.slane %v9323_v33, 6  ;;  %v4168_v18 = vrot.slane %v9323_v33, 2 }
 0x57f   : > { %v12701_v14 = vsel %vm4139_vm6, %v4195_v35, %v4196_v16  ;;  %v12711_v35 = vld [vmem:[#allocation2 + $0x2b8] sm:$0xff] }
 0x580   : > { %v3560_v49 = vpop.f32.mrf.mxu1  ;;  %v4169_v34 = vsel %vm4139_vm6, %v4166_v2, %v4168_v18 }
 0x581   : > { %v3895_v46 = vpop.f32.mrf.mxu3  ;;  %8648 = vmatmul.msk.f32.gmra.mxu2 %vm271_vm1, %v9316_v19  ;;  %v3604_v58 = vadd.f32 %v3560_v49, %v12275_v3 }
 0x582   : > { %v3943_v7 = vadd.f32 %v3895_v46, %v3785_v9  ;;  %v4080_v37 = vpop.f32.mrf.mxu0 }
 0x583   : > { %8615 = vmatmul.msk.f32.gmra.mxu1 %vm271_vm1, %v4167_v43 }
 0x584   : > { %v12703_v41 = vadd.f32 %v4074_v32, %v3943_v7  ;;  %v3740_v50 = vpop.f32.mrf.mxu2  ;;  %v4198_v32 = vrot.slane %v12711_v35, 2  ;;  %v4627_v7 = vsel %vm4599_vm7, %v4625_v1, %v4626_v4  ;;  %v9326_v1 = vld [vmem:[#allocation2 + $0x2d8] sm:$0xff] }
 0x585   : > { %8717 = vmatmul.msk.f32.gmra.mxu0 %vm271_vm1, %v12701_v14  ;;  %v3786_v9 = vadd.f32 %v3740_v50, %v3603_v21  ;;  %v9325_v21 = vld [vmem:[#allocation2 + $0x1a0] sm:$0xff]  ;;  %v4200_v18 = vrot.slane %v9326_v1, 2 }
 0x586   : > { %15209 = vst [vmem:[#allocation86_spill] sm:$0xff] %v12703_v41  ;;  %8682 = vmatmul.msk.f32.gmra.mxu3 %vm271_vm1, %v4624_v61  ;;  %v12717_v43 = vsel %vm4139_vm6, %v4196_v16, %v4198_v32  ;;  %v4628_v50 = vrot.slane %v9325_v21, 6  ;;  %v12727_v16 = vld [vmem:[#allocation2 + $0x2e0] sm:$0xff] }
 0x588   : > { %v3563_v60 = vpop.f32.mrf.mxu1 }
 0x589   : > { %v3898_v19 = vpop.f32.mrf.mxu3  ;;  %8649 = vmatmul.msk.f32.gmra.mxu2 %vm271_vm1, %v9320_v20 }
 0x58a   : > { %v3944_v46 = vadd.f32 %v3898_v19, %v3786_v9  ;;  %v4083_v61 = vpop.f32.mrf.mxu0  ;;  %v4629_v19 = vsel %vm4599_vm7, %v4626_v4, %v4628_v50  ;;  %v4631_v4 = vrot.slane %v12551_v53, 6  ;;  %v12745_v50 = vld [vmem:[#allocation2 + $0x2e8] sm:$0xff] }
 0x58b   : > { %8616 = vmatmul.msk.f32.gmra.mxu1 %vm271_vm1, %v4169_v34  ;;  %v3605_v34 = vadd.f32 %v3563_v60, %v12286_v25 }
 0x58c   : > { %v12719_v41 = vadd.f32 %v4077_v6, %v3944_v46  ;;  %v3743_v2 = vpop.f32.mrf.mxu2  ;;  %v4201_v6 = vrot.slane %v12727_v16, 2 }
 0x58d   : > { %8718 = vmatmul.msk.f32.gmra.mxu0 %vm271_vm1, %v12717_v43  ;;  %v3787_v32 = vadd.f32 %v3743_v2, %v3604_v58  ;;  %v4630_v58 = vrot.slane %v12534_v39, 6 }
 0x58e   : > { %8683 = vmatmul.msk.f32.gmra.mxu3 %vm271_vm1, %v4627_v7  ;;  %v12732_v46 = vsel %vm4139_vm6, %v4200_v18, %v4201_v6 }
 0x58f   : > { %v12749_v25 = vsel %vm4599_vm7, %v4630_v58, %v4631_v4  ;;  %v12765_v58 = vld [vmem:[#allocation2 + $0x310] sm:$0xff] }
 0x590   : > { %v3566_v3 = vpop.f32.mrf.mxu1 }
 0x591   : > { %v3901_v20 = vpop.f32.mrf.mxu3  ;;  %8650 = vmatmul.msk.f32.gmra.mxu2 %vm271_vm1, %v9323_v33 }
 0x592   : > { %v3945_v9 = vadd.f32 %v3901_v20, %v3787_v32  ;;  %v4086_v49 = vpop.f32.mrf.mxu0  ;;  %v3606_v20 = vadd.f32 %v3566_v3, %v12297_v40 }
 0x593   : > { %8617 = vmatmul.msk.f32.gmra.mxu1 %vm271_vm1, %v12540_v57 }
 0x594   : > { %v12734_v7 = vadd.f32 %v4080_v37, %v3945_v9  ;;  %v3746_v21 = vpop.f32.mrf.mxu2  ;;  %v4203_v37 = vrot.slane %v12745_v50, 2  ;;  %v9329_v9 = vld [vmem:[#allocation2 + $0x1d0] sm:$0xff] }
 0x595   : > { %8719 = vmatmul.msk.f32.gmra.mxu0 %vm271_vm1, %v12732_v46  ;;  %v3788_v33 = vadd.f32 %v3746_v21, %v3605_v34  ;;  %v9330_v34 = vld [vmem:[#allocation2 + $0x308] sm:$0xff] }
 0x596   : > { %8684 = vmatmul.msk.f32.gmra.mxu3 %vm271_vm1, %v4629_v19  ;;  %v12752_v18 = vsel %vm4139_vm6, %v4201_v6, %v4203_v37  ;;  %v4633_v19 = vrot.slane %v9329_v9, 6  ;;  %v4636_v9 = vrot.slane %v12583_v54, 6 }
 0x598   : > { %v3569_v60 = vpop.f32.mrf.mxu1  ;;  %v12769_v40 = vsel %vm4599_vm7, %v4631_v4, %v4633_v19  ;;  %v4635_v4 = vrot.slane %v12567_v44, 6  ;;  %v12787_v19 = vld [vmem:[#allocation2 + $0x318] sm:$0xff] }
 0x599   : > { %v3904_v2 = vpop.f32.mrf.mxu3  ;;  %8651 = vmatmul.msk.f32.gmra.mxu2 %vm271_vm1, %v12534_v39  ;;  %v4206_v39 = vrot.slane %v12765_v58, 2 }
 0x59a   : > { %v3946_v1 = vadd.f32 %v3904_v2, %v3788_v33  ;;  %v4089_v57 = vpop.f32.mrf.mxu0 }
 0x59b   : > { %8618 = vmatmul.msk.f32.gmra.mxu1 %vm271_vm1, %v12557_v31 }
 0x59c   : > { %v12754_v32 = vadd.f32 %v4083_v61, %v3946_v1  ;;  %v3749_v6 = vpop.f32.mrf.mxu2  ;;  %v4205_v61 = vrot.slane %v9330_v34, 2 }
 0x59d   : > { %8720 = vmatmul.msk.f32.gmra.mxu0 %vm271_vm1, %v12752_v18  ;;  %v3789_v21 = vadd.f32 %v3749_v6, %v3606_v20  ;;  %v3607_v20 = vadd.f32 %v3569_v60, %v12308_v28  ;;  %v12791_v28 = vsel %vm4599_vm7, %v4635_v4, %v4636_v9 }
 0x59e   : > { %15210 = vst [vmem:[#allocation113_spill] sm:$0xff] %v12754_v32  ;;  %8685 = vmatmul.msk.f32.gmra.mxu3 %vm271_vm1, %v12749_v25  ;;  %v12772_v2 = vsel %vm4139_vm6, %v4205_v61, %v4206_v39 }
 0x5a0   : > { %v3572_v3 = vpop.f32.mrf.mxu1 }
 0x5a1   : > { %v3907_v37 = vpop.f32.mrf.mxu3  ;;  %8652 = vmatmul.msk.f32.gmra.mxu2 %vm271_vm1, %v12551_v53  ;;  %v4208_v53 = vrot.slane %v12787_v19, 2 }
 0x5a2   : > { %v3947_v33 = vadd.f32 %v3907_v37, %v3789_v21  ;;  %v4092_v31 = vpop.f32.mrf.mxu0 }
 0x5a3   : > { %8619 = vmatmul.msk.f32.gmra.mxu1 %vm271_vm1, %v12573_v13  ;;  %v12794_v21 = vsel %vm4139_vm6, %v4206_v39, %v4208_v53  ;;  %v12807_v53 = vld [vmem:[#allocation2 + $0x340] sm:$0xff] }
 0x5a4   : > { %v12774_v1 = vadd.f32 %v4086_v49, %v3947_v33  ;;  %v3752_v49 = vpop.f32.mrf.mxu2  ;;  %v3608_v33 = vadd.f32 %v3572_v3, %v12319_v55 }
 0x5a5   : > { %8721 = vmatmul.msk.f32.gmra.mxu0 %vm271_vm1, %v12772_v2  ;;  %v3790_v6 = vadd.f32 %v3752_v49, %v3607_v20  ;;  %v9333_v20 = vld [vmem:[#allocation2 + $0x200] sm:$0xff]  ;;  %v9334_v49 = vld [vmem:[#allocation2 + $0x338] sm:$0xff] }
 0x5a6   : > { %15211 = vst [vmem:[#allocation83_spill] sm:$0xff] %v12774_v1  ;;  %8686 = vmatmul.msk.f32.gmra.mxu3 %vm271_vm1, %v12769_v40  ;;  %v4638_v4 = vrot.slane %v9333_v20, 6 }
 0x5a8   : > { %v3575_v60 = vpop.f32.mrf.mxu1  ;;  %v12811_v55 = vsel %vm4599_vm7, %v4636_v9, %v4638_v4  ;;  %v4640_v9 = vrot.slane %v12599_v15, 6  ;;  %v4641_v4 = vrot.slane %v12615_v11, 6 }
 0x5a9   : > { %v3910_v34 = vpop.f32.mrf.mxu3  ;;  %8653 = vmatmul.msk.f32.gmra.mxu2 %vm271_vm1, %v12567_v44  ;;  %v4211_v44 = vrot.slane %v12807_v53, 2 }
 0x5aa   : > { %v3948_v61 = vadd.f32 %v3910_v34, %v3790_v6  ;;  %v4095_v13 = vpop.f32.mrf.mxu0 }
 0x5ab   : > { %8620 = vmatmul.msk.f32.gmra.mxu1 %vm271_vm1, %v12589_v12 }
 0x5ac   : > { %v12796_v37 = vadd.f32 %v4089_v57, %v3948_v61  ;;  %v3755_v39 = vpop.f32.mrf.mxu2  ;;  %v4210_v57 = vrot.slane %v9334_v49, 2 }
 0x5ad   : > { %8722 = vmatmul.msk.f32.gmra.mxu0 %vm271_vm1, %v12794_v21  ;;  %v3791_v6 = vadd.f32 %v3755_v39, %v3608_v33  ;;  %v3609_v33 = vadd.f32 %v3575_v60, %v12330_v36  ;;  %v12829_v39 = vld [vmem:[#allocation2 + $0x348] sm:$0xff]  ;;  %v12833_v36 = vsel %vm4599_vm7, %v4640_v9, %v4641_v4  ;;  %v9337_v9 = vld [vmem:[#allocation2 + $0x230] sm:$0xff] }
 0x5ae   : > { %15212 = vst [vmem:[#allocation99_spill] sm:$0xff] %v12796_v37  ;;  %8687 = vmatmul.msk.f32.gmra.mxu3 %vm271_vm1, %v12791_v28  ;;  %v12814_v20 = vsel %vm4139_vm6, %v4210_v57, %v4211_v44 }
 0x5b0   : > { %v4306_v3 = vpop.f32.mrf.mxu1 }
 0x5b1   : > { %v3913_v34 = vpop.f32.mrf.mxu3  ;;  %8654 = vmatmul.msk.f32.gmra.mxu2 %vm271_vm1, %v12583_v54  ;;  %v4213_v54 = vrot.slane %v12829_v39, 2 }
 0x5b2   : > { %v3949_v61 = vadd.f32 %v3913_v34, %v3791_v6  ;;  %v4970_v12 = vpop.f32.mrf.mxu0 }
 0x5b3   : > { %8621 = vmatmul.msk.f32.gmra.mxu1 %vm271_vm1, %v12605_v56  ;;  %v12836_v34 = vsel %vm4139_vm6, %v4211_v44, %v4213_v54  ;;  %v9338_v54 = vld [vmem:[#allocation2 + $0x368] sm:$0xff] }
 0x5b4   : > { %v12816_v37 = vadd.f32 %v4092_v31, %v3949_v61  ;;  %v3758_v31 = vpop.f32.mrf.mxu2 }
 0x5b5   : > { %8723 = vmatmul.msk.f32.gmra.mxu0 %vm271_vm1, %v12814_v20  ;;  %v3792_v49 = vadd.f32 %v3758_v31, %v3609_v33  ;;  %v4402_v33 = vadd.f32 %v4306_v3, %v12341_v24  ;;  %v4643_v31 = vrot.slane %v9337_v9, 6 }
 0x5b6   : > { %15213 = vst [vmem:[#allocation72_spill] sm:$0xff] %v12816_v37  ;;  %8688 = vmatmul.msk.f32.gmra.mxu3 %vm271_vm1, %v12811_v55 }
 0x5b7   : > { %v12853_v24 = vsel %vm4599_vm7, %v4641_v4, %v4643_v31  ;;  %v4645_v4 = vrot.slane %v12631_v30, 6  ;;  %v4646_v31 = vrot.slane %v12647_v52, 6 }
 0x5b8   : > { %v4309_v60 = vpop.f32.mrf.mxu1 }
 0x5b9   : > { %v3916_v57 = vpop.f32.mrf.mxu3  ;;  %8655 = vmatmul.msk.f32.gmra.mxu2 %vm271_vm1, %v12599_v15 }
 0x5ba   : > { %v3950_v6 = vadd.f32 %v3916_v57, %v3792_v49  ;;  %v4973_v56 = vpop.f32.mrf.mxu0  ;;  %v12849_v49 = vld [vmem:[#allocation2 + $0x370] sm:$0xff] }
 0x5bb   : > { %8622 = vmatmul.msk.f32.gmra.mxu1 %vm271_vm1, %v12621_v10  ;;  %v4216_v15 = vrot.slane %v12849_v49, 2 }
 0x5bc   : > { %v12838_v61 = vadd.f32 %v4095_v13, %v3950_v6  ;;  %v4468_v44 = vpop.f32.mrf.mxu2  ;;  %v4215_v13 = vrot.slane %v9338_v54, 2 }
 0x5bd   : > { %8724 = vmatmul.msk.f32.gmra.mxu0 %vm271_vm1, %v12836_v34  ;;  %v4564_v57 = vadd.f32 %v4468_v44, %v4402_v33  ;;  %v4403_v33 = vadd.f32 %v4309_v60, %v12352_v38  ;;  %v12875_v38 = vsel %vm4599_vm7, %v4645_v4, %v4646_v31  ;;  %v9341_v4 = vld [vmem:[#allocation2 + $0x260] sm:$0xff] }
 0x5be   : > { %15214 = vst [vmem:[#allocation118_spill] sm:$0xff] %v12838_v61  ;;  %8689 = vmatmul.msk.f32.gmra.mxu3 %vm271_vm1, %v12833_v36  ;;  %v12856_v9 = vsel %vm4139_vm6, %v4215_v13, %v4216_v15 }
 0x5c0   : > { %v4312_v3 = vpop.f32.mrf.mxu1 }
 0x5c1   : > { %v4766_v6 = vpop.f32.mrf.mxu3  ;;  %8656 = vmatmul.msk.f32.gmra.mxu2 %vm271_vm1, %v12615_v11 }
 0x5c2   : > { %v4862_v61 = vadd.f32 %v4766_v6, %v4564_v57  ;;  %v4976_v10 = vpop.f32.mrf.mxu0 }
 0x5c3   : > { %8623 = vmatmul.msk.f32.gmra.mxu1 %vm271_vm1, %v12637_v22 }
 0x5c4   : > { %v12858_v37 = vadd.f32 %v4970_v12, %v4862_v61  ;;  %v4471_v12 = vpop.f32.mrf.mxu2  ;;  %v12871_v61 = vld [vmem:[#allocation2 + $0x378] sm:$0xff] }
 0x5c5   : > { %8725 = vmatmul.msk.f32.gmra.mxu0 %vm271_vm1, %v12856_v9  ;;  %v4218_v11 = vrot.slane %v12871_v61, 2  ;;  %v4565_v44 = vadd.f32 %v4471_v12, %v4403_v33  ;;  %v4404_v33 = vadd.f32 %v4312_v3, %v12368_v47  ;;  %v4648_v12 = vrot.slane %v9341_v4, 6 }
 0x5c6   : > { %15215 = vst [vmem:[#allocation102_spill] sm:$0xff] %v12858_v37  ;;  %8690 = vmatmul.msk.f32.gmra.mxu3 %vm271_vm1, %v12853_v24 }
 0x5c7   : > { %v12878_v57 = vsel %vm4139_vm6, %v4216_v15, %v4218_v11  ;;  %v9342_v11 = vld [vmem:[#allocation2 + $0x398] sm:$0xff]  ;;  %v12895_v47 = vsel %vm4599_vm7, %v4646_v31, %v4648_v12  ;;  %v4650_v31 = vrot.slane %v12663_v5, 6  ;;  %v4651_v12 = vrot.slane %v12679_v23, 6 }
 0x5c8   : > { %v4315_v60 = vpop.f32.mrf.mxu1 }
 0x5c9   : > { %v4769_v54 = vpop.f32.mrf.mxu3  ;;  %8657 = vmatmul.msk.f32.gmra.mxu2 %vm271_vm1, %v12631_v30 }
 0x5ca   : > { %v4863_v13 = vadd.f32 %v4769_v54, %v4565_v44  ;;  %v4979_v22 = vpop.f32.mrf.mxu0  ;;  %v12891_v44 = vld [vmem:[#allocation2 + $0x3a0] sm:$0xff] }
 0x5cb   : > { %8624 = vmatmul.msk.f32.gmra.mxu1 %vm271_vm1, %v12653_v26  ;;  %v4895_v30 = vrot.slane %v12891_v44, 2 }
 0x5cc   : > { %v12880_v6 = vadd.f32 %v4973_v56, %v4863_v13  ;;  %v4474_v15 = vpop.f32.mrf.mxu2  ;;  %v4894_v56 = vrot.slane %v9342_v11, 2 }
 0x5cd   : > { %8726 = vmatmul.msk.f32.gmra.mxu0 %vm271_vm1, %v12878_v57  ;;  %v4566_v54 = vadd.f32 %v4474_v15, %v4404_v33  ;;  %v4405_v33 = vadd.f32 %v4315_v60, %v12382_v48  ;;  %v12917_v48 = vsel %vm4599_vm7, %v4650_v31, %v4651_v12  ;;  %v9345_v31 = vld [vmem:[#allocation2 + $0x290] sm:$0xff] }
 0x5ce   : > { %15216 = vst [vmem:[#allocation101_spill] sm:$0xff] %v12880_v6  ;;  %8691 = vmatmul.msk.f32.gmra.mxu3 %vm271_vm1, %v12875_v38  ;;  %v12898_v4 = vsel %vm4139_vm6, %v4894_v56, %v4895_v30 }
 0x5d0   : > { %v4318_v3 = vpop.f32.mrf.mxu1 }
 0x5d1   : > { %v4772_v13 = vpop.f32.mrf.mxu3  ;;  %8658 = vmatmul.msk.f32.gmra.mxu2 %vm271_vm1, %v12647_v52 }
 0x5d2   : > { %v4864_v6 = vadd.f32 %v4772_v13, %v4566_v54  ;;  %v4982_v26 = vpop.f32.mrf.mxu0 }
 0x5d3   : > { %8625 = vmatmul.msk.f32.gmra.mxu1 %vm271_vm1, %v12669_v8 }
 0x5d4   : > { %v12900_v37 = vadd.f32 %v4976_v10, %v4864_v6  ;;  %v4477_v10 = vpop.f32.mrf.mxu2  ;;  %v12913_v6 = vld [vmem:[#allocation2 + $0x3a8] sm:$0xff] }
 0x5d5   : > { %8727 = vmatmul.msk.f32.gmra.mxu0 %vm271_vm1, %v12898_v4  ;;  %v4897_v52 = vrot.slane %v12913_v6, 2  ;;  %v4567_v15 = vadd.f32 %v4477_v10, %v4405_v33  ;;  %v4406_v33 = vadd.f32 %v4318_v3, %v12398_v62  ;;  %v4653_v10 = vrot.slane %v9345_v31, 6 }
 0x5d6   : > { %15217 = vst [vmem:[#allocation75_spill] sm:$0xff] %v12900_v37  ;;  %8692 = vmatmul.msk.f32.gmra.mxu3 %vm271_vm1, %v12895_v47 }
 0x5d7   : > { %v12920_v54 = vsel %vm4139_vm6, %v4895_v30, %v4897_v52  ;;  %v9346_v52 = vld [vmem:[#allocation2 + $0x3c8] sm:$0xff]  ;;  %v12937_v62 = vsel %vm4599_vm7, %v4651_v12, %v4653_v10  ;;  %v4655_v12 = vrot.slane %v12695_v29, 6  ;;  %v4656_v10 = vrot.slane %v12711_v35, 6 }
 0x5d8   : > { %v4321_v60 = vpop.f32.mrf.mxu1 }
 0x5d9   : > { %v4775_v11 = vpop.f32.mrf.mxu3  ;;  %8659 = vmatmul.msk.f32.gmra.mxu2 %vm271_vm1, %v12663_v5 }
 0x5da   : > { %v4865_v56 = vadd.f32 %v4775_v11, %v4567_v15  ;;  %v4985_v8 = vpop.f32.mrf.mxu0  ;;  %v12933_v15 = vld [vmem:[#allocation2 + $0x3d0] sm:$0xff] }
 0x5db   : > { %8626 = vmatmul.msk.f32.gmra.mxu1 %vm271_vm1, %v12685_v45  ;;  %v4900_v5 = vrot.slane %v12933_v15, 2 }
 0x5dc   : > { %v12922_v13 = vadd.f32 %v4979_v22, %v4865_v56  ;;  %v4480_v30 = vpop.f32.mrf.mxu2  ;;  %v4899_v22 = vrot.slane %v9346_v52, 2 }
 0x5dd   : > { %8728 = vmatmul.msk.f32.gmra.mxu0 %vm271_vm1, %v12920_v54  ;;  %v4568_v11 = vadd.f32 %v4480_v30, %v4406_v33  ;;  %v4407_v33 = vadd.f32 %v4321_v60, %v12412_v27  ;;  %v12959_v27 = vsel %vm4599_vm7, %v4655_v12, %v4656_v10  ;;  %v9349_v12 = vld [vmem:[#allocation2 + $0x2c0] sm:$0xff] }
 0x5de   : > { %15218 = vst [vmem:[#allocation103_spill] sm:$0xff] %v12922_v13  ;;  %8693 = vmatmul.msk.f32.gmra.mxu3 %vm271_vm1, %v12917_v48  ;;  %v12940_v31 = vsel %vm4139_vm6, %v4899_v22, %v4900_v5 }
 0x5e0   : > { %v4324_v3 = vpop.f32.mrf.mxu1 }
 0x5e1   : > { %v4778_v56 = vpop.f32.mrf.mxu3  ;;  %8660 = vmatmul.msk.f32.gmra.mxu2 %vm271_vm1, %v12679_v23 }
 0x5e2   : > { %v4866_v13 = vadd.f32 %v4778_v56, %v4568_v11  ;;  %v4988_v45 = vpop.f32.mrf.mxu0 }
 0x5e3   : > { %8627 = vmatmul.msk.f32.gmra.mxu1 %vm271_vm1, %v12701_v14 }
 0x5e4   : > { %v12942_v37 = vadd.f32 %v4982_v26, %v4866_v13  ;;  %v4483_v26 = vpop.f32.mrf.mxu2  ;;  %v12955_v13 = vld [vmem:[#allocation2 + $0x3d8] sm:$0xff] }
 0x5e5   : > { %8729 = vmatmul.msk.f32.gmra.mxu0 %vm271_vm1, %v12940_v31  ;;  %v4902_v23 = vrot.slane %v12955_v13, 2  ;;  %v4569_v30 = vadd.f32 %v4483_v26, %v4407_v33  ;;  %v4408_v33 = vadd.f32 %v4324_v3, %v12428_v42  ;;  %v4658_v26 = vrot.slane %v9349_v12, 6 }
 0x5e6   : > { %15219 = vst [vmem:[#allocation20_spill] sm:$0xff] %v12942_v37  ;;  %8694 = vmatmul.msk.f32.gmra.mxu3 %vm271_vm1, %v12937_v62 }
 0x5e7   : > { %v12962_v11 = vsel %vm4139_vm6, %v4900_v5, %v4902_v23  ;;  %v9350_v23 = vld [vmem:[#allocation2 + $0x3f8] sm:$0xff]  ;;  %v12979_v42 = vsel %vm4599_vm7, %v4656_v10, %v4658_v26  ;;  %v4660_v10 = vrot.slane %v12727_v16, 6  ;;  %v4661_v26 = vrot.slane %v12745_v50, 6 }
 0x5e8   : > { %v4327_v60 = vpop.f32.mrf.mxu1  ;;  %15220 = vst [vmem:[#allocation122_spill] sm:$0xff] %v12962_v11 }
 0x5e9   : > { %v4781_v52 = vpop.f32.mrf.mxu3  ;;  %8661 = vmatmul.msk.f32.gmra.mxu2 %vm271_vm1, %v12695_v29 }
 0x5ea   : > { %v4867_v22 = vadd.f32 %v4781_v52, %v4569_v30  ;;  %v4991_v14 = vpop.f32.mrf.mxu0  ;;  %v12975_v30 = vld [vmem:[#allocation2 + $0x400] sm:$0xff] }
 0x5eb   : > { %8628 = vmatmul.msk.f32.gmra.mxu1 %vm271_vm1, %v12717_v43  ;;  %v4905_v29 = vrot.slane %v12975_v30, 2 }
 0x5ec   : > { %v12964_v56 = vadd.f32 %v4985_v8, %v4867_v22  ;;  %v4486_v5 = vpop.f32.mrf.mxu2  ;;  %v4904_v8 = vrot.slane %v9350_v23, 2 }
 0x5ed   : > { %8730 = vmatmul.msk.f32.gmra.mxu0 %vm271_vm1, %v12962_v11  ;;  %v4570_v52 = vadd.f32 %v4486_v5, %v4408_v33  ;;  %v4409_v33 = vadd.f32 %v4327_v60, %v12442_v51  ;;  %v13001_v51 = vsel %vm4599_vm7, %v4660_v10, %v4661_v26  ;;  %v9353_v10 = vld [vmem:[#allocation2 + $0x2f0] sm:$0xff] }
 0x5ee   : > { %15221 = vst [vmem:[#allocation55_spill] sm:$0xff] %v12964_v56  ;;  %8695 = vmatmul.msk.f32.gmra.mxu3 %vm271_vm1, %v12959_v27  ;;  %v12982_v12 = vsel %vm4139_vm6, %v4904_v8, %v4905_v29 }
 0x5ef   : > { %15222 = vst [vmem:[#allocation107_spill] sm:$0xff] %v12982_v12 }
 0x5f0   : > { %v4330_v3 = vpop.f32.mrf.mxu1 }
 0x5f1   : > { %v4784_v22 = vpop.f32.mrf.mxu3  ;;  %8662 = vmatmul.msk.f32.gmra.mxu2 %vm271_vm1, %v12711_v35 }
 0x5f2   : > { %v4868_v56 = vadd.f32 %v4784_v22, %v4570_v52  ;;  %v4994_v43 = vpop.f32.mrf.mxu0 }
 0x5f3   : > { %8629 = vmatmul.msk.f32.gmra.mxu1 %vm271_vm1, %v12732_v46 }
 0x5f4   : > { %v12984_v37 = vadd.f32 %v4988_v45, %v4868_v56  ;;  %v4489_v45 = vpop.f32.mrf.mxu2  ;;  %v12997_v56 = vld [vmem:[#allocation2 + $0x408] sm:$0xff] }
 0x5f5   : > { %8731 = vmatmul.msk.f32.gmra.mxu0 %vm271_vm1, %v12982_v12  ;;  %15224 = vst [vmem:[#allocation71_spill] sm:$0xff] %v12997_v56  ;;  %v4907_v35 = vrot.slane %v12997_v56, 2  ;;  %v4571_v5 = vadd.f32 %v4489_v45, %v4409_v33  ;;  %v4410_v33 = vadd.f32 %v4330_v3, %v12454_v17  ;;  %v4663_v45 = vrot.slane %v9353_v10, 6 }
 0x5f6   : > { %15223 = vst [vmem:[#allocation89_spill] sm:$0xff] %v12984_v37  ;;  %8696 = vmatmul.msk.f32.gmra.mxu3 %vm271_vm1, %v12979_v42 }
 0x5f7   : > { %v13004_v22 = vsel %vm4139_vm6, %v4905_v29, %v4907_v35  ;;  %v9354_v35 = vld [vmem:[#allocation2 + $0x428] sm:$0xff]  ;;  %v13021_v17 = vsel %vm4599_vm7, %v4661_v26, %v4663_v45  ;;  %v4666_v26 = vrot.slane %v12787_v19, 6 }
 0x5f8   : > { %v4333_v60 = vpop.f32.mrf.mxu1  ;;  %15225 = vst [vmem:[#allocation31_spill] sm:$0xff] %v13004_v22 }
 0x5f9   : > { %v4787_v23 = vpop.f32.mrf.mxu3  ;;  %8663 = vmatmul.msk.f32.gmra.mxu2 %vm271_vm1, %v12727_v16 }
 0x5fa   : > { %v4869_v8 = vadd.f32 %v4787_v23, %v4571_v5  ;;  %v4997_v52 = vpop.f32.mrf.mxu0  ;;  %v13017_v5 = vld [vmem:[#allocation2 + $0x430] sm:$0xff] }
 0x5fb   : > { %8630 = vmatmul.msk.f32.gmra.mxu1 %vm271_vm1, %v12752_v18  ;;  %15227 = vst [vmem:[#allocation64_spill] sm:$0xff] %v13017_v5  ;;  %v4910_v23 = vrot.slane %v13017_v5, 2 }
 0x5fc   : > { %v13006_v37 = vadd.f32 %v4991_v14, %v4869_v8  ;;  %v4492_v29 = vpop.f32.mrf.mxu2  ;;  %v4909_v14 = vrot.slane %v9354_v35, 2 }
 0x5fd   : > { %8732 = vmatmul.msk.f32.gmra.mxu0 %vm271_vm1, %v13004_v22  ;;  %v4572_v8 = vadd.f32 %v4492_v29, %v4410_v33  ;;  %v4411_v33 = vadd.f32 %v4333_v60, %v12466_v59 }
 0x5fe   : > { %15226 = vst [vmem:[#allocation125_spill] sm:$0xff] %v13006_v37  ;;  %8697 = vmatmul.msk.f32.gmra.mxu3 %vm271_vm1, %v13001_v51  ;;  %v13024_v10 = vsel %vm4139_vm6, %v4909_v14, %v4910_v23 }
 0x5ff   : > { %15228 = vst [vmem:[#allocation50_spill] sm:$0xff] %v13024_v10 }
 0x600   : > { %v4336_v3 = vpop.f32.mrf.mxu1 }
 0x601   : > { %v4790_v37 = vpop.f32.mrf.mxu3  ;;  %8664 = vmatmul.msk.f32.gmra.mxu2 %vm271_vm1, %v12745_v50 }
 0x602   : > { %v4870_v1 = vadd.f32 %v4790_v37, %v4572_v8  ;;  %v5000_v12 = vpop.f32.mrf.mxu0  ;;  %v4665_v37 = vrot.slane %v12765_v58, 6 }
 0x603   : > { %8631 = vmatmul.msk.f32.gmra.mxu1 %vm271_vm1, %v12772_v2 }
 0x604   : > { %v13026_v32 = vadd.f32 %v4994_v43, %v4870_v1  ;;  %v4495_v1 = vpop.f32.mrf.mxu2  ;;  %v13039_v43 = vld [vmem:[#allocation2 + $0x438] sm:$0xff]  ;;  %v13043_v59 = vsel %vm4599_vm7, %v4665_v37, %v4666_v26  ;;  %v9357_v37 = vld [vmem:[#allocation2 + $0x320] sm:$0xff] }
 0x605   : > { %8733 = vmatmul.msk.f32.gmra.mxu0 %vm271_vm1, %v13024_v10  ;;  %15230 = vst [vmem:[#allocation115_spill] sm:$0xff] %v13039_v43  ;;  %v4912_v45 = vrot.slane %v13039_v43, 2  ;;  %v4573_v29 = vadd.f32 %v4495_v1, %v4411_v33  ;;  %v4412_v33 = vadd.f32 %v4336_v3, %v12476_v0  ;;  %v4668_v1 = vrot.slane %v9357_v37, 6 }
 0x606   : > { %15229 = vst [vmem:[#allocation44_spill] sm:$0xff] %v13026_v32  ;;  %8698 = vmatmul.msk.f32.gmra.mxu3 %vm271_vm1, %v13021_v17 }
 0x607   : > { %v13046_v32 = vsel %vm4139_vm6, %v4910_v23, %v4912_v45  ;;  %v9358_v45 = vld [vmem:[#allocation2 + $0x458] sm:$0xff]  ;;  %v13063_v0 = vsel %vm4599_vm7, %v4666_v26, %v4668_v1  ;;  %v4671_v26 = vrot.slane %v12829_v39, 6 }
 0x608   : > { %v4339_v60 = vpop.f32.mrf.mxu1  ;;  %15231 = vst [vmem:[#allocation104_spill] sm:$0xff] %v13046_v32 }
 0x609   : > { %v4793_v35 = vpop.f32.mrf.mxu3  ;;  %8665 = vmatmul.msk.f32.gmra.mxu2 %vm271_vm1, %v12765_v58 }
 0x60a   : > { %v4871_v14 = vadd.f32 %v4793_v35, %v4573_v29  ;;  %v5003_v8 = vpop.f32.mrf.mxu0  ;;  %v13059_v29 = vld [vmem:[#allocation2 + $0x460] sm:$0xff] }
 0x60b   : > { %8632 = vmatmul.msk.f32.gmra.mxu1 %vm271_vm1, %v12794_v21  ;;  %15233 = vst [vmem:[#allocation119_spill] sm:$0xff] %v13059_v29  ;;  %v4915_v35 = vrot.slane %v13059_v29, 2 }
 0x60c   : > { %v13048_v22 = vadd.f32 %v4997_v52, %v4871_v14  ;;  %v4498_v23 = vpop.f32.mrf.mxu2  ;;  %v4914_v52 = vrot.slane %v9358_v45, 2 }
 0x60d   : > { %8734 = vmatmul.msk.f32.gmra.mxu0 %vm271_vm1, %v13046_v32  ;;  %v4574_v14 = vadd.f32 %v4498_v23, %v4412_v33  ;;  %v4413_v33 = vadd.f32 %v4339_v60, %v12486_v63 }
 0x60e   : > { %15232 = vst [vmem:[#allocation105_spill] sm:$0xff] %v13048_v22  ;;  %8699 = vmatmul.msk.f32.gmra.mxu3 %vm271_vm1, %v13043_v59  ;;  %v13066_v37 = vsel %vm4139_vm6, %v4914_v52, %v4915_v35 }
 0x60f   : > { %15234 = vst [vmem:[#allocation74_spill] sm:$0xff] %v13066_v37 }
 0x610   : > { %v4342_v3 = vpop.f32.mrf.mxu1 }
 0x611   : > { %v4796_v22 = vpop.f32.mrf.mxu3  ;;  %8666 = vmatmul.msk.f32.gmra.mxu2 %vm271_vm1, %v12787_v19 }
 0x612   : > { %v4872_v10 = vadd.f32 %v4796_v22, %v4574_v14  ;;  %v5006_v43 = vpop.f32.mrf.mxu0  ;;  %v4670_v22 = vrot.slane %v12807_v53, 6 }
 0x613   : > { %8633 = vmatmul.msk.f32.gmra.mxu1 %vm271_vm1, %v12814_v20 }
 0x614   : > { %v13068_v5 = vadd.f32 %v5000_v12, %v4872_v10  ;;  %v4501_v12 = vpop.f32.mrf.mxu2  ;;  %v13081_v10 = vld [vmem:[#allocation2 + $0x468] sm:$0xff]  ;;  %v13085_v63 = vsel %vm4599_vm7, %v4670_v22, %v4671_v26 }
 0x615   : > { %8735 = vmatmul.msk.f32.gmra.mxu0 %vm271_vm1, %v13066_v37  ;;  %15236 = vst [vmem:[#allocation116_spill] sm:$0xff] %v13081_v10  ;;  %v4917_v1 = vrot.slane %v13081_v10, 2  ;;  %v4575_v23 = vadd.f32 %v4501_v12, %v4413_v33  ;;  %v8909_v37 = vld [vmem:[%s14634_s2 + $0x64] sm:$0xf]  ;;  %v8943_v33 = vld [vmem:[%s14634_s2 + $0x68] sm:$0xf] }
 0x616   : > { %15235 = vst [vmem:[#allocation18_spill] sm:$0xff] %v13068_v5  ;;  %8700 = vmatmul.msk.f32.gmra.mxu3 %vm271_vm1, %v13063_v0  ;;  %8910 = vmatpush.msk.msrb.mxu2 %vm940_vm0, %v8909_v37 }
 0x617   : > { %v13088_v5 = vsel %vm4139_vm6, %v4915_v35, %v4917_v1  ;;  %v15239_v35 = vld [vmem:[#allocation66_spill] sm:$0xff]  ;;  %8944 = vmatpush.msk.msrb.mxu3 %vm940_vm0, %v8943_v33  ;;  %v4675_v33 = vrot.slane %v12849_v49, 6 }
 0x618   : > { %v4345_v60 = vpop.f32.mrf.mxu1  ;;  %15237 = vst [vmem:[#allocation117_spill] sm:$0xff] %v13088_v5  ;;  %v4414_v22 = vadd.f32 %v4342_v3, %v15239_v35  ;;  %v8875_v3 = vld [vmem:[%s14634_s2 + $0x60] sm:$0xf] }
 0x619   : > { %v4799_v45 = vpop.f32.mrf.mxu3  ;;  %8667 = vmatmul.msk.f32.gmra.mxu2 %vm271_vm1, %v12807_v53  ;;  %8876 = vmatpush.msk.msrb.mxu1 %vm940_vm0, %v8875_v3 }
 0x61a   : > { %v4873_v52 = vadd.f32 %v4799_v45, %v4575_v23  ;;  %v5009_v14 = vpop.f32.mrf.mxu0  ;;  %v9362_v23 = vld [vmem:[#allocation2 + $0x488] sm:$0xff] }
 0x61b   : > { %8634 = vmatmul.msk.f32.gmra.mxu1 %vm271_vm1, %v12836_v34  ;;  %v4919_v45 = vrot.slane %v9362_v23, 2 }
 0x61c   : > { %v13090_v32 = vadd.f32 %v5003_v8, %v4873_v52  ;;  %v9361_v8 = vld [vmem:[#allocation2 + $0x350] sm:$0xff]  ;;  %v4504_v1 = vpop.f32.mrf.mxu2 }
 0x61d   : > { %v4673_v12 = vrot.slane %v9361_v8, 6  ;;  %8736 = vmatmul.msk.f32.gmra.mxu0 %vm271_vm1, %v13088_v5  ;;  %v13108_v52 = vld [vmem:[#allocation2 + $0x490] sm:$0xff] }
 0x61e   : > { %15238 = vst [vmem:[#allocation127_spill] sm:$0xff] %v13090_v32  ;;  %8701 = vmatmul.msk.f32.gmra.mxu3 %vm271_vm1, %v13085_v63  ;;  %v4920_v37 = vrot.slane %v13108_v52, 2  ;;  %v4576_v32 = vadd.f32 %v4504_v1, %v4414_v22 }
 0x61f   : > { %15240 = vst [vmem:[#allocation130_spill] sm:$0xff] %v13108_v52  ;;  %v13117_v8 = vsel %vm4599_vm7, %v4671_v26, %v4673_v12  ;;  %v13138_v12 = vld [vmem:[#allocation2 + $0x498] sm:$0xff] }
 0x620   : > { %v4348_v5 = vpop.f32.mrf.mxu1  ;;  %v13120_v29 = vsel %vm4139_vm6, %v4919_v45, %v4920_v37  ;;  %v4922_v1 = vrot.slane %v13138_v12, 2 }
 0x621   : > { %v4802_v10 = vpop.f32.mrf.mxu3  ;;  %15241 = vst [vmem:[#allocation120_spill] sm:$0xff] %v13120_v29  ;;  %8668 = vmatmul.msk.f32.gmra.mxu2 %vm271_vm1, %v12829_v39 }
 0x622   : > { %v4874_v35 = vadd.f32 %v4802_v10, %v4576_v32  ;;  %v5012_v23 = vpop.f32.mrf.mxu0  ;;  %v8977_v32 = vld [vmem:[%s14634_s2 + $0x6c] sm:$0xf]  ;;  %v13146_v11 = vsel %vm4139_vm6, %v4920_v37, %v4922_v1 }
 0x623   : > { %v15243_v10 = vld [vmem:[#allocation90_spill] sm:$0xff]  ;;  %8635 = vmatmul.msk.f32.gmra.mxu1 %vm271_vm1, %v12856_v9  ;;  %8978 = vmatpush.msk.msrb.mxu0 %vm940_vm0, %v8977_v32 }
 0x624   : > { %v13122_v52 = vadd.f32 %v5006_v43, %v4874_v35  ;;  %v4415_v26 = vadd.f32 %v4345_v60, %v15243_v10  ;;  %v4676_v43 = vrot.slane %v12871_v61, 6  ;;  %v4507_v22 = vpop.f32.mrf.mxu2  ;;  %v15245_v32 = vld [vmem:[#allocation54_spill] sm:$0xff] }
 0x625   : > { %8737 = vmatmul.msk.f32.gmra.mxu0 %vm271_vm1, %v13120_v29 }
 0x626   : > { %15242 = vst [vmem:[#allocation128_spill] sm:$0xff] %v13122_v52  ;;  %8702 = vmatmul.msk.f32.gmra.mxu3 %vm271_vm1, %v13117_v8  ;;  %v4577_v45 = vadd.f32 %v4507_v22, %v4415_v26  ;;  %v13143_v35 = vsel %vm4599_vm7, %v4675_v33, %v4676_v43  ;;  %v4416_v26 = vadd.f32 %v4348_v5, %v15245_v32  ;;  %v9365_v33 = vld [vmem:[#allocation2 + $0x380] sm:$0xff] }
 0x627   : > { %v4678_v22 = vrot.slane %v9365_v33, 6  ;;  %v15246_v5 = vld [vmem:[#allocation53_spill] sm:$0xff] }
 0x628   : > { %v4351_v10 = vpop.f32.mrf.mxu1 }
 0x629   : > { %v4805_v3 = vpop.f32.mrf.mxu3  ;;  %8669 = vmatmul.msk.f32.gmra.mxu2 %vm271_vm1, %v12849_v49  ;;  %v4417_v32 = vadd.f32 %v4351_v10, %v15246_v5  ;;  %v15247_v10 = vld [vmem:[#allocation110_spill] sm:$0xff] }
 0x62a   : > { %v4875_v60 = vadd.f32 %v4805_v3, %v4577_v45  ;;  %v5015_v52 = vpop.f32.mrf.mxu0  ;;  %v13160_v3 = vsel %vm4599_vm7, %v4676_v43, %v4678_v22 }
 0x62b   : > { %8636 = vmatmul.msk.f32.gmra.mxu1 %vm271_vm1, %v12878_v57 }
 0x62c   : > { %v13148_v56 = vadd.f32 %v5009_v14, %v4875_v60  ;;  %v4510_v37 = vpop.f32.mrf.mxu2 }
 0x62d   : > { %8738 = vmatmul.msk.f32.gmra.mxu0 %vm271_vm1, %v13146_v11  ;;  %v4578_v1 = vadd.f32 %v4510_v37, %v4416_v26 }
 0x62e   : > { %15244 = vst [vmem:[#allocation121_spill] sm:$0xff] %v13148_v56  ;;  %8703 = vmatmul.msk.f32.gmra.mxu3 %vm271_vm1, %v13143_v35 }
 0x630   : > { %v4354_v60 = vpop.f32.mrf.mxu1 }
 0x631   : > { %v4808_v14 = vpop.f32.mrf.mxu3  ;;  %8670 = vmatmul.msk.f32.gmra.mxu2 %vm271_vm1, %v12871_v61 }
 0x632   : > { %v4876_v45 = vadd.f32 %v4808_v14, %v4578_v1  ;;  %v5018_v56 = vpop.f32.mrf.mxu0  ;;  %v4418_v14 = vadd.f32 %v4354_v60, %v15247_v10 }
 0x633   : > { %8741 = vmatmul.msk.f32.vlgmr.msra.gmra.mxu1 %vm271_vm1, %v12749_v25 }
 0x634   : > { %v13162_v29 = vadd.f32 %v5012_v23, %v4876_v45  ;;  %v4513_v43 = vpop.f32.mrf.mxu2 }
 0x635   : > { %8843 = vmatmul.msk.f32.vlgmr.msra.gmra.mxu0 %vm271_vm1, %v13001_v51  ;;  %v4579_v26 = vadd.f32 %v4513_v43, %v4417_v32 }
 0x636   : > { %8704 = vmatmul.msk.f32.gmra.mxu3 %vm271_vm1, %v13160_v3 }
 0x638   : > { %v4357_v23 = vpop.f32.mrf.mxu1 }
 0x639   : > { %v4811_v33 = vpop.f32.mrf.mxu3  ;;  %8775 = vmatmul.msk.f32.vlgmr.msra.gmra.mxu2 %vm271_vm1, %v12732_v46 }
 0x63a   : > { %v4877_v22 = vadd.f32 %v4811_v33, %v4579_v26  ;;  %v5021_v37 = vpop.f32.mrf.mxu0 }
 0x63b   : > { %8742 = vmatmul.msk.f32.gmra.mxu1 %vm271_vm1, %v12769_v40 }
 0x63c   : > { %v13173_v1 = vadd.f32 %v5015_v52, %v4877_v22  ;;  %v4516_v25 = vpop.f32.mrf.mxu2 }
 0x63d   : > { %8844 = vmatmul.msk.f32.gmra.mxu0 %vm271_vm1, %v13021_v17  ;;  %v4580_v45 = vadd.f32 %v4516_v25, %v4418_v14 }
 0x63e   : > { %8809 = vmatmul.msk.f32.vlgmr.msra.gmra.mxu3 %vm271_vm1, %v12727_v16  ;;  %v15248_v16 = vld [vmem:[#allocation39_spill] sm:$0xff] }
 0x63f   : > { %v4419_v46 = vadd.f32 %v4357_v23, %v15248_v16 }
 0x640   : > { %v4360_v52 = vpop.f32.mrf.mxu1 }
 0x641   : > { %v4814_v5 = vpop.f32.mrf.mxu3  ;;  %8776 = vmatmul.msk.f32.gmra.mxu2 %vm271_vm1, %v12752_v18 }
 0x642   : > { %v4878_v32 = vadd.f32 %v4814_v5, %v4580_v45  ;;  %v5024_v43 = vpop.f32.mrf.mxu0 }
 0x643   : > { %8743 = vmatmul.msk.f32.gmra.mxu1 %vm271_vm1, %v12791_v28 }
 0x644   : > { %v13184_v26 = vadd.f32 %v5018_v56, %v4878_v32  ;;  %v4519_v40 = vpop.f32.mrf.mxu2 }
 0x645   : > { %8845 = vmatmul.msk.f32.gmra.mxu0 %vm271_vm1, %v13043_v59  ;;  %v4581_v60 = vadd.f32 %v4519_v40, %v4419_v46 }
 0x646   : > { %8810 = vmatmul.msk.f32.gmra.mxu3 %vm271_vm1, %v12745_v50  ;;  %v15249_v50 = vld [vmem:[#allocation82_spill] sm:$0xff] }
 0x647   : > { %v4420_v18 = vadd.f32 %v4360_v52, %v15249_v50 }
 0x648   : > { %v4363_v56 = vpop.f32.mrf.mxu1 }
 0x649   : > { %v4817_v33 = vpop.f32.mrf.mxu3  ;;  %8777 = vmatmul.msk.f32.gmra.mxu2 %vm271_vm1, %v12772_v2 }
 0x64a   : > { %v4879_v22 = vadd.f32 %v4817_v33, %v4581_v60  ;;  %v5027_v10 = vpop.f32.mrf.mxu0 }
 0x64b   : > { %8744 = vmatmul.msk.f32.gmra.mxu1 %vm271_vm1, %v12811_v55 }
 0x64c   : > { %v13195_v14 = vadd.f32 %v5021_v37, %v4879_v22  ;;  %v4522_v28 = vpop.f32.mrf.mxu2 }
 0x64d   : > { %8846 = vmatmul.msk.f32.gmra.mxu0 %vm271_vm1, %v13063_v0  ;;  %v4582_v23 = vadd.f32 %v4522_v28, %v4420_v18 }
 0x64e   : > { %8811 = vmatmul.msk.f32.gmra.mxu3 %vm271_vm1, %v12765_v58  ;;  %v15250_v58 = vld [vmem:[#allocation78_spill] sm:$0xff] }
 0x64f   : > { %v4421_v2 = vadd.f32 %v4363_v56, %v15250_v58  ;;  %v5098_v58 = vrot.slane %v12891_v44, 6 }
 0x650   : > { %v4366_v37 = vpop.f32.mrf.mxu1 }
 0x651   : > { %v4820_v25 = vpop.f32.mrf.mxu3  ;;  %8778 = vmatmul.msk.f32.gmra.mxu2 %vm271_vm1, %v12794_v21 }
 0x652   : > { %v4880_v45 = vadd.f32 %v4820_v25, %v4582_v23  ;;  %v5030_v5 = vpop.f32.mrf.mxu0 }
 0x653   : > { %8745 = vmatmul.msk.f32.gmra.mxu1 %vm271_vm1, %v12833_v36 }
 0x654   : > { %v13206_v32 = vadd.f32 %v5024_v43, %v4880_v45  ;;  %v4525_v55 = vpop.f32.mrf.mxu2 }
 0x655   : > { %8847 = vmatmul.msk.f32.gmra.mxu0 %vm271_vm1, %v13085_v63  ;;  %v4583_v52 = vadd.f32 %v4525_v55, %v4421_v2  ;;  %v5099_v2 = vrot.slane %v12913_v6, 6 }
 0x656   : > { %8812 = vmatmul.msk.f32.gmra.mxu3 %vm271_vm1, %v12787_v19  ;;  %v15251_v19 = vld [vmem:[#allocation79_spill] sm:$0xff] }
 0x657   : > { %v4422_v21 = vadd.f32 %v4366_v37, %v15251_v19 }
 0x658   : > { %v4369_v43 = vpop.f32.mrf.mxu1 }
 0x659   : > { %v4823_v16 = vpop.f32.mrf.mxu3  ;;  %8779 = vmatmul.msk.f32.gmra.mxu2 %vm271_vm1, %v12814_v20 }
 0x65a   : > { %v4881_v46 = vadd.f32 %v4823_v16, %v4583_v52  ;;  %v5033_v40 = vpop.f32.mrf.mxu0 }
 0x65b   : > { %8746 = vmatmul.msk.f32.gmra.mxu1 %vm271_vm1, %v12853_v24 }
 0x65c   : > { %v13217_v60 = vadd.f32 %v5027_v10, %v4881_v46  ;;  %v4528_v36 = vpop.f32.mrf.mxu2 }
 0x65d   : > { %8848 = vmatmul.msk.f32.gmra.mxu0 %vm271_vm1, %v13117_v8  ;;  %v4584_v33 = vadd.f32 %v4528_v36, %v4422_v21  ;;  %v9366_v21 = vld [vmem:[#allocation2 + $0x3b0] sm:$0xff] }
 0x65e   : > { %8813 = vmatmul.msk.f32.gmra.mxu3 %vm271_vm1, %v12807_v53  ;;  %v15252_v53 = vld [vmem:[#allocation43_spill] sm:$0xff]  ;;  %v5101_v36 = vrot.slane %v9366_v21, 6 }
 0x65f   : > { %v4423_v20 = vadd.f32 %v4369_v43, %v15252_v53 }
 0x660   : > { %v4372_v10 = vpop.f32.mrf.mxu1 }
 0x661   : > { %v4826_v22 = vpop.f32.mrf.mxu3  ;;  %8780 = vmatmul.msk.f32.gmra.mxu2 %vm271_vm1, %v12836_v34 }
 0x662   : > { %v4882_v56 = vadd.f32 %v4826_v22, %v4584_v33  ;;  %v5036_v50 = vpop.f32.mrf.mxu0 }
 0x663   : > { %8747 = vmatmul.msk.f32.gmra.mxu1 %vm271_vm1, %v12875_v38 }
 0x664   : > { %v13228_v18 = vadd.f32 %v5030_v5, %v4882_v56  ;;  %v4531_v24 = vpop.f32.mrf.mxu2 }
 0x665   : > { %8849 = vmatmul.msk.f32.gmra.mxu0 %vm271_vm1, %v13143_v35  ;;  %v4585_v28 = vadd.f32 %v4531_v24, %v4423_v20  ;;  %v5103_v24 = vrot.slane %v12933_v15, 6 }
 0x666   : > { %8814 = vmatmul.msk.f32.gmra.mxu3 %vm271_vm1, %v12829_v39  ;;  %v15253_v39 = vld [vmem:[#allocation68_spill] sm:$0xff] }
 0x667   : > { %v4424_v34 = vadd.f32 %v4372_v10, %v15253_v39 }
 0x668   : > { %v4375_v45 = vpop.f32.mrf.mxu1 }
 0x669   : > { %v4829_v23 = vpop.f32.mrf.mxu3  ;;  %8781 = vmatmul.msk.f32.gmra.mxu2 %vm271_vm1, %v12856_v9 }
 0x66a   : > { %v4883_v25 = vadd.f32 %v4829_v23, %v4585_v28  ;;  %v5039_v37 = vpop.f32.mrf.mxu0  ;;  %v5104_v28 = vrot.slane %v12955_v13, 6 }
 0x66b   : > { %8748 = vmatmul.msk.f32.gmra.mxu1 %vm271_vm1, %v12895_v47  ;;  %v15254_v47 = vld [vmem:[#allocation114_spill] sm:$0xff] }
 0x66c   : > { %v13239_v5 = vadd.f32 %v5033_v40, %v4883_v25  ;;  %v4534_v38 = vpop.f32.mrf.mxu2  ;;  %v4425_v40 = vadd.f32 %v4375_v45, %v15254_v47  ;;  %v15256_v47 = vld [vmem:[#allocation71_spill] sm:$0xff] }
 0x66d   : > { %8850 = vmatmul.msk.f32.gmra.mxu0 %vm271_vm1, %v13160_v3  ;;  %v4586_v55 = vadd.f32 %v4534_v38, %v4424_v34  ;;  %v9367_v38 = vld [vmem:[#allocation2 + $0x3e0] sm:$0xff] }
 0x66e   : > { %8815 = vmatmul.msk.f32.gmra.mxu3 %vm271_vm1, %v12849_v49  ;;  %v13253_v49 = vsel %vm4599_vm7, %v5098_v58, %v5099_v2  ;;  %v5106_v58 = vrot.slane %v9367_v38, 6  ;;  %v15262_v38 = vld [vmem:[#allocation115_spill] sm:$0xff] }
 0x670   : > { %v4378_v9 = vpop.f32.mrf.mxu1 }
 0x671   : > { %v4832_v52 = vpop.f32.mrf.mxu3  ;;  %8782 = vmatmul.msk.f32.gmra.mxu2 %vm271_vm1, %v12878_v57  ;;  %v13267_v57 = vsel %vm4599_vm7, %v5099_v2, %v5101_v36 }
 0x672   : > { %v4884_v16 = vadd.f32 %v4832_v52, %v4586_v55  ;;  %v5042_v46 = vpop.f32.mrf.mxu0 }
 0x673   : > { %8749 = vmatmul.msk.f32.gmra.mxu1 %vm271_vm1, %v12917_v48  ;;  %v15255_v48 = vld [vmem:[#allocation86_spill] sm:$0xff] }
 0x674   : > { %v13255_v43 = vadd.f32 %v5036_v50, %v4884_v16  ;;  %v4537_v19 = vpop.f32.mrf.mxu2  ;;  %v4426_v53 = vadd.f32 %v4378_v9, %v15255_v48 }
 0x675   : > { %8851 = vmatmul.msk.f32.gmra.mxu0 %vm271_vm1, %v13253_v49  ;;  %v4587_v33 = vadd.f32 %v4537_v19, %v4425_v40  ;;  %v5109_v40 = vrot.slane %v15256_v47, 6 }
 0x676   : > { %8816 = vmatmul.msk.f32.gmra.mxu3 %vm271_vm1, %v12871_v61 }
 0x678   : > { %v4381_v10 = vpop.f32.mrf.mxu1 }
 0x679   : > { %v4835_v22 = vpop.f32.mrf.mxu3  ;;  %8783 = vmatmul.msk.f32.gmra.mxu2 %vm271_vm1, %v12898_v4 }
 0x67a   : > { %v4885_v56 = vadd.f32 %v4835_v22, %v4587_v33  ;;  %v5045_v50 = vpop.f32.mrf.mxu0  ;;  %v15257_v22 = vld [vmem:[#allocation122_spill] sm:$0xff] }
 0x67b   : > { %8750 = vmatmul.msk.f32.gmra.mxu1 %vm271_vm1, %v12937_v62  ;;  %v4427_v62 = vadd.f32 %v4381_v10, %v12719_v41 }
 0x67c   : > { %v13269_v61 = vadd.f32 %v5039_v37, %v4885_v56  ;;  %v4540_v20 = vpop.f32.mrf.mxu2 }
 0x67d   : > { %8852 = vmatmul.msk.f32.gmra.mxu0 %vm271_vm1, %v13267_v57  ;;  %v4588_v23 = vadd.f32 %v4540_v20, %v4426_v53 }
 0x67e   : > { %8817 = vmatmul.msk.f32.gmra.mxu3 %vm271_vm1, %v12891_v44  ;;  %v13283_v44 = vsel %vm4599_vm7, %v5103_v24, %v5104_v28 }
 0x680   : > { %v4384_v4 = vpop.f32.mrf.mxu1 }
 0x681   : > { %v4838_v25 = vpop.f32.mrf.mxu3  ;;  %8784 = vmatmul.msk.f32.gmra.mxu2 %vm271_vm1, %v12920_v54  ;;  %v13297_v54 = vsel %vm4599_vm7, %v5104_v28, %v5106_v58  ;;  %v4428_v41 = vadd.f32 %v4384_v4, %v12734_v7  ;;  %v5114_v58 = vrot.slane %v15262_v38, 6 }
 0x682   : > { %v4886_v45 = vadd.f32 %v4838_v25, %v4588_v23  ;;  %v5048_v37 = vpop.f32.mrf.mxu0 }
 0x683   : > { %8751 = vmatmul.msk.f32.gmra.mxu1 %vm271_vm1, %v12959_v27 }
 0x684   : > { %v13285_v39 = vadd.f32 %v5042_v46, %v4886_v45  ;;  %v4543_v34 = vpop.f32.mrf.mxu2  ;;  %v5108_v46 = vrot.slane %v12975_v30, 6  ;;  %v15259_v45 = vld [vmem:[#allocation107_spill] sm:$0xff] }
 0x685   : > { %8853 = vmatmul.msk.f32.gmra.mxu0 %vm271_vm1, %v13283_v44  ;;  %v4589_v2 = vadd.f32 %v4543_v34, %v4427_v62  ;;  %v15261_v62 = vld [vmem:[#allocation64_spill] sm:$0xff] }
 0x686   : > { %8818 = vmatmul.msk.f32.gmra.mxu3 %vm271_vm1, %v12913_v6  ;;  %v5113_v34 = vrot.slane %v15261_v62, 6 }
 0x688   : > { %v4387_v16 = vpop.f32.mrf.mxu1 }
 0x689   : > { %v4841_v55 = vpop.f32.mrf.mxu3  ;;  %8785 = vmatmul.msk.f32.gmra.mxu2 %vm271_vm1, %v12940_v31 }
 0x68a   : > { %v4887_v52 = vadd.f32 %v4841_v55, %v4589_v2  ;;  %v5051_v9 = vpop.f32.mrf.mxu0 }
 0x68b   : > { %8752 = vmatmul.msk.f32.gmra.mxu1 %vm271_vm1, %v12979_v42  ;;  %v15258_v42 = vld [vmem:[#allocation113_spill] sm:$0xff] }
 0x68c   : > { %v13299_v6 = vadd.f32 %v5045_v50, %v4887_v52  ;;  %v4546_v27 = vpop.f32.mrf.mxu2  ;;  %v4429_v56 = vadd.f32 %v4387_v16, %v15258_v42  ;;  %v9368_v50 = vld [vmem:[#allocation2 + $0x410] sm:$0xff] }
 0x68d   : > { %8854 = vmatmul.msk.f32.gmra.mxu0 %vm271_vm1, %v13297_v54  ;;  %v4590_v19 = vadd.f32 %v4546_v27, %v4428_v41  ;;  %v5111_v48 = vrot.slane %v9368_v50, 6  ;;  %v15263_v27 = vld [vmem:[#allocation31_spill] sm:$0xff] }
 0x68e   : > { %8819 = vmatmul.msk.f32.gmra.mxu3 %vm271_vm1, %v12933_v15  ;;  %v13313_v15 = vsel %vm4599_vm7, %v5108_v46, %v5109_v40 }
 0x68f   : > { %v13327_v25 = vsel %vm4599_vm7, %v5109_v40, %v5111_v48 }
 0x690   : > { %v4390_v31 = vpop.f32.mrf.mxu1 }
 0x691   : > { %v4844_v21 = vpop.f32.mrf.mxu3  ;;  %8786 = vmatmul.msk.f32.gmra.mxu2 %vm271_vm1, %v15257_v22 }
 0x692   : > { %v4888_v36 = vadd.f32 %v4844_v21, %v4590_v19  ;;  %v5054_v33 = vpop.f32.mrf.mxu0  ;;  %v9369_v19 = vld [vmem:[#allocation2 + $0x440] sm:$0xff] }
 0x693   : > { %8753 = vmatmul.msk.f32.gmra.mxu1 %vm271_vm1, %v13001_v51  ;;  %v15260_v51 = vld [vmem:[#allocation83_spill] sm:$0xff]  ;;  %v5116_v21 = vrot.slane %v9369_v19, 6 }
 0x694   : > { %v13315_v7 = vadd.f32 %v5048_v37, %v4888_v36  ;;  %v4549_v10 = vpop.f32.mrf.mxu2  ;;  %v4430_v4 = vadd.f32 %v4390_v31, %v15260_v51 }
 0x695   : > { %8855 = vmatmul.msk.f32.gmra.mxu0 %vm271_vm1, %v13313_v15  ;;  %v4591_v53 = vadd.f32 %v4549_v10, %v4429_v56  ;;  %v13357_v56 = vsel %vm4599_vm7, %v5114_v58, %v5116_v21  ;;  %v15265_v10 = vld [vmem:[#allocation50_spill] sm:$0xff] }
 0x696   : > { %8820 = vmatmul.msk.f32.gmra.mxu3 %vm271_vm1, %v12955_v13  ;;  %v15271_v21 = vld [vmem:[#allocation74_spill] sm:$0xff] }
 0x698   : > { %v4393_v28 = vpop.f32.mrf.mxu1 }
 0x699   : > { %v4847_v20 = vpop.f32.mrf.mxu3  ;;  %8787 = vmatmul.msk.f32.gmra.mxu2 %vm271_vm1, %v15259_v45 }
 0x69a   : > { %v4889_v24 = vadd.f32 %v4847_v20, %v4591_v53  ;;  %v5057_v23 = vpop.f32.mrf.mxu0  ;;  %v15267_v53 = vld [vmem:[#allocation119_spill] sm:$0xff] }
 0x69b   : > { %8754 = vmatmul.msk.f32.gmra.mxu1 %vm271_vm1, %v13021_v17  ;;  %v15264_v17 = vld [vmem:[#allocation99_spill] sm:$0xff]  ;;  %v5118_v20 = vrot.slane %v15267_v53, 6 }
 0x69c   : > { %v13329_v13 = vadd.f32 %v5051_v9, %v4889_v24  ;;  %v4552_v37 = vpop.f32.mrf.mxu2  ;;  %v4431_v46 = vadd.f32 %v4393_v28, %v15264_v17  ;;  %v15268_v24 = vld [vmem:[#allocation116_spill] sm:$0xff] }
 0x69d   : > { %8856 = vmatmul.msk.f32.gmra.mxu0 %vm271_vm1, %v13327_v25  ;;  %v4592_v2 = vadd.f32 %v4552_v37, %v4430_v4  ;;  %v5119_v28 = vrot.slane %v15268_v24, 6 }
 0x69e   : > { %8821 = vmatmul.msk.f32.gmra.mxu3 %vm271_vm1, %v12975_v30  ;;  %v13343_v30 = vsel %vm4599_vm7, %v5113_v34, %v5114_v58  ;;  %v15269_v58 = vld [vmem:[#allocation104_spill] sm:$0xff] }
 0x6a0   : > { %v4396_v16 = vpop.f32.mrf.mxu1 }
 0x6a1   : > { %v4850_v55 = vpop.f32.mrf.mxu3  ;;  %8788 = vmatmul.msk.f32.gmra.mxu2 %vm271_vm1, %v15263_v27 }
 0x6a2   : > { %v4890_v52 = vadd.f32 %v4850_v55, %v4592_v2  ;;  %v5060_v9 = vpop.f32.mrf.mxu0 }
 0x6a3   : > { %8755 = vmatmul.msk.f32.gmra.mxu1 %vm271_vm1, %v13043_v59  ;;  %v15266_v59 = vld [vmem:[#allocation72_spill] sm:$0xff] }
 0x6a4   : > { %v13345_v41 = vadd.f32 %v5054_v33, %v4890_v52  ;;  %v4555_v40 = vpop.f32.mrf.mxu2  ;;  %v4432_v50 = vadd.f32 %v4396_v16, %v15266_v59  ;;  %v9370_v52 = vld [vmem:[#allocation2 + $0x470] sm:$0xff] }
 0x6a5   : > { %8857 = vmatmul.msk.f32.gmra.mxu0 %vm271_vm1, %v13343_v30  ;;  %v4593_v36 = vadd.f32 %v4555_v40, %v4431_v46  ;;  %v5121_v16 = vrot.slane %v9370_v52, 6 }
 0x6a6   : > { %8822 = vmatmul.msk.f32.gmra.mxu3 %vm271_vm1, %v15256_v47 }
 0x6a7   : > { %v13387_v19 = vsel %vm4599_vm7, %v5119_v28, %v5121_v16 }
 0x6a8   : > { %v4399_v22 = vpop.f32.mrf.mxu1 }
 0x6a9   : > { %v4853_v31 = vpop.f32.mrf.mxu3  ;;  %8789 = vmatmul.msk.f32.gmra.mxu2 %vm271_vm1, %v15265_v10 }
 0x6aa   : > { %v4891_v33 = vadd.f32 %v4853_v31, %v4593_v36  ;;  %v5063_v42 = vpop.f32.mrf.mxu0 }
 0x6ab   : > { %8756 = vmatmul.msk.f32.gmra.mxu1 %vm271_vm1, %v13063_v0  ;;  %v15270_v0 = vld [vmem:[#allocation118_spill] sm:$0xff] }
 0x6ac   : > { %v13359_v47 = vadd.f32 %v5057_v23, %v4891_v33  ;;  %v4558_v48 = vpop.f32.mrf.mxu2  ;;  %v4433_v2 = vadd.f32 %v4399_v22, %v15270_v0  ;;  %v15273_v33 = vld [vmem:[#allocation130_spill] sm:$0xff] }
 0x6ad   : > { %8858 = vmatmul.msk.f32.gmra.mxu0 %vm271_vm1, %v13357_v56  ;;  %v4594_v23 = vadd.f32 %v4558_v48, %v4432_v50  ;;  %v5123_v22 = vrot.slane %v15273_v33, 6 }
 0x6ae   : > { %8823 = vmatmul.msk.f32.gmra.mxu3 %vm271_vm1, %v15261_v62  ;;  %v13373_v62 = vsel %vm4599_vm7, %v5118_v20, %v5119_v28 }
 0x6b0   : > { %v5174_v4 = vpop.f32.mrf.mxu1 }
 0x6b1   : > { %v4856_v45 = vpop.f32.mrf.mxu3  ;;  %8790 = vmatmul.msk.f32.gmra.mxu2 %vm271_vm1, %v15269_v58 }
 0x6b2   : > { %v4892_v51 = vadd.f32 %v4856_v45, %v4594_v23  ;;  %v5756_v37 = vpop.f32.mrf.mxu0  ;;  %v15274_v23 = vld [vmem:[#allocation117_spill] sm:$0xff] }
 0x6b3   : > { %8757 = vmatmul.msk.f32.gmra.mxu1 %vm271_vm1, %v13085_v63  ;;  %v15272_v63 = vld [vmem:[#allocation102_spill] sm:$0xff] }
 0x6b4   : > { %v13375_v34 = vadd.f32 %v5060_v9, %v4892_v51  ;;  %v4561_v55 = vpop.f32.mrf.mxu2  ;;  %v5270_v36 = vadd.f32 %v5174_v4, %v15272_v63  ;;  %v9371_v4 = vld [vmem:[#allocation2 + $0x4a0] sm:$0xff]  ;;  %v9373_v63 = vld [vmem:[#allocation2 + $0x4c8] sm:$0xff] }
 0x6b5   : > { %8859 = vmatmul.msk.f32.gmra.mxu0 %vm271_vm1, %v13373_v62  ;;  %v4595_v27 = vadd.f32 %v4561_v55, %v4433_v2  ;;  %v5126_v58 = vrot.slane %v9371_v4, 6 }
 0x6b6   : > { %8824 = vmatmul.msk.f32.gmra.mxu3 %vm271_vm1, %v15262_v38 }
 0x6b8   : > { %v5177_v46 = vpop.f32.mrf.mxu1 }
 0x6b9   : > { %v4859_v9 = vpop.f32.mrf.mxu3  ;;  %8791 = vmatmul.msk.f32.gmra.mxu2 %vm271_vm1, %v15271_v21 }
 0x6ba   : > { %v4893_v17 = vadd.f32 %v4859_v9, %v4595_v27  ;;  %v5759_v40 = vpop.f32.mrf.mxu0  ;;  %v15276_v27 = vld [vmem:[#allocation120_spill] sm:$0xff] }
 0x6bb   : > { %8758 = vmatmul.msk.f32.gmra.mxu1 %vm271_vm1, %v13117_v8  ;;  %v15275_v8 = vld [vmem:[#allocation101_spill] sm:$0xff] }
 0x6bc   : > { %v13389_v38 = vadd.f32 %v5063_v42, %v4893_v17  ;;  %v5387_v31 = vpop.f32.mrf.mxu2  ;;  %v5124_v42 = vrot.slane %v13138_v12, 6  ;;  %v5271_v45 = vadd.f32 %v5177_v46, %v15275_v8  ;;  %v9372_v46 = vld [vmem:[#allocation2 + $0x4c0] sm:$0xff] }
 0x6bd   : > { %8860 = vmatmul.msk.f32.gmra.mxu0 %vm271_vm1, %v13387_v19  ;;  %v5483_v10 = vadd.f32 %v5387_v31, %v5270_v36  ;;  %v5680_v21 = vrot.slane %v9372_v46, 6 }
 0x6be   : > { %8825 = vmatmul.msk.f32.gmra.mxu3 %vm271_vm1, %v15267_v53  ;;  %v13403_v53 = vsel %vm4599_vm7, %v5123_v22, %v5124_v42  ;;  %v13417_v16 = vsel %vm4599_vm7, %v5124_v42, %v5126_v58 }
 0x6c0   : > { %v5180_v48 = vpop.f32.mrf.mxu1 }
 0x6c1   : > { %v5549_v59 = vpop.f32.mrf.mxu3  ;;  %8792 = vmatmul.msk.f32.gmra.mxu2 %vm271_vm1, %v15274_v23  ;;  %v15278_v23 = vld [vmem:[#allocation103_spill] sm:$0xff] }
 0x6c2   : > { %v5645_v50 = vadd.f32 %v5549_v59, %v5483_v10  ;;  %v5762_v20 = vpop.f32.mrf.mxu0 }
 0x6c3   : > { %8759 = vmatmul.msk.f32.gmra.mxu1 %vm271_vm1, %v13143_v35  ;;  %v15277_v35 = vld [vmem:[#allocation75_spill] sm:$0xff] }
 0x6c4   : > { %v13405_v28 = vadd.f32 %v5756_v37, %v5645_v50  ;;  %v5390_v51 = vpop.f32.mrf.mxu2  ;;  %v5272_v9 = vadd.f32 %v5180_v48, %v15277_v35  ;;  %v5312_v48 = vrot.slane %v9372_v46, 2 }
 0x6c5   : > { %8861 = vmatmul.msk.f32.gmra.mxu0 %vm271_vm1, %v13403_v53  ;;  %v5484_v0 = vadd.f32 %v5390_v51, %v5271_v45  ;;  %v9375_v51 = vld [vmem:[#allocation2 + $0x4d0] sm:$0xff] }
 0x6c6   : > { %8826 = vmatmul.msk.f32.gmra.mxu3 %vm271_vm1, %v15268_v24 }
 0x6c8   : > { %v5183_v55 = vpop.f32.mrf.mxu1 }
 0x6c9   : > { %v5552_v37 = vpop.f32.mrf.mxu3  ;;  %8793 = vmatmul.msk.f32.gmra.mxu2 %vm271_vm1, %v15276_v27  ;;  %v5273_v8 = vadd.f32 %v5183_v55, %v15278_v23  ;;  %v15279_v55 = vld [vmem:[#allocation20_spill] sm:$0xff] }
 0x6ca   : > { %v5646_v2 = vadd.f32 %v5552_v37, %v5484_v0  ;;  %v5765_v52 = vpop.f32.mrf.mxu0 }
 0x6cb   : > { %8760 = vmatmul.msk.f32.gmra.mxu1 %vm271_vm1, %v13160_v3  ;;  %v9374_v3 = vld [vmem:[#allocation2 + $0x4b8] sm:$0xff] }
 0x6cc   : > { %v13419_v24 = vadd.f32 %v5759_v40, %v5646_v2  ;;  %v5393_v17 = vpop.f32.mrf.mxu2  ;;  %v5681_v40 = vrot.slane %v9373_v63, 6  ;;  %v5311_v50 = vrot.slane %v9374_v3, 2 }
 0x6cd   : > { %8862 = vmatmul.msk.f32.gmra.mxu0 %vm271_vm1, %v13417_v16  ;;  %v5485_v36 = vadd.f32 %v5393_v17, %v5272_v9  ;;  %v9376_v17 = vld [vmem:[#allocation2 + $0x4f0] sm:$0xff] }
 0x6ce   : > { %8827 = vmatmul.msk.f32.gmra.mxu3 %vm271_vm1, %v15273_v33  ;;  %v5682_v33 = vsel %vm4599_vm7, %v5680_v21, %v5681_v40  ;;  %v5685_v21 = vrot.slane %v9376_v17, 6 }
 0x6d0   : > { %v5186_v42 = vpop.f32.mrf.mxu1 }
 0x6d1   : > { %v5555_v31 = vpop.f32.mrf.mxu3  ;;  %8794 = vmatmul.msk.f32.gmra.mxu2 %vm271_vm1, %v13146_v11  ;;  %v5313_v11 = vsel %vm4139_vm6, %v5311_v50, %v5312_v48  ;;  %v5274_v35 = vadd.f32 %v5186_v42, %v15279_v55 }
 0x6d2   : > { %v5647_v22 = vadd.f32 %v5555_v31, %v5485_v36  ;;  %v5768_v10 = vpop.f32.mrf.mxu0  ;;  %v9377_v36 = vld [vmem:[#allocation2 + $0x4f8] sm:$0xff] }
 0x6d3   : > { %8761 = vmatmul.msk.f32.gmra.mxu1 %vm271_vm1, %v13253_v49  ;;  %v5314_v49 = vrot.slane %v9373_v63, 2  ;;  %v5686_v31 = vrot.slane %v9377_v36, 6 }
 0x6d4   : > { %v13431_v59 = vadd.f32 %v5762_v20, %v5647_v22  ;;  %v5396_v45 = vpop.f32.mrf.mxu2  ;;  %v5683_v20 = vrot.slane %v9375_v51, 6 }
 0x6d5   : > { %8863 = vmatmul.msk.f32.gmra.mxu0 %vm271_vm1, %v5682_v33  ;;  %v5486_v4 = vadd.f32 %v5396_v45, %v5273_v8  ;;  %v5315_v22 = vsel %vm4139_vm6, %v5312_v48, %v5314_v49  ;;  %v5687_v50 = vsel %vm4599_vm7, %v5685_v21, %v5686_v31  ;;  %v5317_v8 = vrot.slane %v9376_v17, 2  ;;  %v15280_v45 = vld [vmem:[#allocation55_spill] sm:$0xff]  ;;  %v9380_v21 = vld [vmem:[#allocation2 + $0x520] sm:$0xff] }
 0x6d6   : > { %8828 = vmatmul.msk.f32.gmra.mxu3 %vm271_vm1, %v13138_v12  ;;  %v5684_v2 = vsel %vm4599_vm7, %v5681_v40, %v5683_v20  ;;  %v9379_v20 = vld [vmem:[#allocation2 + $0x500] sm:$0xff] }
 0x6d8   : > { %v5189_v37 = vpop.f32.mrf.mxu1 }
 0x6d9   : > { %v5558_v58 = vpop.f32.mrf.mxu3  ;;  %8795 = vmatmul.msk.f32.gmra.mxu2 %vm271_vm1, %v5313_v11  ;;  %v5275_v51 = vadd.f32 %v5189_v37, %v15280_v45  ;;  %v15281_v37 = vld [vmem:[#allocation89_spill] sm:$0xff] }
 0x6da   : > { %v5648_v0 = vadd.f32 %v5558_v58, %v5486_v4  ;;  %v5771_v12 = vpop.f32.mrf.mxu0  ;;  %v5688_v4 = vrot.slane %v9379_v20, 6 }
 0x6db   : > { %8762 = vmatmul.msk.f32.gmra.mxu1 %vm271_vm1, %v13267_v57  ;;  %v9378_v57 = vld [vmem:[#allocation2 + $0x4e8] sm:$0xff] }
 0x6dc   : > { %v13443_v27 = vadd.f32 %v5765_v52, %v5648_v0  ;;  %v5399_v9 = vpop.f32.mrf.mxu2  ;;  %v5316_v23 = vrot.slane %v9378_v57, 2  ;;  %v5689_v49 = vsel %vm4599_vm7, %v5686_v31, %v5688_v4  ;;  %v9383_v4 = vld [vmem:[#allocation2 + $0x530] sm:$0xff] }
 0x6dd   : > { %8864 = vmatmul.msk.f32.gmra.mxu0 %vm271_vm1, %v5684_v2  ;;  %v5487_v40 = vadd.f32 %v5399_v9, %v5274_v35 }
 0x6de   : > { %8829 = vmatmul.msk.f32.gmra.mxu3 %vm271_vm1, %v9372_v46  ;;  %v5318_v11 = vsel %vm4139_vm6, %v5316_v23, %v5317_v8 }
 0x6e0   : > { %v5192_v3 = vpop.f32.mrf.mxu1 }
 0x6e1   : > { %v5561_v52 = vpop.f32.mrf.mxu3  ;;  %8796 = vmatmul.msk.f32.gmra.mxu2 %vm271_vm1, %v5315_v22  ;;  %v5276_v35 = vadd.f32 %v5192_v3, %v15281_v37 }
 0x6e2   : > { %v5649_v33 = vadd.f32 %v5561_v52, %v5487_v40  ;;  %v5774_v46 = vpop.f32.mrf.mxu0  ;;  %v5690_v40 = vrot.slane %v9380_v21, 6  ;;  %v9381_v52 = vld [vmem:[#allocation2 + $0x528] sm:$0xff] }
 0x6e3   : > { %8763 = vmatmul.msk.f32.gmra.mxu1 %vm271_vm1, %v13283_v44  ;;  %v5319_v44 = vrot.slane %v9377_v36, 2  ;;  %v5691_v22 = vrot.slane %v9381_v52, 6 }
 0x6e4   : > { %v13453_v42 = vadd.f32 %v5768_v10, %v5649_v33  ;;  %v5402_v48 = vpop.f32.mrf.mxu2 }
 0x6e5   : > { %8865 = vmatmul.msk.f32.gmra.mxu0 %vm271_vm1, %v5687_v50  ;;  %v5488_v58 = vadd.f32 %v5402_v48, %v5275_v51  ;;  %v5320_v33 = vsel %vm4139_vm6, %v5317_v8, %v5319_v44  ;;  %v5692_v23 = vsel %vm4599_vm7, %v5690_v40, %v5691_v22  ;;  %v5322_v51 = vrot.slane %v9380_v21, 2  ;;  %v15282_v48 = vld [vmem:[#allocation125_spill] sm:$0xff]  ;;  %v712_v40 = vld [vmem:[#allocation2 + $0x558] sm:$0xff] }
 0x6e6   : > { %8830 = vmatmul.msk.f32.gmra.mxu3 %vm271_vm1, %v9373_v63 }
 0x6e8   : > { %v5195_v2 = vpop.f32.mrf.mxu1 }
 0x6e9   : > { %v5564_v10 = vpop.f32.mrf.mxu3  ;;  %8797 = vmatmul.msk.f32.gmra.mxu2 %vm271_vm1, %v5318_v11  ;;  %v5277_v20 = vadd.f32 %v5195_v2, %v15282_v48  ;;  %v15283_v2 = vld [vmem:[#allocation44_spill] sm:$0xff] }
 0x6ea   : > { %v5650_v0 = vadd.f32 %v5564_v10, %v5488_v58  ;;  %v5777_v63 = vpop.f32.mrf.mxu0  ;;  %v5693_v58 = vrot.slane %v9383_v4, 6  ;;  %v15284_v4 = vld [vmem:[#allocation105_spill] sm:$0xff] }
 0x6eb   : > { %8764 = vmatmul.msk.f32.gmra.mxu1 %vm271_vm1, %v13297_v54  ;;  %v9382_v54 = vld [vmem:[#allocation2 + $0x518] sm:$0xff] }
 0x6ec   : > { %v13463_v55 = vadd.f32 %v5771_v12, %v5650_v0  ;;  %v5405_v9 = vpop.f32.mrf.mxu2  ;;  %v5321_v45 = vrot.slane %v9382_v54, 2  ;;  %v5694_v44 = vsel %vm4599_vm7, %v5691_v22, %v5693_v58  ;;  %v710_v54 = vld [vmem:[#allocation2 + $0x548] sm:$0xff] }
 0x6ed   : > { %8866 = vmatmul.msk.f32.gmra.mxu0 %vm271_vm1, %v5689_v49  ;;  %v5489_v31 = vadd.f32 %v5405_v9, %v5276_v35  ;;  %v711_v9 = vld [vmem:[#allocation2 + $0x550] sm:$0xff] }
 0x6ee   : > { %8831 = vmatmul.msk.f32.gmra.mxu3 %vm271_vm1, %v9376_v17  ;;  %v5323_v11 = vsel %vm4139_vm6, %v5321_v45, %v5322_v51 }
 0x6f0   : > { %v5198_v57 = vpop.f32.mrf.mxu1 }
 0x6f1   : > { %v5567_v12 = vpop.f32.mrf.mxu3  ;;  %8798 = vmatmul.msk.f32.gmra.mxu2 %vm271_vm1, %v5320_v33  ;;  %v5278_v35 = vadd.f32 %v5198_v57, %v15283_v2  ;;  %v5696_v33 = vrot.slane %v712_v40, 6 }
 0x6f2   : > { %v5651_v50 = vadd.f32 %v5567_v12, %v5489_v31  ;;  %v5780_v17 = vpop.f32.mrf.mxu0  ;;  %v5695_v12 = vrot.slane %v711_v9, 6 }
 0x6f3   : > { %8765 = vmatmul.msk.f32.gmra.mxu1 %vm271_vm1, %v13313_v15  ;;  %v5324_v15 = vrot.slane %v9381_v52, 2 }
 0x6f4   : > { %v13473_v3 = vadd.f32 %v5774_v46, %v5651_v50  ;;  %v5408_v8 = vpop.f32.mrf.mxu2  ;;  %v5697_v57 = vsel %vm4599_vm7, %v5695_v12, %v5696_v33  ;;  %v718_v12 = vld [vmem:[#allocation2 + $0x588] sm:$0xff] }
 0x6f5   : > { %8867 = vmatmul.msk.f32.gmra.mxu0 %vm271_vm1, %v5692_v23  ;;  %v5490_v10 = vadd.f32 %v5408_v8, %v5277_v20  ;;  %v5325_v50 = vsel %vm4139_vm6, %v5322_v51, %v5324_v15  ;;  %v5326_v20 = vrot.slane %v710_v54, 2  ;;  %v5327_v8 = vrot.slane %v711_v9, 2 }
 0x6f6   : > { %8832 = vmatmul.msk.f32.gmra.mxu3 %vm271_vm1, %v9377_v36 }
 0x6f8   : > { %v5201_v49 = vpop.f32.mrf.mxu1 }
 0x6f9   : > { %v5570_v46 = vpop.f32.mrf.mxu3  ;;  %8799 = vmatmul.msk.f32.gmra.mxu2 %vm271_vm1, %v5323_v11  ;;  %v5279_v58 = vadd.f32 %v5201_v49, %v15284_v4  ;;  %v15285_v49 = vld [vmem:[#allocation18_spill] sm:$0xff] }
 0x6fa   : > { %v5652_v0 = vadd.f32 %v5570_v46, %v5490_v10  ;;  %v5783_v36 = vpop.f32.mrf.mxu0 }
 0x6fb   : > { %8766 = vmatmul.msk.f32.gmra.mxu1 %vm271_vm1, %v13327_v25  ;;  %v713_v25 = vld [vmem:[#allocation2 + $0x560] sm:$0xff] }
 0x6fc   : > { %v13483_v37 = vadd.f32 %v5777_v63, %v5652_v0  ;;  %v5411_v31 = vpop.f32.mrf.mxu2  ;;  %v5698_v10 = vrot.slane %v713_v25, 6 }
 0x6fd   : > { %8868 = vmatmul.msk.f32.gmra.mxu0 %vm271_vm1, %v5694_v44  ;;  %v5491_v22 = vadd.f32 %v5411_v31, %v5278_v35  ;;  %v717_v31 = vld [vmem:[#allocation2 + $0x580] sm:$0xff] }
 0x6fe   : > { %8833 = vmatmul.msk.f32.gmra.mxu3 %vm271_vm1, %v9380_v21 }
 0x700   : > { %v5204_v21 = vpop.f32.mrf.mxu1 }
 0x701   : > { %v5573_v63 = vpop.f32.mrf.mxu3  ;;  %8800 = vmatmul.msk.f32.gmra.mxu2 %vm271_vm1, %v5325_v50  ;;  %v5280_v35 = vadd.f32 %v5204_v21, %v15285_v49  ;;  %v5701_v50 = vrot.slane %v718_v12, 6 }
 0x702   : > { %v5653_v23 = vadd.f32 %v5573_v63, %v5491_v22  ;;  %v5786_v45 = vpop.f32.mrf.mxu0  ;;  %v5700_v63 = vrot.slane %v717_v31, 6 }
 0x703   : > { %8767 = vmatmul.msk.f32.gmra.mxu1 %vm271_vm1, %v13343_v30  ;;  %v5329_v30 = vrot.slane %v712_v40, 2 }
 0x704   : > { %v13493_v48 = vadd.f32 %v5780_v17, %v5653_v23  ;;  %v5414_v51 = vpop.f32.mrf.mxu2  ;;  %v5328_v17 = vsel %vm4139_vm6, %v5326_v20, %v5327_v8  ;;  %v5702_v21 = vsel %vm4599_vm7, %v5700_v63, %v5701_v50 }
 0x705   : > { %8869 = vmatmul.msk.f32.gmra.mxu0 %vm271_vm1, %v5697_v57  ;;  %v5492_v46 = vadd.f32 %v5414_v51, %v5279_v58  ;;  %v5330_v23 = vsel %vm4139_vm6, %v5327_v8, %v5329_v30  ;;  %v716_v57 = vld [vmem:[#allocation2 + $0x578] sm:$0xff]  ;;  %v5332_v58 = vrot.slane %v717_v31, 2 }
 0x706   : > { %8834 = vmatmul.msk.f32.gmra.mxu3 %vm271_vm1, %v9381_v52  ;;  %v5699_v52 = vsel %vm4599_vm7, %v5696_v33, %v5698_v10  ;;  %v5331_v4 = vrot.slane %v716_v57, 2  ;;  %v15286_v51 = vld [vmem:[#allocation127_spill] sm:$0xff]  ;;  %v9011_v57 = vld [vmem:[%s14634_s2 + $0x70] sm:$0xf] }
 0x707   : > { %9012 = vmatpush.msk.msra.mxu1 %vm940_vm0, %v9011_v57 }
 0x708   : > { %v5207_v44 = vpop.f32.mrf.mxu1 }
 0x709   : > { %v5576_v11 = vpop.f32.mrf.mxu3  ;;  %8801 = vmatmul.msk.f32.gmra.mxu2 %vm271_vm1, %v5328_v17  ;;  %v5281_v10 = vadd.f32 %v5207_v44, %v15286_v51  ;;  %v5334_v44 = vrot.slane %v718_v12, 2 }
 0x70a   : > { %v5654_v0 = vadd.f32 %v5576_v11, %v5492_v46  ;;  %v5789_v15 = vpop.f32.mrf.mxu0 }
 0x70b   : > { %8768 = vmatmul.msk.f32.gmra.mxu1 %vm271_vm1, %v13357_v56  ;;  %v719_v56 = vld [vmem:[#allocation2 + $0x590] sm:$0xff] }
 0x70c   : > { %v13503_v2 = vadd.f32 %v5783_v36, %v5654_v0  ;;  %v5417_v22 = vpop.f32.mrf.mxu2  ;;  %v5703_v46 = vrot.slane %v719_v56, 6 }
 0x70d   : > { %8870 = vmatmul.msk.f32.gmra.mxu0 %vm271_vm1, %v5699_v52  ;;  %v5493_v33 = vadd.f32 %v5417_v22, %v5280_v35  ;;  %v9079_v35 = vld [vmem:[%s14634_s2 + $0x78] sm:$0xf]  ;;  %v15287_v22 = vld [vmem:[#allocation128_spill] sm:$0xff] }
 0x70e   : > { %8835 = vmatmul.msk.f32.gmra.mxu3 %vm271_vm1, %v711_v9 }
 0x70f   : > { %9080 = vmatpush.msk.msra.mxu3 %vm940_vm0, %v9079_v35 }
 0x710   : > { %v5210_v9 = vpop.f32.mrf.mxu1 }
 0x711   : > { %v5579_v36 = vpop.f32.mrf.mxu3  ;;  %8802 = vmatmul.msk.f32.gmra.mxu2 %vm271_vm1, %v5330_v23  ;;  %v5282_v63 = vadd.f32 %v5210_v9, %v15287_v22  ;;  %v5335_v9 = vsel %vm4139_vm6, %v5332_v58, %v5334_v44 }
 0x712   : > { %v5655_v54 = vadd.f32 %v5579_v36, %v5493_v33  ;;  %v5792_v25 = vpop.f32.mrf.mxu0 }
 0x713   : > { %8769 = vmatmul.msk.f32.gmra.mxu1 %vm271_vm1, %v13373_v62  ;;  %v9045_v62 = vld [vmem:[%s14634_s2 + $0x74] sm:$0xf] }
 0x714   : > { %v13513_v20 = vadd.f32 %v5786_v45, %v5655_v54  ;;  %v5420_v8 = vpop.f32.mrf.mxu2  ;;  %v5333_v45 = vsel %vm4139_vm6, %v5331_v4, %v5332_v58  ;;  %9046 = vmatpush.msk.msra.mxu2 %vm940_vm0, %v9045_v62  ;;  %v9113_v58 = vld [vmem:[%s14634_s2 + $0x7c] sm:$0xf] }
 0x715   : > { %8871 = vmatmul.msk.f32.gmra.mxu0 %vm271_vm1, %v5702_v21  ;;  %v5494_v11 = vadd.f32 %v5420_v8, %v5281_v10  ;;  %v722_v21 = vld [vmem:[#allocation2 + $0x5a8] sm:$0xff]  ;;  %v725_v8 = vld [vmem:[#allocation2 + $0x5c0] sm:$0xff] }
 0x716   : > { %8836 = vmatmul.msk.f32.gmra.mxu3 %vm271_vm1, %v712_v40  ;;  %v5704_v40 = vsel %vm4599_vm7, %v5701_v50, %v5703_v46  ;;  %v724_v50 = vld [vmem:[#allocation2 + $0x5b8] sm:$0xff]  ;;  %v5336_v46 = vrot.slane %v722_v21, 2  ;;  %9114 = vmatpush.msk.msra.mxu0 %vm940_vm0, %v9113_v58 }
 0x717   : > { %v5706_v23 = vrot.slane %v724_v50, 6  ;;  %v544_v58 = vld [vmem:[#allocation2 + $0x18] sm:$0xff] }
 0x718   : > { %v5213_v52 = vpop.f32.mrf.mxu1 }
 0x719   : > { %v5582_v17 = vpop.f32.mrf.mxu3  ;;  %8803 = vmatmul.msk.f32.gmra.mxu2 %vm271_vm1, %v5333_v45 }
 0x71a   : > { %v5656_v0 = vadd.f32 %v5582_v17, %v5494_v11  ;;  %v5795_v30 = vpop.f32.mrf.mxu0  ;;  %v15288_v17 = vld [vmem:[#allocation121_spill] sm:$0xff] }
 0x71b   : > { %8770 = vmatmul.msk.f32.gmra.mxu1 %vm271_vm1, %v13387_v19  ;;  %v5283_v45 = vadd.f32 %v5213_v52, %v15288_v17  ;;  %v542_v52 = vld [vmem:[#allocation2 + $0x8] sm:$0xff]  ;;  %v545_v17 = vld [vmem:[#allocation2 + $0x20] sm:$0xff] }
 0x71c   : > { %v13523_v49 = vadd.f32 %v5789_v15, %v5656_v0  ;;  %v723_v15 = vld [vmem:[#allocation2 + $0x5b0] sm:$0xff]  ;;  %v5423_v33 = vpop.f32.mrf.mxu2  ;;  %v5708_v0 = vrot.slane %v725_v8, 6 }
 0x71d   : > { %8872 = vmatmul.msk.f32.gmra.mxu0 %vm271_vm1, %v5704_v40  ;;  %v5705_v36 = vrot.slane %v723_v15, 6  ;;  %v5337_v11 = vrot.slane %v723_v15, 2 }
 0x71e   : > { %8837 = vmatmul.msk.f32.gmra.mxu3 %vm271_vm1, %v717_v31  ;;  %v5495_v31 = vadd.f32 %v5423_v33, %v5282_v63  ;;  %v5709_v63 = vsel %vm4599_vm7, %v5706_v23, %v5708_v0  ;;  %v543_v0 = vld [vmem:[#allocation2 + $0x10] sm:$0xff] }
 0x71f   : > { %v5707_v51 = vsel %vm4599_vm7, %v5705_v36, %v5706_v23  ;;  %v595_v36 = vld [vmem:[#allocation2 + $0x1b0] sm:$0xff]  ;;  %v5907_v23 = vrot.slane %v542_v52, 7 }
 0x720   : > { %v5216_v56 = vpop.f32.mrf.mxu1 }
 0x721   : > { %v5585_v54 = vpop.f32.mrf.mxu3  ;;  %8804 = vmatmul.msk.f32.gmra.mxu2 %vm271_vm1, %v5335_v9 }
 0x722   : > { %v5657_v19 = vadd.f32 %v5585_v54, %v5495_v31  ;;  %v5798_v4 = vpop.f32.mrf.mxu0  ;;  %v5339_v31 = vrot.slane %v724_v50, 2  ;;  %v5284_v54 = vadd.f32 %v5216_v56, %v13162_v29  ;;  %v15289_v56 = vld [vmem:[#allocation19_spill] sm:$0xff] }
 0x723   : > { %8771 = vmatmul.msk.f32.gmra.mxu1 %vm271_vm1, %v13403_v53  ;;  %v541_v53 = vld [vmem:[#allocation2] sm:$0xff] }
 0x724   : > { %v13545_v10 = vadd.f32 %v5792_v25, %v5657_v19  ;;  %v5426_v25 = vpop.f32.mrf.mxu2  ;;  %v5906_v9 = vrot.slane %v541_v53, 7 }
 0x725   : > { %8873 = vmatmul.msk.f32.gmra.mxu0 %vm271_vm1, %v5707_v51  ;;  %v5496_v40 = vadd.f32 %v5426_v25, %v5283_v45  ;;  %v5340_v51 = vsel %vm4139_vm6, %v5337_v11, %v5339_v31  ;;  %v15290_v45 = vrot.slane %v15289_v56, 7  ;;  %v546_v31 = vld [vmem:[#allocation2 + $0x28] sm:$0xff] }
 0x726   : > { %8838 = vmatmul.msk.f32.gmra.mxu3 %vm271_vm1, %v718_v12  ;;  %v5338_v12 = vsel %vm4139_vm6, %v5336_v46, %v5337_v11 }
 0x728   : > { %v5219_v35 = vpop.f32.mrf.mxu1 }
 0x729   : > { %v5588_v62 = vpop.f32.mrf.mxu3  ;;  %8805 = vmatmul.msk.f32.gmra.mxu2 %vm271_vm1, %v5338_v12  ;;  %v5285_v11 = vadd.f32 %v5219_v35, %v13173_v1 }
 0x72a   : > { %v5658_v44 = vadd.f32 %v5588_v62, %v5496_v40  ;;  %v5801_v22 = vpop.f32.mrf.mxu0  ;;  %v6344_v40 = vrot.slane %v544_v58, 1  ;;  %v6345_v62 = vrot.slane %v545_v17, 1 }
 0x72b   : > { %8772 = vmatmul.msk.f32.gmra.mxu1 %vm271_vm1, %v13417_v16 }
 0x72c   : > { %v13559_v33 = vadd.f32 %v5795_v30, %v5658_v44  ;;  %v5429_v57 = vpop.f32.mrf.mxu2  ;;  %v5948_v30 = vrot.slane %v595_v36, 7  ;;  %v5909_v44 = vrot.slane %v543_v0, 7  ;;  %v6346_v52 = vsel %vm1409_vm3, %v6344_v40, %v6345_v62  ;;  %v550_v40 = vld [vmem:[#allocation2 + $0x48] sm:$0xff] }
 0x72d   : > { %8874 = vmatmul.msk.f32.gmra.mxu0 %vm271_vm1, %v5709_v63  ;;  %v5497_v19 = vadd.f32 %v5429_v57, %v5284_v54  ;;  %v547_v54 = vld [vmem:[#allocation2 + $0x30] sm:$0xff]  ;;  %v548_v57 = vld [vmem:[#allocation2 + $0x38] sm:$0xff] }
 0x72e   : > { %8839 = vmatmul.msk.f32.gmra.mxu3 %vm271_vm1, %v723_v15  ;;  %v5908_v15 = vsel %vm794_vm2, %v5906_v9, %v5907_v23  ;;  %v13572_v16 = vsel %vm794_vm2, %v5948_v30, %v15290_v45  ;;  %v601_v9 = vld [vmem:[#allocation2 + $0x1e0] sm:$0xff] }
 0x730   : > { %v5222_v46 = vpop.f32.mrf.mxu1 }
 0x731   : > { %v5591_v21 = vpop.f32.mrf.mxu3  ;;  %8806 = vmatmul.msk.f32.gmra.mxu2 %vm271_vm1, %v5340_v51  ;;  %v5286_v30 = vadd.f32 %v5222_v46, %v13184_v26  ;;  %v5911_v51 = vrot.slane %v547_v54, 7  ;;  %v551_v26 = vld [vmem:[#allocation2 + $0x50] sm:$0xff] }
 0x732   : > { %v5659_v8 = vadd.f32 %v5591_v21, %v5497_v19  ;;  %v5804_v29 = vpop.f32.mrf.mxu0  ;;  %v6347_v19 = vrot.slane %v546_v31, 1  ;;  %v15291_v21 = vld [vmem:[#allocation24_spill] sm:$0xff] }
 0x733   : > { %8877 = vmatmul.msk.f32.vlgmr.msrb.gmra.mxu1 %vm271_vm1, %v5908_v15 }
 0x734   : > { %v13574_v25 = vadd.f32 %v5798_v4, %v5659_v8  ;;  %v5432_v12 = vpop.f32.mrf.mxu2  ;;  %v5912_v8 = vrot.slane %v548_v57, 7  ;;  %v6348_v45 = vsel %vm1409_vm3, %v6345_v62, %v6347_v19  ;;  %v549_v62 = vld [vmem:[#allocation2 + $0x40] sm:$0xff] }
 0x735   : > { %8979 = vmatmul.msk.f32.vlgmr.msrb.gmra.mxu0 %vm271_vm1, %v13572_v16  ;;  %v5498_v63 = vadd.f32 %v5432_v12, %v5285_v11  ;;  %v15292_v12 = vld [vmem:[#allocation30_spill] sm:$0xff]  ;;  %v5914_v54 = vrot.slane %v549_v62, 7 }
 0x736   : > { %8840 = vmatmul.msk.f32.gmra.mxu3 %vm271_vm1, %v724_v50  ;;  %v5910_v50 = vsel %vm794_vm2, %v5907_v23, %v5909_v44  ;;  %v15293_v44 = vrot.slane %v15292_v12, 7 }
 0x737   : > { %v5915_v19 = vsel %vm794_vm2, %v5912_v8, %v5914_v54  ;;  %v556_v54 = vld [vmem:[#allocation2 + $0x78] sm:$0xff] }
 0x738   : > { %v5225_v36 = vpop.f32.mrf.mxu1 }
 0x739   : > { %v5594_v53 = vpop.f32.mrf.mxu3  ;;  %8911 = vmatmul.msk.f32.vlgmr.msrb.gmra.mxu2 %vm271_vm1, %v543_v0  ;;  %v5913_v0 = vsel %vm794_vm2, %v5911_v51, %v5912_v8  ;;  %v553_v51 = vld [vmem:[#allocation2 + $0x60] sm:$0xff] }
 0x73a   : > { %v5660_v4 = vadd.f32 %v5594_v53, %v5498_v63  ;;  %v5807_v1 = vpop.f32.mrf.mxu0 }
 0x73b   : > { %8878 = vmatmul.msk.f32.gmra.mxu1 %vm271_vm1, %v5910_v50  ;;  %v6350_v50 = vrot.slane %v551_v26, 1 }
 0x73c   : > { %v13584_v35 = vadd.f32 %v5801_v22, %v5660_v4  ;;  %v5435_v23 = vpop.f32.mrf.mxu2  ;;  %v5950_v22 = vrot.slane %v601_v9, 7  ;;  %v5287_v4 = vadd.f32 %v5225_v36, %v13195_v14 }
 0x73d   : > { %8980 = vmatmul.msk.f32.gmra.mxu0 %vm271_vm1, %v15291_v21  ;;  %v5499_v15 = vadd.f32 %v5435_v23, %v5286_v30  ;;  %v552_v23 = vld [vmem:[#allocation2 + $0x58] sm:$0xff] }
 0x73e   : > { %8945 = vmatmul.msk.f32.vlgmr.msrb.gmra.mxu3 %vm271_vm1, %v6346_v52  ;;  %v13597_v63 = vsel %vm794_vm2, %v5950_v22, %v15293_v44  ;;  %v6349_v52 = vrot.slane %v550_v40, 1  ;;  %v554_v22 = vld [vmem:[#allocation2 + $0x68] sm:$0xff] }
 0x73f   : > { %v5917_v26 = vrot.slane %v554_v22, 7 }
 0x740   : > { %v5228_v11 = vpop.f32.mrf.mxu1  ;;  %v6351_v30 = vsel %vm1409_vm3, %v6349_v52, %v6350_v50 }
 0x741   : > { %v5597_v17 = vpop.f32.mrf.mxu3  ;;  %8912 = vmatmul.msk.f32.gmra.mxu2 %vm271_vm1, %v544_v58 }
 0x742   : > { %v5661_v56 = vadd.f32 %v5597_v17, %v5499_v15  ;;  %v5810_v46 = vpop.f32.mrf.mxu0  ;;  %v607_v15 = vld [vmem:[#allocation2 + $0x210] sm:$0xff]  ;;  %v5288_v17 = vadd.f32 %v5228_v11, %v13206_v32  ;;  %v557_v32 = vld [vmem:[#allocation2 + $0x80] sm:$0xff] }
 0x743   : > { %8879 = vmatmul.msk.f32.gmra.mxu1 %vm271_vm1, %v5913_v0  ;;  %v5916_v0 = vrot.slane %v553_v51, 7  ;;  %v6355_v51 = vrot.slane %v557_v32, 1 }
 0x744   : > { %v13599_v53 = vadd.f32 %v5804_v29, %v5661_v56  ;;  %v5438_v31 = vpop.f32.mrf.mxu2  ;;  %v6352_v56 = vrot.slane %v552_v23, 1  ;;  %v6354_v23 = vrot.slane %v556_v54, 1 }
 0x745   : > { %8981 = vmatmul.msk.f32.gmra.mxu0 %vm271_vm1, %v13597_v63  ;;  %v5500_v57 = vadd.f32 %v5438_v31, %v5287_v4  ;;  %v5918_v31 = vsel %vm794_vm2, %v5916_v0, %v5917_v26 }
 0x746   : > { %8946 = vmatmul.msk.f32.gmra.mxu3 %vm271_vm1, %v6348_v45  ;;  %v15294_v45 = vld [vmem:[#allocation36_spill] sm:$0xff] }
 0x748   : > { %v5231_v58 = vpop.f32.mrf.mxu1 }
 0x749   : > { %v5600_v9 = vpop.f32.mrf.mxu3  ;;  %8913 = vmatmul.msk.f32.gmra.mxu2 %vm271_vm1, %v549_v62  ;;  %v6353_v62 = vsel %vm1409_vm3, %v6350_v50, %v6352_v56  ;;  %v555_v50 = vld [vmem:[#allocation2 + $0x70] sm:$0xff] }
 0x74a   : > { %v5662_v29 = vadd.f32 %v5600_v9, %v5500_v57  ;;  %v5813_v14 = vpop.f32.mrf.mxu0  ;;  %v15295_v57 = vld [vmem:[#allocation42_spill] sm:$0xff] }
 0x74b   : > { %8880 = vmatmul.msk.f32.gmra.mxu1 %vm271_vm1, %v5915_v19  ;;  %v15296_v9 = vrot.slane %v15295_v57, 7  ;;  %v5289_v19 = vadd.f32 %v5231_v58, %v13217_v60  ;;  %v9384_v57 = vld [vmem:[#allocation2 + $0x98] sm:$0xff] }
 0x74c   : > { %v13609_v36 = vadd.f32 %v5807_v1, %v5662_v29  ;;  %v5441_v8 = vpop.f32.mrf.mxu2  ;;  %v5952_v1 = vrot.slane %v607_v15, 7  ;;  %v5919_v15 = vrot.slane %v555_v50, 7 }
 0x74d   : > { %8982 = vmatmul.msk.f32.gmra.mxu0 %vm271_vm1, %v15294_v45  ;;  %v5501_v12 = vadd.f32 %v5441_v8, %v5288_v17  ;;  %v6356_v8 = vsel %vm1409_vm3, %v6354_v23, %v6355_v51 }
 0x74e   : > { %8947 = vmatmul.msk.f32.gmra.mxu3 %vm271_vm1, %v6351_v30  ;;  %v13622_v29 = vsel %vm794_vm2, %v5952_v1, %v15296_v9  ;;  %v5920_v0 = vsel %vm794_vm2, %v5917_v26, %v5919_v15  ;;  %v558_v1 = vld [vmem:[#allocation2 + $0x88] sm:$0xff]  ;;  %v5922_v9 = vrot.slane %v9384_v57, 7 }
 0x750   : > { %v5234_v52 = vpop.f32.mrf.mxu1 }
 0x751   : > { %v5603_v44 = vpop.f32.mrf.mxu3  ;;  %8914 = vmatmul.msk.f32.gmra.mxu2 %vm271_vm1, %v550_v40 }
 0x752   : > { %v5663_v4 = vadd.f32 %v5603_v44, %v5501_v12  ;;  %v5816_v11 = vpop.f32.mrf.mxu0  ;;  %v559_v12 = vld [vmem:[#allocation2 + $0x90] sm:$0xff]  ;;  %v613_v44 = vld [vmem:[#allocation2 + $0x240] sm:$0xff] }
 0x753   : > { %8881 = vmatmul.msk.f32.gmra.mxu1 %vm271_vm1, %v5918_v31  ;;  %v15297_v31 = vld [vmem:[#allocation49_spill] sm:$0xff]  ;;  %v5921_v26 = vrot.slane %v559_v12, 7  ;;  %v9386_v12 = vld [vmem:[#allocation2 + $0xb0] sm:$0xff] }
 0x754   : > { %v13624_v30 = vadd.f32 %v5810_v46, %v5663_v4  ;;  %v5444_v22 = vpop.f32.mrf.mxu2  ;;  %v5290_v4 = vadd.f32 %v5234_v52, %v13228_v18  ;;  %v15298_v52 = vld [vmem:[#allocation9_spill] sm:$0xff] }
 0x755   : > { %8983 = vmatmul.msk.f32.gmra.mxu0 %vm271_vm1, %v13622_v29  ;;  %v5502_v17 = vadd.f32 %v5444_v22, %v5289_v19 }
 0x756   : > { %8948 = vmatmul.msk.f32.gmra.mxu3 %vm271_vm1, %v6353_v62  ;;  %v6357_v62 = vrot.slane %v558_v1, 1 }
 0x758   : > { %v5237_v40 = vpop.f32.mrf.mxu1  ;;  %v6358_v22 = vsel %vm1409_vm3, %v6355_v51, %v6357_v62  ;;  %v9385_v51 = vld [vmem:[#allocation2 + $0xa8] sm:$0xff]  ;;  %v9387_v62 = vld [vmem:[#allocation2 + $0xa0] sm:$0xff] }
 0x759   : > { %v5606_v56 = vpop.f32.mrf.mxu3  ;;  %8915 = vmatmul.msk.f32.gmra.mxu2 %vm271_vm1, %v555_v50  ;;  %v6359_v1 = vrot.slane %v9385_v51, 1 }
 0x75a   : > { %v5664_v46 = vadd.f32 %v5606_v56, %v5502_v17  ;;  %v5819_v60 = vpop.f32.mrf.mxu0  ;;  %v5923_v17 = vsel %vm794_vm2, %v5921_v26, %v5922_v9  ;;  %v15299_v56 = vrot.slane %v15298_v52, 7 }
 0x75b   : > { %8882 = vmatmul.msk.f32.gmra.mxu1 %vm271_vm1, %v5920_v0  ;;  %v5291_v0 = vadd.f32 %v5237_v40, %v13239_v5  ;;  %v564_v40 = vld [vmem:[#allocation2 + $0xb8] sm:$0xff] }
 0x75c   : > { %v13634_v58 = vadd.f32 %v5813_v14, %v5664_v46  ;;  %v5447_v32 = vpop.f32.mrf.mxu2  ;;  %v5954_v14 = vrot.slane %v613_v44, 7  ;;  %v6360_v44 = vrot.slane %v9386_v12, 1  ;;  %v6362_v52 = vrot.slane %v564_v40, 1 }
 0x75d   : > { %8984 = vmatmul.msk.f32.gmra.mxu0 %vm271_vm1, %v15297_v31  ;;  %v5503_v19 = vadd.f32 %v5447_v32, %v5290_v4  ;;  %v5924_v32 = vrot.slane %v9387_v62, 7 }
 0x75e   : > { %8949 = vmatmul.msk.f32.gmra.mxu3 %vm271_vm1, %v6356_v8  ;;  %v13647_v46 = vsel %vm794_vm2, %v5954_v14, %v15299_v56  ;;  %v15300_v56 = vld [vmem:[#allocation10_spill] sm:$0xff] }
 0x75f   : > { %v5925_v5 = vsel %vm794_vm2, %v5922_v9, %v5924_v32 }
 0x760   : > { %v5240_v15 = vpop.f32.mrf.mxu1 }
 0x761   : > { %v5609_v23 = vpop.f32.mrf.mxu3  ;;  %8916 = vmatmul.msk.f32.gmra.mxu2 %vm271_vm1, %v556_v54  ;;  %v6361_v54 = vsel %vm1409_vm3, %v6359_v1, %v6360_v44  ;;  %v9388_v1 = vld [vmem:[#allocation2 + $0xc8] sm:$0xff] }
 0x762   : > { %v5665_v50 = vadd.f32 %v5609_v23, %v5503_v19  ;;  %v5822_v18 = vpop.f32.mrf.mxu0  ;;  %v5927_v12 = vrot.slane %v9388_v1, 7 }
 0x763   : > { %8883 = vmatmul.msk.f32.gmra.mxu1 %vm271_vm1, %v5923_v17  ;;  %v5292_v17 = vadd.f32 %v5240_v15, %v13255_v43  ;;  %v15301_v15 = vld [vmem:[#allocation17_spill] sm:$0xff] }
 0x764   : > { %v13649_v8 = vadd.f32 %v5816_v11, %v5665_v50  ;;  %v5450_v4 = vpop.f32.mrf.mxu2  ;;  %v565_v50 = vld [vmem:[#allocation2 + $0xc0] sm:$0xff] }
 0x765   : > { %8985 = vmatmul.msk.f32.gmra.mxu0 %vm271_vm1, %v13647_v46  ;;  %v5504_v11 = vadd.f32 %v5450_v4, %v5291_v0  ;;  %v5926_v9 = vrot.slane %v565_v50, 7 }
 0x766   : > { %8950 = vmatmul.msk.f32.gmra.mxu3 %vm271_vm1, %v6358_v22  ;;  %v619_v22 = vld [vmem:[#allocation2 + $0x270] sm:$0xff] }
 0x768   : > { %v5243_v14 = vpop.f32.mrf.mxu1 }
 0x769   : > { %v5612_v26 = vpop.f32.mrf.mxu3  ;;  %8917 = vmatmul.msk.f32.gmra.mxu2 %vm271_vm1, %v9387_v62  ;;  %v5293_v50 = vadd.f32 %v5243_v14, %v13269_v61  ;;  %v570_v14 = vld [vmem:[#allocation2 + $0xe8] sm:$0xff] }
 0x76a   : > { %v5666_v57 = vadd.f32 %v5612_v26, %v5504_v11  ;;  %v5825_v19 = vpop.f32.mrf.mxu0  ;;  %v6363_v11 = vsel %vm1409_vm3, %v6360_v44, %v6362_v52  ;;  %v9389_v44 = vld [vmem:[#allocation2 + $0xd8] sm:$0xff] }
 0x76b   : > { %8884 = vmatmul.msk.f32.gmra.mxu1 %vm271_vm1, %v5925_v5 }
 0x76c   : > { %v13659_v23 = vadd.f32 %v5819_v60, %v5666_v57  ;;  %v5453_v0 = vpop.f32.mrf.mxu2  ;;  %v5956_v60 = vrot.slane %v619_v22, 7  ;;  %v5928_v57 = vsel %vm794_vm2, %v5926_v9, %v5927_v12  ;;  %v6364_v22 = vrot.slane %v9389_v44, 1  ;;  %v9391_v9 = vld [vmem:[#allocation2 + $0xd0] sm:$0xff] }
 0x76d   : > { %8986 = vmatmul.msk.f32.gmra.mxu0 %vm271_vm1, %v15300_v56  ;;  %v5505_v4 = vadd.f32 %v5453_v0, %v5292_v17  ;;  %v9390_v17 = vld [vmem:[#allocation2 + $0xe0] sm:$0xff]  ;;  %v5929_v1 = vrot.slane %v9391_v9, 7 }
 0x76e   : > { %8951 = vmatmul.msk.f32.gmra.mxu3 %vm271_vm1, %v6361_v54  ;;  %v15302_v54 = vrot.slane %v15301_v15, 7  ;;  %v6365_v52 = vrot.slane %v9390_v17, 1  ;;  %v625_v15 = vld [vmem:[#allocation2 + $0x2a0] sm:$0xff]  ;;  %v15305_v17 = vld [vmem:[#allocation22_spill] sm:$0xff] }
 0x76f   : > { %v5930_v61 = vsel %vm794_vm2, %v5927_v12, %v5929_v1 }
 0x770   : > { %v5246_v26 = vpop.f32.mrf.mxu1  ;;  %v13672_v5 = vsel %vm794_vm2, %v5956_v60, %v15302_v54 }
 0x771   : > { %v5615_v32 = vpop.f32.mrf.mxu3  ;;  %8918 = vmatmul.msk.f32.gmra.mxu2 %vm271_vm1, %v9385_v51  ;;  %v6366_v51 = vsel %vm1409_vm3, %v6364_v22, %v6365_v52  ;;  %v5294_v54 = vadd.f32 %v5246_v26, %v13285_v39  ;;  %v15306_v26 = vld [vmem:[#allocation29_spill] sm:$0xff] }
 0x772   : > { %v5667_v62 = vadd.f32 %v5615_v32, %v5505_v4  ;;  %v5828_v43 = vpop.f32.mrf.mxu0 }
 0x773   : > { %8885 = vmatmul.msk.f32.gmra.mxu1 %vm271_vm1, %v5928_v57  ;;  %v571_v57 = vld [vmem:[#allocation2 + $0xf0] sm:$0xff] }
 0x774   : > { %v13674_v40 = vadd.f32 %v5822_v18, %v5667_v62  ;;  %v5456_v0 = vpop.f32.mrf.mxu2  ;;  %v5931_v12 = vrot.slane %v571_v57, 7 }
 0x775   : > { %8987 = vmatmul.msk.f32.gmra.mxu0 %vm271_vm1, %v13672_v5  ;;  %v5506_v18 = vadd.f32 %v5456_v0, %v5293_v50  ;;  %v6367_v50 = vrot.slane %v570_v14, 1  ;;  %v9392_v0 = vld [vmem:[#allocation2 + $0xf8] sm:$0xff] }
 0x776   : > { %15303 = vst [vmem:[#allocation133_spill] sm:$0xff] %v13674_v40  ;;  %8952 = vmatmul.msk.f32.gmra.mxu3 %vm271_vm1, %v6363_v11  ;;  %v5932_v1 = vrot.slane %v9392_v0, 7 }
 0x778   : > { %v5249_v32 = vpop.f32.mrf.mxu1 }
 0x779   : > { %v5618_v60 = vpop.f32.mrf.mxu3  ;;  %8919 = vmatmul.msk.f32.gmra.mxu2 %vm271_vm1, %v9391_v9  ;;  %v5295_v57 = vadd.f32 %v5249_v32, %v13299_v6  ;;  %v576_v32 = vld [vmem:[#allocation2 + $0x118] sm:$0xff] }
 0x77a   : > { %v5668_v4 = vadd.f32 %v5618_v60, %v5506_v18  ;;  %v5831_v62 = vpop.f32.mrf.mxu0 }
 0x77b   : > { %8886 = vmatmul.msk.f32.gmra.mxu1 %vm271_vm1, %v5930_v61  ;;  %v15307_v61 = vrot.slane %v15306_v26, 7  ;;  %v631_v26 = vld [vmem:[#allocation2 + $0x2d0] sm:$0xff] }
 0x77c   : > { %v13684_v11 = vadd.f32 %v5825_v19, %v5668_v4  ;;  %v5459_v22 = vpop.f32.mrf.mxu2  ;;  %v5958_v19 = vrot.slane %v625_v15, 7  ;;  %v6368_v4 = vsel %vm1409_vm3, %v6365_v52, %v6367_v50  ;;  %v9393_v52 = vld [vmem:[#allocation2 + $0x108] sm:$0xff] }
 0x77d   : > { %8988 = vmatmul.msk.f32.gmra.mxu0 %vm271_vm1, %v15305_v17  ;;  %v5507_v18 = vadd.f32 %v5459_v22, %v5294_v54  ;;  %v6369_v15 = vrot.slane %v9393_v52, 1  ;;  %v9394_v54 = vld [vmem:[#allocation2 + $0x110] sm:$0xff] }
 0x77e   : > { %15304 = vst [vmem:[#allocation136_spill] sm:$0xff] %v13684_v11  ;;  %8953 = vmatmul.msk.f32.gmra.mxu3 %vm271_vm1, %v6366_v51  ;;  %v5933_v51 = vsel %vm794_vm2, %v5931_v12, %v5932_v1  ;;  %v13697_v14 = vsel %vm794_vm2, %v5958_v19, %v15307_v61  ;;  %v6370_v50 = vrot.slane %v9394_v54, 1  ;;  %v9395_v12 = vld [vmem:[#allocation2 + $0x100] sm:$0xff] }
 0x77f   : > { %v5934_v0 = vrot.slane %v9395_v12, 7  ;;  %v15310_v54 = vld [vmem:[#allocation33_spill] sm:$0xff] }
 0x780   : > { %v5252_v11 = vpop.f32.mrf.mxu1 }
 0x781   : > { %v5621_v60 = vpop.f32.mrf.mxu3  ;;  %8920 = vmatmul.msk.f32.gmra.mxu2 %vm271_vm1, %v9389_v44  ;;  %v6371_v44 = vsel %vm1409_vm3, %v6369_v15, %v6370_v50  ;;  %v5935_v6 = vsel %vm794_vm2, %v5932_v1, %v5934_v0  ;;  %v5296_v61 = vadd.f32 %v5252_v11, %v13315_v7  ;;  %v15311_v11 = vld [vmem:[#allocation41_spill] sm:$0xff] }
 0x782   : > { %v5669_v9 = vadd.f32 %v5621_v60, %v5507_v18  ;;  %v5834_v39 = vpop.f32.mrf.mxu0 }
 0x783   : > { %8887 = vmatmul.msk.f32.gmra.mxu1 %vm271_vm1, %v5933_v51  ;;  %v577_v51 = vld [vmem:[#allocation2 + $0x120] sm:$0xff] }
 0x784   : > { %v13699_v40 = vadd.f32 %v5828_v43, %v5669_v9  ;;  %v5462_v22 = vpop.f32.mrf.mxu2  ;;  %v5936_v1 = vrot.slane %v577_v51, 7 }
 0x785   : > { %8989 = vmatmul.msk.f32.gmra.mxu0 %vm271_vm1, %v13697_v14  ;;  %v5508_v43 = vadd.f32 %v5462_v22, %v5295_v57  ;;  %v6372_v57 = vrot.slane %v576_v32, 1  ;;  %v9396_v22 = vld [vmem:[#allocation2 + $0x128] sm:$0xff] }
 0x786   : > { %15308 = vst [vmem:[#allocation131_spill] sm:$0xff] %v13699_v40  ;;  %8954 = vmatmul.msk.f32.gmra.mxu3 %vm271_vm1, %v6368_v4  ;;  %v5937_v0 = vrot.slane %v9396_v22, 7 }
 0x788   : > { %v5255_v60 = vpop.f32.mrf.mxu1 }
 0x789   : > { %v5624_v19 = vpop.f32.mrf.mxu3  ;;  %8921 = vmatmul.msk.f32.gmra.mxu2 %vm271_vm1, %v9395_v12  ;;  %v5297_v51 = vadd.f32 %v5255_v60, %v13329_v13  ;;  %v582_v60 = vld [vmem:[#allocation2 + $0x148] sm:$0xff] }
 0x78a   : > { %v5670_v18 = vadd.f32 %v5624_v19, %v5508_v43  ;;  %v5837_v9 = vpop.f32.mrf.mxu0 }
 0x78b   : > { %8888 = vmatmul.msk.f32.gmra.mxu1 %vm271_vm1, %v5935_v6  ;;  %v15312_v6 = vrot.slane %v15311_v11, 7  ;;  %v637_v11 = vld [vmem:[#allocation2 + $0x300] sm:$0xff] }
 0x78c   : > { %v13709_v4 = vadd.f32 %v5831_v62, %v5670_v18  ;;  %v5465_v15 = vpop.f32.mrf.mxu2  ;;  %v5960_v62 = vrot.slane %v631_v26, 7  ;;  %v6373_v18 = vsel %vm1409_vm3, %v6370_v50, %v6372_v57  ;;  %v9397_v50 = vld [vmem:[#allocation2 + $0x138] sm:$0xff] }
 0x78d   : > { %8990 = vmatmul.msk.f32.gmra.mxu0 %vm271_vm1, %v15310_v54  ;;  %v5509_v43 = vadd.f32 %v5465_v15, %v5296_v61  ;;  %v6374_v26 = vrot.slane %v9397_v50, 1  ;;  %v9398_v61 = vld [vmem:[#allocation2 + $0x140] sm:$0xff] }
 0x78e   : > { %15309 = vst [vmem:[#allocation123_spill] sm:$0xff] %v13709_v4  ;;  %8955 = vmatmul.msk.f32.gmra.mxu3 %vm271_vm1, %v6371_v44  ;;  %v5938_v44 = vsel %vm794_vm2, %v5936_v1, %v5937_v0  ;;  %v13722_v32 = vsel %vm794_vm2, %v5960_v62, %v15312_v6  ;;  %v6375_v57 = vrot.slane %v9398_v61, 1  ;;  %v9399_v1 = vld [vmem:[#allocation2 + $0x130] sm:$0xff] }
 0x78f   : > { %v5939_v22 = vrot.slane %v9399_v1, 7  ;;  %v15315_v61 = vld [vmem:[#allocation46_spill] sm:$0xff] }
 0x790   : > { %v5258_v4 = vpop.f32.mrf.mxu1 }
 0x791   : > { %v5627_v19 = vpop.f32.mrf.mxu3  ;;  %8922 = vmatmul.msk.f32.gmra.mxu2 %vm271_vm1, %v9393_v52  ;;  %v6376_v52 = vsel %vm1409_vm3, %v6374_v26, %v6375_v57  ;;  %v5940_v13 = vsel %vm794_vm2, %v5937_v0, %v5939_v22  ;;  %v5298_v6 = vadd.f32 %v5258_v4, %v13345_v41  ;;  %v15316_v4 = vld [vmem:[#allocation13_spill] sm:$0xff] }
 0x792   : > { %v5671_v12 = vadd.f32 %v5627_v19, %v5509_v43  ;;  %v5840_v7 = vpop.f32.mrf.mxu0 }
 0x793   : > { %8889 = vmatmul.msk.f32.gmra.mxu1 %vm271_vm1, %v5938_v44  ;;  %v583_v44 = vld [vmem:[#allocation2 + $0x150] sm:$0xff] }
 0x794   : > { %v13724_v40 = vadd.f32 %v5834_v39, %v5671_v12  ;;  %v5468_v15 = vpop.f32.mrf.mxu2  ;;  %v5941_v0 = vrot.slane %v583_v44, 7 }
 0x795   : > { %8991 = vmatmul.msk.f32.gmra.mxu0 %vm271_vm1, %v13722_v32  ;;  %v5510_v39 = vadd.f32 %v5468_v15, %v5297_v51  ;;  %v6377_v51 = vrot.slane %v582_v60, 1  ;;  %v9400_v15 = vld [vmem:[#allocation2 + $0x158] sm:$0xff] }
 0x796   : > { %15313 = vst [vmem:[#allocation134_spill] sm:$0xff] %v13724_v40  ;;  %8956 = vmatmul.msk.f32.gmra.mxu3 %vm271_vm1, %v6373_v18  ;;  %v5942_v22 = vrot.slane %v9400_v15, 7 }
 0x798   : > { %v5261_v19 = vpop.f32.mrf.mxu1 }
 0x799   : > { %v5630_v62 = vpop.f32.mrf.mxu3  ;;  %8923 = vmatmul.msk.f32.gmra.mxu2 %vm271_vm1, %v9399_v1  ;;  %v5299_v44 = vadd.f32 %v5261_v19, %v13359_v47  ;;  %v588_v47 = vld [vmem:[#allocation2 + $0x178] sm:$0xff] }
 0x79a   : > { %v5672_v43 = vadd.f32 %v5630_v62, %v5510_v39  ;;  %v5843_v12 = vpop.f32.mrf.mxu0 }
 0x79b   : > { %8890 = vmatmul.msk.f32.gmra.mxu1 %vm271_vm1, %v5940_v13  ;;  %v15317_v13 = vrot.slane %v15316_v4, 7  ;;  %v643_v4 = vld [vmem:[#allocation2 + $0x330] sm:$0xff] }
 0x79c   : > { %v13734_v18 = vadd.f32 %v5837_v9, %v5672_v43  ;;  %v5471_v26 = vpop.f32.mrf.mxu2  ;;  %v6607_v9 = vrot.slane %v637_v11, 7  ;;  %v6378_v43 = vsel %vm1409_vm3, %v6375_v57, %v6377_v51  ;;  %v9401_v11 = vld [vmem:[#allocation2 + $0x168] sm:$0xff] }
 0x79d   : > { %8992 = vmatmul.msk.f32.gmra.mxu0 %vm271_vm1, %v15315_v61  ;;  %v5511_v39 = vadd.f32 %v5471_v26, %v5298_v6  ;;  %v6379_v57 = vrot.slane %v9401_v11, 1  ;;  %v9402_v6 = vld [vmem:[#allocation2 + $0x170] sm:$0xff] }
 0x79e   : > { %15314 = vst [vmem:[#allocation124_spill] sm:$0xff] %v13734_v18  ;;  %8957 = vmatmul.msk.f32.gmra.mxu3 %vm271_vm1, %v6376_v52  ;;  %v5943_v52 = vsel %vm794_vm2, %v5941_v0, %v5942_v22  ;;  %v6608_v60 = vsel %vm794_vm2, %v6607_v9, %v15317_v13  ;;  %v6380_v51 = vrot.slane %v9402_v6, 1  ;;  %v9403_v0 = vld [vmem:[#allocation2 + $0x160] sm:$0xff]  ;;  %v6609_v6 = vrot.slane %v643_v4, 7 }
 0x79f   : > { %v5944_v15 = vrot.slane %v9403_v0, 7 }
 0x7a0   : > { %v5264_v18 = vpop.f32.mrf.mxu1 }
 0x7a1   : > { %v5633_v62 = vpop.f32.mrf.mxu3  ;;  %8924 = vmatmul.msk.f32.gmra.mxu2 %vm271_vm1, %v9397_v50  ;;  %v6381_v50 = vsel %vm1409_vm3, %v6379_v57, %v6380_v51  ;;  %v5300_v13 = vadd.f32 %v5264_v18, %v13375_v34  ;;  %v15322_v18 = vld [vmem:[#allocation21_spill] sm:$0xff] }
 0x7a2   : > { %v5673_v1 = vadd.f32 %v5633_v62, %v5511_v39  ;;  %v5846_v41 = vpop.f32.mrf.mxu0 }
 0x7a3   : > { %8891 = vmatmul.msk.f32.gmra.mxu1 %vm271_vm1, %v5943_v52  ;;  %v589_v52 = vld [vmem:[#allocation2 + $0x180] sm:$0xff] }
 0x7a4   : > { %v13747_v40 = vadd.f32 %v5840_v7, %v5673_v1  ;;  %v5474_v26 = vpop.f32.mrf.mxu2  ;;  %v5945_v1 = vsel %vm794_vm2, %v5942_v22, %v5944_v15  ;;  %v5946_v22 = vrot.slane %v589_v52, 7 }
 0x7a5   : > { %8993 = vmatmul.msk.f32.gmra.mxu0 %vm271_vm1, %v6608_v60  ;;  %v5512_v9 = vadd.f32 %v5474_v26, %v5299_v44  ;;  %v6382_v60 = vrot.slane %v588_v47, 1  ;;  %v15319_v44 = vld [vmem:[#allocation15_spill] sm:$0xff] }
 0x7a6   : > { %8958 = vmatmul.msk.f32.gmra.mxu3 %vm271_vm1, %v6378_v43 }
 0x7a8   : > { %v5267_v62 = vpop.f32.mrf.mxu1 }
 0x7a9   : > { %v5636_v7 = vpop.f32.mrf.mxu3  ;;  %8925 = vmatmul.msk.f32.gmra.mxu2 %vm271_vm1, %v9403_v0  ;;  %v6383_v0 = vsel %vm1409_vm3, %v6380_v51, %v6382_v60  ;;  %v5301_v52 = vadd.f32 %v5267_v62, %v13389_v38  ;;  %v15325_v62 = vld [vmem:[#allocation12_spill] sm:$0xff] }
 0x7aa   : > { %v5674_v39 = vadd.f32 %v5636_v7, %v5512_v9  ;;  %v5849_v19 = vpop.f32.mrf.mxu0  ;;  %v15320_v7 = vld [vmem:[#allocation11_spill] sm:$0xff] }
 0x7ab   : > { %8892 = vmatmul.msk.f32.gmra.mxu1 %vm271_vm1, %v5945_v1  ;;  %v15323_v1 = vrot.slane %v15322_v18, 7  ;;  %v15327_v18 = vld [vmem:[#allocation56_spill] sm:$0xff] }
 0x7ac   : > { %v13756_v43 = vadd.f32 %v5843_v12, %v5674_v39  ;;  %v5477_v57 = vpop.f32.mrf.mxu2  ;;  %v15321_v39 = vrot.slane %v15320_v7, 7 }
 0x7ad   : > { %8994 = vmatmul.msk.f32.gmra.mxu0 %vm271_vm1, %v15319_v44  ;;  %v5513_v26 = vadd.f32 %v5477_v57, %v5300_v13  ;;  %v6610_v47 = vsel %vm794_vm2, %v6609_v6, %v15323_v1  ;;  %v594_v57 = vld [vmem:[#allocation2 + $0x1a8] sm:$0xff]  ;;  %v15328_v1 = vrot.slane %v15327_v18, 1 }
 0x7ae   : > { %15318 = vst [vmem:[#allocation139_spill] sm:$0xff] %v13756_v43  ;;  %8959 = vmatmul.msk.f32.gmra.mxu3 %vm271_vm1, %v6381_v50  ;;  %v5947_v50 = vsel %vm794_vm2, %v5946_v22, %v15321_v39 }
 0x7b0   : > { %v6032_v9 = vpop.f32.mrf.mxu1 }
 0x7b1   : > { %v5639_v12 = vpop.f32.mrf.mxu3  ;;  %8926 = vmatmul.msk.f32.gmra.mxu2 %vm271_vm1, %v9401_v11  ;;  %v649_v11 = vld [vmem:[#allocation2 + $0x360] sm:$0xff]  ;;  %v6128_v38 = vadd.f32 %v6032_v9, %v13405_v28 }
 0x7b2   : > { %v5675_v15 = vadd.f32 %v5639_v12, %v5513_v26  ;;  %v6665_v34 = vpop.f32.mrf.mxu0  ;;  %v15324_v26 = vld [vmem:[#allocation57_spill] sm:$0xff]  ;;  %v6384_v12 = vrot.slane %v594_v57, 1  ;;  %v6611_v7 = vrot.slane %v649_v11, 7 }
 0x7b3   : > { %8893 = vmatmul.msk.f32.gmra.mxu1 %vm271_vm1, %v5947_v50 }
 0x7b4   : > { %v13771_v43 = vadd.f32 %v5846_v41, %v5675_v15  ;;  %v5480_v51 = vpop.f32.mrf.mxu2  ;;  %v9404_v41 = vld [vmem:[#allocation2 + $0x190] sm:$0xff]  ;;  %v15326_v15 = vld [vmem:[#allocation25_spill] sm:$0xff] }
 0x7b5   : > { %8995 = vmatmul.msk.f32.gmra.mxu0 %vm271_vm1, %v6610_v47  ;;  %v5514_v4 = vadd.f32 %v5480_v51, %v5301_v52  ;;  %v6385_v47 = vsel %vm1409_vm3, %v15328_v1, %v6384_v12 }
 0x7b6   : > { %8960 = vmatmul.msk.f32.gmra.mxu3 %vm271_vm1, %v6383_v0 }
 0x7b8   : > { %v6035_v44 = vpop.f32.mrf.mxu1 }
 0x7b9   : > { %v5642_v13 = vpop.f32.mrf.mxu3  ;;  %8927 = vmatmul.msk.f32.gmra.mxu2 %vm271_vm1, %v9404_v41  ;;  %v6129_v57 = vadd.f32 %v6035_v44, %v13419_v24  ;;  %v15331_v24 = vld [vmem:[#allocation59_spill] sm:$0xff] }
 0x7ba   : > { %v5676_v60 = vadd.f32 %v5642_v13, %v5514_v4  ;;  %v6668_v22 = vpop.f32.mrf.mxu0  ;;  %v15329_v4 = vld [vmem:[#allocation32_spill] sm:$0xff] }
 0x7bb   : > { %8894 = vmatmul.msk.f32.gmra.mxu1 %vm271_vm1, %v15325_v62  ;;  %v15330_v28 = vrot.slane %v15329_v4, 7 }
 0x7bc   : > { %v13778_v6 = vadd.f32 %v5849_v19, %v5676_v60  ;;  %v6197_v0 = vpop.f32.mrf.mxu2  ;;  %v9405_v60 = vld [vmem:[#allocation2 + $0x198] sm:$0xff] }
 0x7bd   : > { %8996 = vmatmul.msk.f32.gmra.mxu0 %vm271_vm1, %v15326_v15  ;;  %v6293_v19 = vadd.f32 %v6197_v0, %v6128_v38  ;;  %v13794_v9 = vsel %vm794_vm2, %v6611_v7, %v15330_v28  ;;  %v9406_v0 = vld [vmem:[#allocation2 + $0x1c0] sm:$0xff]  ;;  %v655_v7 = vld [vmem:[#allocation2 + $0x390] sm:$0xff] }
 0x7be   : > { %8961 = vmatmul.msk.f32.gmra.mxu3 %vm271_vm1, %v15324_v26 }
 0x7c0   : > { %v6038_v52 = vpop.f32.mrf.mxu1 }
 0x7c1   : > { %v6470_v39 = vpop.f32.mrf.mxu3  ;;  %8928 = vmatmul.msk.f32.gmra.mxu2 %vm271_vm1, %v9405_v60 }
 0x7c2   : > { %v6566_v50 = vadd.f32 %v6470_v39, %v6293_v19  ;;  %v6671_v51 = vpop.f32.mrf.mxu0  ;;  %v15332_v19 = vld [vmem:[#allocation37_spill] sm:$0xff] }
 0x7c3   : > { %8895 = vmatmul.msk.f32.gmra.mxu1 %vm271_vm1, %v13572_v16  ;;  %v6130_v16 = vadd.f32 %v6038_v52, %v13431_v59  ;;  %v15335_v59 = vld [vmem:[#allocation45_spill] sm:$0xff] }
 0x7c4   : > { %v13796_v13 = vadd.f32 %v6665_v34, %v6566_v50  ;;  %v6200_v41 = vpop.f32.mrf.mxu2  ;;  %v600_v34 = vld [vmem:[#allocation2 + $0x1d8] sm:$0xff]  ;;  %v6613_v50 = vrot.slane %v655_v7, 7  ;;  %v15336_v52 = vrot.slane %v15335_v59, 7 }
 0x7c5   : > { %8997 = vmatmul.msk.f32.gmra.mxu0 %vm271_vm1, %v13794_v9  ;;  %v6294_v11 = vadd.f32 %v6200_v41, %v6129_v57  ;;  %v6386_v44 = vrot.slane %v600_v34, 1 }
 0x7c6   : > { %8962 = vmatmul.msk.f32.gmra.mxu3 %vm271_vm1, %v6385_v47  ;;  %v15333_v47 = vld [vmem:[#allocation58_spill] sm:$0xff] }
 0x7c7   : > { %v15334_v4 = vrot.slane %v15333_v47, 1 }
 0x7c8   : > { %v6041_v62 = vpop.f32.mrf.mxu1 }
 0x7c9   : > { %v6473_v26 = vpop.f32.mrf.mxu3  ;;  %8929 = vmatmul.msk.f32.gmra.mxu2 %vm271_vm1, %v9406_v0  ;;  %v13818_v28 = vsel %vm1409_vm3, %v15334_v4, %v6386_v44 }
 0x7ca   : > { %v6567_v38 = vadd.f32 %v6473_v26, %v6294_v11  ;;  %v6674_v12 = vpop.f32.mrf.mxu0  ;;  %v9407_v11 = vld [vmem:[#allocation2 + $0x1c8] sm:$0xff]  ;;  %v6131_v26 = vadd.f32 %v6041_v62, %v13443_v27 }
 0x7cb   : > { %8896 = vmatmul.msk.f32.gmra.mxu1 %vm271_vm1, %v15291_v21  ;;  %v13823_v21 = vsel %vm794_vm2, %v6613_v50, %v15336_v52  ;;  %v9408_v50 = vld [vmem:[#allocation2 + $0x1f0] sm:$0xff]  ;;  %v15337_v27 = vld [vmem:[#allocation61_spill] sm:$0xff]  ;;  %v15339_v52 = vld [vmem:[#allocation60_spill] sm:$0xff] }
 0x7cc   : > { %v13805_v15 = vadd.f32 %v6668_v22, %v6567_v38  ;;  %v6203_v39 = vpop.f32.mrf.mxu2 }
 0x7cd   : > { %8998 = vmatmul.msk.f32.gmra.mxu0 %vm271_vm1, %v15332_v19  ;;  %v6295_v22 = vadd.f32 %v6203_v39, %v6130_v16  ;;  %v606_v16 = vld [vmem:[#allocation2 + $0x208] sm:$0xff] }
 0x7ce   : > { %8963 = vmatmul.msk.f32.gmra.mxu3 %vm271_vm1, %v15331_v24  ;;  %v6388_v62 = vrot.slane %v606_v16, 1 }
 0x7d0   : > { %v6044_v60 = vpop.f32.mrf.mxu1 }
 0x7d1   : > { %v6476_v18 = vpop.f32.mrf.mxu3  ;;  %8930 = vmatmul.msk.f32.gmra.mxu2 %vm271_vm1, %v9407_v11  ;;  %v15340_v11 = vrot.slane %v15339_v52, 1  ;;  %v15344_v52 = vld [vmem:[#allocation16_spill] sm:$0xff] }
 0x7d2   : > { %v6568_v1 = vadd.f32 %v6476_v18, %v6295_v22  ;;  %v6677_v57 = vpop.f32.mrf.mxu0  ;;  %v661_v22 = vld [vmem:[#allocation2 + $0x3c0] sm:$0xff]  ;;  %v15338_v18 = vld [vmem:[#allocation51_spill] sm:$0xff] }
 0x7d3   : > { %8897 = vmatmul.msk.f32.gmra.mxu1 %vm271_vm1, %v13597_v63  ;;  %v6132_v63 = vadd.f32 %v6044_v60, %v13453_v42  ;;  %v6615_v47 = vrot.slane %v661_v22, 7  ;;  %v15341_v42 = vld [vmem:[#allocation14_spill] sm:$0xff] }
 0x7d4   : > { %v13825_v41 = vadd.f32 %v6671_v51, %v6568_v1  ;;  %v6206_v38 = vpop.f32.mrf.mxu2  ;;  %v15342_v60 = vrot.slane %v15341_v42, 7 }
 0x7d5   : > { %8999 = vmatmul.msk.f32.gmra.mxu0 %vm271_vm1, %v13823_v21  ;;  %v6296_v34 = vadd.f32 %v6206_v38, %v6131_v26  ;;  %v13848_v26 = vsel %vm1409_vm3, %v15340_v11, %v6388_v62 }
 0x7d6   : > { %8964 = vmatmul.msk.f32.gmra.mxu3 %vm271_vm1, %v13818_v28 }
 0x7d8   : > { %v6047_v51 = vpop.f32.mrf.mxu1 }
 0x7d9   : > { %v6479_v0 = vpop.f32.mrf.mxu3  ;;  %8931 = vmatmul.msk.f32.gmra.mxu2 %vm271_vm1, %v9408_v50  ;;  %v6133_v16 = vadd.f32 %v6047_v51, %v13463_v55  ;;  %v15343_v55 = vld [vmem:[#allocation63_spill] sm:$0xff] }
 0x7da   : > { %v6569_v7 = vadd.f32 %v6479_v0, %v6296_v34  ;;  %v6680_v44 = vpop.f32.mrf.mxu0 }
 0x7db   : > { %8898 = vmatmul.msk.f32.gmra.mxu1 %vm271_vm1, %v15294_v45  ;;  %v13853_v45 = vsel %vm794_vm2, %v6615_v47, %v15342_v60 }
 0x7dc   : > { %v13835_v39 = vadd.f32 %v6674_v12, %v6569_v7  ;;  %v6209_v1 = vpop.f32.mrf.mxu2  ;;  %v9409_v7 = vld [vmem:[#allocation2 + $0x1f8] sm:$0xff] }
 0x7dd   : > { %9000 = vmatmul.msk.f32.gmra.mxu0 %vm271_vm1, %v15338_v18  ;;  %v6297_v12 = vadd.f32 %v6209_v1, %v6132_v63  ;;  %v612_v1 = vld [vmem:[#allocation2 + $0x238] sm:$0xff] }
 0x7de   : > { %8965 = vmatmul.msk.f32.gmra.mxu3 %vm271_vm1, %v15337_v27  ;;  %v6390_v51 = vrot.slane %v612_v1, 1 }
 0x7e0   : > { %v6050_v38 = vpop.f32.mrf.mxu1 }
 0x7e1   : > { %v6482_v4 = vpop.f32.mrf.mxu3  ;;  %8932 = vmatmul.msk.f32.gmra.mxu2 %vm271_vm1, %v9409_v7 }
 0x7e2   : > { %v6570_v59 = vadd.f32 %v6482_v4, %v6297_v12  ;;  %v6683_v34 = vpop.f32.mrf.mxu0  ;;  %v9410_v4 = vld [vmem:[#allocation2 + $0x220] sm:$0xff] }
 0x7e3   : > { %8899 = vmatmul.msk.f32.gmra.mxu1 %vm271_vm1, %v13622_v29  ;;  %v6134_v29 = vadd.f32 %v6050_v38, %v13473_v3  ;;  %v15347_v3 = vld [vmem:[#allocation23_spill] sm:$0xff] }
 0x7e4   : > { %v13855_v0 = vadd.f32 %v6677_v57, %v6570_v59  ;;  %v6212_v50 = vpop.f32.mrf.mxu2  ;;  %v667_v59 = vld [vmem:[#allocation2 + $0x3f0] sm:$0xff]  ;;  %v15348_v38 = vrot.slane %v15347_v3, 7 }
 0x7e5   : > { %9001 = vmatmul.msk.f32.gmra.mxu0 %vm271_vm1, %v13853_v45  ;;  %v6298_v22 = vadd.f32 %v6212_v50, %v6133_v16  ;;  %v6617_v42 = vrot.slane %v667_v59, 7  ;;  %v15345_v16 = vld [vmem:[#allocation62_spill] sm:$0xff] }
 0x7e6   : > { %8966 = vmatmul.msk.f32.gmra.mxu3 %vm271_vm1, %v13848_v26  ;;  %v15346_v50 = vrot.slane %v15345_v16, 1  ;;  %v9412_v16 = vld [vmem:[#allocation2 + $0x250] sm:$0xff] }
 0x7e7   : > { %v15352_v3 = vld [vmem:[#allocation26_spill] sm:$0xff] }
 0x7e8   : > { %v6053_v57 = vpop.f32.mrf.mxu1 }
 0x7e9   : > { %v6485_v63 = vpop.f32.mrf.mxu3  ;;  %8933 = vmatmul.msk.f32.gmra.mxu2 %vm271_vm1, %v9410_v4  ;;  %v9411_v4 = vld [vmem:[#allocation2 + $0x228] sm:$0xff]  ;;  %v6135_v59 = vadd.f32 %v6053_v57, %v13483_v37  ;;  %v15351_v37 = vld [vmem:[#allocation67_spill] sm:$0xff] }
 0x7ea   : > { %v6571_v62 = vadd.f32 %v6485_v63, %v6298_v22  ;;  %v6686_v47 = vpop.f32.mrf.mxu0  ;;  %v13878_v22 = vsel %vm1409_vm3, %v15346_v50, %v6390_v51  ;;  %v673_v50 = vld [vmem:[#allocation2 + $0x420] sm:$0xff] }
 0x7eb   : > { %8900 = vmatmul.msk.f32.gmra.mxu1 %vm271_vm1, %v15297_v31  ;;  %v13883_v31 = vsel %vm794_vm2, %v6617_v42, %v15348_v38 }
 0x7ec   : > { %v13865_v12 = vadd.f32 %v6680_v44, %v6571_v62  ;;  %v6215_v11 = vpop.f32.mrf.mxu2 }
 0x7ed   : > { %9002 = vmatmul.msk.f32.gmra.mxu0 %vm271_vm1, %v15344_v52  ;;  %v6299_v44 = vadd.f32 %v6215_v11, %v6134_v29 }
 0x7ee   : > { %8967 = vmatmul.msk.f32.gmra.mxu3 %vm271_vm1, %v15343_v55 }
 0x7f0   : > { %v6056_v63 = vpop.f32.mrf.mxu1 }
 0x7f1   : > { %v6488_v60 = vpop.f32.mrf.mxu3  ;;  %8934 = vmatmul.msk.f32.gmra.mxu2 %vm271_vm1, %v9411_v4  ;;  %v6619_v4 = vrot.slane %v673_v50, 7 }
 0x7f2   : > { %v6572_v7 = vadd.f32 %v6488_v60, %v6299_v44  ;;  %v6689_v62 = vpop.f32.mrf.mxu0  ;;  %v618_v44 = vld [vmem:[#allocation2 + $0x268] sm:$0xff] }
 0x7f3   : > { %8901 = vmatmul.msk.f32.gmra.mxu1 %vm271_vm1, %v13647_v46  ;;  %v6136_v46 = vadd.f32 %v6056_v63, %v13493_v48  ;;  %v6392_v57 = vrot.slane %v618_v44, 1  ;;  %v15355_v48 = vld [vmem:[#allocation34_spill] sm:$0xff] }
 0x7f4   : > { %v13885_v1 = vadd.f32 %v6683_v34, %v6572_v7  ;;  %v6218_v29 = vpop.f32.mrf.mxu2  ;;  %v15356_v63 = vrot.slane %v15355_v48, 7 }
 0x7f5   : > { %9003 = vmatmul.msk.f32.gmra.mxu0 %vm271_vm1, %v13883_v31  ;;  %v6300_v51 = vadd.f32 %v6218_v29, %v6135_v59 }
 0x7f6   : > { %15349 = vst [vmem:[#allocation137_spill] sm:$0xff] %v13885_v1  ;;  %8968 = vmatmul.msk.f32.gmra.mxu3 %vm271_vm1, %v13878_v22  ;;  %v9413_v1 = vld [vmem:[#allocation2 + $0x258] sm:$0xff] }
 0x7f8   : > { %v6059_v34 = vpop.f32.mrf.mxu1 }
 0x7f9   : > { %v6491_v11 = vpop.f32.mrf.mxu3  ;;  %8935 = vmatmul.msk.f32.gmra.mxu2 %vm271_vm1, %v9412_v16  ;;  %v6137_v50 = vadd.f32 %v6059_v34, %v13503_v2  ;;  %v15359_v2 = vld [vmem:[#allocation73_spill] sm:$0xff] }
 0x7fa   : > { %v6573_v42 = vadd.f32 %v6491_v11, %v6300_v51  ;;  %v6692_v60 = vpop.f32.mrf.mxu0  ;;  %v15353_v51 = vld [vmem:[#allocation65_spill] sm:$0xff] }
 0x7fb   : > { %8902 = vmatmul.msk.f32.gmra.mxu1 %vm271_vm1, %v15300_v56  ;;  %v15354_v11 = vrot.slane %v15353_v51, 1  ;;  %v13913_v56 = vsel %vm794_vm2, %v6619_v4, %v15356_v63  ;;  %v679_v51 = vld [vmem:[#allocation2 + $0x450] sm:$0xff] }
 0x7fc   : > { %v13895_v7 = vadd.f32 %v6686_v47, %v6573_v42  ;;  %v6221_v38 = vpop.f32.mrf.mxu2  ;;  %v6621_v63 = vrot.slane %v679_v51, 7 }
 0x7fd   : > { %9004 = vmatmul.msk.f32.gmra.mxu0 %vm271_vm1, %v15352_v3  ;;  %v6301_v47 = vadd.f32 %v6221_v38, %v6136_v46  ;;  %v13908_v42 = vsel %vm1409_vm3, %v15354_v11, %v6392_v57  ;;  %v15360_v11 = vld [vmem:[#allocation38_spill] sm:$0xff] }
 0x7fe   : > { %15350 = vst [vmem:[#allocation126_spill] sm:$0xff] %v13895_v7  ;;  %8969 = vmatmul.msk.f32.gmra.mxu3 %vm271_vm1, %v15351_v37 }
 0x800   : > { %v6062_v16 = vpop.f32.mrf.mxu1 }
 0x801   : > { %v6494_v59 = vpop.f32.mrf.mxu3  ;;  %8936 = vmatmul.msk.f32.gmra.mxu2 %vm271_vm1, %v9413_v1  ;;  %v9414_v1 = vld [vmem:[#allocation2 + $0x280] sm:$0xff] }
 0x802   : > { %v6574_v29 = vadd.f32 %v6494_v59, %v6301_v47  ;;  %v6695_v7 = vpop.f32.mrf.mxu0  ;;  %v624_v47 = vld [vmem:[#allocation2 + $0x298] sm:$0xff] }
 0x803   : > { %8903 = vmatmul.msk.f32.gmra.mxu1 %vm271_vm1, %v13672_v5  ;;  %v6138_v5 = vadd.f32 %v6062_v16, %v13513_v20  ;;  %v6394_v34 = vrot.slane %v624_v47, 1  ;;  %v15363_v20 = vld [vmem:[#allocation47_spill] sm:$0xff] }
 0x804   : > { %v13915_v44 = vadd.f32 %v6689_v62, %v6574_v29  ;;  %v6224_v46 = vpop.f32.mrf.mxu2  ;;  %v15364_v16 = vrot.slane %v15363_v20, 7 }
 0x805   : > { %9005 = vmatmul.msk.f32.gmra.mxu0 %vm271_vm1, %v13913_v56  ;;  %v6302_v57 = vadd.f32 %v6224_v46, %v6137_v50 }
 0x806   : > { %15357 = vst [vmem:[#allocation129_spill] sm:$0xff] %v13915_v44  ;;  %8970 = vmatmul.msk.f32.gmra.mxu3 %vm271_vm1, %v13908_v42  ;;  %v9415_v44 = vld [vmem:[#allocation2 + $0x288] sm:$0xff] }
 0x808   : > { %v6065_v62 = vpop.f32.mrf.mxu1 }
 0x809   : > { %v6497_v38 = vpop.f32.mrf.mxu3  ;;  %8937 = vmatmul.msk.f32.gmra.mxu2 %vm271_vm1, %v9414_v1  ;;  %v6139_v51 = vadd.f32 %v6065_v62, %v13523_v49  ;;  %v15367_v49 = vld [vmem:[#allocation80_spill] sm:$0xff] }
 0x80a   : > { %v6575_v4 = vadd.f32 %v6497_v38, %v6302_v57  ;;  %v6698_v59 = vpop.f32.mrf.mxu0  ;;  %v15361_v57 = vld [vmem:[#allocation70_spill] sm:$0xff] }
 0x80b   : > { %8904 = vmatmul.msk.f32.gmra.mxu1 %vm271_vm1, %v15305_v17  ;;  %v15362_v38 = vrot.slane %v15361_v57, 1  ;;  %v13943_v17 = vsel %vm794_vm2, %v6621_v63, %v15364_v16  ;;  %v685_v57 = vld [vmem:[#allocation2 + $0x480] sm:$0xff] }
 0x80c   : > { %v13925_v29 = vadd.f32 %v6692_v60, %v6575_v4  ;;  %v6227_v48 = vpop.f32.mrf.mxu2  ;;  %v6623_v16 = vrot.slane %v685_v57, 7 }
 0x80d   : > { %9006 = vmatmul.msk.f32.gmra.mxu0 %vm271_vm1, %v15360_v11  ;;  %v6303_v60 = vadd.f32 %v6227_v48, %v6138_v5  ;;  %v13938_v4 = vsel %vm1409_vm3, %v15362_v38, %v6394_v34  ;;  %v15368_v38 = vld [vmem:[#allocation52_spill] sm:$0xff] }
 0x80e   : > { %15358 = vst [vmem:[#allocation132_spill] sm:$0xff] %v13925_v29  ;;  %8971 = vmatmul.msk.f32.gmra.mxu3 %vm271_vm1, %v15359_v2 }
 0x810   : > { %v6068_v1 = vpop.f32.mrf.mxu1 }
 0x811   : > { %v6500_v50 = vpop.f32.mrf.mxu3  ;;  %8938 = vmatmul.msk.f32.gmra.mxu2 %vm271_vm1, %v9415_v44  ;;  %v9416_v44 = vld [vmem:[#allocation2 + $0x2b0] sm:$0xff] }
 0x812   : > { %v6576_v46 = vadd.f32 %v6500_v50, %v6303_v60  ;;  %v6701_v29 = vpop.f32.mrf.mxu0  ;;  %v630_v60 = vld [vmem:[#allocation2 + $0x2c8] sm:$0xff] }
 0x813   : > { %8905 = vmatmul.msk.f32.gmra.mxu1 %vm271_vm1, %v13697_v14  ;;  %v6140_v14 = vadd.f32 %v6068_v1, %v13545_v10  ;;  %v6396_v62 = vrot.slane %v630_v60, 1  ;;  %v15371_v10 = vld [vmem:[#allocation106_spill] sm:$0xff] }
 0x814   : > { %v13945_v47 = vadd.f32 %v6695_v7, %v6576_v46  ;;  %v6230_v5 = vpop.f32.mrf.mxu2  ;;  %v15372_v1 = vrot.slane %v15371_v10, 7 }
 0x815   : > { %9007 = vmatmul.msk.f32.gmra.mxu0 %vm271_vm1, %v13943_v17  ;;  %v6304_v34 = vadd.f32 %v6230_v5, %v6139_v51 }
 0x816   : > { %15365 = vst [vmem:[#allocation135_spill] sm:$0xff] %v13945_v47  ;;  %8972 = vmatmul.msk.f32.gmra.mxu3 %vm271_vm1, %v13938_v4  ;;  %v9417_v47 = vld [vmem:[#allocation2 + $0x2b8] sm:$0xff] }
 0x818   : > { %v6071_v7 = vpop.f32.mrf.mxu1 }
 0x819   : > { %v6503_v48 = vpop.f32.mrf.mxu3  ;;  %8939 = vmatmul.msk.f32.gmra.mxu2 %vm271_vm1, %v9416_v44  ;;  %v6141_v57 = vadd.f32 %v6071_v7, %v13559_v33  ;;  %v15374_v7 = vld [vmem:[#allocation109_spill] sm:$0xff] }
 0x81a   : > { %v6577_v63 = vadd.f32 %v6503_v48, %v6304_v34  ;;  %v6704_v50 = vpop.f32.mrf.mxu0  ;;  %v15369_v34 = vld [vmem:[#allocation77_spill] sm:$0xff] }
 0x81b   : > { %8906 = vmatmul.msk.f32.gmra.mxu1 %vm271_vm1, %v15310_v54  ;;  %v15370_v48 = vrot.slane %v15369_v34, 1  ;;  %v13973_v54 = vsel %vm794_vm2, %v6623_v16, %v15372_v1  ;;  %v15373_v34 = vld [vmem:[#allocation87_spill] sm:$0xff] }
 0x81c   : > { %v13955_v46 = vadd.f32 %v6698_v59, %v6577_v63  ;;  %v6233_v20 = vpop.f32.mrf.mxu2 }
 0x81d   : > { %9008 = vmatmul.msk.f32.gmra.mxu0 %vm271_vm1, %v15368_v38  ;;  %v6305_v59 = vadd.f32 %v6233_v20, %v6140_v14  ;;  %v13968_v63 = vsel %vm1409_vm3, %v15370_v48, %v6396_v62 }
 0x81e   : > { %15366 = vst [vmem:[#allocation138_spill] sm:$0xff] %v13955_v46  ;;  %8973 = vmatmul.msk.f32.gmra.mxu3 %vm271_vm1, %v15367_v49 }
 0x820   : > { %v6074_v44 = vpop.f32.mrf.mxu1 }
 0x821   : > { %v6506_v51 = vpop.f32.mrf.mxu3  ;;  %8940 = vmatmul.msk.f32.gmra.mxu2 %vm271_vm1, %v9417_v47  ;;  %v9418_v47 = vld [vmem:[#allocation2 + $0x2e0] sm:$0xff]  ;;  %v6142_v33 = vadd.f32 %v6074_v44, %v13574_v25  ;;  %v9419_v25 = vld [vmem:[#allocation2 + $0x2e8] sm:$0xff] }
 0x822   : > { %v6578_v5 = vadd.f32 %v6506_v51, %v6305_v59  ;;  %v6707_v46 = vpop.f32.mrf.mxu0  ;;  %v636_v59 = vld [vmem:[#allocation2 + $0x2f8] sm:$0xff] }
 0x823   : > { %8907 = vmatmul.msk.f32.gmra.mxu1 %vm271_vm1, %v13722_v32  ;;  %v6398_v32 = vrot.slane %v636_v59, 1  ;;  %v15378_v59 = vld [vmem:[#allocation96_spill] sm:$0xff] }
 0x824   : > { %v13975_v60 = vadd.f32 %v6701_v29, %v6578_v5  ;;  %v6236_v14 = vpop.f32.mrf.mxu2 }
 0x825   : > { %9009 = vmatmul.msk.f32.gmra.mxu0 %vm271_vm1, %v13973_v54  ;;  %v6306_v62 = vadd.f32 %v6236_v14, %v6141_v57  ;;  %v15375_v57 = vld [vmem:[#allocation84_spill] sm:$0xff] }
 0x826   : > { %8974 = vmatmul.msk.f32.gmra.mxu3 %vm271_vm1, %v13968_v63  ;;  %v15376_v14 = vrot.slane %v15375_v57, 1  ;;  %v15379_v57 = vld [vmem:[#allocation95_spill] sm:$0xff] }
 0x828   : > { %v6077_v29 = vpop.f32.mrf.mxu1 }
 0x829   : > { %v6509_v20 = vpop.f32.mrf.mxu3  ;;  %8941 = vmatmul.msk.f32.gmra.mxu2 %vm271_vm1, %v9418_v47  ;;  %v6143_v44 = vadd.f32 %v6077_v29, %v13584_v35  ;;  %v9420_v35 = vld [vmem:[#allocation2 + $0x370] sm:$0xff] }
 0x82a   : > { %v6579_v16 = vadd.f32 %v6509_v20, %v6306_v62  ;;  %v6710_v51 = vpop.f32.mrf.mxu0  ;;  %v13998_v62 = vsel %vm1409_vm3, %v15376_v14, %v6398_v32  ;;  %v15380_v14 = vrot.slane %v15379_v57, 1 }
 0x82b   : > { %8908 = vmatmul.msk.f32.gmra.mxu1 %vm271_vm1, %v15315_v61  ;;  %v654_v61 = vld [vmem:[#allocation2 + $0x388] sm:$0xff] }
 0x82c   : > { %v13985_v5 = vadd.f32 %v6704_v50, %v6579_v16  ;;  %v6239_v48 = vpop.f32.mrf.mxu2  ;;  %v6806_v32 = vrot.slane %v654_v61, 1 }
 0x82d   : > { %9010 = vmatmul.msk.f32.gmra.mxu0 %vm271_vm1, %v15374_v7  ;;  %v6307_v10 = vadd.f32 %v6239_v48, %v6142_v33 }
 0x82e   : > { %8975 = vmatmul.msk.f32.gmra.mxu3 %vm271_vm1, %v15373_v34 }
 0x830   : > { %v6080_v20 = vpop.f32.mrf.mxu1 }
 0x831   : > { %v6512_v1 = vpop.f32.mrf.mxu3  ;;  %8942 = vmatmul.msk.f32.gmra.mxu2 %vm271_vm1, %v9419_v25  ;;  %v14013_v25 = vsel %vm1409_vm3, %v15380_v14, %v6806_v32 }
 0x832   : > { %v6580_v50 = vadd.f32 %v6512_v1, %v6307_v10  ;;  %v6713_v16 = vpop.f32.mrf.mxu0 }
 0x833   : > { %9013 = vmatmul.msk.f32.vlgmr.msra.gmra.mxu1 %vm271_vm1, %v15331_v24  ;;  %v6144_v24 = vadd.f32 %v6080_v20, %v13599_v53 }
 0x834   : > { %v14000_v47 = vadd.f32 %v6707_v46, %v6580_v50  ;;  %v6242_v33 = vpop.f32.mrf.mxu2 }
 0x835   : > { %9115 = vmatmul.msk.f32.vlgmr.msra.gmra.mxu0 %vm271_vm1, %v15378_v59  ;;  %v6308_v48 = vadd.f32 %v6242_v33, %v6143_v44 }
 0x836   : > { %15377 = vst [vmem:[#allocation140_spill] sm:$0xff] %v14000_v47  ;;  %8976 = vmatmul.msk.f32.gmra.mxu3 %vm271_vm1, %v13998_v62 }
 0x838   : > { %v6083_v1 = vpop.f32.mrf.mxu1 }
 0x839   : > { %v6515_v46 = vpop.f32.mrf.mxu3  ;;  %9047 = vmatmul.msk.f32.vlgmr.msra.gmra.mxu2 %vm271_vm1, %v13794_v9  ;;  %v660_v9 = vld [vmem:[#allocation2 + $0x3b8] sm:$0xff]  ;;  %v6145_v53 = vadd.f32 %v6083_v1, %v13609_v36  ;;  %v9422_v36 = vld [vmem:[#allocation2 + $0x3a0] sm:$0xff] }
 0x83a   : > { %v6581_v10 = vadd.f32 %v6515_v46, %v6308_v48  ;;  %v6716_v50 = vpop.f32.mrf.mxu0  ;;  %v9421_v46 = vld [vmem:[#allocation2 + $0x378] sm:$0xff] }
 0x83b   : > { %9014 = vmatmul.msk.f32.gmra.mxu1 %vm271_vm1, %v13818_v28  ;;  %v15381_v28 = vld [vmem:[#allocation98_spill] sm:$0xff] }
 0x83c   : > { %v14015_v47 = vadd.f32 %v6710_v51, %v6581_v10  ;;  %v6245_v29 = vpop.f32.mrf.mxu2  ;;  %v6808_v10 = vrot.slane %v660_v9, 1 }
 0x83d   : > { %9116 = vmatmul.msk.f32.gmra.mxu0 %vm271_vm1, %v14013_v25  ;;  %v6309_v61 = vadd.f32 %v6245_v29, %v6144_v24 }
 0x83e   : > { %9081 = vmatmul.msk.f32.vlgmr.msra.gmra.mxu3 %vm271_vm1, %v9420_v35 }
 0x840   : > { %v6086_v51 = vpop.f32.mrf.mxu1 }
 0x841   : > { %v6518_v44 = vpop.f32.mrf.mxu3  ;;  %9048 = vmatmul.msk.f32.gmra.mxu2 %vm271_vm1, %v15332_v19  ;;  %v15382_v19 = vld [vmem:[#allocation97_spill] sm:$0xff] }
 0x842   : > { %v6582_v33 = vadd.f32 %v6518_v44, %v6309_v61  ;;  %v6719_v32 = vpop.f32.mrf.mxu0  ;;  %v15383_v29 = vrot.slane %v15382_v19, 1 }
 0x843   : > { %9015 = vmatmul.msk.f32.gmra.mxu1 %vm271_vm1, %v15337_v27  ;;  %v6146_v27 = vadd.f32 %v6086_v51, %v13624_v30 }
 0x844   : > { %v14025_v48 = vadd.f32 %v6713_v16, %v6582_v33  ;;  %v6248_v20 = vpop.f32.mrf.mxu2  ;;  %v14038_v61 = vsel %vm1409_vm3, %v15383_v29, %v6808_v10  ;;  %v9423_v10 = vld [vmem:[#allocation2 + $0x3a8] sm:$0xff] }
 0x845   : > { %9117 = vmatmul.msk.f32.gmra.mxu0 %vm271_vm1, %v15381_v28  ;;  %v6310_v57 = vadd.f32 %v6248_v20, %v6145_v53 }
 0x846   : > { %9082 = vmatmul.msk.f32.gmra.mxu3 %vm271_vm1, %v9421_v46 }
 0x848   : > { %v6089_v35 = vpop.f32.mrf.mxu1 }
 0x849   : > { %v6521_v16 = vpop.f32.mrf.mxu3  ;;  %9049 = vmatmul.msk.f32.gmra.mxu2 %vm271_vm1, %v13823_v21  ;;  %v666_v21 = vld [vmem:[#allocation2 + $0x3e8] sm:$0xff]  ;;  %v6147_v30 = vadd.f32 %v6089_v35, %v13634_v58  ;;  %v9424_v58 = vld [vmem:[#allocation2 + $0x3d0] sm:$0xff] }
 0x84a   : > { %v6583_v14 = vadd.f32 %v6521_v16, %v6310_v57  ;;  %v6722_v24 = vpop.f32.mrf.mxu0  ;;  %v6810_v57 = vrot.slane %v666_v21, 1 }
 0x84b   : > { %9016 = vmatmul.msk.f32.gmra.mxu1 %vm271_vm1, %v13848_v26  ;;  %v15384_v26 = vld [vmem:[#allocation28_spill] sm:$0xff] }
 0x84c   : > { %v14040_v44 = vadd.f32 %v6716_v50, %v6583_v14  ;;  %v6251_v1 = vpop.f32.mrf.mxu2 }
 0x84d   : > { %9118 = vmatmul.msk.f32.gmra.mxu0 %vm271_vm1, %v14038_v61  ;;  %v6311_v33 = vadd.f32 %v6251_v1, %v6146_v27 }
 0x84e   : > { %9083 = vmatmul.msk.f32.gmra.mxu3 %vm271_vm1, %v9422_v36 }
 0x850   : > { %v6092_v50 = vpop.f32.mrf.mxu1 }
 0x851   : > { %v6524_v9 = vpop.f32.mrf.mxu3  ;;  %9050 = vmatmul.msk.f32.gmra.mxu2 %vm271_vm1, %v15338_v18  ;;  %v15385_v18 = vld [vmem:[#allocation100_spill] sm:$0xff] }
 0x852   : > { %v6584_v46 = vadd.f32 %v6524_v9, %v6311_v33  ;;  %v6725_v53 = vpop.f32.mrf.mxu0  ;;  %v15386_v36 = vrot.slane %v15385_v18, 1 }
 0x853   : > { %9017 = vmatmul.msk.f32.gmra.mxu1 %vm271_vm1, %v15343_v55  ;;  %v6148_v55 = vadd.f32 %v6092_v50, %v13649_v8 }
 0x854   : > { %v14050_v20 = vadd.f32 %v6719_v32, %v6584_v46  ;;  %v6254_v51 = vpop.f32.mrf.mxu2  ;;  %v14063_v27 = vsel %vm1409_vm3, %v15386_v36, %v6810_v57 }
 0x855   : > { %9119 = vmatmul.msk.f32.gmra.mxu0 %vm271_vm1, %v15384_v26  ;;  %v6312_v16 = vadd.f32 %v6254_v51, %v6147_v30  ;;  %v9425_v30 = vld [vmem:[#allocation2 + $0x3d8] sm:$0xff] }
 0x856   : > { %9084 = vmatmul.msk.f32.gmra.mxu3 %vm271_vm1, %v9423_v10 }
 0x858   : > { %v6095_v19 = vpop.f32.mrf.mxu1 }
 0x859   : > { %v6527_v32 = vpop.f32.mrf.mxu3  ;;  %9051 = vmatmul.msk.f32.gmra.mxu2 %vm271_vm1, %v13853_v45  ;;  %v672_v45 = vld [vmem:[#allocation2 + $0x418] sm:$0xff]  ;;  %v6149_v8 = vadd.f32 %v6095_v19, %v13659_v23  ;;  %v9426_v23 = vld [vmem:[#allocation2 + $0x400] sm:$0xff] }
 0x85a   : > { %v6585_v14 = vadd.f32 %v6527_v32, %v6312_v16  ;;  %v6728_v29 = vpop.f32.mrf.mxu0  ;;  %v6812_v51 = vrot.slane %v672_v45, 1 }
 0x85b   : > { %9018 = vmatmul.msk.f32.gmra.mxu1 %vm271_vm1, %v13878_v22  ;;  %v15387_v22 = vld [vmem:[#allocation40_spill] sm:$0xff] }
 0x85c   : > { %v14065_v1 = vadd.f32 %v6722_v24, %v6585_v14  ;;  %v6257_v35 = vpop.f32.mrf.mxu2 }
 0x85d   : > { %9120 = vmatmul.msk.f32.gmra.mxu0 %vm271_vm1, %v14063_v27  ;;  %v6313_v33 = vadd.f32 %v6257_v35, %v6148_v55 }
 0x85e   : > { %9085 = vmatmul.msk.f32.gmra.mxu3 %vm271_vm1, %v9424_v58 }
 0x860   : > { %v6098_v24 = vpop.f32.mrf.mxu1 }
 0x861   : > { %v6530_v9 = vpop.f32.mrf.mxu3  ;;  %9052 = vmatmul.msk.f32.gmra.mxu2 %vm271_vm1, %v15344_v52  ;;  %v15388_v52 = vld [vmem:[#allocation35_spill] sm:$0xff] }
 0x862   : > { %v6586_v46 = vadd.f32 %v6530_v9, %v6313_v33  ;;  %v6731_v21 = vpop.f32.mrf.mxu0  ;;  %v15389_v18 = vrot.slane %v15388_v52, 1 }
 0x863   : > { %9019 = vmatmul.msk.f32.gmra.mxu1 %vm271_vm1, %v15351_v37  ;;  %v15390_v37 = vld [vmem:[#allocation133_spill] sm:$0xff] }
 0x864   : > { %v14075_v10 = vadd.f32 %v6725_v53, %v6586_v46  ;;  %v6260_v50 = vpop.f32.mrf.mxu2  ;;  %v14088_v36 = vsel %vm1409_vm3, %v15389_v18, %v6812_v51  ;;  %v6150_v19 = vadd.f32 %v6098_v24, %v15390_v37  ;;  %v15391_v24 = vld [vmem:[#allocation136_spill] sm:$0xff] }
 0x865   : > { %9121 = vmatmul.msk.f32.gmra.mxu0 %vm271_vm1, %v15387_v22  ;;  %v6314_v57 = vadd.f32 %v6260_v50, %v6149_v8  ;;  %v15392_v8 = vld [vmem:[#allocation108_spill] sm:$0xff] }
 0x866   : > { %9086 = vmatmul.msk.f32.gmra.mxu3 %vm271_vm1, %v9425_v30  ;;  %v9427_v30 = vld [vmem:[#allocation2 + $0x408] sm:$0xff] }
 0x868   : > { %v6101_v32 = vpop.f32.mrf.mxu1 }
 0x869   : > { %v6533_v53 = vpop.f32.mrf.mxu3  ;;  %9053 = vmatmul.msk.f32.gmra.mxu2 %vm271_vm1, %v13883_v31  ;;  %v678_v31 = vld [vmem:[#allocation2 + $0x448] sm:$0xff] }
 0x86a   : > { %v6587_v16 = vadd.f32 %v6533_v53, %v6314_v57  ;;  %v6734_v14 = vpop.f32.mrf.mxu0  ;;  %v6814_v51 = vrot.slane %v678_v31, 1 }
 0x86b   : > { %9020 = vmatmul.msk.f32.gmra.mxu1 %vm271_vm1, %v13908_v42  ;;  %v6151_v42 = vadd.f32 %v6101_v32, %v15391_v24  ;;  %v15395_v32 = vld [vmem:[#allocation131_spill] sm:$0xff] }
 0x86c   : > { %v14090_v58 = vadd.f32 %v6728_v29, %v6587_v16  ;;  %v6263_v55 = vpop.f32.mrf.mxu2  ;;  %v9429_v24 = vld [vmem:[#allocation2 + $0x438] sm:$0xff] }
 0x86d   : > { %9122 = vmatmul.msk.f32.gmra.mxu0 %vm271_vm1, %v14088_v36  ;;  %v6315_v35 = vadd.f32 %v6263_v55, %v6150_v19 }
 0x86e   : > { %9087 = vmatmul.msk.f32.gmra.mxu3 %vm271_vm1, %v9426_v23 }
 0x870   : > { %v6104_v29 = vpop.f32.mrf.mxu1 }
 0x871   : > { %v6536_v33 = vpop.f32.mrf.mxu3  ;;  %9054 = vmatmul.msk.f32.gmra.mxu2 %vm271_vm1, %v15352_v3  ;;  %v15393_v3 = vld [vmem:[#allocation48_spill] sm:$0xff]  ;;  %v6152_v19 = vadd.f32 %v6104_v29, %v15395_v32  ;;  %v15396_v29 = vld [vmem:[#allocation123_spill] sm:$0xff] }
 0x872   : > { %v6588_v9 = vadd.f32 %v6536_v33, %v6315_v35  ;;  %v6737_v46 = vpop.f32.mrf.mxu0  ;;  %v15394_v18 = vrot.slane %v15393_v3, 1 }
 0x873   : > { %9021 = vmatmul.msk.f32.gmra.mxu1 %vm271_vm1, %v15359_v2  ;;  %v9428_v2 = vld [vmem:[#allocation2 + $0x430] sm:$0xff] }
 0x874   : > { %v14100_v45 = vadd.f32 %v6731_v21, %v6588_v9  ;;  %v6266_v50 = vpop.f32.mrf.mxu2  ;;  %v14113_v23 = vsel %vm1409_vm3, %v15394_v18, %v6814_v51 }
 0x875   : > { %9123 = vmatmul.msk.f32.gmra.mxu0 %vm271_vm1, %v15392_v8  ;;  %v6316_v57 = vadd.f32 %v6266_v50, %v6151_v42  ;;  %v15397_v42 = vld [vmem:[#allocation112_spill] sm:$0xff] }
 0x876   : > { %9088 = vmatmul.msk.f32.gmra.mxu3 %vm271_vm1, %v9427_v30 }
 0x878   : > { %v6107_v16 = vpop.f32.mrf.mxu1 }
 0x879   : > { %v6539_v21 = vpop.f32.mrf.mxu3  ;;  %9055 = vmatmul.msk.f32.gmra.mxu2 %vm271_vm1, %v13913_v56  ;;  %v684_v56 = vld [vmem:[#allocation2 + $0x478] sm:$0xff] }
 0x87a   : > { %v6589_v53 = vadd.f32 %v6539_v21, %v6316_v57  ;;  %v6740_v52 = vpop.f32.mrf.mxu0  ;;  %v6816_v51 = vrot.slane %v684_v56, 1 }
 0x87b   : > { %9022 = vmatmul.msk.f32.gmra.mxu1 %vm271_vm1, %v13938_v4  ;;  %v6153_v4 = vadd.f32 %v6107_v16, %v15396_v29  ;;  %v15400_v16 = vld [vmem:[#allocation134_spill] sm:$0xff] }
 0x87c   : > { %v14115_v37 = vadd.f32 %v6734_v14, %v6589_v53  ;;  %v6269_v55 = vpop.f32.mrf.mxu2  ;;  %v9431_v29 = vld [vmem:[#allocation2 + $0x468] sm:$0xff] }
 0x87d   : > { %9124 = vmatmul.msk.f32.gmra.mxu0 %vm271_vm1, %v14113_v23  ;;  %v6317_v35 = vadd.f32 %v6269_v55, %v6152_v19 }
 0x87e   : > { %9089 = vmatmul.msk.f32.gmra.mxu3 %vm271_vm1, %v9428_v2 }
 0x880   : > { %v6110_v14 = vpop.f32.mrf.mxu1 }
 0x881   : > { %v6542_v33 = vpop.f32.mrf.mxu3  ;;  %9056 = vmatmul.msk.f32.gmra.mxu2 %vm271_vm1, %v15360_v11  ;;  %v15398_v11 = vld [vmem:[#allocation111_spill] sm:$0xff]  ;;  %v6154_v19 = vadd.f32 %v6110_v14, %v15400_v16  ;;  %v15401_v14 = vld [vmem:[#allocation124_spill] sm:$0xff] }
 0x882   : > { %v6590_v9 = vadd.f32 %v6542_v33, %v6317_v35  ;;  %v6743_v31 = vpop.f32.mrf.mxu0  ;;  %v15399_v18 = vrot.slane %v15398_v11, 1 }
 0x883   : > { %9023 = vmatmul.msk.f32.gmra.mxu1 %vm271_vm1, %v15367_v49  ;;  %v9430_v49 = vld [vmem:[#allocation2 + $0x460] sm:$0xff] }
 0x884   : > { %v14125_v30 = vadd.f32 %v6737_v46, %v6590_v9  ;;  %v6272_v50 = vpop.f32.mrf.mxu2  ;;  %v14138_v2 = vsel %vm1409_vm3, %v15399_v18, %v6816_v51 }
 0x885   : > { %9125 = vmatmul.msk.f32.gmra.mxu0 %vm271_vm1, %v15397_v42  ;;  %v6318_v57 = vadd.f32 %v6272_v50, %v6153_v4  ;;  %v15402_v4 = vld [vmem:[#allocation69_spill] sm:$0xff] }
 0x886   : > { %9090 = vmatmul.msk.f32.gmra.mxu3 %vm271_vm1, %v9429_v24 }
 0x888   : > { %v6113_v53 = vpop.f32.mrf.mxu1 }
 0x889   : > { %v6545_v46 = vpop.f32.mrf.mxu3  ;;  %9057 = vmatmul.msk.f32.gmra.mxu2 %vm271_vm1, %v13943_v17  ;;  %v690_v17 = vld [vmem:[#allocation2 + $0x4a8] sm:$0xff] }
 0x88a   : > { %v6591_v21 = vadd.f32 %v6545_v46, %v6318_v57  ;;  %v6746_v3 = vpop.f32.mrf.mxu0  ;;  %v6818_v51 = vrot.slane %v690_v17, 1 }
 0x88b   : > { %9024 = vmatmul.msk.f32.gmra.mxu1 %vm271_vm1, %v13968_v63  ;;  %v6155_v63 = vadd.f32 %v6113_v53, %v15401_v14  ;;  %v15405_v14 = vld [vmem:[#allocation139_spill] sm:$0xff] }
 0x88c   : > { %v14140_v32 = vadd.f32 %v6740_v52, %v6591_v21  ;;  %v6275_v55 = vpop.f32.mrf.mxu2 }
 0x88d   : > { %9126 = vmatmul.msk.f32.gmra.mxu0 %vm271_vm1, %v14138_v2  ;;  %v6319_v35 = vadd.f32 %v6275_v55, %v6154_v19 }
 0x88e   : > { %9091 = vmatmul.msk.f32.gmra.mxu3 %vm271_vm1, %v9430_v49 }
 0x890   : > { %v6116_v52 = vpop.f32.mrf.mxu1 }
 0x891   : > { %v6548_v33 = vpop.f32.mrf.mxu3  ;;  %9058 = vmatmul.msk.f32.gmra.mxu2 %vm271_vm1, %v15368_v38  ;;  %v15403_v38 = vld [vmem:[#allocation81_spill] sm:$0xff]  ;;  %v6156_v53 = vadd.f32 %v6116_v52, %v13747_v40  ;;  %v696_v40 = vld [vmem:[#allocation2 + $0x4d8] sm:$0xff] }
 0x892   : > { %v6592_v9 = vadd.f32 %v6548_v33, %v6319_v35  ;;  %v6749_v56 = vpop.f32.mrf.mxu0  ;;  %v15404_v18 = vrot.slane %v15403_v38, 1  ;;  %v9433_v52 = vld [vmem:[#allocation2 + $0x498] sm:$0xff] }
 0x893   : > { %9025 = vmatmul.msk.f32.gmra.mxu1 %vm271_vm1, %v15373_v34  ;;  %v9432_v34 = vld [vmem:[#allocation2 + $0x490] sm:$0xff] }
 0x894   : > { %v14150_v24 = vadd.f32 %v6743_v31, %v6592_v9  ;;  %v6278_v50 = vpop.f32.mrf.mxu2  ;;  %v14163_v49 = vsel %vm1409_vm3, %v15404_v18, %v6818_v51  ;;  %v15407_v51 = vld [vmem:[#allocation76_spill] sm:$0xff] }
 0x895   : > { %9127 = vmatmul.msk.f32.gmra.mxu0 %vm271_vm1, %v15402_v4  ;;  %v6320_v57 = vadd.f32 %v6278_v50, %v6155_v63  ;;  %v15406_v50 = vld [vmem:[#allocation92_spill] sm:$0xff] }
 0x896   : > { %9092 = vmatmul.msk.f32.gmra.mxu3 %vm271_vm1, %v9431_v29 }
 0x898   : > { %v6119_v21 = vpop.f32.mrf.mxu1 }
 0x899   : > { %v6551_v31 = vpop.f32.mrf.mxu3  ;;  %9059 = vmatmul.msk.f32.gmra.mxu2 %vm271_vm1, %v13973_v54  ;;  %v642_v54 = vld [vmem:[#allocation2 + $0x328] sm:$0xff]  ;;  %v6157_v63 = vadd.f32 %v6119_v21, %v15405_v14 }
 0x89a   : > { %v6593_v46 = vadd.f32 %v6551_v31, %v6320_v57  ;;  %v6752_v11 = vpop.f32.mrf.mxu0  ;;  %v7406_v31 = vrot.slane %v696_v40, 1 }
 0x89b   : > { %9026 = vmatmul.msk.f32.gmra.mxu1 %vm271_vm1, %v13998_v62 }
 0x89c   : > { %v14165_v16 = vadd.f32 %v6746_v3, %v6593_v46  ;;  %v6281_v19 = vpop.f32.mrf.mxu2  ;;  %v691_v3 = vld [vmem:[#allocation2 + $0x4b0] sm:$0xff] }
 0x89d   : > { %9128 = vmatmul.msk.f32.gmra.mxu0 %vm271_vm1, %v14163_v49  ;;  %v6321_v55 = vadd.f32 %v6281_v19, %v6156_v53  ;;  %v7003_v62 = vrot.slane %v691_v3, 7  ;;  %v15412_v3 = vld [vmem:[#allocation27_spill] sm:$0xff] }
 0x89e   : > { %9093 = vmatmul.msk.f32.gmra.mxu3 %vm271_vm1, %v9432_v34 }
 0x8a0   : > { %v6122_v9 = vpop.f32.mrf.mxu1 }
 0x8a1   : > { %v6554_v35 = vpop.f32.mrf.mxu3  ;;  %9060 = vmatmul.msk.f32.gmra.mxu2 %vm271_vm1, %v15374_v7  ;;  %v15408_v7 = vld [vmem:[#allocation85_spill] sm:$0xff]  ;;  %v6158_v40 = vadd.f32 %v6122_v9, %v13771_v43  ;;  %v15414_v43 = vld [vmem:[#allocation88_spill] sm:$0xff] }
 0x8a2   : > { %v6594_v33 = vadd.f32 %v6554_v35, %v6321_v55  ;;  %v6755_v17 = vpop.f32.mrf.mxu0  ;;  %v15409_v18 = vrot.slane %v15408_v7, 7  ;;  %v15410_v55 = vld [vmem:[#allocation91_spill] sm:$0xff] }
 0x8a3   : > { %9027 = vmatmul.msk.f32.gmra.mxu1 %vm271_vm1, %v15406_v50  ;;  %v15411_v35 = vrot.slane %v15410_v55, 1  ;;  %v648_v9 = vld [vmem:[#allocation2 + $0x358] sm:$0xff]  ;;  %v702_v55 = vld [vmem:[#allocation2 + $0x508] sm:$0xff] }
 0x8a4   : > { %v14175_v29 = vadd.f32 %v6749_v56, %v6594_v33  ;;  %v6284_v57 = vpop.f32.mrf.mxu2  ;;  %v6802_v56 = vrot.slane %v642_v54, 1  ;;  %v7004_v34 = vsel %vm794_vm2, %v7003_v62, %v15409_v18  ;;  %v9434_v54 = vld [vmem:[#allocation2 + $0x4c0] sm:$0xff] }
 0x8a5   : > { %9129 = vmatmul.msk.f32.gmra.mxu0 %vm271_vm1, %v15407_v51  ;;  %v6322_v46 = vadd.f32 %v6284_v57, %v6157_v63  ;;  %v9435_v63 = vld [vmem:[#allocation2 + $0x4f8] sm:$0xff]  ;;  %v9436_v57 = vld [vmem:[#allocation2 + $0x500] sm:$0xff] }
 0x8a6   : > { %9094 = vmatmul.msk.f32.gmra.mxu3 %vm271_vm1, %v9433_v52  ;;  %v6803_v21 = vsel %vm1409_vm3, %v15411_v35, %v6802_v56  ;;  %v15413_v52 = vrot.slane %v15412_v3, 1  ;;  %v7408_v51 = vrot.slane %v9435_v63, 1  ;;  %v7409_v56 = vrot.slane %v9436_v57, 1  ;;  %v9437_v35 = vld [vmem:[#allocation2 + $0x4c8] sm:$0xff] }
 0x8a7   : > { %v9438_v3 = vld [vmem:[#allocation2 + $0x4e8] sm:$0xff] }
 0x8a8   : > { %v6125_v19 = vpop.f32.mrf.mxu1  ;;  %v7407_v14 = vsel %vm1409_vm3, %v15413_v52, %v7406_v31  ;;  %v7006_v52 = vrot.slane %v9438_v3, 7 }
 0x8a9   : > { %v6557_v38 = vpop.f32.mrf.mxu3  ;;  %9061 = vmatmul.msk.f32.gmra.mxu2 %vm271_vm1, %v7004_v34  ;;  %v7410_v34 = vsel %vm1409_vm3, %v7408_v51, %v7409_v56 }
 0x8aa   : > { %v6595_v53 = vadd.f32 %v6557_v38, %v6322_v46  ;;  %v6758_v33 = vpop.f32.mrf.mxu0  ;;  %v697_v38 = vld [vmem:[#allocation2 + $0x4e0] sm:$0xff] }
 0x8ab   : > { %9028 = vmatmul.msk.f32.gmra.mxu1 %vm271_vm1, %v6803_v21  ;;  %v7005_v21 = vrot.slane %v697_v38, 7 }
 0x8ac   : > { %v14194_v50 = vadd.f32 %v6752_v11, %v6595_v53  ;;  %v6287_v62 = vpop.f32.mrf.mxu2 }
 0x8ad   : > { %9130 = vmatmul.msk.f32.gmra.mxu0 %vm271_vm1, %v7407_v14  ;;  %v6323_v46 = vadd.f32 %v6287_v62, %v6158_v40  ;;  %v6159_v14 = vadd.f32 %v6125_v19, %v13778_v6  ;;  %v6804_v40 = vrot.slane %v648_v9, 1  ;;  %v7411_v62 = vrot.slane %v702_v55, 1 }
 0x8ae   : > { %9095 = vmatmul.msk.f32.gmra.mxu3 %vm271_vm1, %v9434_v54  ;;  %v15415_v54 = vld [vmem:[#allocation94_spill] sm:$0xff] }
 0x8af   : > { %v7412_v6 = vsel %vm1409_vm3, %v7409_v56, %v7411_v62 }
 0x8b0   : > { %v6860_v7 = vpop.f32.mrf.mxu1 }
 0x8b1   : > { %v6560_v31 = vpop.f32.mrf.mxu3  ;;  %9062 = vmatmul.msk.f32.gmra.mxu2 %vm271_vm1, %v15414_v43  ;;  %v15416_v43 = vld [vmem:[#allocation93_spill] sm:$0xff]  ;;  %v6956_v55 = vadd.f32 %v6860_v7, %v13796_v13  ;;  %v14230_v13 = vld [vmem:[%s14635_s3] ss:$0 sm:$0xff]  ;;  %v703_v7 = vld [vmem:[#allocation2 + $0x510] sm:$0xff] }
 0x8b2   : > { %v6596_v11 = vadd.f32 %v6560_v31, %v6323_v46  ;;  %v7504_v18 = vpop.f32.mrf.mxu0  ;;  %v7007_v46 = vsel %vm794_vm2, %v7005_v21, %v7006_v52  ;;  %v15417_v38 = vrot.slane %v15416_v43, 1 }
 0x8b3   : > { %9029 = vmatmul.msk.f32.gmra.mxu1 %vm271_vm1, %v15415_v54 }
 0x8b4   : > { %v14202_v53 = vadd.f32 %v6755_v17, %v6596_v11  ;;  %v6290_v17 = vpop.f32.mrf.mxu2 }
 0x8b5   : > { %9131 = vmatmul.msk.f32.gmra.mxu0 %vm271_vm1, %v7410_v34  ;;  %v6324_v51 = vadd.f32 %v6290_v17, %v6159_v14  ;;  %v9439_v34 = vld [vmem:[#allocation2 + $0x4f0] sm:$0xff]  ;;  %v14223_v14 = vld [vmem:[#allocation2 + $0x528] sm:$0xff] }
 0x8b6   : > { %9096 = vmatmul.msk.f32.gmra.mxu3 %vm271_vm1, %v9437_v35  ;;  %v6805_v35 = vsel %vm1409_vm3, %v15417_v38, %v6804_v40  ;;  %v7008_v9 = vrot.slane %v9439_v34, 7  ;;  %v7413_v56 = vrot.slane %v14223_v14, 1  ;;  %v708_v38 = vld [vmem:[#allocation2 + $0x538] sm:$0xff] }
 0x8b8   : > { %v6863_v11 = vpop.f32.mrf.mxu1  ;;  %v7009_v62 = vsel %vm794_vm2, %v7006_v52, %v7008_v9  ;;  %v7010_v52 = vrot.slane %v703_v7, 7 }
 0x8b9   : > { %v6563_v57 = vpop.f32.mrf.mxu3  ;;  %9063 = vmatmul.msk.f32.gmra.mxu2 %vm271_vm1, %v7007_v46 }
 0x8ba   : > { %v6597_v31 = vadd.f32 %v6563_v57, %v6324_v51  ;;  %v7507_v3 = vpop.f32.mrf.mxu0 }
 0x8bb   : > { %9030 = vmatmul.msk.f32.gmra.mxu1 %vm271_vm1, %v6805_v35  ;;  %v9442_v35 = vld [vmem:[#allocation2 + $0x518] sm:$0xff] }
 0x8bc   : > { %v14216_v19 = vadd.f32 %v6758_v33, %v6597_v31  ;;  %v7101_v21 = vpop.f32.mrf.mxu2  ;;  %v9441_v33 = vld [vmem:[#allocation2 + $0x530] sm:$0xff] }
 0x8bd   : > { %9132 = vmatmul.msk.f32.gmra.mxu0 %vm271_vm1, %v7412_v6  ;;  %v7414_v54 = vrot.slane %v9441_v33, 1  ;;  %v7197_v17 = vadd.f32 %v7101_v21, %v6956_v55  ;;  %v7011_v6 = vrot.slane %v9442_v35, 7  ;;  %v7416_v55 = vrot.slane %v708_v38, 1  ;;  %v9445_v38 = vld [vmem:[#allocation2 + $0x560] sm:$0xff] }
 0x8be   : > { %9097 = vmatmul.msk.f32.gmra.mxu3 %vm271_vm1, %v9439_v34  ;;  %v6957_v34 = vadd.f32 %v6863_v11, %v13805_v15 }
 0x8bf   : > { %v7415_v31 = vsel %vm1409_vm3, %v7413_v56, %v7414_v54  ;;  %v7417_v15 = vsel %vm1409_vm3, %v7414_v54, %v7416_v55  ;;  %v14258_v54 = vld [vmem:[#allocation2 + $0x558] sm:$0xff] }
 0x8c0   : > { %v6866_v57 = vpop.f32.mrf.mxu1 }
 0x8c1   : > { %v7266_v40 = vpop.f32.mrf.mxu3  ;;  %9064 = vmatmul.msk.f32.gmra.mxu2 %vm271_vm1, %v7009_v62  ;;  %v6958_v7 = vadd.f32 %v6866_v57, %v13825_v41 }
 0x8c2   : > { %v7362_v51 = vadd.f32 %v7266_v40, %v7197_v17  ;;  %v7510_v46 = vpop.f32.mrf.mxu0 }
 0x8c3   : > { %9031 = vmatmul.msk.f32.gmra.mxu1 %vm271_vm1, %v15378_v59  ;;  %v9443_v59 = vld [vmem:[#allocation2 + $0x520] sm:$0xff] }
 0x8c4   : > { %v7600_v43 = vadd.f32 %v7504_v18, %v7362_v51  ;;  %v7104_v18 = vpop.f32.mrf.mxu2  ;;  %v7013_v62 = vrot.slane %v9443_v59, 7 }
 0x8c5   : > { %9133 = vmatmul.msk.f32.gmra.mxu0 %vm271_vm1, %v7415_v31  ;;  %v7198_v21 = vadd.f32 %v7104_v18, %v6957_v34 }
 0x8c6   : > { %9098 = vmatmul.msk.f32.gmra.mxu3 %vm271_vm1, %v9435_v63  ;;  %v7636_v9 = vadd.f32 %v14230_v13, %v7600_v43  ;;  %v7012_v63 = vsel %vm794_vm2, %v7010_v52, %v7011_v6  ;;  %v7419_v52 = vrot.slane %v9445_v38, 1 }
 0x8c8   : > { %7668 = vst.msk [vmem:[%s14239_s15] sm:$0xff] %vm271_vm1, %v7636_v9  ;;  %v6869_v17 = vpop.f32.mrf.mxu1  ;;  %v7771_v51 = vmul.f32 %v7636_v9, %v7636_v9  ;;  %v7700_v35 = vsel %vm271_vm1, %v7636_v9, 0.0 }
 0x8c9   : > { %v7269_v56 = vpop.f32.mrf.mxu3  ;;  %9065 = vmatmul.msk.f32.gmra.mxu2 %vm271_vm1, %v7012_v63 }
 0x8ca   : > { %v7363_v33 = vadd.f32 %v7269_v56, %v7198_v21  ;;  %v7513_v40 = vpop.f32.mrf.mxu0  ;;  %v7803_v21 = vsel %vm271_vm1, %v7771_v51, 0.0 }
 0x8cb   : > { %9032 = vmatmul.msk.f32.gmra.mxu1 %vm271_vm1, %v14013_v25  ;;  %v7014_v25 = vsel %vm794_vm2, %v7011_v6, %v7013_v62  ;;  %v9446_v62 = vld [vmem:[#allocation2 + $0x548] sm:$0xff] }
 0x8cc   : > { %v7601_v11 = vadd.f32 %v7507_v3, %v7363_v33  ;;  %v7107_v43 = vpop.f32.mrf.mxu2  ;;  %v7418_v3 = vrot.slane %v14258_v54, 1  ;;  %v709_v33 = vld [vmem:[#allocation2 + $0x540] sm:$0xff]  ;;  %v7016_v51 = vrot.slane %v9446_v62, 7 }
 0x8cd   : > { %9134 = vmatmul.msk.f32.gmra.mxu0 %vm271_vm1, %v7417_v15  ;;  %v7199_v34 = vadd.f32 %v7107_v43, %v6958_v7  ;;  %v714_v7 = vld [vmem:[#allocation2 + $0x568] sm:$0xff]  ;;  %v7015_v6 = vrot.slane %v709_v33, 7  ;;  %v9447_v33 = vld [vmem:[#allocation2 + $0x550] sm:$0xff] }
 0x8ce   : > { %9099 = vmatmul.msk.f32.gmra.mxu3 %vm271_vm1, %v9443_v59  ;;  %v7637_v31 = vadd.f32 %v14230_v13, %v7601_v11  ;;  %v7420_v59 = vsel %vm1409_vm3, %v7418_v3, %v7419_v52 }
 0x8d0   : > { %7669 = vst.msk [vmem:[%s14239_s15 + $0x8] sm:$0xff] %vm271_vm1, %v7637_v31  ;;  %v7701_v41 = vsel %vm271_vm1, %v7637_v31, 0.0  ;;  %v7772_v57 = vmul.f32 %v7637_v31, %v7637_v31  ;;  %v6872_v11 = vpop.f32.mrf.mxu1  ;;  %v6959_v31 = vadd.f32 %v6869_v17, %v13835_v39 }
 0x8d1   : > { %v7272_v18 = vpop.f32.mrf.mxu3  ;;  %v7702_v55 = vadd.f32 %v7701_v41, %v7700_v35  ;;  %9066 = vmatmul.msk.f32.gmra.mxu2 %vm271_vm1, %v7014_v25 }
 0x8d2   : > { %v7804_v56 = vsel %vm271_vm1, %v7772_v57, 0.0  ;;  %v7364_v63 = vadd.f32 %v7272_v18, %v7199_v34  ;;  %v7516_v9 = vpop.f32.mrf.mxu0  ;;  %v7017_v18 = vsel %vm794_vm2, %v7015_v6, %v7016_v51 }
 0x8d3   : > { %v7805_v15 = vadd.f32 %v7804_v56, %v7803_v21  ;;  %9033 = vmatmul.msk.f32.gmra.mxu1 %vm271_vm1, %v15381_v28 }
 0x8d4   : > { %v7602_v38 = vadd.f32 %v7510_v46, %v7364_v63  ;;  %v7110_v3 = vpop.f32.mrf.mxu2  ;;  %v7421_v46 = vrot.slane %v714_v7, 1  ;;  %v14290_v7 = vld [vmem:[#allocation2 + $0x588] sm:$0xff] }
 0x8d5   : > { %9135 = vmatmul.msk.f32.gmra.mxu0 %vm271_vm1, %v7420_v59  ;;  %v7018_v59 = vrot.slane %v9447_v33, 7 }
 0x8d6   : > { %9100 = vmatmul.msk.f32.gmra.mxu3 %vm271_vm1, %v14223_v14  ;;  %v7638_v43 = vadd.f32 %v14230_v13, %v7602_v38  ;;  %v7200_v14 = vadd.f32 %v7110_v3, %v6959_v31  ;;  %v7422_v56 = vsel %vm1409_vm3, %v7419_v52, %v7421_v46  ;;  %v9449_v52 = vld [vmem:[#allocation2 + $0x590] sm:$0xff] }
 0x8d7   : > { %v7424_v6 = vrot.slane %v9449_v52, 1  ;;  %v7019_v3 = vsel %vm794_vm2, %v7016_v51, %v7018_v59 }
 0x8d8   : > { %7670 = vst.msk [vmem:[%s14239_s15 + $0x10] sm:$0xff] %vm271_vm1, %v7638_v43  ;;  %v7703_v35 = vsel %vm271_vm1, %v7638_v43, 0.0  ;;  %v7773_v41 = vmul.f32 %v7638_v43, %v7638_v43  ;;  %v6875_v21 = vpop.f32.mrf.mxu1 }
 0x8d9   : > { %v7275_v57 = vpop.f32.mrf.mxu3  ;;  %v7704_v34 = vadd.f32 %v7703_v35, %v7702_v55  ;;  %9067 = vmatmul.msk.f32.gmra.mxu2 %vm271_vm1, %v7017_v18  ;;  %v6960_v55 = vadd.f32 %v6872_v11, %v13855_v0  ;;  %v715_v35 = vld [vmem:[#allocation2 + $0x570] sm:$0xff] }
 0x8da   : > { %v7806_v39 = vsel %vm271_vm1, %v7773_v41, 0.0  ;;  %v7365_v17 = vadd.f32 %v7275_v57, %v7200_v14  ;;  %v7519_v28 = vpop.f32.mrf.mxu0 }
 0x8db   : > { %v7807_v25 = vadd.f32 %v7806_v39, %v7805_v15  ;;  %9034 = vmatmul.msk.f32.gmra.mxu1 %vm271_vm1, %v14038_v61 }
 0x8dc   : > { %v7603_v63 = vadd.f32 %v7513_v40, %v7365_v17  ;;  %v7113_v15 = vpop.f32.mrf.mxu2  ;;  %v7423_v40 = vrot.slane %v14290_v7, 1  ;;  %v720_v17 = vld [vmem:[#allocation2 + $0x598] sm:$0xff] }
 0x8dd   : > { %9136 = vmatmul.msk.f32.gmra.mxu0 %vm271_vm1, %v7422_v56  ;;  %v7201_v0 = vadd.f32 %v7113_v15, %v6960_v55  ;;  %v9450_v56 = vld [vmem:[#allocation2 + $0x578] sm:$0xff] }
 0x8de   : > { %9101 = vmatmul.msk.f32.gmra.mxu3 %vm271_vm1, %v9447_v33  ;;  %v7639_v38 = vadd.f32 %v14230_v13, %v7603_v63  ;;  %v7425_v18 = vsel %vm1409_vm3, %v7423_v40, %v7424_v6  ;;  %v7021_v51 = vrot.slane %v9450_v56, 7  ;;  %v6961_v63 = vadd.f32 %v6875_v21, %v13865_v12 }
 0x8e0   : > { %7671 = vst.msk [vmem:[%s14239_s15 + $0x18] sm:$0xff] %vm271_vm1, %v7639_v38  ;;  %v7705_v62 = vsel %vm271_vm1, %v7639_v38, 0.0  ;;  %v7774_v31 = vmul.f32 %v7639_v38, %v7639_v38  ;;  %v6878_v14 = vpop.f32.mrf.mxu1 }
 0x8e1   : > { %v7278_v11 = vpop.f32.mrf.mxu3  ;;  %v7706_v43 = vadd.f32 %v7705_v62, %v7704_v34  ;;  %9068 = vmatmul.msk.f32.gmra.mxu2 %vm271_vm1, %v7019_v3  ;;  %v7020_v34 = vrot.slane %v715_v35, 7 }
 0x8e2   : > { %v7808_v61 = vsel %vm271_vm1, %v7774_v31, 0.0  ;;  %v7366_v46 = vadd.f32 %v7278_v11, %v7201_v0  ;;  %v7522_v57 = vpop.f32.mrf.mxu0  ;;  %v9451_v11 = vld [vmem:[#allocation2 + $0x580] sm:$0xff] }
 0x8e3   : > { %v7809_v41 = vadd.f32 %v7808_v61, %v7807_v25  ;;  %9035 = vmatmul.msk.f32.gmra.mxu1 %vm271_vm1, %v15384_v26  ;;  %v7022_v40 = vsel %vm794_vm2, %v7020_v34, %v7021_v51  ;;  %v7023_v3 = vrot.slane %v9451_v11, 7  ;;  %v15418_v61 = vld [vmem:[#allocation137_spill] sm:$0xff] }
 0x8e4   : > { %v7604_v39 = vadd.f32 %v7516_v9, %v7366_v46  ;;  %v7116_v25 = vpop.f32.mrf.mxu2  ;;  %v7426_v9 = vrot.slane %v720_v17, 1 }
 0x8e5   : > { %9137 = vmatmul.msk.f32.gmra.mxu0 %vm271_vm1, %v7425_v18 }
 0x8e6   : > { %9102 = vmatmul.msk.f32.gmra.mxu3 %vm271_vm1, %v14258_v54  ;;  %v7640_v33 = vadd.f32 %v14230_v13, %v7604_v39  ;;  %v7202_v54 = vadd.f32 %v7116_v25, %v6961_v63  ;;  %v7427_v31 = vsel %vm1409_vm3, %v7424_v6, %v7426_v9  ;;  %v9453_v6 = vld [vmem:[#allocation2 + $0x5c0] sm:$0xff]  ;;  %v7024_v63 = vsel %vm794_vm2, %v7021_v51, %v7023_v3 }
 0x8e7   : > { %v7429_v18 = vrot.slane %v9453_v6, 1  ;;  %v721_v25 = vld [vmem:[#allocation2 + $0x5a0] sm:$0xff] }
 0x8e8   : > { %7672 = vst.msk [vmem:[%s14239_s15 + $0x20] sm:$0xff] %vm271_vm1, %v7640_v33  ;;  %v7707_v59 = vsel %vm271_vm1, %v7640_v33, 0.0  ;;  %v7775_v55 = vmul.f32 %v7640_v33, %v7640_v33  ;;  %v6881_v62 = vpop.f32.mrf.mxu1 }
 0x8e9   : > { %v7281_v38 = vpop.f32.mrf.mxu3  ;;  %v7708_v15 = vadd.f32 %v7707_v59, %v7706_v43  ;;  %9069 = vmatmul.msk.f32.gmra.mxu2 %vm271_vm1, %v7022_v40  ;;  %v6962_v43 = vadd.f32 %v6878_v14, %v15418_v61  ;;  %v726_v40 = vld [vmem:[#allocation2 + $0x5c8] sm:$0xff] }
 0x8ea   : > { %v7810_v12 = vsel %vm271_vm1, %v7775_v55, 0.0  ;;  %v7367_v21 = vadd.f32 %v7281_v38, %v7202_v54  ;;  %v7525_v26 = vpop.f32.mrf.mxu0 }
 0x8eb   : > { %v7811_v52 = vadd.f32 %v7810_v12, %v7809_v41  ;;  %9036 = vmatmul.msk.f32.gmra.mxu1 %vm271_vm1, %v14063_v27  ;;  %v14320_v41 = vld [vmem:[#allocation2 + $0x5b8] sm:$0xff]  ;;  %v9454_v12 = vld [vmem:[#allocation2 + $0x5a8] sm:$0xff] }
 0x8ec   : > { %v7605_v0 = vadd.f32 %v7519_v28, %v7367_v21  ;;  %v7119_v35 = vpop.f32.mrf.mxu2  ;;  %v7428_v28 = vrot.slane %v14320_v41, 1  ;;  %v7026_v51 = vrot.slane %v9454_v12, 7  ;;  %v15419_v21 = vld [vmem:[#allocation126_spill] sm:$0xff] }
 0x8ed   : > { %9138 = vmatmul.msk.f32.gmra.mxu0 %vm271_vm1, %v7427_v31  ;;  %v7203_v14 = vadd.f32 %v7119_v35, %v6962_v43  ;;  %v6963_v31 = vadd.f32 %v6881_v62, %v15419_v21 }
 0x8ee   : > { %9103 = vmatmul.msk.f32.gmra.mxu3 %vm271_vm1, %v9451_v11  ;;  %v7641_v46 = vadd.f32 %v14230_v13, %v7605_v0  ;;  %v7430_v54 = vsel %vm1409_vm3, %v7428_v28, %v7429_v18 }
 0x8f0   : > { %7673 = vst.msk [vmem:[%s14239_s15 + $0x28] sm:$0xff] %vm271_vm1, %v7641_v46  ;;  %v7709_v39 = vsel %vm271_vm1, %v7641_v46, 0.0  ;;  %v7776_v17 = vmul.f32 %v7641_v46, %v7641_v46  ;;  %v6884_v59 = vpop.f32.mrf.mxu1 }
 0x8f1   : > { %v7284_v34 = vpop.f32.mrf.mxu3  ;;  %v7710_v56 = vadd.f32 %v7709_v39, %v7708_v15  ;;  %9070 = vmatmul.msk.f32.gmra.mxu2 %vm271_vm1, %v7024_v63  ;;  %v7025_v15 = vrot.slane %v721_v25, 7  ;;  %v9455_v63 = vld [vmem:[#allocation2 + $0x5b0] sm:$0xff] }
 0x8f2   : > { %v7812_v27 = vsel %vm271_vm1, %v7776_v17, 0.0  ;;  %v7368_v33 = vadd.f32 %v7284_v34, %v7203_v14  ;;  %v7528_v55 = vpop.f32.mrf.mxu0  ;;  %v14344_v14 = vld [vmem:[#allocation2 + $0x5e8] sm:$0xff]  ;;  %v731_v34 = vld [vmem:[#allocation2 + $0x5f0] sm:$0xff] }
 0x8f3   : > { %v7813_v9 = vadd.f32 %v7812_v27, %v7811_v52  ;;  %9037 = vmatmul.msk.f32.gmra.mxu1 %vm271_vm1, %v15387_v22  ;;  %v7027_v46 = vsel %vm794_vm2, %v7025_v15, %v7026_v51  ;;  %v15420_v27 = vld [vmem:[#allocation129_spill] sm:$0xff] }
 0x8f4   : > { %v7606_v38 = vadd.f32 %v7522_v57, %v7368_v33  ;;  %v7122_v52 = vpop.f32.mrf.mxu2  ;;  %v7431_v57 = vrot.slane %v726_v40, 1  ;;  %v6964_v33 = vadd.f32 %v6884_v59, %v15420_v27 }
 0x8f5   : > { %9139 = vmatmul.msk.f32.gmra.mxu0 %vm271_vm1, %v7430_v54 }
 0x8f6   : > { %9104 = vmatmul.msk.f32.gmra.mxu3 %vm271_vm1, %v14290_v7  ;;  %v7642_v0 = vadd.f32 %v14230_v13, %v7606_v38  ;;  %v7204_v7 = vadd.f32 %v7122_v52, %v6963_v31  ;;  %v7432_v39 = vsel %vm1409_vm3, %v7429_v18, %v7431_v57 }
 0x8f8   : > { %7674 = vst.msk [vmem:[%s14239_s15 + $0x30] sm:$0xff] %vm271_vm1, %v7642_v0  ;;  %v7711_v11 = vsel %vm271_vm1, %v7642_v0, 0.0  ;;  %v7777_v3 = vmul.f32 %v7642_v0, %v7642_v0  ;;  %v6887_v6 = vpop.f32.mrf.mxu1  ;;  %v728_v0 = vld [vmem:[#allocation2 + $0x5d8] sm:$0xff] }
 0x8f9   : > { %v7287_v61 = vpop.f32.mrf.mxu3  ;;  %v7712_v43 = vadd.f32 %v7711_v11, %v7710_v56  ;;  %9071 = vmatmul.msk.f32.gmra.mxu2 %vm271_vm1, %v7027_v46  ;;  %v7028_v56 = vrot.slane %v9455_v63, 7  ;;  %v15421_v46 = vld [vmem:[#allocation132_spill] sm:$0xff] }
 0x8fa   : > { %v7814_v62 = vsel %vm271_vm1, %v7777_v3, 0.0  ;;  %v7369_v35 = vadd.f32 %v7287_v61, %v7204_v7  ;;  %v7531_v22 = vpop.f32.mrf.mxu0  ;;  %v732_v61 = vld [vmem:[#allocation2 + $0x5f8] sm:$0xff] }
 0x8fb   : > { %v7815_v28 = vadd.f32 %v7814_v62, %v7813_v9  ;;  %9038 = vmatmul.msk.f32.gmra.mxu1 %vm271_vm1, %v14088_v36  ;;  %v7434_v9 = vrot.slane %v731_v34, 1  ;;  %v7029_v59 = vsel %vm794_vm2, %v7026_v51, %v7028_v56  ;;  %v727_v36 = vld [vmem:[#allocation2 + $0x5d0] sm:$0xff]  ;;  %v7031_v51 = vrot.slane %v728_v0, 7 }
 0x8fc   : > { %v7607_v17 = vadd.f32 %v7525_v26, %v7369_v35  ;;  %v7125_v18 = vpop.f32.mrf.mxu2  ;;  %v7433_v26 = vrot.slane %v14344_v14, 1  ;;  %v6965_v62 = vadd.f32 %v6887_v6, %v15421_v46  ;;  %v734_v46 = vld [vmem:[#allocation2 + $0x608] sm:$0xff] }
 0x8fd   : > { %9140 = vmatmul.msk.f32.gmra.mxu0 %vm271_vm1, %v7432_v39  ;;  %v7205_v40 = vadd.f32 %v7125_v18, %v6964_v33  ;;  %v7436_v39 = vrot.slane %v732_v61, 1  ;;  %v729_v33 = vld [vmem:[#allocation2 + $0x5e0] sm:$0xff] }
 0x8fe   : > { %9105 = vmatmul.msk.f32.gmra.mxu3 %vm271_vm1, %v9455_v63  ;;  %v7643_v25 = vadd.f32 %v14230_v13, %v7607_v17  ;;  %v7435_v3 = vsel %vm1409_vm3, %v7433_v26, %v7434_v9 }
 0x8ff   : > { %v7437_v26 = vsel %vm1409_vm3, %v7434_v9, %v7436_v39 }
 0x900   : > { %7675 = vst.msk [vmem:[%s14239_s15 + $0x38] sm:$0xff] %vm271_vm1, %v7643_v25  ;;  %v7713_v54 = vsel %vm271_vm1, %v7643_v25, 0.0  ;;  %v7778_v38 = vmul.f32 %v7643_v25, %v7643_v25  ;;  %v6890_v57 = vpop.f32.mrf.mxu1 }
 0x901   : > { %v7290_v15 = vpop.f32.mrf.mxu3  ;;  %v7714_v12 = vadd.f32 %v7713_v54, %v7712_v43  ;;  %9072 = vmatmul.msk.f32.gmra.mxu2 %vm271_vm1, %v7029_v59  ;;  %v7030_v43 = vrot.slane %v727_v36, 7 }
 0x902   : > { %v7816_v21 = vsel %vm271_vm1, %v7778_v38, 0.0  ;;  %v7370_v31 = vadd.f32 %v7290_v15, %v7205_v40  ;;  %v7534_v11 = vpop.f32.mrf.mxu0  ;;  %v14374_v38 = vld [vmem:[#allocation2 + $0x618] sm:$0xff]  ;;  %v737_v40 = vld [vmem:[#allocation2 + $0x620] sm:$0xff]  ;;  %v7033_v15 = vrot.slane %v729_v33, 7 }
 0x903   : > { %v7817_v52 = vadd.f32 %v7816_v21, %v7815_v28  ;;  %9039 = vmatmul.msk.f32.gmra.mxu1 %vm271_vm1, %v15392_v8  ;;  %v7032_v56 = vsel %vm794_vm2, %v7030_v43, %v7031_v51  ;;  %v7439_v9 = vrot.slane %v737_v40, 1 }
 0x904   : > { %v7608_v7 = vadd.f32 %v7528_v55, %v7370_v31  ;;  %v7128_v28 = vpop.f32.mrf.mxu2 }
 0x905   : > { %9141 = vmatmul.msk.f32.gmra.mxu0 %vm271_vm1, %v7435_v3  ;;  %v7206_v34 = vadd.f32 %v7128_v28, %v6965_v62 }
 0x906   : > { %9106 = vmatmul.msk.f32.gmra.mxu3 %vm271_vm1, %v14320_v41  ;;  %v7644_v35 = vadd.f32 %v14230_v13, %v7608_v7 }
 0x908   : > { %7676 = vst.msk [vmem:[%s14239_s15 + $0x40] sm:$0xff] %vm271_vm1, %v7644_v35  ;;  %v7715_v55 = vsel %vm271_vm1, %v7644_v35, 0.0  ;;  %v7779_v17 = vmul.f32 %v7644_v35, %v7644_v35  ;;  %v6893_v8 = vpop.f32.mrf.mxu1 }
 0x909   : > { %v7293_v41 = vpop.f32.mrf.mxu3  ;;  %v7716_v63 = vadd.f32 %v7715_v55, %v7714_v12  ;;  %9073 = vmatmul.msk.f32.gmra.mxu2 %vm271_vm1, %v7032_v56  ;;  %v15422_v12 = vld [vmem:[#allocation135_spill] sm:$0xff] }
 0x90a   : > { %v7818_v6 = vsel %vm271_vm1, %v7779_v17, 0.0  ;;  %v7371_v27 = vadd.f32 %v7293_v41, %v7206_v34  ;;  %v7537_v18 = vpop.f32.mrf.mxu0  ;;  %v6966_v59 = vadd.f32 %v6890_v57, %v15422_v12  ;;  %v7034_v57 = vsel %vm794_vm2, %v7031_v51, %v7033_v15  ;;  %v738_v17 = vld [vmem:[#allocation2 + $0x628] sm:$0xff]  ;;  %v735_v15 = vld [vmem:[#allocation2 + $0x610] sm:$0xff] }
 0x90b   : > { %v7819_v25 = vadd.f32 %v7818_v6, %v7817_v52  ;;  %9040 = vmatmul.msk.f32.gmra.mxu1 %vm271_vm1, %v14113_v23  ;;  %v733_v23 = vld [vmem:[#allocation2 + $0x600] sm:$0xff]  ;;  %v7036_v51 = vrot.slane %v734_v46, 7  ;;  %v15423_v41 = vld [vmem:[#allocation138_spill] sm:$0xff] }
 0x90c   : > { %v7609_v54 = vadd.f32 %v7531_v22, %v7371_v27  ;;  %v7131_v31 = vpop.f32.mrf.mxu2  ;;  %v7438_v22 = vrot.slane %v14374_v38, 1  ;;  %v7035_v34 = vrot.slane %v733_v23, 7  ;;  %v7441_v27 = vrot.slane %v738_v17, 1 }
 0x90d   : > { %9142 = vmatmul.msk.f32.gmra.mxu0 %vm271_vm1, %v7437_v26  ;;  %v7207_v52 = vadd.f32 %v7131_v31, %v6966_v59 }
 0x90e   : > { %9107 = vmatmul.msk.f32.gmra.mxu3 %vm271_vm1, %v729_v33  ;;  %v7645_v21 = vadd.f32 %v14230_v13, %v7609_v54  ;;  %v7440_v39 = vsel %vm1409_vm3, %v7438_v22, %v7439_v9  ;;  %v7037_v54 = vsel %vm794_vm2, %v7035_v34, %v7036_v51  ;;  %v14404_v22 = vld [vmem:[#allocation2 + $0x648] sm:$0xff] }
 0x910   : > { %7677 = vst.msk [vmem:[%s14239_s15 + $0x48] sm:$0xff] %vm271_vm1, %v7645_v21  ;;  %v7717_v36 = vsel %vm271_vm1, %v7645_v21, 0.0  ;;  %v7780_v0 = vmul.f32 %v7645_v21, %v7645_v21  ;;  %v6896_v35 = vpop.f32.mrf.mxu1  ;;  %v7442_v21 = vsel %vm1409_vm3, %v7439_v9, %v7441_v27 }
 0x911   : > { %v7296_v3 = vpop.f32.mrf.mxu3  ;;  %v7718_v7 = vadd.f32 %v7717_v36, %v7716_v63  ;;  %9074 = vmatmul.msk.f32.gmra.mxu2 %vm271_vm1, %v7034_v57  ;;  %v6967_v63 = vadd.f32 %v6893_v8, %v15423_v41  ;;  %v743_v36 = vld [vmem:[#allocation2 + $0x650] sm:$0xff] }
 0x912   : > { %v7820_v61 = vsel %vm271_vm1, %v7780_v0, 0.0  ;;  %v7372_v43 = vadd.f32 %v7296_v3, %v7207_v52  ;;  %v7540_v28 = vpop.f32.mrf.mxu0  ;;  %v7038_v0 = vrot.slane %v735_v15, 7  ;;  %v6968_v52 = vadd.f32 %v6896_v35, %v13975_v60 }
 0x913   : > { %v7821_v62 = vadd.f32 %v7820_v61, %v7819_v25  ;;  %9041 = vmatmul.msk.f32.gmra.mxu1 %vm271_vm1, %v15397_v42  ;;  %v7444_v9 = vrot.slane %v743_v36, 1 }
 0x914   : > { %v7610_v55 = vadd.f32 %v7534_v11, %v7372_v43  ;;  %v7134_v6 = vpop.f32.mrf.mxu2  ;;  %v7039_v60 = vsel %vm794_vm2, %v7036_v51, %v7038_v0  ;;  %v15424_v0 = vld [vmem:[#allocation140_spill] sm:$0xff] }
 0x915   : > { %9143 = vmatmul.msk.f32.gmra.mxu0 %vm271_vm1, %v7440_v39  ;;  %v7208_v25 = vadd.f32 %v7134_v6, %v6967_v63  ;;  %v740_v39 = vld [vmem:[#allocation2 + $0x638] sm:$0xff] }
 0x916   : > { %9108 = vmatmul.msk.f32.gmra.mxu3 %vm271_vm1, %v14344_v14  ;;  %v7646_v56 = vadd.f32 %v14230_v13, %v7610_v55  ;;  %v7041_v51 = vrot.slane %v740_v39, 7 }
 0x918   : > { %7678 = vst.msk [vmem:[%s14239_s15 + $0x50] sm:$0xff] %vm271_vm1, %v7646_v56  ;;  %v7719_v11 = vsel %vm271_vm1, %v7646_v56, 0.0  ;;  %v7781_v33 = vmul.f32 %v7646_v56, %v7646_v56  ;;  %v6899_v42 = vpop.f32.mrf.mxu1  ;;  %v744_v56 = vld [vmem:[#allocation2 + $0x658] sm:$0xff] }
 0x919   : > { %v7299_v14 = vpop.f32.mrf.mxu3  ;;  %v7720_v26 = vadd.f32 %v7719_v11, %v7718_v7  ;;  %9075 = vmatmul.msk.f32.gmra.mxu2 %vm271_vm1, %v7037_v54  ;;  %v6969_v27 = vadd.f32 %v6899_v42, %v13985_v5 }
 0x91a   : > { %v7822_v8 = vsel %vm271_vm1, %v7781_v33, 0.0  ;;  %v7373_v40 = vadd.f32 %v7299_v14, %v7208_v25  ;;  %v7543_v59 = vpop.f32.mrf.mxu0  ;;  %v7446_v25 = vrot.slane %v744_v56, 1 }
 0x91b   : > { %v7823_v12 = vadd.f32 %v7822_v8, %v7821_v62  ;;  %9042 = vmatmul.msk.f32.gmra.mxu1 %vm271_vm1, %v14138_v2  ;;  %v739_v2 = vld [vmem:[#allocation2 + $0x630] sm:$0xff] }
 0x91c   : > { %v7611_v31 = vadd.f32 %v7537_v18, %v7373_v40  ;;  %v7137_v7 = vpop.f32.mrf.mxu2  ;;  %v7443_v18 = vrot.slane %v14404_v22, 1  ;;  %v7040_v6 = vrot.slane %v739_v2, 7 }
 0x91d   : > { %9144 = vmatmul.msk.f32.gmra.mxu0 %vm271_vm1, %v7442_v21  ;;  %v7209_v43 = vadd.f32 %v7137_v7, %v6968_v52  ;;  %v7447_v21 = vsel %vm1409_vm3, %v7444_v9, %v7446_v25 }
 0x91e   : > { %9109 = vmatmul.msk.f32.gmra.mxu3 %vm271_vm1, %v735_v15  ;;  %v7647_v3 = vadd.f32 %v14230_v13, %v7611_v31  ;;  %v7445_v41 = vsel %vm1409_vm3, %v7443_v18, %v7444_v9  ;;  %v7042_v8 = vsel %vm794_vm2, %v7040_v6, %v7041_v51  ;;  %v741_v15 = vld [vmem:[#allocation2 + $0x640] sm:$0xff] }
 0x91f   : > { %v7043_v36 = vrot.slane %v741_v15, 7 }
 0x920   : > { %7679 = vst.msk [vmem:[%s14239_s15 + $0x58] sm:$0xff] %vm271_vm1, %v7647_v3  ;;  %v7721_v57 = vsel %vm271_vm1, %v7647_v3, 0.0  ;;  %v7782_v61 = vmul.f32 %v7647_v3, %v7647_v3  ;;  %v6902_v17 = vpop.f32.mrf.mxu1 }
 0x921   : > { %v7302_v23 = vpop.f32.mrf.mxu3  ;;  %v7722_v46 = vadd.f32 %v7721_v57, %v7720_v26  ;;  %9076 = vmatmul.msk.f32.gmra.mxu2 %vm271_vm1, %v7039_v60  ;;  %v6970_v52 = vadd.f32 %v6902_v17, %v15424_v0 }
 0x922   : > { %v7824_v62 = vsel %vm271_vm1, %v7782_v61, 0.0  ;;  %v7374_v35 = vadd.f32 %v7302_v23, %v7209_v43  ;;  %v7546_v34 = vpop.f32.mrf.mxu0  ;;  %v7044_v43 = vsel %vm794_vm2, %v7041_v51, %v7043_v36 }
 0x923   : > { %v7825_v55 = vadd.f32 %v7824_v62, %v7823_v12  ;;  %9043 = vmatmul.msk.f32.gmra.mxu1 %vm271_vm1, %v15402_v4 }
 0x924   : > { %v7612_v63 = vadd.f32 %v7540_v28, %v7374_v35  ;;  %v7140_v33 = vpop.f32.mrf.mxu2 }
 0x925   : > { %9145 = vmatmul.msk.f32.gmra.mxu0 %vm271_vm1, %v7445_v41  ;;  %v7210_v26 = vadd.f32 %v7140_v33, %v6969_v27 }
 0x926   : > { %9110 = vmatmul.msk.f32.gmra.mxu3 %vm271_vm1, %v14374_v38  ;;  %v7648_v11 = vadd.f32 %v14230_v13, %v7612_v63 }
 0x928   : > { %7680 = vst.msk [vmem:[%s14239_s15 + $0x60] sm:$0xff] %vm271_vm1, %v7648_v11  ;;  %v7723_v28 = vsel %vm271_vm1, %v7648_v11, 0.0  ;;  %v7783_v14 = vmul.f32 %v7648_v11, %v7648_v11  ;;  %v6905_v12 = vpop.f32.mrf.mxu1 }
 0x929   : > { %v7305_v38 = vpop.f32.mrf.mxu3  ;;  %v7724_v54 = vadd.f32 %v7723_v28, %v7722_v46  ;;  %9077 = vmatmul.msk.f32.gmra.mxu2 %vm271_vm1, %v7042_v8  ;;  %v6971_v2 = vadd.f32 %v6905_v12, %v14015_v47 }
 0x92a   : > { %v7826_v5 = vsel %vm271_vm1, %v7783_v14, 0.0  ;;  %v7375_v40 = vadd.f32 %v7305_v38, %v7210_v26  ;;  %v7549_v42 = vpop.f32.mrf.mxu0 }
 0x92b   : > { %v7827_v4 = vadd.f32 %v7826_v5, %v7825_v55  ;;  %9044 = vmatmul.msk.f32.gmra.mxu1 %vm271_vm1, %v14163_v49 }
 0x92c   : > { %v7613_v31 = vadd.f32 %v7543_v59, %v7375_v40  ;;  %v7143_v7 = vpop.f32.mrf.mxu2 }
 0x92d   : > { %9146 = vmatmul.msk.f32.gmra.mxu0 %vm271_vm1, %v7447_v21  ;;  %v7211_v9 = vadd.f32 %v7143_v7, %v6970_v52 }
 0x92e   : > { %9111 = vmatmul.msk.f32.gmra.mxu3 %vm271_vm1, %v741_v15  ;;  %v7649_v3 = vadd.f32 %v14230_v13, %v7613_v31 }
 0x930   : > { %7681 = vst.msk [vmem:[%s14239_s15 + $0x68] sm:$0xff] %vm271_vm1, %v7649_v3  ;;  %v7725_v18 = vsel %vm271_vm1, %v7649_v3, 0.0  ;;  %v7784_v59 = vmul.f32 %v7649_v3, %v7649_v3  ;;  %v6908_v62 = vpop.f32.mrf.mxu1 }
 0x931   : > { %v7308_v57 = vpop.f32.mrf.mxu3  ;;  %v7726_v61 = vadd.f32 %v7725_v18, %v7724_v54  ;;  %9078 = vmatmul.msk.f32.gmra.mxu2 %vm271_vm1, %v7044_v43  ;;  %v6972_v47 = vadd.f32 %v6908_v62, %v14025_v48 }
 0x932   : > { %v7828_v23 = vsel %vm271_vm1, %v7784_v59, 0.0  ;;  %v7376_v46 = vadd.f32 %v7308_v57, %v7211_v9  ;;  %v7552_v49 = vpop.f32.mrf.mxu0 }
 0x933   : > { %v7829_v60 = vadd.f32 %v7828_v23, %v7827_v4 }
 0x934   : > { %v7614_v35 = vadd.f32 %v7546_v34, %v7376_v46  ;;  %v7146_v55 = vpop.f32.mrf.mxu2 }
 0x935   : > { %v7212_v63 = vadd.f32 %v7146_v55, %v6971_v2 }
 0x936   : > { %9112 = vmatmul.msk.f32.gmra.mxu3 %vm271_vm1, %v14404_v22  ;;  %v7650_v39 = vadd.f32 %v14230_v13, %v7614_v35 }
 0x938   : > { %7682 = vst.msk [vmem:[%s14239_s15 + $0x70] sm:$0xff] %vm271_vm1, %v7650_v39  ;;  %v7727_v17 = vsel %vm271_vm1, %v7650_v39, 0.0  ;;  %v7785_v41 = vmul.f32 %v7650_v39, %v7650_v39  ;;  %v6911_v11 = vpop.f32.mrf.mxu1 }
 0x939   : > { %v7311_v56 = vpop.f32.mrf.mxu3  ;;  %v7728_v6 = vadd.f32 %v7727_v17, %v7726_v61  ;;  %v6973_v48 = vadd.f32 %v6911_v11, %v14040_v44 }
 0x93a   : > { %v7830_v34 = vsel %vm271_vm1, %v7785_v41, 0.0  ;;  %v7377_v51 = vadd.f32 %v7311_v56, %v7212_v63  ;;  %v7555_v22 = vpop.f32.mrf.mxu0 }
 0x93b   : > { %v7831_v27 = vadd.f32 %v7830_v34, %v7829_v60 }
 0x93c   : > { %v7615_v33 = vadd.f32 %v7549_v42, %v7377_v51  ;;  %v7149_v28 = vpop.f32.mrf.mxu2 }
 0x93d   : > { %v7213_v38 = vadd.f32 %v7149_v28, %v6972_v47 }
 0x93e   : > { %v7651_v25 = vadd.f32 %v14230_v13, %v7615_v33 }
 0x940   : > { %7683 = vst.msk [vmem:[%s14239_s15 + $0x78] sm:$0xff] %vm271_vm1, %v7651_v25  ;;  %v7729_v14 = vsel %vm271_vm1, %v7651_v25, 0.0  ;;  %v7786_v26 = vmul.f32 %v7651_v25, %v7651_v25  ;;  %v6914_v4 = vpop.f32.mrf.mxu1 }
 0x941   : > { %v7314_v54 = vpop.f32.mrf.mxu3  ;;  %v7730_v8 = vadd.f32 %v7729_v14, %v7728_v6  ;;  %v6974_v44 = vadd.f32 %v6914_v4, %v14050_v20 }
 0x942   : > { %v7832_v5 = vsel %vm271_vm1, %v7786_v26, 0.0  ;;  %v7378_v40 = vadd.f32 %v7314_v54, %v7213_v38  ;;  %v7558_v12 = vpop.f32.mrf.mxu0 }
 0x943   : > { %v7833_v15 = vadd.f32 %v7832_v5, %v7831_v27 }
 0x944   : > { %v7616_v42 = vadd.f32 %v7552_v49, %v7378_v40  ;;  %v7152_v31 = vpop.f32.mrf.mxu2 }
 0x945   : > { %v7214_v52 = vadd.f32 %v7152_v31, %v6973_v48 }
 0x946   : > { %v7652_v21 = vadd.f32 %v14230_v13, %v7616_v42 }
 0x948   : > { %7684 = vst.msk [vmem:[%s14239_s15 + $0x80] sm:$0xff] %vm271_vm1, %v7652_v21  ;;  %v7731_v36 = vsel %vm271_vm1, %v7652_v21, 0.0  ;;  %v7787_v0 = vmul.f32 %v7652_v21, %v7652_v21  ;;  %v6917_v57 = vpop.f32.mrf.mxu1 }
 0x949   : > { %v7317_v3 = vpop.f32.mrf.mxu3  ;;  %v7732_v7 = vadd.f32 %v7731_v36, %v7730_v8  ;;  %v6975_v20 = vadd.f32 %v6917_v57, %v14065_v1 }
 0x94a   : > { %v7834_v18 = vsel %vm271_vm1, %v7787_v0, 0.0  ;;  %v7379_v59 = vadd.f32 %v7317_v3, %v7214_v52  ;;  %v7561_v61 = vpop.f32.mrf.mxu0 }
 0x94b   : > { %v7835_v9 = vadd.f32 %v7834_v18, %v7833_v15 }
 0x94c   : > { %v7617_v43 = vadd.f32 %v7555_v22, %v7379_v59  ;;  %v7155_v46 = vpop.f32.mrf.mxu2 }
 0x94d   : > { %v7215_v49 = vadd.f32 %v7155_v46, %v6974_v44 }
 0x94e   : > { %v7653_v23 = vadd.f32 %v14230_v13, %v7617_v43 }
 0x950   : > { %7685 = vst.msk [vmem:[%s14239_s15 + $0x88] sm:$0xff] %vm271_vm1, %v7653_v23  ;;  %v7733_v60 = vsel %vm271_vm1, %v7653_v23, 0.0  ;;  %v7788_v62 = vmul.f32 %v7653_v23, %v7653_v23  ;;  %v6920_v41 = vpop.f32.mrf.mxu1 }
 0x951   : > { %v7320_v35 = vpop.f32.mrf.mxu3  ;;  %v7734_v2 = vadd.f32 %v7733_v60, %v7732_v7  ;;  %v6976_v1 = vadd.f32 %v6920_v41, %v14075_v10 }
 0x952   : > { %v7836_v39 = vsel %vm271_vm1, %v7788_v62, 0.0  ;;  %v7380_v55 = vadd.f32 %v7320_v35, %v7215_v49  ;;  %v7564_v63 = vpop.f32.mrf.mxu0 }
 0x953   : > { %v7837_v17 = vadd.f32 %v7836_v39, %v7835_v9 }
 0x954   : > { %v7618_v56 = vadd.f32 %v7558_v12, %v7380_v55  ;;  %v7158_v34 = vpop.f32.mrf.mxu2 }
 0x955   : > { %v7216_v11 = vadd.f32 %v7158_v34, %v6975_v20 }
 0x956   : > { %v7654_v6 = vadd.f32 %v14230_v13, %v7618_v56 }
 0x958   : > { %7686 = vst.msk [vmem:[%s14239_s15 + $0x90] sm:$0xff] %vm271_vm1, %v7654_v6  ;;  %v7735_v51 = vsel %vm271_vm1, %v7654_v6, 0.0  ;;  %v7789_v27 = vmul.f32 %v7654_v6, %v7654_v6  ;;  %v6923_v14 = vpop.f32.mrf.mxu1 }
 0x959   : > { %v7323_v22 = vpop.f32.mrf.mxu3  ;;  %v7736_v33 = vadd.f32 %v7735_v51, %v7734_v2  ;;  %v6977_v10 = vadd.f32 %v6923_v14, %v14090_v58 }
 0x95a   : > { %v7838_v47 = vsel %vm271_vm1, %v7789_v27, 0.0  ;;  %v7381_v25 = vadd.f32 %v7323_v22, %v7216_v11  ;;  %v7567_v26 = vpop.f32.mrf.mxu0 }
 0x95b   : > { %v7839_v28 = vadd.f32 %v7838_v47, %v7837_v17 }
 0x95c   : > { %v7619_v38 = vadd.f32 %v7561_v61, %v7381_v25  ;;  %v7161_v8 = vpop.f32.mrf.mxu2 }
 0x95d   : > { %v7217_v15 = vadd.f32 %v7161_v8, %v6976_v1 }
 0x95e   : > { %v7655_v54 = vadd.f32 %v14230_v13, %v7619_v38 }
 0x960   : > { %7687 = vst.msk [vmem:[%s14239_s15 + $0x98] sm:$0xff] %vm271_vm1, %v7655_v54  ;;  %v7737_v5 = vsel %vm271_vm1, %v7655_v54, 0.0  ;;  %v7790_v40 = vmul.f32 %v7655_v54, %v7655_v54  ;;  %v6926_v31 = vpop.f32.mrf.mxu1 }
 0x961   : > { %v7326_v4 = vpop.f32.mrf.mxu3  ;;  %v7738_v12 = vadd.f32 %v7737_v5, %v7736_v33  ;;  %v6978_v58 = vadd.f32 %v6926_v31, %v14100_v45 }
 0x962   : > { %v7840_v42 = vsel %vm271_vm1, %v7790_v40, 0.0  ;;  %v7382_v48 = vadd.f32 %v7326_v4, %v7217_v15  ;;  %v7570_v36 = vpop.f32.mrf.mxu0 }
 0x963   : > { %v7841_v21 = vadd.f32 %v7840_v42, %v7839_v28 }
 0x964   : > { %v7620_v0 = vadd.f32 %v7564_v63, %v7382_v48  ;;  %v7164_v3 = vpop.f32.mrf.mxu2 }
 0x965   : > { %v7218_v59 = vadd.f32 %v7164_v3, %v6977_v10 }
 0x966   : > { %v7656_v52 = vadd.f32 %v14230_v13, %v7620_v0 }
 0x968   : > { %7688 = vst.msk [vmem:[%s14239_s15 + $0xa0] sm:$0xff] %vm271_vm1, %v7656_v52  ;;  %v7739_v7 = vsel %vm271_vm1, %v7656_v52, 0.0  ;;  %v7791_v18 = vmul.f32 %v7656_v52, %v7656_v52  ;;  %v6929_v23 = vpop.f32.mrf.mxu1 }
 0x969   : > { %v7329_v9 = vpop.f32.mrf.mxu3  ;;  %v7740_v57 = vadd.f32 %v7739_v7, %v7738_v12  ;;  %v6979_v45 = vadd.f32 %v6929_v23, %v14115_v37 }
 0x96a   : > { %v7842_v61 = vsel %vm271_vm1, %v7791_v18, 0.0  ;;  %v7383_v43 = vadd.f32 %v7329_v9, %v7218_v59  ;;  %v7573_v46 = vpop.f32.mrf.mxu0 }
 0x96b   : > { %v7843_v44 = vadd.f32 %v7842_v61, %v7841_v21 }
 0x96c   : > { %v7621_v60 = vadd.f32 %v7567_v26, %v7383_v43  ;;  %v7167_v49 = vpop.f32.mrf.mxu2 }
 0x96d   : > { %v7219_v39 = vadd.f32 %v7167_v49, %v6978_v58 }
 0x96e   : > { %v7657_v62 = vadd.f32 %v14230_v13, %v7621_v60 }
 0x970   : > { %7689 = vst.msk [vmem:[%s14239_s15 + $0xa8] sm:$0xff] %vm271_vm1, %v7657_v62  ;;  %v7741_v35 = vsel %vm271_vm1, %v7657_v62, 0.0  ;;  %v7792_v2 = vmul.f32 %v7657_v62, %v7657_v62  ;;  %v6932_v20 = vpop.f32.mrf.mxu1 }
 0x971   : > { %v7332_v55 = vpop.f32.mrf.mxu3  ;;  %v7742_v17 = vadd.f32 %v7741_v35, %v7740_v57  ;;  %v6980_v37 = vadd.f32 %v6932_v20, %v14125_v30 }
 0x972   : > { %v7844_v41 = vsel %vm271_vm1, %v7792_v2, 0.0  ;;  %v7384_v63 = vadd.f32 %v7332_v55, %v7219_v39  ;;  %v7576_v6 = vpop.f32.mrf.mxu0 }
 0x973   : > { %v7845_v56 = vadd.f32 %v7844_v41, %v7843_v44 }
 0x974   : > { %v7622_v34 = vadd.f32 %v7570_v36, %v7384_v63  ;;  %v7170_v27 = vpop.f32.mrf.mxu2 }
 0x975   : > { %v7220_v33 = vadd.f32 %v7170_v27, %v6979_v45 }
 0x976   : > { %v7658_v51 = vadd.f32 %v14230_v13, %v7622_v34 }
 0x978   : > { %7690 = vst.msk [vmem:[%s14239_s15 + $0xb0] sm:$0xff] %vm271_vm1, %v7658_v51  ;;  %v7743_v11 = vsel %vm271_vm1, %v7658_v51, 0.0  ;;  %v7793_v22 = vmul.f32 %v7658_v51, %v7658_v51  ;;  %v6935_v38 = vpop.f32.mrf.mxu1 }
 0x979   : > { %v7335_v47 = vpop.f32.mrf.mxu3  ;;  %v7744_v25 = vadd.f32 %v7743_v11, %v7742_v17  ;;  %v6981_v30 = vadd.f32 %v6935_v38, %v14140_v32 }
 0x97a   : > { %v7846_v28 = vsel %vm271_vm1, %v7793_v22, 0.0  ;;  %v7385_v14 = vadd.f32 %v7335_v47, %v7220_v33  ;;  %v7579_v54 = vpop.f32.mrf.mxu0 }
 0x97b   : > { %v7847_v26 = vadd.f32 %v7846_v28, %v7845_v56 }
 0x97c   : > { %v7623_v1 = vadd.f32 %v7573_v46, %v7385_v14  ;;  %v7173_v5 = vpop.f32.mrf.mxu2 }
 0x97d   : > { %v7221_v4 = vadd.f32 %v7173_v5, %v6980_v37 }
 0x97e   : > { %v7659_v8 = vadd.f32 %v14230_v13, %v7623_v1  ;;  %v14512_v13 = vld [vmem:[%s14635_s3] ss:$0 sm:$0xff] }
 0x980   : > { %7691 = vst.msk [vmem:[%s14239_s15 + $0xb8] sm:$0xff] %vm271_vm1, %v7659_v8  ;;  %v7745_v40 = vsel %vm271_vm1, %v7659_v8, 0.0  ;;  %v7794_v15 = vmul.f32 %v7659_v8, %v7659_v8  ;;  %v6938_v36 = vpop.f32.mrf.mxu1 }
 0x981   : > { %v7338_v12 = vpop.f32.mrf.mxu3  ;;  %v7746_v42 = vadd.f32 %v7745_v40, %v7744_v25  ;;  %v6982_v46 = vadd.f32 %v6938_v36, %v14150_v24 }
 0x982   : > { %v7848_v48 = vsel %vm271_vm1, %v7794_v15, 0.0  ;;  %v7386_v21 = vadd.f32 %v7338_v12, %v7221_v4  ;;  %v7582_v3 = vpop.f32.mrf.mxu0 }
 0x983   : > { %v7849_v31 = vadd.f32 %v7848_v48, %v7847_v26 }
 0x984   : > { %v7624_v0 = vadd.f32 %v7576_v6, %v7386_v21  ;;  %v7176_v52 = vpop.f32.mrf.mxu2 }
 0x985   : > { %v7222_v59 = vadd.f32 %v7176_v52, %v6981_v30 }
 0x986   : > { %v7660_v10 = vadd.f32 %v14512_v13, %v7624_v0 }
 0x988   : > { %7692 = vst.msk [vmem:[%s14239_s15 + $0xc0] sm:$0xff] %vm271_vm1, %v7660_v10  ;;  %v7747_v7 = vsel %vm271_vm1, %v7660_v10, 0.0  ;;  %v7795_v18 = vmul.f32 %v7660_v10, %v7660_v10  ;;  %v6941_v44 = vpop.f32.mrf.mxu1 }
 0x989   : > { %v7341_v9 = vpop.f32.mrf.mxu3  ;;  %v7748_v57 = vadd.f32 %v7747_v7, %v7746_v42  ;;  %v6983_v24 = vadd.f32 %v6941_v44, %v14165_v16 }
 0x98a   : > { %v7850_v32 = vsel %vm271_vm1, %v7795_v18, 0.0  ;;  %v7387_v61 = vadd.f32 %v7341_v9, %v7222_v59  ;;  %v7585_v55 = vpop.f32.mrf.mxu0 }
 0x98b   : > { %v7851_v43 = vadd.f32 %v7850_v32, %v7849_v31 }
 0x98c   : > { %v7625_v23 = vadd.f32 %v7579_v54, %v7387_v61  ;;  %v7179_v58 = vpop.f32.mrf.mxu2 }
 0x98d   : > { %v7223_v35 = vadd.f32 %v7179_v58, %v6982_v46 }
 0x98e   : > { %v7661_v60 = vadd.f32 %v14512_v13, %v7625_v23 }
 0x990   : > { %7693 = vst.msk [vmem:[%s14239_s15 + $0xc8] sm:$0xff] %vm271_vm1, %v7661_v60  ;;  %v7749_v62 = vsel %vm271_vm1, %v7661_v60, 0.0  ;;  %v7796_v49 = vmul.f32 %v7661_v60, %v7661_v60  ;;  %v6944_v20 = vpop.f32.mrf.mxu1 }
 0x991   : > { %v7344_v2 = vpop.f32.mrf.mxu3  ;;  %v7750_v39 = vadd.f32 %v7749_v62, %v7748_v57  ;;  %v6984_v16 = vadd.f32 %v6944_v20, %v14175_v29 }
 0x992   : > { %v7852_v17 = vsel %vm271_vm1, %v7796_v49, 0.0  ;;  %v7388_v41 = vadd.f32 %v7344_v2, %v7223_v35  ;;  %v7588_v28 = vpop.f32.mrf.mxu0 }
 0x993   : > { %v7853_v63 = vadd.f32 %v7852_v17, %v7851_v43 }
 0x994   : > { %v7626_v56 = vadd.f32 %v7582_v3, %v7388_v41  ;;  %v7182_v34 = vpop.f32.mrf.mxu2 }
 0x995   : > { %v7224_v27 = vadd.f32 %v7182_v34, %v6983_v24 }
 0x996   : > { %v7662_v6 = vadd.f32 %v14512_v13, %v7626_v56 }
 0x998   : > { %7694 = vst.msk [vmem:[%s14239_s15 + $0xd0] sm:$0xff] %vm271_vm1, %v7662_v6  ;;  %v7751_v45 = vsel %vm271_vm1, %v7662_v6, 0.0  ;;  %v7797_v51 = vmul.f32 %v7662_v6, %v7662_v6  ;;  %v6947_v1 = vpop.f32.mrf.mxu1 }
 0x999   : > { %v7347_v11 = vpop.f32.mrf.mxu3  ;;  %v7752_v22 = vadd.f32 %v7751_v45, %v7750_v39  ;;  %v6985_v29 = vadd.f32 %v6947_v1, %v14194_v50 }
 0x99a   : > { %v7854_v33 = vsel %vm271_vm1, %v7797_v51, 0.0  ;;  %v7389_v47 = vadd.f32 %v7347_v11, %v7224_v27  ;;  %v7591_v48 = vpop.f32.mrf.mxu0 }
 0x99b   : > { %v7855_v25 = vadd.f32 %v7854_v33, %v7853_v63 }
 0x99c   : > { %v7627_v14 = vadd.f32 %v7585_v55, %v7389_v47  ;;  %v7185_v38 = vpop.f32.mrf.mxu2 }
 0x99d   : > { %v7225_v8 = vadd.f32 %v7185_v38, %v6984_v16 }
 0x99e   : > { %v7663_v26 = vadd.f32 %v14512_v13, %v7627_v14 }
 0x9a0   : > { %7695 = vst.msk [vmem:[%s14239_s15 + $0xd8] sm:$0xff] %vm271_vm1, %v7663_v26  ;;  %v7753_v54 = vsel %vm271_vm1, %v7663_v26, 0.0  ;;  %v7798_v37 = vmul.f32 %v7663_v26, %v7663_v26  ;;  %v6950_v3 = vpop.f32.mrf.mxu1 }
 0x9a1   : > { %v7350_v5 = vpop.f32.mrf.mxu3  ;;  %v7754_v40 = vadd.f32 %v7753_v54, %v7752_v22  ;;  %v6986_v50 = vadd.f32 %v6950_v3, %v14202_v53 }
 0x9a2   : > { %v7856_v15 = vsel %vm271_vm1, %v7798_v37, 0.0  ;;  %v7390_v4 = vadd.f32 %v7350_v5, %v7225_v8  ;;  %v7594_v61 = vpop.f32.mrf.mxu0 }
 0x9a3   : > { %v7857_v12 = vadd.f32 %v7856_v15, %v7855_v25 }
 0x9a4   : > { %v7628_v42 = vadd.f32 %v7588_v28, %v7390_v4  ;;  %v7188_v31 = vpop.f32.mrf.mxu2 }
 0x9a5   : > { %v7226_v30 = vadd.f32 %v7188_v31, %v6985_v29 }
 0x9a6   : > { %v7664_v21 = vadd.f32 %v14512_v13, %v7628_v42 }
 0x9a8   : > { %7696 = vst.msk [vmem:[%s14239_s15 + $0xe0] sm:$0xff] %vm271_vm1, %v7664_v21  ;;  %v7755_v36 = vsel %vm271_vm1, %v7664_v21, 0.0  ;;  %v7799_v0 = vmul.f32 %v7664_v21, %v7664_v21  ;;  %v6953_v35 = vpop.f32.mrf.mxu1 }
 0x9a9   : > { %v7353_v10 = vpop.f32.mrf.mxu3  ;;  %v7756_v52 = vadd.f32 %v7755_v36, %v7754_v40  ;;  %v6987_v53 = vadd.f32 %v6953_v35, %v14216_v19 }
 0x9aa   : > { %v7858_v7 = vsel %vm271_vm1, %v7799_v0, 0.0  ;;  %v7391_v18 = vadd.f32 %v7353_v10, %v7226_v30  ;;  %v7597_v24 = vpop.f32.mrf.mxu0 }
 0x9ab   : > { %v7859_v59 = vadd.f32 %v7858_v7, %v7857_v12 }
 0x9ac   : > { %v7629_v9 = vadd.f32 %v7591_v48, %v7391_v18  ;;  %v7191_v32 = vpop.f32.mrf.mxu2 }
 0x9ad   : > { %v7227_v23 = vadd.f32 %v7191_v32, %v6986_v50 }
 0x9ae   : > { %v7665_v57 = vadd.f32 %v14512_v13, %v7629_v9 }
 0x9b0   : > { %7697 = vst.msk [vmem:[%s14239_s15 + $0xe8] sm:$0xff] %vm271_vm1, %v7665_v57  ;;  %v7757_v43 = vsel %vm271_vm1, %v7665_v57, 0.0  ;;  %v7800_v44 = vmul.f32 %v7665_v57, %v7665_v57 }
 0x9b1   : > { %v7356_v46 = vpop.f32.mrf.mxu3  ;;  %v7758_v60 = vadd.f32 %v7757_v43, %v7756_v52 }
 0x9b2   : > { %v7860_v58 = vsel %vm271_vm1, %v7800_v44, 0.0  ;;  %v7392_v62 = vadd.f32 %v7356_v46, %v7227_v23 }
 0x9b3   : > { %v7861_v49 = vadd.f32 %v7860_v58, %v7859_v59 }
 0x9b4   : > { %v7630_v2 = vadd.f32 %v7594_v61, %v7392_v62  ;;  %v7194_v55 = vpop.f32.mrf.mxu2 }
 0x9b5   : > { %v7228_v63 = vadd.f32 %v7194_v55, %v6987_v53 }
 0x9b6   : > { %v7666_v39 = vadd.f32 %v14512_v13, %v7630_v2 }
 0x9b8   : > { %7698 = vst.msk [vmem:[%s14239_s15 + $0xf0] sm:$0xff] %vm271_vm1, %v7666_v39  ;;  %v7759_v17 = vsel %vm271_vm1, %v7666_v39, 0.0  ;;  %v7801_v41 = vmul.f32 %v7666_v39, %v7666_v39 }
 0x9b9   : > { %v7359_v56 = vpop.f32.mrf.mxu3  ;;  %v7760_v20 = vadd.f32 %v7759_v17, %v7758_v60 }
 0x9ba   : > { %v7862_v6 = vsel %vm271_vm1, %v7801_v41, 0.0  ;;  %v7393_v34 = vadd.f32 %v7359_v56, %v7228_v63 }
 0x9bb   : > { %v7863_v45 = vadd.f32 %v7862_v6, %v7861_v49 }
 0x9bc   : > { %v7631_v51 = vadd.f32 %v7597_v24, %v7393_v34 }
 0x9be   : > { %v7667_v19 = vadd.f32 %v14512_v13, %v7631_v51 }
 0x9c0   : > { %7699 = vst.msk [vmem:[%s14239_s15 + $0xf8] sm:$0xff] %vm271_vm1, %v7667_v19  ;;  %v7761_v27 = vsel %vm271_vm1, %v7667_v19, 0.0  ;;  %v7802_v11 = vmul.f32 %v7667_v19, %v7667_v19  ;;  %s14579_s15 = sshll.u32 %s7907_s13, 4  ;;  %s7912_s15 = int_to_ptr.hbm [resolvable:$true] %s14579_s15 }
 0x9c1   : > { %v7762_v22 = vadd.f32 %v7761_v27, %v7760_v20 }
 0x9c2   : > { %v7864_v33 = vsel %vm271_vm1, %v7802_v11, 0.0 }
 0x9c3   : > { %v7763_v47 = vrot.slane %v7762_v22, 4  ;;  %v7865_v25 = vadd.f32 %v7864_v33, %v7863_v45 }
 0x9c5   : > { %v7764_v28 = vadd.f32 %v7763_v47, %v7762_v22  ;;  %v7866_v14 = vrot.slane %v7865_v25, 4 }
 0x9c7   : > { %v7765_v16 = vrot.slane %v7764_v28, 2  ;;  %v7867_v13 = vadd.f32 %v7866_v14, %v7865_v25 }
 0x9c9   : > { %v7766_v26 = vadd.f32 %v7765_v16, %v7764_v28  ;;  %v7868_v38 = vrot.slane %v7867_v13, 2 }
 0x9cb   : > { %v7767_v1 = vrot.slane %v7766_v26, 1  ;;  %v7869_v54 = vadd.f32 %v7868_v38, %v7867_v13 }
 0x9cd   : > { %v7768_v37 = vadd.f32 %v7767_v1, %v7766_v26  ;;  %v7870_v8 = vrot.slane %v7869_v54, 1 }
 0x9cf   : > { %7770 = vst.msk [vmem:[%s254_s14] sm:$0x1] %vm7769_vm8, %v7768_v37  ;;  %v7871_v5 = vadd.f32 %v7870_v8, %v7869_v54 }
 0x9d0   : > { %9484 = shalt.err (!%p9481_p3)
}
 0x9d1   : > { %9154 = dma.vmem_to_hbm [thread:$0]  (%p9627_p5), %s7897_s16, 16, %s7899_s17, %s7879_s25   ;;  %7872 = vst.msk [vmem:[%s260_s18] sm:$0x1] %vm7769_vm8, %v7871_v5 }
 0x9d2   : > { %s7883_s13 = scalar_lea.sflag [#allocation6], %s14561_s20  ;;  %s9499_s14 = sshra.s32 %s7912_s15, 4  ;;  %s9500_s14 = int_to_ptr.hbm [resolvable:$true] %s9499_s14 }
 0x9d3   : > { %s9501_s26 = scalar_lea.hbm %s9500_s14, 1  ;;  %s9505_s28 = scalar_lea.hbm %s14638_s6, 2 }
 0x9d4   : > { %p9502_p4 = scmp.ne.s32.totalorder %s9500_s14, %s9501_s26  ;;  %p9506_p9 = scmp.lt.s32.totalorder %s9500_s14, %s14638_s6 }
 0x9d5   : > { %p9507_p10 = scmp.lt.s32.totalorder %s9505_s28, %s9501_s26 }
 0x9d6   : > { %p9503_p7 = pnand %p9502_p4, %p9627_p5 }
 0x9d7   : > { %p9508_p11 = por %p9507_p10, %p9506_p9 }
 0x9d8   : > { %p9504_p8 = pneg %p9503_p7 }
 0x9da   : > { %p9509_p12 = pnand %p9508_p11, %p9504_p8 }
 0x9dc   : > { %9512 = shalt.err (!%p9509_p12)
}
 0x9dd   : > { %9155 = dma.vmem_to_hbm [thread:$0]  (%p9627_p5), %s7910_s19, 16, %s7912_s15, %s7883_s13  }
 0x9de PF: > { %p9165_p13 = scmp.ge.s32.totalorder %s9551_s24, 2  ;;  %s7931_s20 = sand.u32 1, %s9539_s21  }
 0x9df   : > { %s7932_s16 = scalar_lea.sflag [#allocation4], %s7931_s20 }
 0x9e0   : > { %p9159_p0 = pnand %p9165_p13, %p9631_p6 }
 0x9e2   : > { %p9160_p1 = pneg %p9159_p0 }
 0x9e4   : > { %9530 = dma.done.wait (%p9160_p1), %s7932_s16, 16  }
 0x9e5   : > { %9532 = vsyncadd (%p9160_p1), %s7932_s16, 4294967280  ;;  %s7941_s17 = scalar_lea.sflag [#allocation6], %s7931_s20 }
 0x9e6   : > { %9534 = dma.done.wait (%p9160_p1), %s7941_s17, 16  }
 0x9e7   : > { %9536 = vsyncadd (%p9160_p1), %s7941_s17, 4294967280  ;;  %p20_p5 = scmp.ge.s32.totalorder %s9614_s27, 4   ;;  %s15425_s21 = smov %s9543_s22 }
 0x9e8   : > { %s15426_s22 = smov %s9547_s23  ;;  %s15427_s23 = smov %s9625_s30 }
 0x9e9   : > { %s15428_s24 = smov %s9614_s27  ;;  %22 = sbr.rel (!%p20_p5) target bundleno = 5 (0x5), region = 132 }
 0x9ee   :  { %7946 = vsyncpa [#allocation4], 1 }
 0x9ef   :  { %7948 = vsyncpa [#allocation4 + $0x1], 1 }
 0x9f0   :  { %7949 = vsyncpa [#allocation6], 1 }
 0x9f1   :  { %7951 = vsyncpa [#allocation6 + $0x1], 1 }

</bundles_post_ra>
